<compile_context>
chip_gen: v7x
topology: tpu7x:2x2x1
jax: 0.10.0
libtpu: 0.0.40
codegen_flags: <defaults>
</compile_context>

<pallas_src>
import functools

import jax
import jax.numpy as jnp
from jax.experimental import pallas as pl
from jax.experimental.pallas import tpu as pltpu


# ----------------------------------------------------------------------------
# Pallas kernel: fused (patches_bf16 @ W_bf16) -> f32 acc, + shift, activation.
# ----------------------------------------------------------------------------
def _fused_matmul_affine_kernel(a_ref, w_ref, shift_ref, o_ref, *, act):
    y = jnp.dot(a_ref[...], w_ref[...], preferred_element_type=jnp.float32)
    y = y + shift_ref[...]                              # per-output-channel shift (f32)
    if act == "leaky":
        y = jnp.where(y > 0.0, y, 0.2 * y)              # LeakyReLU(0.2)
    elif act == "sigmoid":
        y = 1.0 / (1.0 + jnp.exp(-y))                   # Sigmoid (f32)
    o_ref[...] = y.astype(o_ref.dtype)


def _round_up(x, m):
    return ((x + m - 1) // m) * m


def _pick_tile_m(M, target=512):
    """Largest tile <= target that is a multiple of 8 and divides M, else full M."""
    if M <= target:
        return M
    t = target
    while t >= 8:
        if M % t == 0:
            return t
        t -= 8
    return M


def fused_conv_matmul(patches, w_mat, shift, act, tile_m=512):
    """patches: (M, K) bf16, w_mat: (K, Cp) bf16 (scale pre-folded),
    shift: (1, Cp) f32. Returns (M, Cp) f32."""
    M, K = patches.shape
    K2, Cp = w_mat.shape
    assert K == K2 and Cp % 128 == 0

    tm = _pick_tile_m(M, tile_m)
    grid = (pl.cdiv(M, tm),)
    kernel = functools.partial(_fused_matmul_affine_kernel, act=act)

    flops = 2 * M * K * Cp
    transcendentals = M * Cp if act == "sigmoid" else 0
    bytes_accessed = (M * K * patches.dtype.itemsize
                      + K * Cp * w_mat.dtype.itemsize
                      + Cp * 4
                      + M * Cp * 4)

    return pl.pallas_call(
        kernel,
        out_shape=jax.ShapeDtypeStruct((M, Cp), jnp.float32),
        grid=grid,
        in_specs=[
            pl.BlockSpec((tm, K), lambda i: (i, 0)),    # patches: tiled over M
            pl.BlockSpec((K, Cp), lambda i: (0, 0)),    # weights: VMEM-resident
            pl.BlockSpec((1, Cp), lambda i: (0, 0)),    # shift:   VMEM-resident
        ],
        out_specs=pl.BlockSpec((tm, Cp), lambda i: (i, 0)),
        compiler_params=pltpu.CompilerParams(
            dimension_semantics=("parallel",),          # independent M tiles
            vmem_limit_bytes=32 * 1024 * 1024,
        ),
        cost_estimate=pl.CostEstimate(
            flops=flops,
            transcendentals=transcendentals,
            bytes_accessed=bytes_accessed,
        ),
    )(patches, w_mat, shift)


# ----------------------------------------------------------------------------
# Glue: NHWC im2col (matches PyTorch Conv2d semantics after weight transpose).
# ----------------------------------------------------------------------------
def im2col_nhwc(x, kh, kw, stride, pad):
    N, H, W, C = x.shape
    xp = jnp.pad(x, ((0, 0), (pad, pad), (pad, pad), (0, 0)))
    Ho = (H + 2 * pad - kh) // stride + 1
    Wo = (W + 2 * pad - kw) // stride + 1
    cols = []
    for i in range(kh):
        for j in range(kw):
            cols.append(xp[:, i:i + stride * Ho:stride, j:j + stride * Wo:stride, :])
    cols = jnp.stack(cols, axis=3)            # (N, Ho, Wo, kh*kw, C)
    # flattened K index = (i*kw + j)*C + c  -> matches weight.transpose(2,3,1,0)
    return cols.reshape(N * Ho * Wo, kh * kw * C), Ho, Wo


def conv_block(x_nhwc, weight, bias, bn=None, act="leaky", stride=2, pad=1,
               tile_m=512):
    """Conv2d(+bias) [+BatchNorm(eval)] + activation. x is NHWC f32; returns NHWC f32."""
    Cout, Cin, KH, KW = weight.shape
    N = x_nhwc.shape[0]
    patches, Ho, Wo = im2col_nhwc(x_nhwc, KH, KW, stride, pad)   # (M, KH*KW*Cin)
    # Weight as (K, Cout) with K index = i*KW*Cin + j*Cin + c.
    w_mat = jnp.transpose(weight, (2, 3, 1, 0)).reshape(KH * KW * Cin, Cout)

    if bn is None:
        scale = jnp.ones((Cout,), jnp.float32)
        shift = bias.astype(jnp.float32)
    else:
        gamma, beta, r_mean, r_var, eps = bn
        scale = gamma / jnp.sqrt(r_var + eps)
        shift = beta + (bias - r_mean) * scale

    # Fold per-channel scale into the weight columns (parameter-sized, host op).
    w_scaled = w_mat.astype(jnp.float32) * scale[None, :]

    # Lane-pad Cout to a multiple of 128 so output stores are unmasked.
    Cp = _round_up(Cout, 128)
    if Cp != Cout:
        w_scaled = jnp.pad(w_scaled, ((0, 0), (0, Cp - Cout)))
        shift = jnp.pad(shift, (0, Cp - Cout))

    y = fused_conv_matmul(
        patches.astype(jnp.bfloat16),            # bf16 DMA + native MXU rate
        w_scaled.astype(jnp.bfloat16),
        shift.reshape(1, Cp).astype(jnp.float32),  # epilogue stays f32 (v5e-safe)
        act, tile_m)                              # (M, Cp) f32

    if Cp != Cout:
        y = y[:, :Cout]
    return y.reshape(N, Ho, Wo, Cout)             # stay NHWC (no transposes)


# ----------------------------------------------------------------------------
# Parameter construction (deterministic, DCGAN-style init).
# ----------------------------------------------------------------------------
def init_params(key):
    def conv_init(k, cout, cin, kh, kw):
        kw_, kb_ = jax.random.split(k)
        w = 0.02 * jax.random.normal(kw_, (cout, cin, kh, kw), jnp.float32)
        b = 0.01 * jax.random.normal(kb_, (cout,), jnp.float32)
        return w, b

    def bn_init(c):
        return (jnp.ones((c,), jnp.float32),   # gamma
                jnp.zeros((c,), jnp.float32),  # beta
                jnp.zeros((c,), jnp.float32),  # running_mean
                jnp.ones((c,), jnp.float32),   # running_var
                1e-5)                          # eps

    ks = jax.random.split(key, 5)
    params = {
        "conv1": conv_init(ks[0], 64, 1, 4, 4),
        "conv2": conv_init(ks[1], 128, 64, 4, 4),
        "bn2": bn_init(128),
        "conv3": conv_init(ks[2], 256, 128, 4, 4),
        "bn3": bn_init(256),
        "conv4": conv_init(ks[3], 512, 256, 4, 4),
        "bn4": bn_init(512),
        "conv5": conv_init(ks[4], 1, 512, 4, 4),
    }
    return params


# ----------------------------------------------------------------------------
# Full forward pass (mirrors Discriminator64.forward, eval mode).
# ----------------------------------------------------------------------------
def discriminator64_forward(params, x):
    # x: (N, 1, 64, 64) NCHW f32 (PyTorch layout). Convert to NHWC once.
    h = jnp.transpose(x, (0, 2, 3, 1)).astype(jnp.float32)                                 # (N,64,64,1)
    h = conv_block(h, *params["conv1"], bn=None, act="leaky", stride=2, pad=1)             # (N,32,32,64)
    h = conv_block(h, *params["conv2"], bn=params["bn2"], act="leaky", stride=2, pad=1)    # (N,16,16,128)
    h = conv_block(h, *params["conv3"], bn=params["bn3"], act="leaky", stride=2, pad=1)    # (N,8,8,256)
    h = conv_block(h, *params["conv4"], bn=params["bn4"], act="leaky", stride=2, pad=1)    # (N,4,4,512)
    h = conv_block(h, *params["conv5"], bn=None, act="sigmoid", stride=1, pad=0)           # (N,1,1,1)
    return h.reshape(-1)                                                                   # (N,)


if __name__ == "__main__":
    key = jax.random.PRNGKey(0)
    pkey, xkey = jax.random.split(key)
    params = init_params(pkey)
    # Discriminator64 architecturally requires 1x64x64 inputs; batch kept small.
    x = jax.random.normal(xkey, (2, 1, 64, 64), jnp.float32)

    fwd = jax.jit(discriminator64_forward)
    out = fwd(params, x)
    out = jax.block_until_ready(out)

    assert out.shape == (2,), out.shape
    assert bool(jnp.all(jnp.isfinite(out)))
    assert bool(jnp.all((out >= 0.0) & (out <= 1.0)))   # sigmoid output range
    print("KERNEL_OK")
</pallas_src>

<mosaic_0001>
module attributes {stable_mosaic.version = 11 : i64} {
  func.func @_fused_matmul_affine_kernel(%arg0: i32, %arg1: memref<512x16xbf16, #tpu.memory_space<vmem>>, %arg2: memref<16x128xbf16, #tpu.memory_space<vmem>>, %arg3: memref<1x128xf32, #tpu.memory_space<vmem>>, %arg4: memref<512x128xf32, #tpu.memory_space<vmem>>) attributes {dimension_semantics = [#tpu.dimension_semantics<parallel>], iteration_bounds = array<i64: 4>, scalar_prefetch = 0 : i64, scratch_operands = 0 : i64, tpu.core_type = #tpu.core_type<tc>, window_params = [{transform_indices = @transform_0, window_bounds = array<i64: 512, 16>}, {pipeline_mode = #tpu.pipeline_mode<synchronous>, transform_indices = @transform_1, window_bounds = array<i64: 16, 128>}, {pipeline_mode = #tpu.pipeline_mode<synchronous>, transform_indices = @transform_2, window_bounds = array<i64: 1, 128>}, {transform_indices = @transform_3, window_bounds = array<i64: 512, 128>}]} {
    %c0 = arith.constant 0 : index
    %c0_0 = arith.constant 0 : index
    %0 = vector.load %arg1[%c0, %c0_0] : memref<512x16xbf16, #tpu.memory_space<vmem>>, vector<512x16xbf16>
    %c0_1 = arith.constant 0 : index
    %c0_2 = arith.constant 0 : index
    %1 = vector.load %arg2[%c0_1, %c0_2] : memref<16x128xbf16, #tpu.memory_space<vmem>>, vector<16x128xbf16>
    %cst = arith.constant dense<0.000000e+00> : vector<512x128xf32>
    %2 = tpu.matmul %0, %1, %cst {dimension_numbers = #tpu.dot_dimension_numbers<[1], [0], [0], [1], [0, 0, 1, 1], [], []>} : vector<512x16xbf16>, vector<16x128xbf16>, vector<512x128xf32> -> vector<512x128xf32>
    %c0_3 = arith.constant 0 : index
    %c0_4 = arith.constant 0 : index
    %3 = vector.load %arg3[%c0_3, %c0_4] : memref<1x128xf32, #tpu.memory_space<vmem>>, vector<1x128xf32>
    %4 = vector.broadcast %3 : vector<1x128xf32> to vector<512x128xf32>
    %5 = arith.addf %2, %4 : vector<512x128xf32>
    %cst_5 = arith.constant 0.000000e+00 : f32
    %6 = vector.broadcast %cst_5 : f32 to vector<512x128xf32>
    %7 = arith.cmpf ogt, %5, %6 : vector<512x128xf32>
    %cst_6 = arith.constant 2.000000e-01 : f32
    %8 = vector.broadcast %cst_6 : f32 to vector<512x128xf32>
    %9 = arith.mulf %8, %5 : vector<512x128xf32>
    %10 = arith.select %7, %5, %9 : vector<512x128xi1>, vector<512x128xf32>
    %c0_7 = arith.constant 0 : index
    %c0_8 = arith.constant 0 : index
    %11 = vector.load %arg4[%c0_7, %c0_8] : memref<512x128xf32, #tpu.memory_space<vmem>>, vector<512x128xf32>
    tpu.vector_store %arg4[%c0_7, %c0_8], %10 {strides = array<i32>} : memref<512x128xf32, #tpu.memory_space<vmem>>, vector<512x128xf32>,
    return
  }
  func.func @transform_0(%arg0: i32) -> (i32, i32) {
    %c0_i32 = arith.constant 0 : i32
    %c0_i32_0 = arith.constant 0 : i32
    return %arg0, %c0_i32 : i32, i32
  }
  func.func @transform_1(%arg0: i32) -> (i32, i32) {
    %c0_i32 = arith.constant 0 : i32
    %c0_i32_0 = arith.constant 0 : i32
    %c0_i32_1 = arith.constant 0 : i32
    return %c0_i32, %c0_i32_0 : i32, i32
  }
  func.func @transform_2(%arg0: i32) -> (i32, i32) {
    %c0_i32 = arith.constant 0 : i32
    %c0_i32_0 = arith.constant 0 : i32
    %c0_i32_1 = arith.constant 0 : i32
    return %c0_i32, %c0_i32_0 : i32, i32
  }
  func.func @transform_3(%arg0: i32) -> (i32, i32) {
    %c0_i32 = arith.constant 0 : i32
    %c0_i32_0 = arith.constant 0 : i32
    return %arg0, %c0_i32 : i32, i32
  }
}

module attributes {stable_mosaic.version = 11 : i64} {
  func.func @_fused_matmul_affine_kernel(%arg0: i32, %arg1: memref<512x1024xbf16, #tpu.memory_space<vmem>>, %arg2: memref<1024x128xbf16, #tpu.memory_space<vmem>>, %arg3: memref<1x128xf32, #tpu.memory_space<vmem>>, %arg4: memref<512x128xf32, #tpu.memory_space<vmem>>) attributes {dimension_semantics = [#tpu.dimension_semantics<parallel>], iteration_bounds = array<i64: 1>, scalar_prefetch = 0 : i64, scratch_operands = 0 : i64, tpu.core_type = #tpu.core_type<tc>, window_params = [{transform_indices = @transform_0, window_bounds = array<i64: 512, 1024>}, {pipeline_mode = #tpu.pipeline_mode<synchronous>, transform_indices = @transform_1, window_bounds = array<i64: 1024, 128>}, {pipeline_mode = #tpu.pipeline_mode<synchronous>, transform_indices = @transform_2, window_bounds = array<i64: 1, 128>}, {transform_indices = @transform_3, window_bounds = array<i64: 512, 128>}]} {
    %c0 = arith.constant 0 : index
    %c0_0 = arith.constant 0 : index
    %0 = vector.load %arg1[%c0, %c0_0] : memref<512x1024xbf16, #tpu.memory_space<vmem>>, vector<512x1024xbf16>
    %c0_1 = arith.constant 0 : index
    %c0_2 = arith.constant 0 : index
    %1 = vector.load %arg2[%c0_1, %c0_2] : memref<1024x128xbf16, #tpu.memory_space<vmem>>, vector<1024x128xbf16>
    %cst = arith.constant dense<0.000000e+00> : vector<512x128xf32>
    %2 = tpu.matmul %0, %1, %cst {dimension_numbers = #tpu.dot_dimension_numbers<[1], [0], [0], [1], [0, 0, 1, 1], [], []>} : vector<512x1024xbf16>, vector<1024x128xbf16>, vector<512x128xf32> -> vector<512x128xf32>
    %c0_3 = arith.constant 0 : index
    %c0_4 = arith.constant 0 : index
    %3 = vector.load %arg3[%c0_3, %c0_4] : memref<1x128xf32, #tpu.memory_space<vmem>>, vector<1x128xf32>
    %4 = vector.broadcast %3 : vector<1x128xf32> to vector<512x128xf32>
    %5 = arith.addf %2, %4 : vector<512x128xf32>
    %cst_5 = arith.constant 0.000000e+00 : f32
    %6 = vector.broadcast %cst_5 : f32 to vector<512x128xf32>
    %7 = arith.cmpf ogt, %5, %6 : vector<512x128xf32>
    %cst_6 = arith.constant 2.000000e-01 : f32
    %8 = vector.broadcast %cst_6 : f32 to vector<512x128xf32>
    %9 = arith.mulf %8, %5 : vector<512x128xf32>
    %10 = arith.select %7, %5, %9 : vector<512x128xi1>, vector<512x128xf32>
    %c0_7 = arith.constant 0 : index
    %c0_8 = arith.constant 0 : index
    %11 = vector.load %arg4[%c0_7, %c0_8] : memref<512x128xf32, #tpu.memory_space<vmem>>, vector<512x128xf32>
    tpu.vector_store %arg4[%c0_7, %c0_8], %10 {strides = array<i32>} : memref<512x128xf32, #tpu.memory_space<vmem>>, vector<512x128xf32>,
    return
  }
  func.func @transform_0(%arg0: i32) -> (i32, i32) {
    %c0_i32 = arith.constant 0 : i32
    %c0_i32_0 = arith.constant 0 : i32
    return %arg0, %c0_i32 : i32, i32
  }
  func.func @transform_1(%arg0: i32) -> (i32, i32) {
    %c0_i32 = arith.constant 0 : i32
    %c0_i32_0 = arith.constant 0 : i32
    %c0_i32_1 = arith.constant 0 : i32
    return %c0_i32, %c0_i32_0 : i32, i32
  }
  func.func @transform_2(%arg0: i32) -> (i32, i32) {
    %c0_i32 = arith.constant 0 : i32
    %c0_i32_0 = arith.constant 0 : i32
    %c0_i32_1 = arith.constant 0 : i32
    return %c0_i32, %c0_i32_0 : i32, i32
  }
  func.func @transform_3(%arg0: i32) -> (i32, i32) {
    %c0_i32 = arith.constant 0 : i32
    %c0_i32_0 = arith.constant 0 : i32
    return %arg0, %c0_i32 : i32, i32
  }
}

module attributes {stable_mosaic.version = 11 : i64} {
  func.func @_fused_matmul_affine_kernel(%arg0: i32, %arg1: memref<128x2048xbf16, #tpu.memory_space<vmem>>, %arg2: memref<2048x256xbf16, #tpu.memory_space<vmem>>, %arg3: memref<1x256xf32, #tpu.memory_space<vmem>>, %arg4: memref<128x256xf32, #tpu.memory_space<vmem>>) attributes {dimension_semantics = [#tpu.dimension_semantics<parallel>], iteration_bounds = array<i64: 1>, scalar_prefetch = 0 : i64, scratch_operands = 0 : i64, tpu.core_type = #tpu.core_type<tc>, window_params = [{transform_indices = @transform_0, window_bounds = array<i64: 128, 2048>}, {pipeline_mode = #tpu.pipeline_mode<synchronous>, transform_indices = @transform_1, window_bounds = array<i64: 2048, 256>}, {pipeline_mode = #tpu.pipeline_mode<synchronous>, transform_indices = @transform_2, window_bounds = array<i64: 1, 256>}, {transform_indices = @transform_3, window_bounds = array<i64: 128, 256>}]} {
    %c0 = arith.constant 0 : index
    %c0_0 = arith.constant 0 : index
    %0 = vector.load %arg1[%c0, %c0_0] : memref<128x2048xbf16, #tpu.memory_space<vmem>>, vector<128x2048xbf16>
    %c0_1 = arith.constant 0 : index
    %c0_2 = arith.constant 0 : index
    %1 = vector.load %arg2[%c0_1, %c0_2] : memref<2048x256xbf16, #tpu.memory_space<vmem>>, vector<2048x256xbf16>
    %cst = arith.constant dense<0.000000e+00> : vector<128x256xf32>
    %2 = tpu.matmul %0, %1, %cst {dimension_numbers = #tpu.dot_dimension_numbers<[1], [0], [0], [1], [0, 0, 1, 1], [], []>} : vector<128x2048xbf16>, vector<2048x256xbf16>, vector<128x256xf32> -> vector<128x256xf32>
    %c0_3 = arith.constant 0 : index
    %c0_4 = arith.constant 0 : index
    %3 = vector.load %arg3[%c0_3, %c0_4] : memref<1x256xf32, #tpu.memory_space<vmem>>, vector<1x256xf32>
    %4 = vector.broadcast %3 : vector<1x256xf32> to vector<128x256xf32>
    %5 = arith.addf %2, %4 : vector<128x256xf32>
    %cst_5 = arith.constant 0.000000e+00 : f32
    %6 = vector.broadcast %cst_5 : f32 to vector<128x256xf32>
    %7 = arith.cmpf ogt, %5, %6 : vector<128x256xf32>
    %cst_6 = arith.constant 2.000000e-01 : f32
    %8 = vector.broadcast %cst_6 : f32 to vector<128x256xf32>
    %9 = arith.mulf %8, %5 : vector<128x256xf32>
    %10 = arith.select %7, %5, %9 : vector<128x256xi1>, vector<128x256xf32>
    %c0_7 = arith.constant 0 : index
    %c0_8 = arith.constant 0 : index
    %11 = vector.load %arg4[%c0_7, %c0_8] : memref<128x256xf32, #tpu.memory_space<vmem>>, vector<128x256xf32>
    tpu.vector_store %arg4[%c0_7, %c0_8], %10 {strides = array<i32>} : memref<128x256xf32, #tpu.memory_space<vmem>>, vector<128x256xf32>,
    return
  }
  func.func @transform_0(%arg0: i32) -> (i32, i32) {
    %c0_i32 = arith.constant 0 : i32
    %c0_i32_0 = arith.constant 0 : i32
    return %arg0, %c0_i32 : i32, i32
  }
  func.func @transform_1(%arg0: i32) -> (i32, i32) {
    %c0_i32 = arith.constant 0 : i32
    %c0_i32_0 = arith.constant 0 : i32
    %c0_i32_1 = arith.constant 0 : i32
    return %c0_i32, %c0_i32_0 : i32, i32
  }
  func.func @transform_2(%arg0: i32) -> (i32, i32) {
    %c0_i32 = arith.constant 0 : i32
    %c0_i32_0 = arith.constant 0 : i32
    %c0_i32_1 = arith.constant 0 : i32
    return %c0_i32, %c0_i32_0 : i32, i32
  }
  func.func @transform_3(%arg0: i32) -> (i32, i32) {
    %c0_i32 = arith.constant 0 : i32
    %c0_i32_0 = arith.constant 0 : i32
    return %arg0, %c0_i32 : i32, i32
  }
}

module attributes {stable_mosaic.version = 11 : i64} {
  func.func @_fused_matmul_affine_kernel(%arg0: i32, %arg1: memref<32x4096xbf16, #tpu.memory_space<vmem>>, %arg2: memref<4096x512xbf16, #tpu.memory_space<vmem>>, %arg3: memref<1x512xf32, #tpu.memory_space<vmem>>, %arg4: memref<32x512xf32, #tpu.memory_space<vmem>>) attributes {dimension_semantics = [#tpu.dimension_semantics<parallel>], iteration_bounds = array<i64: 1>, scalar_prefetch = 0 : i64, scratch_operands = 0 : i64, tpu.core_type = #tpu.core_type<tc>, window_params = [{transform_indices = @transform_0, window_bounds = array<i64: 32, 4096>}, {pipeline_mode = #tpu.pipeline_mode<synchronous>, transform_indices = @transform_1, window_bounds = array<i64: 4096, 512>}, {pipeline_mode = #tpu.pipeline_mode<synchronous>, transform_indices = @transform_2, window_bounds = array<i64: 1, 512>}, {transform_indices = @transform_3, window_bounds = array<i64: 32, 512>}]} {
    %c0 = arith.constant 0 : index
    %c0_0 = arith.constant 0 : index
    %0 = vector.load %arg1[%c0, %c0_0] : memref<32x4096xbf16, #tpu.memory_space<vmem>>, vector<32x4096xbf16>
    %c0_1 = arith.constant 0 : index
    %c0_2 = arith.constant 0 : index
    %1 = vector.load %arg2[%c0_1, %c0_2] : memref<4096x512xbf16, #tpu.memory_space<vmem>>, vector<4096x512xbf16>
    %cst = arith.constant dense<0.000000e+00> : vector<32x512xf32>
    %2 = tpu.matmul %0, %1, %cst {dimension_numbers = #tpu.dot_dimension_numbers<[1], [0], [0], [1], [0, 0, 1, 1], [], []>} : vector<32x4096xbf16>, vector<4096x512xbf16>, vector<32x512xf32> -> vector<32x512xf32>
    %c0_3 = arith.constant 0 : index
    %c0_4 = arith.constant 0 : index
    %3 = vector.load %arg3[%c0_3, %c0_4] : memref<1x512xf32, #tpu.memory_space<vmem>>, vector<1x512xf32>
    %4 = vector.broadcast %3 : vector<1x512xf32> to vector<32x512xf32>
    %5 = arith.addf %2, %4 : vector<32x512xf32>
    %cst_5 = arith.constant 0.000000e+00 : f32
    %6 = vector.broadcast %cst_5 : f32 to vector<32x512xf32>
    %7 = arith.cmpf ogt, %5, %6 : vector<32x512xf32>
    %cst_6 = arith.constant 2.000000e-01 : f32
    %8 = vector.broadcast %cst_6 : f32 to vector<32x512xf32>
    %9 = arith.mulf %8, %5 : vector<32x512xf32>
    %10 = arith.select %7, %5, %9 : vector<32x512xi1>, vector<32x512xf32>
    %c0_7 = arith.constant 0 : index
    %c0_8 = arith.constant 0 : index
    %11 = vector.load %arg4[%c0_7, %c0_8] : memref<32x512xf32, #tpu.memory_space<vmem>>, vector<32x512xf32>
    tpu.vector_store %arg4[%c0_7, %c0_8], %10 {strides = array<i32>} : memref<32x512xf32, #tpu.memory_space<vmem>>, vector<32x512xf32>,
    return
  }
  func.func @transform_0(%arg0: i32) -> (i32, i32) {
    %c0_i32 = arith.constant 0 : i32
    %c0_i32_0 = arith.constant 0 : i32
    return %arg0, %c0_i32 : i32, i32
  }
  func.func @transform_1(%arg0: i32) -> (i32, i32) {
    %c0_i32 = arith.constant 0 : i32
    %c0_i32_0 = arith.constant 0 : i32
    %c0_i32_1 = arith.constant 0 : i32
    return %c0_i32, %c0_i32_0 : i32, i32
  }
  func.func @transform_2(%arg0: i32) -> (i32, i32) {
    %c0_i32 = arith.constant 0 : i32
    %c0_i32_0 = arith.constant 0 : i32
    %c0_i32_1 = arith.constant 0 : i32
    return %c0_i32, %c0_i32_0 : i32, i32
  }
  func.func @transform_3(%arg0: i32) -> (i32, i32) {
    %c0_i32 = arith.constant 0 : i32
    %c0_i32_0 = arith.constant 0 : i32
    return %arg0, %c0_i32 : i32, i32
  }
}

module attributes {stable_mosaic.version = 11 : i64} {
  func.func @_fused_matmul_affine_kernel(%arg0: i32, %arg1: memref<2x8192xbf16, #tpu.memory_space<vmem>>, %arg2: memref<8192x128xbf16, #tpu.memory_space<vmem>>, %arg3: memref<1x128xf32, #tpu.memory_space<vmem>>, %arg4: memref<2x128xf32, #tpu.memory_space<vmem>>) attributes {dimension_semantics = [#tpu.dimension_semantics<parallel>], iteration_bounds = array<i64: 1>, scalar_prefetch = 0 : i64, scratch_operands = 0 : i64, tpu.core_type = #tpu.core_type<tc>, window_params = [{transform_indices = @transform_0, window_bounds = array<i64: 2, 8192>}, {pipeline_mode = #tpu.pipeline_mode<synchronous>, transform_indices = @transform_1, window_bounds = array<i64: 8192, 128>}, {pipeline_mode = #tpu.pipeline_mode<synchronous>, transform_indices = @transform_2, window_bounds = array<i64: 1, 128>}, {transform_indices = @transform_3, window_bounds = array<i64: 2, 128>}]} {
    %c0 = arith.constant 0 : index
    %c0_0 = arith.constant 0 : index
    %0 = vector.load %arg1[%c0, %c0_0] : memref<2x8192xbf16, #tpu.memory_space<vmem>>, vector<2x8192xbf16>
    %c0_1 = arith.constant 0 : index
    %c0_2 = arith.constant 0 : index
    %1 = vector.load %arg2[%c0_1, %c0_2] : memref<8192x128xbf16, #tpu.memory_space<vmem>>, vector<8192x128xbf16>
    %cst = arith.constant dense<0.000000e+00> : vector<2x128xf32>
    %2 = tpu.matmul %0, %1, %cst {dimension_numbers = #tpu.dot_dimension_numbers<[1], [0], [0], [1], [0, 0, 1, 1], [], []>} : vector<2x8192xbf16>, vector<8192x128xbf16>, vector<2x128xf32> -> vector<2x128xf32>
    %c0_3 = arith.constant 0 : index
    %c0_4 = arith.constant 0 : index
    %3 = vector.load %arg3[%c0_3, %c0_4] : memref<1x128xf32, #tpu.memory_space<vmem>>, vector<1x128xf32>
    %4 = vector.broadcast %3 : vector<1x128xf32> to vector<2x128xf32>
    %5 = arith.addf %2, %4 : vector<2x128xf32>
    %cst_5 = arith.constant 0.000000e+00 : f32
    %6 = vector.broadcast %cst_5 : f32 to vector<2x128xf32>
    %7 = arith.subf %6, %5 : vector<2x128xf32>
    %8 = math.exp %7 : vector<2x128xf32>
    %cst_6 = arith.constant 1.000000e+00 : f32
    %9 = vector.broadcast %cst_6 : f32 to vector<2x128xf32>
    %10 = arith.addf %9, %8 : vector<2x128xf32>
    %cst_7 = arith.constant 1.000000e+00 : f32
    %11 = vector.broadcast %cst_7 : f32 to vector<2x128xf32>
    %12 = arith.divf %11, %10 : vector<2x128xf32>
    %c0_8 = arith.constant 0 : index
    %c0_9 = arith.constant 0 : index
    %13 = vector.load %arg4[%c0_8, %c0_9] : memref<2x128xf32, #tpu.memory_space<vmem>>, vector<2x128xf32>
    tpu.vector_store %arg4[%c0_8, %c0_9], %12 {strides = array<i32>} : memref<2x128xf32, #tpu.memory_space<vmem>>, vector<2x128xf32>,
    return
  }
  func.func @transform_0(%arg0: i32) -> (i32, i32) {
    %c0_i32 = arith.constant 0 : i32
    %c0_i32_0 = arith.constant 0 : i32
    return %arg0, %c0_i32 : i32, i32
  }
  func.func @transform_1(%arg0: i32) -> (i32, i32) {
    %c0_i32 = arith.constant 0 : i32
    %c0_i32_0 = arith.constant 0 : i32
    %c0_i32_1 = arith.constant 0 : i32
    return %c0_i32, %c0_i32_0 : i32, i32
  }
  func.func @transform_2(%arg0: i32) -> (i32, i32) {
    %c0_i32 = arith.constant 0 : i32
    %c0_i32_0 = arith.constant 0 : i32
    %c0_i32_1 = arith.constant 0 : i32
    return %c0_i32, %c0_i32_0 : i32, i32
  }
  func.func @transform_3(%arg0: i32) -> (i32, i32) {
    %c0_i32 = arith.constant 0 : i32
    %c0_i32_0 = arith.constant 0 : i32
    return %arg0, %c0_i32 : i32, i32
  }
}

</mosaic_0001>

<bundles_post_ra>
// kernel: discriminator64_forward.5
= control target key start
LH: loop header
LB: loop body
LE: loop exit
PB: predicated region body
PF: predicated region fallthrough
CT: control target
= control target key end

     0   :  { %s1359_s12 = smov 0   ;;  %s1584_s0 = inlined_call_operand.vmem [shape: bf16[2048,16], index: 0, kind: input, shape index: {}]   ;;  %s1585_s1 = inlined_call_operand.vmem [shape: bf16[16,128], index: 1, kind: input, shape index: {}]   ;;  %s1586_s2 = inlined_call_operand.vmem [shape: f32[1,128], index: 2, kind: input, shape index: {}]   ;;  %s1587_s3 = inlined_call_operand.vmem [shape: f32[2048,128], index: 3, kind: output, shape index: {}]  }
   0x1 LB: > { %s1112_s13 = sadd.s32 4294967295, %s1337_s12   ;;  %p1116_p0 = scmp.ge.s32.totalorder %s1337_s12, 1  ;;  %s1337_s12 = sphi %s1359_s12, %s13_s12  }
   0x2   : > { %p138_p1 = scmp.lt.s32.totalorder %s1337_s12, 5 }
   0x4   : > { %p139_p2 = pnand %p1116_p0, %p138_p1 }
   0x5   : > { %v1298_v0 = vld [vmem:[%s1585_s1] sm:$0xff] (!%p139_p2)   ;;  %s1117_s16 = sshll.u32 (!%p139_p2), %s1112_s13, 6  ;;  %vm414_vm0 = vcmask (!%p139_p2), 130048  }
   0x6   : > { %142 = sbr.rel (%p139_p2) target bundleno = 299 (0x12b), region = 32  ;;  %p163_p3 = scmp.lt.s32.totalorder (!%p139_p2), %s1117_s16, 255  ;;  %1222 = vmatprep.subr.bf16.mxu0 (!%p139_p2), %v1298_v0  ;;  %1288 = vmatprep.subr.bf16.mxu1 (!%p139_p2), %v1298_v0  ;;  %v1445_v33 = vld [vmem:[%s1586_s2] ss:$0 sm:$0xff] (!%p139_p2) }
   0x7   : > { %1223 = vmatpush3.bf16.msra.mxu0 (!%p139_p2), %v1298_v0  ;;  %1289 = vmatpush3.bf16.msra.mxu1 (!%p139_p2), %v1298_v0 }
   0xd   : > { %s1589_s16 = smov (!%p163_p3, %s1117_s16), 255 }
   0xe   : > { %s1118_s17 = sshll.u32 %s1589_s16, 2  ;;  %s1120_s23 = sshll.u32 %s1589_s16, 3 }
   0xf   : > { %s1376_s20 = scalar_lea.vmem %s1584_s0, %s1118_s17  ;;  %s1454_s26 = scalar_lea.vmem %s1587_s3, %s1120_s23 }
  0x10   : > { %v1299_v1 = vld [vmem:[%s1376_s20] sm:$0xff]   ;;  %v1301_v3 = vld [vmem:[%s1376_s20 + $0x8] sm:$0xff]   ;;  %v1303_v5 = vld [vmem:[%s1376_s20 + $0x10] sm:$0xff]  }
  0x11   : > { %v1300_v2 = vld [vmem:[%s1376_s20 + $0x80] sm:$0xff]   ;;  %1224 = vmatprep.mubr.msk.bf16.mxu0 %vm414_vm0, %v1299_v1  ;;  %v1302_v4 = vld [vmem:[%s1376_s20 + $0x88] sm:$0xff]   ;;  %v1304_v6 = vld [vmem:[%s1376_s20 + $0x90] sm:$0xff]  }
  0x12   : > { %1256 = vmatprep.mubr.msk.bf16.mxu1 %vm414_vm0, %v1300_v2  ;;  %1225 = vmatmul.mubr.msk.bf16.vlgmr.msra.gmra.mrb[0].mxu0 %vm414_vm0, %v1301_v3  ;;  %v1305_v7 = vld [vmem:[%s1376_s20 + $0x18] sm:$0xff]   ;;  %v1307_v9 = vld [vmem:[%s1376_s20 + $0x20] sm:$0xff]   ;;  %v1309_v11 = vld [vmem:[%s1376_s20 + $0x28] sm:$0xff]  }
  0x13   : > { %1257 = vmatmul.mubr.msk.bf16.vlgmr.msra.gmra.mrb[0].mxu1 %vm414_vm0, %v1302_v4  ;;  %1228 = vmatprep.mubr.msk.bf16.mxu0 %vm414_vm0, %v1303_v5  ;;  %v1306_v8 = vld [vmem:[%s1376_s20 + $0x98] sm:$0xff]   ;;  %v1308_v10 = vld [vmem:[%s1376_s20 + $0xa0] sm:$0xff]   ;;  %v1310_v12 = vld [vmem:[%s1376_s20 + $0xa8] sm:$0xff]  }
  0x14   : > { %1260 = vmatprep.mubr.msk.bf16.mxu1 %vm414_vm0, %v1304_v6  ;;  %v1311_v13 = vld [vmem:[%s1376_s20 + $0x30] sm:$0xff]   ;;  %v1313_v15 = vld [vmem:[%s1376_s20 + $0x38] sm:$0xff]   ;;  %v1315_v17 = vld [vmem:[%s1376_s20 + $0x40] sm:$0xff]  }
  0x15   : > { %v1312_v14 = vld [vmem:[%s1376_s20 + $0xb0] sm:$0xff]   ;;  %v1314_v16 = vld [vmem:[%s1376_s20 + $0xb8] sm:$0xff]   ;;  %v1316_v18 = vld [vmem:[%s1376_s20 + $0xc0] sm:$0xff]  }
  0x16   : > { %v1317_v19 = vld [vmem:[%s1376_s20 + $0x48] sm:$0xff]   ;;  %v1319_v21 = vld [vmem:[%s1376_s20 + $0x50] sm:$0xff]   ;;  %v1321_v23 = vld [vmem:[%s1376_s20 + $0x58] sm:$0xff]  }
  0x17   : > { %v1318_v20 = vld [vmem:[%s1376_s20 + $0xc8] sm:$0xff]   ;;  %v1320_v22 = vld [vmem:[%s1376_s20 + $0xd0] sm:$0xff]   ;;  %v1322_v24 = vld [vmem:[%s1376_s20 + $0xd8] sm:$0xff]  }
  0x18   : > { %v1323_v25 = vld [vmem:[%s1376_s20 + $0x60] sm:$0xff]   ;;  %v1325_v27 = vld [vmem:[%s1376_s20 + $0x68] sm:$0xff]   ;;  %v1327_v29 = vld [vmem:[%s1376_s20 + $0x70] sm:$0xff]  }
  0x19   : > { %v1324_v26 = vld [vmem:[%s1376_s20 + $0xe0] sm:$0xff]   ;;  %v1326_v28 = vld [vmem:[%s1376_s20 + $0xe8] sm:$0xff]   ;;  %v1328_v30 = vld [vmem:[%s1376_s20 + $0xf0] sm:$0xff]  }
  0x1a   : > { %1229 = vmatmul.mubr.msk.bf16.gmra.mrb[4].mxu0 %vm414_vm0, %v1305_v7  ;;  %v1329_v31 = vld [vmem:[%s1376_s20 + $0x78] sm:$0xff]  }
  0x1b   : > { %1261 = vmatmul.mubr.msk.bf16.gmra.mrb[4].mxu1 %vm414_vm0, %v1306_v8  ;;  %1232 = vmatprep.mubr.msk.bf16.mxu0 %vm414_vm0, %v1307_v9  ;;  %v1330_v32 = vld [vmem:[%s1376_s20 + $0xf8] sm:$0xff]  }
  0x1c   : > { %1264 = vmatprep.mubr.msk.bf16.mxu1 %vm414_vm0, %v1308_v10 }
  0x22   : > { %1233 = vmatmul.mubr.msk.bf16.gmra.mrb[8].mxu0 %vm414_vm0, %v1309_v11 }
  0x23   : > { %1265 = vmatmul.mubr.msk.bf16.gmra.mrb[8].mxu1 %vm414_vm0, %v1310_v12  ;;  %1236 = vmatprep.mubr.msk.bf16.mxu0 %vm414_vm0, %v1311_v13 }
  0x24   : > { %1268 = vmatprep.mubr.msk.bf16.mxu1 %vm414_vm0, %v1312_v14 }
  0x2a   : > { %1237 = vmatmul.mubr.msk.bf16.gmra.mrb[12].mxu0 %vm414_vm0, %v1313_v15 }
  0x2b   : > { %1269 = vmatmul.mubr.msk.bf16.gmra.mrb[12].mxu1 %vm414_vm0, %v1314_v16  ;;  %1240 = vmatprep.mubr.msk.bf16.mxu0 %vm414_vm0, %v1315_v17 }
  0x2c   : > { %1272 = vmatprep.mubr.msk.bf16.mxu1 %vm414_vm0, %v1316_v18 }
  0x32   : > { %1241 = vmatmul.mubr.msk.bf16.gmra.mrb[16].mxu0 %vm414_vm0, %v1317_v19 }
  0x33   : > { %1273 = vmatmul.mubr.msk.bf16.gmra.mrb[16].mxu1 %vm414_vm0, %v1318_v20  ;;  %1244 = vmatprep.mubr.msk.bf16.mxu0 %vm414_vm0, %v1319_v21 }
  0x34   : > { %1276 = vmatprep.mubr.msk.bf16.mxu1 %vm414_vm0, %v1320_v22 }
  0x3a   : > { %1245 = vmatmul.mubr.msk.bf16.gmra.mrb[20].mxu0 %vm414_vm0, %v1321_v23 }
  0x3b   : > { %1277 = vmatmul.mubr.msk.bf16.gmra.mrb[20].mxu1 %vm414_vm0, %v1322_v24  ;;  %1248 = vmatprep.mubr.msk.bf16.mxu0 %vm414_vm0, %v1323_v25 }
  0x3c   : > { %1280 = vmatprep.mubr.msk.bf16.mxu1 %vm414_vm0, %v1324_v26 }
  0x42   : > { %1249 = vmatmul.mubr.msk.bf16.gmra.mrb[24].mxu0 %vm414_vm0, %v1325_v27 }
  0x43   : > { %1281 = vmatmul.mubr.msk.bf16.gmra.mrb[24].mxu1 %vm414_vm0, %v1326_v28  ;;  %1252 = vmatprep.mubr.msk.bf16.mxu0 %vm414_vm0, %v1327_v29 }
  0x44   : > { %1284 = vmatprep.mubr.msk.bf16.mxu1 %vm414_vm0, %v1328_v30 }
  0x4a   : > { %1253 = vmatmul.mubr.msk.bf16.gmra.mrb[28].mxu0 %vm414_vm0, %v1329_v31 }
  0x4b   : > { %1285 = vmatmul.mubr.msk.bf16.gmra.mrb[28].mxu1 %vm414_vm0, %v1330_v32 }
  0xe5   : > { %v1226_v34 = vpop.f32.mrb[0].mxu0 }
  0xe6   : > { %v554_v35 = vadd.f32 %v1226_v34, %v1445_v33  ;;  %v1258_v36 = vpop.f32.mrb[0].mxu1  ;;  %v545_v37 = vpop.f32.mrb[1].mxu0 }
  0xe7   : > { %v682_v38 = vadd.f32 %v1258_v36, %v1445_v33  ;;  %v546_v39 = vadd.f32 %v1445_v33, %v545_v37  ;;  %v673_v40 = vpop.f32.mrb[1].mxu1  ;;  %v1227_v41 = vpop.f32.mrb[2].mxu0 }
  0xe8   : > { %vm802_vm1 = vcmp.gt.f32.partialorder %v554_v35, 0.0  ;;  %v866_v42 = vmul.f32 0.2, %v554_v35  ;;  %v674_v43 = vadd.f32 %v1445_v33, %v673_v40  ;;  %v557_v44 = vadd.f32 %v1227_v41, %v1445_v33  ;;  %v1259_v45 = vpop.f32.mrb[2].mxu1  ;;  %v548_v46 = vpop.f32.mrb[3].mxu0 }
  0xe9   : > { %vm834_vm2 = vcmp.gt.f32.partialorder %v682_v38, 0.0  ;;  %v898_v47 = vmul.f32 0.2, %v682_v38  ;;  %vm800_vm3 = vcmp.gt.f32.partialorder %v546_v39, 0.0  ;;  %v864_v48 = vmul.f32 0.2, %v546_v39 }
  0xea   : > { %v930_v49 = vsel %vm802_vm1, %v554_v35, %v866_v42  ;;  %vm832_vm4 = vcmp.gt.f32.partialorder %v674_v43, 0.0  ;;  %v896_v50 = vmul.f32 0.2, %v674_v43  ;;  %vm803_vm5 = vcmp.gt.f32.partialorder %v557_v44, 0.0  ;;  %v676_v51 = vpop.f32.mrb[3].mxu1 }
  0xeb   : > { %994 = vst [vmem:[%s1454_s26 + $0x10] sm:$0xff] %v930_v49  ;;  %v962_v52 = vsel %vm834_vm2, %v682_v38, %v898_v47  ;;  %v928_v53 = vsel %vm800_vm3, %v546_v39, %v864_v48  ;;  %v867_v54 = vmul.f32 0.2, %v557_v44  ;;  %v685_v55 = vadd.f32 %v1259_v45, %v1445_v33 }
  0xec   : > { %1026 = vst [vmem:[%s1454_s26 + $0x110] sm:$0xff] %v962_v52  ;;  %992 = vst [vmem:[%s1454_s26] sm:$0xff] %v928_v53  ;;  %v960_v56 = vsel %vm832_vm4, %v674_v43, %v896_v50  ;;  %v549_v57 = vadd.f32 %v1445_v33, %v548_v46  ;;  %v677_v58 = vadd.f32 %v1445_v33, %v676_v51 }
  0xed   : > { %1024 = vst [vmem:[%s1454_s26 + $0x100] sm:$0xff] %v960_v56  ;;  %v931_v59 = vsel %vm803_vm5, %v557_v44, %v867_v54  ;;  %vm835_vm6 = vcmp.gt.f32.partialorder %v685_v55, 0.0  ;;  %v899_v60 = vmul.f32 0.2, %v685_v55  ;;  %v1230_v61 = vpop.f32.mrb[4].mxu0 }
  0xee   : > { %995 = vst [vmem:[%s1454_s26 + $0x18] sm:$0xff] %v931_v59  ;;  %vm801_vm7 = vcmp.gt.f32.partialorder %v549_v57, 0.0  ;;  %v865_v62 = vmul.f32 0.2, %v549_v57  ;;  %vm833_vm8 = vcmp.gt.f32.partialorder %v677_v58, 0.0  ;;  %v570_v1 = vadd.f32 %v1230_v61, %v1445_v33  ;;  %v1262_v2 = vpop.f32.mrb[4].mxu1 }
  0xef   : > { %v897_v63 = vmul.f32 0.2, %v677_v58  ;;  %v963_v0 = vsel %vm835_vm6, %v685_v55, %v899_v60  ;;  %v561_v3 = vpop.f32.mrb[5].mxu0  ;;  %v698_v6 = vadd.f32 %v1262_v2, %v1445_v33  ;;  %v689_v8 = vpop.f32.mrb[5].mxu1 }
  0xf0   : > { %1027 = vst [vmem:[%s1454_s26 + $0x118] sm:$0xff] %v963_v0  ;;  %v929_v4 = vsel %vm801_vm7, %v549_v57, %v865_v62  ;;  %v562_v7 = vadd.f32 %v1445_v33, %v561_v3  ;;  %v1231_v9 = vpop.f32.mrb[6].mxu0  ;;  %vm806_vm9 = vcmp.gt.f32.partialorder %v570_v1, 0.0  ;;  %v870_v10 = vmul.f32 0.2, %v570_v1  ;;  %v1263_v13 = vpop.f32.mrb[6].mxu1 }
  0xf1   : > { %v961_v5 = vsel %vm833_vm8, %v677_v58, %v897_v63  ;;  %993 = vst [vmem:[%s1454_s26 + $0x8] sm:$0xff] %v929_v4  ;;  %v690_v11 = vadd.f32 %v1445_v33, %v689_v8  ;;  %v573_v12 = vadd.f32 %v1231_v9, %v1445_v33  ;;  %v564_v14 = vpop.f32.mrb[7].mxu0  ;;  %vm838_vm10 = vcmp.gt.f32.partialorder %v698_v6, 0.0  ;;  %v692_v19 = vpop.f32.mrb[7].mxu1 }
  0xf2   : > { %1025 = vst [vmem:[%s1454_s26 + $0x108] sm:$0xff] %v961_v5  ;;  %v902_v15 = vmul.f32 0.2, %v698_v6  ;;  %vm804_vm11 = vcmp.gt.f32.partialorder %v562_v7, 0.0  ;;  %v868_v16 = vmul.f32 0.2, %v562_v7  ;;  %v934_v17 = vsel %vm806_vm9, %v570_v1, %v870_v10 }
  0xf3   : > { %vm836_vm12 = vcmp.gt.f32.partialorder %v690_v11, 0.0  ;;  %v900_v18 = vmul.f32 0.2, %v690_v11  ;;  %vm807_vm13 = vcmp.gt.f32.partialorder %v573_v12, 0.0  ;;  %998 = vst [vmem:[%s1454_s26 + $0x30] sm:$0xff] %v934_v17  ;;  %v701_v23 = vadd.f32 %v1263_v13, %v1445_v33 }
  0xf4   : > { %v966_v20 = vsel %vm838_vm10, %v698_v6, %v902_v15  ;;  %v932_v21 = vsel %vm804_vm11, %v562_v7, %v868_v16  ;;  %v871_v22 = vmul.f32 0.2, %v573_v12  ;;  %v565_v25 = vadd.f32 %v1445_v33, %v564_v14 }
  0xf5   : > { %1030 = vst [vmem:[%s1454_s26 + $0x130] sm:$0xff] %v966_v20  ;;  %996 = vst [vmem:[%s1454_s26 + $0x20] sm:$0xff] %v932_v21  ;;  %v964_v24 = vsel %vm836_vm12, %v690_v11, %v900_v18  ;;  %v693_v26 = vadd.f32 %v1445_v33, %v692_v19  ;;  %v1234_v27 = vpop.f32.mrb[8].mxu0  ;;  %vm839_vm14 = vcmp.gt.f32.partialorder %v701_v23, 0.0  ;;  %v903_v29 = vmul.f32 0.2, %v701_v23 }
  0xf6   : > { %1028 = vst [vmem:[%s1454_s26 + $0x120] sm:$0xff] %v964_v24  ;;  %v935_v28 = vsel %vm807_vm13, %v573_v12, %v871_v22  ;;  %v586_v30 = vadd.f32 %v1234_v27, %v1445_v33  ;;  %v1266_v31 = vpop.f32.mrb[8].mxu1  ;;  %v577_v32 = vpop.f32.mrb[9].mxu0  ;;  %vm805_vm15 = vcmp.gt.f32.partialorder %v565_v25, 0.0  ;;  %v869_v34 = vmul.f32 0.2, %v565_v25 }
  0xf7   : > { %999 = vst [vmem:[%s1454_s26 + $0x38] sm:$0xff] %v935_v28  ;;  %vm837_vm0 = vcmp.gt.f32.partialorder %v693_v26, 0.0  ;;  %v901_v35 = vmul.f32 0.2, %v693_v26  ;;  %v967_v36 = vsel %vm839_vm14, %v701_v23, %v903_v29  ;;  %v714_v38 = vadd.f32 %v1266_v31, %v1445_v33  ;;  %v705_v39 = vpop.f32.mrb[9].mxu1  ;;  %v1235_v40 = vpop.f32.mrb[10].mxu0 }
  0xf8   : > { %vm810_vm1 = vcmp.gt.f32.partialorder %v586_v30, 0.0  ;;  %v874_v37 = vmul.f32 0.2, %v586_v30  ;;  %1031 = vst [vmem:[%s1454_s26 + $0x138] sm:$0xff] %v967_v36  ;;  %v933_v41 = vsel %vm805_vm15, %v565_v25, %v869_v34  ;;  %v578_v43 = vadd.f32 %v1445_v33, %v577_v32  ;;  %v1267_v45 = vpop.f32.mrb[10].mxu1  ;;  %v580_v46 = vpop.f32.mrb[11].mxu0 }
  0xf9   : > { %v965_v42 = vsel %vm837_vm0, %v693_v26, %v901_v35  ;;  %v706_v44 = vadd.f32 %v1445_v33, %v705_v39  ;;  %997 = vst [vmem:[%s1454_s26 + $0x28] sm:$0xff] %v933_v41  ;;  %vm842_vm2 = vcmp.gt.f32.partialorder %v714_v38, 0.0  ;;  %v906_v48 = vmul.f32 0.2, %v714_v38  ;;  %v708_v50 = vpop.f32.mrb[11].mxu1 }
  0xfa   : > { %1029 = vst [vmem:[%s1454_s26 + $0x128] sm:$0xff] %v965_v42  ;;  %v938_v47 = vsel %vm810_vm1, %v586_v30, %v874_v37  ;;  %v589_v49 = vadd.f32 %v1235_v40, %v1445_v33  ;;  %vm808_vm3 = vcmp.gt.f32.partialorder %v578_v43, 0.0  ;;  %v872_v51 = vmul.f32 0.2, %v578_v43 }
  0xfb   : > { %1002 = vst [vmem:[%s1454_s26 + $0x50] sm:$0xff] %v938_v47  ;;  %vm840_vm4 = vcmp.gt.f32.partialorder %v706_v44, 0.0  ;;  %v904_v52 = vmul.f32 0.2, %v706_v44  ;;  %v970_v53 = vsel %vm842_vm2, %v714_v38, %v906_v48  ;;  %v717_v55 = vadd.f32 %v1267_v45, %v1445_v33 }
  0xfc   : > { %vm811_vm5 = vcmp.gt.f32.partialorder %v589_v49, 0.0  ;;  %v875_v54 = vmul.f32 0.2, %v589_v49  ;;  %1034 = vst [vmem:[%s1454_s26 + $0x150] sm:$0xff] %v970_v53  ;;  %v936_v56 = vsel %vm808_vm3, %v578_v43, %v872_v51  ;;  %v581_v58 = vadd.f32 %v1445_v33, %v580_v46 }
  0xfd   : > { %v968_v57 = vsel %vm840_vm4, %v706_v44, %v904_v52  ;;  %v709_v59 = vadd.f32 %v1445_v33, %v708_v50  ;;  %v1238_v60 = vpop.f32.mrb[12].mxu0  ;;  %1000 = vst [vmem:[%s1454_s26 + $0x40] sm:$0xff] %v936_v56  ;;  %vm843_vm6 = vcmp.gt.f32.partialorder %v717_v55, 0.0  ;;  %v907_v62 = vmul.f32 0.2, %v717_v55 }
  0xfe   : > { %1032 = vst [vmem:[%s1454_s26 + $0x140] sm:$0xff] %v968_v57  ;;  %v939_v61 = vsel %vm811_vm5, %v589_v49, %v875_v54  ;;  %v602_v63 = vadd.f32 %v1238_v60, %v1445_v33  ;;  %v1270_v0 = vpop.f32.mrb[12].mxu1  ;;  %v593_v1 = vpop.f32.mrb[13].mxu0  ;;  %vm809_vm7 = vcmp.gt.f32.partialorder %v581_v58, 0.0  ;;  %v873_v2 = vmul.f32 0.2, %v581_v58 }
  0xff   : > { %1003 = vst [vmem:[%s1454_s26 + $0x58] sm:$0xff] %v939_v61  ;;  %vm841_vm8 = vcmp.gt.f32.partialorder %v709_v59, 0.0  ;;  %v905_v3 = vmul.f32 0.2, %v709_v59  ;;  %v971_v4 = vsel %vm843_vm6, %v717_v55, %v907_v62  ;;  %v730_v6 = vadd.f32 %v1270_v0, %v1445_v33  ;;  %v721_v7 = vpop.f32.mrb[13].mxu1  ;;  %v1239_v8 = vpop.f32.mrb[14].mxu0 }
 0x100   : > { %vm814_vm9 = vcmp.gt.f32.partialorder %v602_v63, 0.0  ;;  %v878_v5 = vmul.f32 0.2, %v602_v63  ;;  %1035 = vst [vmem:[%s1454_s26 + $0x158] sm:$0xff] %v971_v4  ;;  %v937_v9 = vsel %vm809_vm7, %v581_v58, %v873_v2  ;;  %v594_v11 = vadd.f32 %v1445_v33, %v593_v1  ;;  %v1271_v13 = vpop.f32.mrb[14].mxu1  ;;  %v596_v14 = vpop.f32.mrb[15].mxu0 }
 0x101   : > { %v969_v10 = vsel %vm841_vm8, %v709_v59, %v905_v3  ;;  %v722_v12 = vadd.f32 %v1445_v33, %v721_v7  ;;  %1001 = vst [vmem:[%s1454_s26 + $0x48] sm:$0xff] %v937_v9  ;;  %vm846_vm10 = vcmp.gt.f32.partialorder %v730_v6, 0.0  ;;  %v910_v16 = vmul.f32 0.2, %v730_v6  ;;  %v724_v18 = vpop.f32.mrb[15].mxu1 }
 0x102   : > { %1033 = vst [vmem:[%s1454_s26 + $0x148] sm:$0xff] %v969_v10  ;;  %v942_v15 = vsel %vm814_vm9, %v602_v63, %v878_v5  ;;  %v605_v17 = vadd.f32 %v1239_v8, %v1445_v33  ;;  %vm812_vm11 = vcmp.gt.f32.partialorder %v594_v11, 0.0  ;;  %v876_v19 = vmul.f32 0.2, %v594_v11 }
 0x103   : > { %1006 = vst [vmem:[%s1454_s26 + $0x70] sm:$0xff] %v942_v15  ;;  %vm844_vm12 = vcmp.gt.f32.partialorder %v722_v12, 0.0  ;;  %v908_v20 = vmul.f32 0.2, %v722_v12  ;;  %v974_v21 = vsel %vm846_vm10, %v730_v6, %v910_v16  ;;  %v733_v23 = vadd.f32 %v1271_v13, %v1445_v33 }
 0x104   : > { %vm815_vm13 = vcmp.gt.f32.partialorder %v605_v17, 0.0  ;;  %v879_v22 = vmul.f32 0.2, %v605_v17  ;;  %1038 = vst [vmem:[%s1454_s26 + $0x170] sm:$0xff] %v974_v21  ;;  %v940_v24 = vsel %vm812_vm11, %v594_v11, %v876_v19  ;;  %v597_v26 = vadd.f32 %v1445_v33, %v596_v14 }
 0x105   : > { %v972_v25 = vsel %vm844_vm12, %v722_v12, %v908_v20  ;;  %v725_v27 = vadd.f32 %v1445_v33, %v724_v18  ;;  %v1242_v28 = vpop.f32.mrb[16].mxu0  ;;  %1004 = vst [vmem:[%s1454_s26 + $0x60] sm:$0xff] %v940_v24  ;;  %vm847_vm14 = vcmp.gt.f32.partialorder %v733_v23, 0.0  ;;  %v911_v30 = vmul.f32 0.2, %v733_v23 }
 0x106   : > { %1036 = vst [vmem:[%s1454_s26 + $0x160] sm:$0xff] %v972_v25  ;;  %v943_v29 = vsel %vm815_vm13, %v605_v17, %v879_v22  ;;  %v618_v31 = vadd.f32 %v1242_v28, %v1445_v33  ;;  %v1274_v32 = vpop.f32.mrb[16].mxu1  ;;  %v609_v34 = vpop.f32.mrb[17].mxu0  ;;  %vm813_vm15 = vcmp.gt.f32.partialorder %v597_v26, 0.0  ;;  %v877_v35 = vmul.f32 0.2, %v597_v26 }
 0x107   : > { %1007 = vst [vmem:[%s1454_s26 + $0x78] sm:$0xff] %v943_v29  ;;  %vm845_vm0 = vcmp.gt.f32.partialorder %v725_v27, 0.0  ;;  %v909_v36 = vmul.f32 0.2, %v725_v27  ;;  %v975_v37 = vsel %vm847_vm14, %v733_v23, %v911_v30  ;;  %v746_v39 = vadd.f32 %v1274_v32, %v1445_v33  ;;  %v737_v40 = vpop.f32.mrb[17].mxu1  ;;  %v1243_v41 = vpop.f32.mrb[18].mxu0 }
 0x108   : > { %vm818_vm1 = vcmp.gt.f32.partialorder %v618_v31, 0.0  ;;  %v882_v38 = vmul.f32 0.2, %v618_v31  ;;  %1039 = vst [vmem:[%s1454_s26 + $0x178] sm:$0xff] %v975_v37  ;;  %v941_v42 = vsel %vm813_vm15, %v597_v26, %v877_v35  ;;  %v610_v44 = vadd.f32 %v1445_v33, %v609_v34  ;;  %v1275_v46 = vpop.f32.mrb[18].mxu1  ;;  %v612_v47 = vpop.f32.mrb[19].mxu0 }
 0x109   : > { %v973_v43 = vsel %vm845_vm0, %v725_v27, %v909_v36  ;;  %v738_v45 = vadd.f32 %v1445_v33, %v737_v40  ;;  %1005 = vst [vmem:[%s1454_s26 + $0x68] sm:$0xff] %v941_v42  ;;  %vm850_vm2 = vcmp.gt.f32.partialorder %v746_v39, 0.0  ;;  %v914_v49 = vmul.f32 0.2, %v746_v39  ;;  %v740_v51 = vpop.f32.mrb[19].mxu1 }
 0x10a   : > { %1037 = vst [vmem:[%s1454_s26 + $0x168] sm:$0xff] %v973_v43  ;;  %v946_v48 = vsel %vm818_vm1, %v618_v31, %v882_v38  ;;  %v621_v50 = vadd.f32 %v1243_v41, %v1445_v33  ;;  %vm816_vm3 = vcmp.gt.f32.partialorder %v610_v44, 0.0  ;;  %v880_v52 = vmul.f32 0.2, %v610_v44 }
 0x10b   : > { %1010 = vst [vmem:[%s1454_s26 + $0x90] sm:$0xff] %v946_v48  ;;  %vm848_vm4 = vcmp.gt.f32.partialorder %v738_v45, 0.0  ;;  %v912_v53 = vmul.f32 0.2, %v738_v45  ;;  %v978_v54 = vsel %vm850_vm2, %v746_v39, %v914_v49  ;;  %v749_v56 = vadd.f32 %v1275_v46, %v1445_v33 }
 0x10c   : > { %vm819_vm5 = vcmp.gt.f32.partialorder %v621_v50, 0.0  ;;  %v883_v55 = vmul.f32 0.2, %v621_v50  ;;  %1042 = vst [vmem:[%s1454_s26 + $0x190] sm:$0xff] %v978_v54  ;;  %v944_v57 = vsel %vm816_vm3, %v610_v44, %v880_v52  ;;  %v613_v59 = vadd.f32 %v1445_v33, %v612_v47 }
 0x10d   : > { %v976_v58 = vsel %vm848_vm4, %v738_v45, %v912_v53  ;;  %v741_v60 = vadd.f32 %v1445_v33, %v740_v51  ;;  %v1246_v61 = vpop.f32.mrb[20].mxu0  ;;  %1008 = vst [vmem:[%s1454_s26 + $0x80] sm:$0xff] %v944_v57  ;;  %vm851_vm6 = vcmp.gt.f32.partialorder %v749_v56, 0.0  ;;  %v915_v63 = vmul.f32 0.2, %v749_v56 }
 0x10e   : > { %1040 = vst [vmem:[%s1454_s26 + $0x180] sm:$0xff] %v976_v58  ;;  %v947_v62 = vsel %vm819_vm5, %v621_v50, %v883_v55  ;;  %v634_v0 = vadd.f32 %v1246_v61, %v1445_v33  ;;  %v1278_v1 = vpop.f32.mrb[20].mxu1  ;;  %v625_v2 = vpop.f32.mrb[21].mxu0  ;;  %vm817_vm7 = vcmp.gt.f32.partialorder %v613_v59, 0.0  ;;  %v881_v3 = vmul.f32 0.2, %v613_v59 }
 0x10f   : > { %1011 = vst [vmem:[%s1454_s26 + $0x98] sm:$0xff] %v947_v62  ;;  %vm849_vm8 = vcmp.gt.f32.partialorder %v741_v60, 0.0  ;;  %v913_v4 = vmul.f32 0.2, %v741_v60  ;;  %v979_v5 = vsel %vm851_vm6, %v749_v56, %v915_v63  ;;  %v762_v7 = vadd.f32 %v1278_v1, %v1445_v33  ;;  %v753_v8 = vpop.f32.mrb[21].mxu1  ;;  %v1247_v9 = vpop.f32.mrb[22].mxu0 }
 0x110   : > { %vm822_vm9 = vcmp.gt.f32.partialorder %v634_v0, 0.0  ;;  %v886_v6 = vmul.f32 0.2, %v634_v0  ;;  %1043 = vst [vmem:[%s1454_s26 + $0x198] sm:$0xff] %v979_v5  ;;  %v945_v10 = vsel %vm817_vm7, %v613_v59, %v881_v3  ;;  %v626_v12 = vadd.f32 %v1445_v33, %v625_v2  ;;  %v1279_v14 = vpop.f32.mrb[22].mxu1  ;;  %v628_v15 = vpop.f32.mrb[23].mxu0 }
 0x111   : > { %v977_v11 = vsel %vm849_vm8, %v741_v60, %v913_v4  ;;  %v754_v13 = vadd.f32 %v1445_v33, %v753_v8  ;;  %1009 = vst [vmem:[%s1454_s26 + $0x88] sm:$0xff] %v945_v10  ;;  %vm854_vm10 = vcmp.gt.f32.partialorder %v762_v7, 0.0  ;;  %v918_v17 = vmul.f32 0.2, %v762_v7  ;;  %v756_v19 = vpop.f32.mrb[23].mxu1 }
 0x112   : > { %1041 = vst [vmem:[%s1454_s26 + $0x188] sm:$0xff] %v977_v11  ;;  %v950_v16 = vsel %vm822_vm9, %v634_v0, %v886_v6  ;;  %v637_v18 = vadd.f32 %v1247_v9, %v1445_v33  ;;  %vm820_vm11 = vcmp.gt.f32.partialorder %v626_v12, 0.0  ;;  %v884_v20 = vmul.f32 0.2, %v626_v12 }
 0x113   : > { %1014 = vst [vmem:[%s1454_s26 + $0xb0] sm:$0xff] %v950_v16  ;;  %vm852_vm12 = vcmp.gt.f32.partialorder %v754_v13, 0.0  ;;  %v916_v21 = vmul.f32 0.2, %v754_v13  ;;  %v982_v22 = vsel %vm854_vm10, %v762_v7, %v918_v17  ;;  %v765_v24 = vadd.f32 %v1279_v14, %v1445_v33 }
 0x114   : > { %vm823_vm13 = vcmp.gt.f32.partialorder %v637_v18, 0.0  ;;  %v887_v23 = vmul.f32 0.2, %v637_v18  ;;  %1046 = vst [vmem:[%s1454_s26 + $0x1b0] sm:$0xff] %v982_v22  ;;  %v948_v25 = vsel %vm820_vm11, %v626_v12, %v884_v20  ;;  %v629_v27 = vadd.f32 %v1445_v33, %v628_v15 }
 0x115   : > { %v980_v26 = vsel %vm852_vm12, %v754_v13, %v916_v21  ;;  %v757_v28 = vadd.f32 %v1445_v33, %v756_v19  ;;  %v1250_v29 = vpop.f32.mrb[24].mxu0  ;;  %1012 = vst [vmem:[%s1454_s26 + $0xa0] sm:$0xff] %v948_v25  ;;  %vm855_vm14 = vcmp.gt.f32.partialorder %v765_v24, 0.0  ;;  %v919_v31 = vmul.f32 0.2, %v765_v24 }
 0x116   : > { %1044 = vst [vmem:[%s1454_s26 + $0x1a0] sm:$0xff] %v980_v26  ;;  %v951_v30 = vsel %vm823_vm13, %v637_v18, %v887_v23  ;;  %v650_v32 = vadd.f32 %v1250_v29, %v1445_v33  ;;  %v1282_v34 = vpop.f32.mrb[24].mxu1  ;;  %v641_v35 = vpop.f32.mrb[25].mxu0  ;;  %vm821_vm15 = vcmp.gt.f32.partialorder %v629_v27, 0.0  ;;  %v885_v36 = vmul.f32 0.2, %v629_v27 }
 0x117   : > { %1015 = vst [vmem:[%s1454_s26 + $0xb8] sm:$0xff] %v951_v30  ;;  %vm853_vm0 = vcmp.gt.f32.partialorder %v757_v28, 0.0  ;;  %v917_v37 = vmul.f32 0.2, %v757_v28  ;;  %v983_v38 = vsel %vm855_vm14, %v765_v24, %v919_v31  ;;  %v778_v40 = vadd.f32 %v1282_v34, %v1445_v33  ;;  %v769_v41 = vpop.f32.mrb[25].mxu1  ;;  %v1251_v42 = vpop.f32.mrb[26].mxu0 }
 0x118   : > { %vm826_vm1 = vcmp.gt.f32.partialorder %v650_v32, 0.0  ;;  %v890_v39 = vmul.f32 0.2, %v650_v32  ;;  %1047 = vst [vmem:[%s1454_s26 + $0x1b8] sm:$0xff] %v983_v38  ;;  %v949_v43 = vsel %vm821_vm15, %v629_v27, %v885_v36  ;;  %v642_v45 = vadd.f32 %v1445_v33, %v641_v35  ;;  %v1283_v47 = vpop.f32.mrb[26].mxu1  ;;  %v644_v48 = vpop.f32.mrb[27].mxu0 }
 0x119   : > { %v981_v44 = vsel %vm853_vm0, %v757_v28, %v917_v37  ;;  %v770_v46 = vadd.f32 %v1445_v33, %v769_v41  ;;  %1013 = vst [vmem:[%s1454_s26 + $0xa8] sm:$0xff] %v949_v43  ;;  %vm858_vm2 = vcmp.gt.f32.partialorder %v778_v40, 0.0  ;;  %v922_v50 = vmul.f32 0.2, %v778_v40  ;;  %v772_v52 = vpop.f32.mrb[27].mxu1 }
 0x11a   : > { %1045 = vst [vmem:[%s1454_s26 + $0x1a8] sm:$0xff] %v981_v44  ;;  %v954_v49 = vsel %vm826_vm1, %v650_v32, %v890_v39  ;;  %v653_v51 = vadd.f32 %v1251_v42, %v1445_v33  ;;  %vm824_vm3 = vcmp.gt.f32.partialorder %v642_v45, 0.0  ;;  %v888_v53 = vmul.f32 0.2, %v642_v45 }
 0x11b   : > { %1018 = vst [vmem:[%s1454_s26 + $0xd0] sm:$0xff] %v954_v49  ;;  %vm856_vm4 = vcmp.gt.f32.partialorder %v770_v46, 0.0  ;;  %v920_v54 = vmul.f32 0.2, %v770_v46  ;;  %v986_v55 = vsel %vm858_vm2, %v778_v40, %v922_v50  ;;  %v781_v57 = vadd.f32 %v1283_v47, %v1445_v33 }
 0x11c   : > { %vm827_vm5 = vcmp.gt.f32.partialorder %v653_v51, 0.0  ;;  %v891_v56 = vmul.f32 0.2, %v653_v51  ;;  %1050 = vst [vmem:[%s1454_s26 + $0x1d0] sm:$0xff] %v986_v55  ;;  %v952_v58 = vsel %vm824_vm3, %v642_v45, %v888_v53  ;;  %v645_v60 = vadd.f32 %v1445_v33, %v644_v48 }
 0x11d   : > { %v984_v59 = vsel %vm856_vm4, %v770_v46, %v920_v54  ;;  %v773_v61 = vadd.f32 %v1445_v33, %v772_v52  ;;  %v1254_v62 = vpop.f32.mrb[28].mxu0  ;;  %1016 = vst [vmem:[%s1454_s26 + $0xc0] sm:$0xff] %v952_v58  ;;  %vm859_vm6 = vcmp.gt.f32.partialorder %v781_v57, 0.0  ;;  %v923_v0 = vmul.f32 0.2, %v781_v57 }
 0x11e   : > { %1048 = vst [vmem:[%s1454_s26 + $0x1c0] sm:$0xff] %v984_v59  ;;  %v955_v63 = vsel %vm827_vm5, %v653_v51, %v891_v56  ;;  %v666_v1 = vadd.f32 %v1254_v62, %v1445_v33  ;;  %v1286_v2 = vpop.f32.mrb[28].mxu1  ;;  %v657_v3 = vpop.f32.mrb[29].mxu0  ;;  %vm825_vm7 = vcmp.gt.f32.partialorder %v645_v60, 0.0  ;;  %v889_v4 = vmul.f32 0.2, %v645_v60 }
 0x11f   : > { %1019 = vst [vmem:[%s1454_s26 + $0xd8] sm:$0xff] %v955_v63  ;;  %vm857_vm8 = vcmp.gt.f32.partialorder %v773_v61, 0.0  ;;  %v921_v5 = vmul.f32 0.2, %v773_v61  ;;  %v987_v6 = vsel %vm859_vm6, %v781_v57, %v923_v0  ;;  %v794_v8 = vadd.f32 %v1286_v2, %v1445_v33  ;;  %v785_v9 = vpop.f32.mrb[29].mxu1  ;;  %v1255_v10 = vpop.f32.mrb[30].mxu0 }
 0x120   : > { %vm830_vm9 = vcmp.gt.f32.partialorder %v666_v1, 0.0  ;;  %v894_v7 = vmul.f32 0.2, %v666_v1  ;;  %1051 = vst [vmem:[%s1454_s26 + $0x1d8] sm:$0xff] %v987_v6  ;;  %v953_v11 = vsel %vm825_vm7, %v645_v60, %v889_v4  ;;  %v658_v13 = vadd.f32 %v1445_v33, %v657_v3  ;;  %v1287_v15 = vpop.f32.mrb[30].mxu1  ;;  %v660_v16 = vpop.f32.mrb[31].mxu0 }
 0x121   : > { %v985_v12 = vsel %vm857_vm8, %v773_v61, %v921_v5  ;;  %v786_v14 = vadd.f32 %v1445_v33, %v785_v9  ;;  %1017 = vst [vmem:[%s1454_s26 + $0xc8] sm:$0xff] %v953_v11  ;;  %vm862_vm10 = vcmp.gt.f32.partialorder %v794_v8, 0.0  ;;  %v926_v18 = vmul.f32 0.2, %v794_v8  ;;  %v788_v20 = vpop.f32.mrb[31].mxu1 }
 0x122   : > { %1049 = vst [vmem:[%s1454_s26 + $0x1c8] sm:$0xff] %v985_v12  ;;  %v958_v17 = vsel %vm830_vm9, %v666_v1, %v894_v7  ;;  %v669_v19 = vadd.f32 %v1255_v10, %v1445_v33  ;;  %vm828_vm11 = vcmp.gt.f32.partialorder %v658_v13, 0.0  ;;  %v892_v21 = vmul.f32 0.2, %v658_v13 }
 0x123   : > { %1022 = vst [vmem:[%s1454_s26 + $0xf0] sm:$0xff] %v958_v17  ;;  %vm860_vm12 = vcmp.gt.f32.partialorder %v786_v14, 0.0  ;;  %v924_v22 = vmul.f32 0.2, %v786_v14  ;;  %v990_v23 = vsel %vm862_vm10, %v794_v8, %v926_v18  ;;  %v797_v25 = vadd.f32 %v1287_v15, %v1445_v33 }
 0x124   : > { %vm831_vm13 = vcmp.gt.f32.partialorder %v669_v19, 0.0  ;;  %v895_v24 = vmul.f32 0.2, %v669_v19  ;;  %1054 = vst [vmem:[%s1454_s26 + $0x1f0] sm:$0xff] %v990_v23  ;;  %v956_v26 = vsel %vm828_vm11, %v658_v13, %v892_v21  ;;  %v661_v28 = vadd.f32 %v1445_v33, %v660_v16 }
 0x125   : > { %v988_v27 = vsel %vm860_vm12, %v786_v14, %v924_v22  ;;  %v789_v29 = vadd.f32 %v1445_v33, %v788_v20  ;;  %1020 = vst [vmem:[%s1454_s26 + $0xe0] sm:$0xff] %v956_v26  ;;  %vm863_vm14 = vcmp.gt.f32.partialorder %v797_v25, 0.0  ;;  %v927_v31 = vmul.f32 0.2, %v797_v25 }
 0x126   : > { %1052 = vst [vmem:[%s1454_s26 + $0x1e0] sm:$0xff] %v988_v27  ;;  %v959_v30 = vsel %vm831_vm13, %v669_v19, %v895_v24  ;;  %vm829_vm15 = vcmp.gt.f32.partialorder %v661_v28, 0.0  ;;  %v893_v32 = vmul.f32 0.2, %v661_v28 }
 0x127   : > { %1023 = vst [vmem:[%s1454_s26 + $0xf8] sm:$0xff] %v959_v30  ;;  %vm861_vm0 = vcmp.gt.f32.partialorder %v789_v29, 0.0  ;;  %v925_v34 = vmul.f32 0.2, %v789_v29  ;;  %v991_v35 = vsel %vm863_vm14, %v797_v25, %v927_v31 }
 0x128   : > { %1055 = vst [vmem:[%s1454_s26 + $0x1f8] sm:$0xff] %v991_v35  ;;  %v957_v36 = vsel %vm829_vm15, %v661_v28, %v893_v32 }
 0x129   : > { %v989_v37 = vsel %vm861_vm0, %v789_v29, %v925_v34  ;;  %1021 = vst [vmem:[%s1454_s26 + $0xe8] sm:$0xff] %v957_v36 }
 0x12a   : > { %1053 = vst [vmem:[%s1454_s26 + $0x1e8] sm:$0xff] %v989_v37 }
 0x12b PF: > { %s13_s12 = sadd.s32 1, %s1337_s12  }
 0x12c   : > { %p10_p4 = scmp.ge.s32.totalorder %s13_s12, 6  }
 0x12e   :  { %12 = sbr.rel (!%p10_p4) target bundleno = 1 (0x1), region = 62 }

// kernel: discriminator64_forward.6
= control target key start
LH: loop header
LB: loop body
LE: loop exit
PB: predicated region body
PF: predicated region fallthrough
CT: control target
= control target key end

     0   :  { %v4257_v0 = vmov 0   ;;  %s5584_s1 = inlined_call_operand.vmem [shape: bf16[1024,128], index: 1, kind: input, shape index: {}]   ;;  %s5585_s0 = inlined_call_operand.vmem [shape: bf16[512,1024], index: 0, kind: input, shape index: {}]   ;;  %s5586_s2 = inlined_call_operand.vmem [shape: f32[1,128], index: 2, kind: input, shape index: {}]   ;;  %s5587_s3 = inlined_call_operand.vmem [shape: f32[512,128], index: 3, kind: output, shape index: {}]  }
   0x1   :  { %2070 = vmatprep.subr.bf16.mxu1 %v4257_v0  ;;  %2648 = vmatprep.subr.bf16.mxu0 %v4257_v0  ;;  %v4192_v1 = vld [vmem:[%s5584_s1] sm:$0xff]   ;;  %v4194_v3 = vld [vmem:[%s5584_s1 + $0x8] sm:$0xff]   ;;  %v4196_v5 = vld [vmem:[%s5584_s1 + $0x10] sm:$0xff]  }
   0x2   :  { %v4193_v2 = vld [vmem:[%s5584_s1 + $0x100] sm:$0xff]   ;;  %2071 = vmatpush1.bf16.msra.mxu1 %v4192_v1  ;;  %v4195_v4 = vld [vmem:[%s5584_s1 + $0x108] sm:$0xff]   ;;  %v4197_v6 = vld [vmem:[%s5584_s1 + $0x110] sm:$0xff]  }
   0x3   :  { %2649 = vmatpush1.bf16.msra.mxu0 %v4193_v2  ;;  %2072 = vmatprep.subr.bf16.mxu1 %v4257_v0  ;;  %v4198_v7 = vld [vmem:[%s5584_s1 + $0x18] sm:$0xff]   ;;  %v4200_v9 = vld [vmem:[%s5584_s1 + $0x20] sm:$0xff]   ;;  %v4202_v11 = vld [vmem:[%s5584_s1 + $0x28] sm:$0xff]  }
   0x4   :  { %2650 = vmatprep.subr.bf16.mxu0 %v4257_v0  ;;  %v4199_v8 = vld [vmem:[%s5584_s1 + $0x118] sm:$0xff]   ;;  %v4201_v10 = vld [vmem:[%s5584_s1 + $0x120] sm:$0xff]   ;;  %v4203_v12 = vld [vmem:[%s5584_s1 + $0x128] sm:$0xff]  }
   0x5   :  { %v4204_v13 = vld [vmem:[%s5584_s1 + $0x30] sm:$0xff]   ;;  %v4206_v15 = vld [vmem:[%s5584_s1 + $0x38] sm:$0xff]   ;;  %v4208_v17 = vld [vmem:[%s5584_s1 + $0x40] sm:$0xff]  }
   0x6   :  { %2073 = vmatpush1.bf16.msra.mxu1 %v4194_v3  ;;  %v4205_v14 = vld [vmem:[%s5584_s1 + $0x130] sm:$0xff]   ;;  %v4207_v16 = vld [vmem:[%s5584_s1 + $0x138] sm:$0xff]   ;;  %v4209_v18 = vld [vmem:[%s5584_s1 + $0x140] sm:$0xff]  }
   0x7   :  { %2651 = vmatpush1.bf16.msra.mxu0 %v4195_v4  ;;  %2074 = vmatprep.subr.bf16.mxu1 %v4257_v0  ;;  %v4353_v19 = vld [vmem:[%s5585_s0] sm:$0xff]  ;;  %v4363_v21 = vld [vmem:[%s5585_s0 + $0x10] sm:$0xff]  ;;  %v4210_v24 = vld [vmem:[%s5584_s1 + $0x48] sm:$0xff]  }
   0x8   :  { %2652 = vmatprep.subr.bf16.mxu0 %v4257_v0  ;;  %v4358_v20 = vld [vmem:[%s5585_s0 + $0x20] sm:$0xff]  ;;  %v4370_v23 = vld [vmem:[%s5585_s0 + $0x30] sm:$0xff]  ;;  %v4211_v26 = vld [vmem:[%s5584_s1 + $0x148] sm:$0xff]  }
   0x9   :  { %v3488_v22 = vcombine.high %v4353_v19, %v4358_v20  ;;  %v3492_v25 = vcombine.high %v4363_v21, %v4370_v23  ;;  %v4212_v27 = vld [vmem:[%s5584_s1 + $0x50] sm:$0xff]   ;;  %v4214_v29 = vld [vmem:[%s5584_s1 + $0x58] sm:$0xff]   ;;  %v4216_v31 = vld [vmem:[%s5584_s1 + $0x60] sm:$0xff]   ;;  %v3487_v42 = vcombine.low %v4353_v19, %v4358_v20  ;;  %v3491_v44 = vcombine.low %v4363_v21, %v4370_v23 }
   0xa   :  { %2075 = vmatpush1.bf16.msra.mxu1 %v4196_v5  ;;  %v4213_v28 = vld [vmem:[%s5584_s1 + $0x150] sm:$0xff]   ;;  %v4215_v30 = vld [vmem:[%s5584_s1 + $0x158] sm:$0xff]   ;;  %v4217_v32 = vld [vmem:[%s5584_s1 + $0x160] sm:$0xff]  }
   0xb   :  { %2653 = vmatpush1.bf16.msra.mxu0 %v4197_v6  ;;  %2076 = vmatprep.subr.bf16.mxu1 %v4257_v0  ;;  %v4218_v33 = vld [vmem:[%s5584_s1 + $0x68] sm:$0xff]   ;;  %v4220_v35 = vld [vmem:[%s5584_s1 + $0x70] sm:$0xff]   ;;  %v4222_v37 = vld [vmem:[%s5584_s1 + $0x78] sm:$0xff]  }
   0xc   :  { %2654 = vmatprep.subr.bf16.mxu0 %v4257_v0  ;;  %2102 = vmatprep.mubr.bf16.mxu1 %v3488_v22  ;;  %v4219_v34 = vld [vmem:[%s5584_s1 + $0x168] sm:$0xff]   ;;  %v4221_v36 = vld [vmem:[%s5584_s1 + $0x170] sm:$0xff]   ;;  %v4223_v38 = vld [vmem:[%s5584_s1 + $0x178] sm:$0xff]  }
   0xd   :  { %2680 = vmatprep.mubr.bf16.mxu0 %v3492_v25  ;;  %v23_v39 = vld [vmem:[%s5585_s0 + $0x40] sm:$0xff]  ;;  %v25_v41 = vld [vmem:[%s5585_s0 + $0x50] sm:$0xff]  ;;  %v4226_v51 = vld [vmem:[%s5584_s1 + $0x88] sm:$0xff]  }
   0xe   :  { %2077 = vmatpush1.bf16.msra.mxu1 %v4198_v7  ;;  %v27_v40 = vld [vmem:[%s5585_s0 + $0x60] sm:$0xff]  ;;  %v29_v43 = vld [vmem:[%s5585_s0 + $0x70] sm:$0xff]  ;;  %v4227_v52 = vld [vmem:[%s5584_s1 + $0x188] sm:$0xff]  }
   0xf   :  { %2655 = vmatpush1.bf16.msra.mxu0 %v4199_v8  ;;  %2078 = vmatprep.subr.bf16.mxu1 %v4257_v0  ;;  %v4224_v45 = vld [vmem:[%s5584_s1 + $0x80] sm:$0xff]   ;;  %v3496_v47 = vcombine.high %v23_v39, %v27_v40  ;;  %v3500_v48 = vcombine.high %v25_v41, %v29_v43  ;;  %v33_v53 = vld [vmem:[%s5585_s0 + $0x90] sm:$0xff]  ;;  %v3495_v55 = vcombine.low %v23_v39, %v27_v40  ;;  %v4230_v2 = vld [vmem:[%s5584_s1 + $0x98] sm:$0xff]  }
  0x10   :  { %2656 = vmatprep.subr.bf16.mxu0 %v4257_v0  ;;  %v4225_v46 = vld [vmem:[%s5584_s1 + $0x180] sm:$0xff]   ;;  %v37_v54 = vld [vmem:[%s5585_s0 + $0xb0] sm:$0xff]  ;;  %v3499_v56 = vcombine.low %v25_v41, %v29_v43  ;;  %v4231_v3 = vld [vmem:[%s5584_s1 + $0x198] sm:$0xff]  }
  0x11   :  { %v31_v49 = vld [vmem:[%s5585_s0 + $0x80] sm:$0xff]  ;;  %v3508_v58 = vcombine.high %v33_v53, %v37_v54  ;;  %v4228_v59 = vld [vmem:[%s5584_s1 + $0x90] sm:$0xff]   ;;  %v3507_v6 = vcombine.low %v33_v53, %v37_v54  ;;  %v4243_v39 = vld [vmem:[%s5584_s1 + $0x1c8] sm:$0xff]  }
  0x12   :  { %2079 = vmatpush1.bf16.msra.mxu1 %v4200_v9  ;;  %v35_v50 = vld [vmem:[%s5585_s0 + $0xa0] sm:$0xff]  ;;  %v4229_v60 = vld [vmem:[%s5584_s1 + $0x190] sm:$0xff]   ;;  %v4246_v54 = vld [vmem:[%s5584_s1 + $0xd8] sm:$0xff]  }
  0x13   :  { %2657 = vmatpush1.bf16.msra.mxu0 %v4201_v10  ;;  %2080 = vmatprep.subr.bf16.mxu1 %v4257_v0  ;;  %v3504_v57 = vcombine.high %v31_v49, %v35_v50  ;;  %v39_v61 = vld [vmem:[%s5585_s0 + $0xc0] sm:$0xff]  ;;  %v41_v63 = vld [vmem:[%s5585_s0 + $0xd0] sm:$0xff]  ;;  %v3503_v4 = vcombine.low %v31_v49, %v35_v50 }
  0x14   :  { %2658 = vmatprep.subr.bf16.mxu0 %v4257_v0  ;;  %v43_v62 = vld [vmem:[%s5585_s0 + $0xe0] sm:$0xff]  ;;  %v45_v1 = vld [vmem:[%s5585_s0 + $0xf0] sm:$0xff] }
  0x15   :  { %v4232_v5 = vld [vmem:[%s5584_s1 + $0xa0] sm:$0xff]   ;;  %v3512_v7 = vcombine.high %v39_v61, %v43_v62  ;;  %v3516_v9 = vcombine.high %v41_v63, %v45_v1  ;;  %v4236_v20 = vld [vmem:[%s5584_s1 + $0xb0] sm:$0xff]  }
  0x16   :  { %2081 = vmatpush1.bf16.msra.mxu1 %v4202_v11  ;;  %v4233_v8 = vld [vmem:[%s5584_s1 + $0x1a0] sm:$0xff]   ;;  %v4237_v21 = vld [vmem:[%s5584_s1 + $0x1b0] sm:$0xff]  }
  0x17   :  { %2659 = vmatpush1.bf16.msra.mxu0 %v4203_v12  ;;  %2082 = vmatprep.subr.bf16.mxu1 %v4257_v0  ;;  %v47_v10 = vld [vmem:[%s5585_s0 + $0x100] sm:$0xff]  ;;  %v49_v12 = vld [vmem:[%s5585_s0 + $0x110] sm:$0xff] }
  0x18   :  { %2660 = vmatprep.subr.bf16.mxu0 %v4257_v0  ;;  %v51_v11 = vld [vmem:[%s5585_s0 + $0x120] sm:$0xff]  ;;  %v57_v25 = vld [vmem:[%s5585_s0 + $0x150] sm:$0xff] }
  0x19   :  { %v55_v22 = vld [vmem:[%s5585_s0 + $0x140] sm:$0xff]  ;;  %v77_v49 = vld [vmem:[%s5585_s0 + $0x1f0] sm:$0xff] }
  0x1a   :  { %2083 = vmatpush1.bf16.msra.mxu1 %v4204_v13  ;;  %v53_v13 = vld [vmem:[%s5585_s0 + $0x130] sm:$0xff]  ;;  %v59_v23 = vld [vmem:[%s5585_s0 + $0x160] sm:$0xff] }
  0x1b   :  { %2661 = vmatpush1.bf16.msra.mxu0 %v4205_v14  ;;  %2084 = vmatprep.subr.bf16.mxu1 %v4257_v0  ;;  %v4234_v14 = vld [vmem:[%s5584_s1 + $0xa8] sm:$0xff]   ;;  %v3524_v19 = vcombine.high %v49_v12, %v53_v13  ;;  %v3527_v40 = vcombine.low %v55_v22, %v59_v23 }
  0x1c   :  { %2662 = vmatprep.subr.bf16.mxu0 %v4257_v0 }
  0x1e   :  { %2085 = vmatpush1.bf16.msra.mxu1 %v4206_v15  ;;  %v4235_v15 = vld [vmem:[%s5584_s1 + $0x1a8] sm:$0xff]  }
  0x1f   :  { %2663 = vmatpush1.bf16.msra.mxu0 %v4207_v16  ;;  %2086 = vmatprep.subr.bf16.mxu1 %v4257_v0  ;;  %v3511_v16 = vcombine.low %v39_v61, %v43_v62 }
  0x20   :  { %2664 = vmatprep.subr.bf16.mxu0 %v4257_v0 }
  0x22   :  { %2087 = vmatpush1.bf16.msra.mxu1 %v4208_v17  ;;  %v3515_v17 = vcombine.low %v41_v63, %v45_v1  ;;  %v87_v1 = vld [vmem:[%s5585_s0 + $0x240] sm:$0xff] }
  0x23   :  { %2665 = vmatpush1.bf16.msra.mxu0 %v4209_v18  ;;  %2088 = vmatprep.subr.bf16.mxu1 %v4257_v0  ;;  %v3520_v18 = vcombine.high %v47_v10, %v51_v11 }
  0x24   :  { %2666 = vmatprep.subr.bf16.mxu0 %v4257_v0 }
  0x26   :  { %2089 = vmatpush1.bf16.msra.mxu1 %v4210_v24  ;;  %v4238_v24 = vld [vmem:[%s5584_s1 + $0xb8] sm:$0xff]  }
  0x27   :  { %2667 = vmatpush1.bf16.msra.mxu0 %v4211_v26  ;;  %2090 = vmatprep.subr.bf16.mxu1 %v4257_v0  ;;  %v61_v26 = vld [vmem:[%s5585_s0 + $0x170] sm:$0xff] }
  0x28   :  { %2668 = vmatprep.subr.bf16.mxu0 %v4257_v0  ;;  %v3531_v41 = vcombine.low %v57_v25, %v61_v26 }
  0x2a   :  { %2091 = vmatpush1.bf16.msra.mxu1 %v4212_v27  ;;  %v4239_v27 = vld [vmem:[%s5584_s1 + $0x1b8] sm:$0xff]  }
  0x2b   :  { %2669 = vmatpush1.bf16.msra.mxu0 %v4213_v28  ;;  %2092 = vmatprep.subr.bf16.mxu1 %v4257_v0  ;;  %v3519_v28 = vcombine.low %v47_v10, %v51_v11  ;;  %v4249_v10 = vld [vmem:[%s5584_s1 + $0x1e0] sm:$0xff]  }
  0x2c   :  { %2670 = vmatprep.subr.bf16.mxu0 %v4257_v0  ;;  %v95_v11 = vld [vmem:[%s5585_s0 + $0x280] sm:$0xff] }
  0x2e   :  { %2093 = vmatpush1.bf16.msra.mxu1 %v4214_v29  ;;  %v3523_v29 = vcombine.low %v49_v12, %v53_v13  ;;  %v99_v12 = vld [vmem:[%s5585_s0 + $0x2a0] sm:$0xff]  ;;  %v97_v13 = vld [vmem:[%s5585_s0 + $0x290] sm:$0xff] }
  0x2f   :  { %2671 = vmatpush1.bf16.msra.mxu0 %v4215_v30  ;;  %2094 = vmatprep.subr.bf16.mxu1 %v4257_v0  ;;  %v3528_v30 = vcombine.high %v55_v22, %v59_v23  ;;  %v109_v22 = vld [vmem:[%s5585_s0 + $0x2f0] sm:$0xff]  ;;  %v3567_v23 = vcombine.low %v95_v11, %v99_v12 }
  0x30   :  { %2672 = vmatprep.subr.bf16.mxu0 %v4257_v0 }
  0x32   :  { %2095 = vmatpush1.bf16.msra.mxu1 %v4216_v31  ;;  %v3532_v31 = vcombine.high %v57_v25, %v61_v26 }
  0x33   :  { %2673 = vmatpush1.bf16.msra.mxu0 %v4217_v32  ;;  %2096 = vmatprep.subr.bf16.mxu1 %v4257_v0  ;;  %v4240_v32 = vld [vmem:[%s5584_s1 + $0xc0] sm:$0xff]  }
  0x34   :  { %2674 = vmatprep.subr.bf16.mxu0 %v4257_v0 }
  0x36   :  { %2097 = vmatpush1.bf16.msra.mxu1 %v4218_v33  ;;  %v4241_v33 = vld [vmem:[%s5584_s1 + $0x1c0] sm:$0xff]  }
  0x37   :  { %2675 = vmatpush1.bf16.msra.mxu0 %v4219_v34  ;;  %2098 = vmatprep.subr.bf16.mxu1 %v4257_v0  ;;  %v63_v34 = vld [vmem:[%s5585_s0 + $0x180] sm:$0xff] }
  0x38   :  { %2676 = vmatprep.subr.bf16.mxu0 %v4257_v0 }
  0x3a   :  { %2099 = vmatpush1.bf16.msra.mxu1 %v4220_v35  ;;  %v67_v35 = vld [vmem:[%s5585_s0 + $0x1a0] sm:$0xff] }
  0x3b   :  { %2677 = vmatpush1.bf16.msra.mxu0 %v4221_v36  ;;  %2100 = vmatprep.subr.bf16.mxu1 %v4257_v0  ;;  %v4242_v36 = vld [vmem:[%s5584_s1 + $0xc8] sm:$0xff]   ;;  %v3535_v50 = vcombine.low %v63_v34, %v67_v35 }
  0x3c   :  { %2678 = vmatprep.subr.bf16.mxu0 %v4257_v0 }
  0x3e   :  { %2101 = vmatpush1.bf16.msra.mxu1 %v4222_v37  ;;  %v65_v37 = vld [vmem:[%s5585_s0 + $0x190] sm:$0xff] }
  0x3f   :  { %2679 = vmatpush1.bf16.msra.mxu0 %v4223_v38  ;;  %2359 = vmatprep.subr.bf16.mxu1 %v4257_v0  ;;  %v69_v38 = vld [vmem:[%s5585_s0 + $0x1b0] sm:$0xff] }
  0x40   :  { %2937 = vmatprep.subr.bf16.mxu0 %v4257_v0  ;;  %v3540_v43 = vcombine.high %v65_v37, %v69_v38 }
  0x41   :  { %2103 = vmatmul.mubr.bf16.vlgmr.msra.gmra.mrb[0].mxu1 %v3487_v42  ;;  %v3536_v42 = vcombine.high %v63_v34, %v67_v35 }
  0x42   :  { %2681 = vmatmul.mubr.bf16.vlgmr.msra.gmra.mrb[0].mxu0 %v3491_v44  ;;  %2360 = vmatpush1.bf16.msra.mxu1 %v4224_v45  ;;  %v4244_v44 = vld [vmem:[%s5584_s1 + $0xd0] sm:$0xff]  }
  0x43   :  { %2938 = vmatpush1.bf16.msra.mxu0 %v4225_v46  ;;  %2110 = vmatprep.mubr.bf16.mxu1 %v3496_v47  ;;  %v4245_v45 = vld [vmem:[%s5584_s1 + $0x1d0] sm:$0xff]   ;;  %v71_v46 = vld [vmem:[%s5585_s0 + $0x1c0] sm:$0xff] }
  0x44   :  { %2688 = vmatprep.mubr.bf16.mxu0 %v3500_v48  ;;  %2361 = vmatprep.subr.bf16.mxu1 %v4257_v0  ;;  %v75_v47 = vld [vmem:[%s5585_s0 + $0x1e0] sm:$0xff]  ;;  %v73_v48 = vld [vmem:[%s5585_s0 + $0x1d0] sm:$0xff] }
  0x45   :  { %2939 = vmatprep.subr.bf16.mxu0 %v4257_v0  ;;  %v3548_v53 = vcombine.high %v73_v48, %v77_v49  ;;  %v3547_v61 = vcombine.low %v73_v48, %v77_v49  ;;  %v131_v48 = vld [vmem:[%s5585_s0 + $0x3a0] sm:$0xff]  ;;  %v129_v49 = vld [vmem:[%s5585_s0 + $0x390] sm:$0xff] }
  0x46   :  { %2362 = vmatpush1.bf16.msra.mxu1 %v4226_v51  ;;  %v3539_v51 = vcombine.low %v65_v37, %v69_v38  ;;  %v119_v37 = vld [vmem:[%s5585_s0 + $0x340] sm:$0xff] }
  0x47   :  { %2940 = vmatpush1.bf16.msra.mxu0 %v4227_v52  ;;  %2363 = vmatprep.subr.bf16.mxu1 %v4257_v0  ;;  %v3544_v52 = vcombine.high %v71_v46, %v75_v47  ;;  %v123_v38 = vld [vmem:[%s5585_s0 + $0x360] sm:$0xff] }
  0x48   :  { %2941 = vmatprep.subr.bf16.mxu0 %v4257_v0 }
  0x49   :  { %2111 = vmatmul.mubr.bf16.gmra.mrb[4].mxu1 %v3495_v55  ;;  %v4247_v55 = vld [vmem:[%s5584_s1 + $0x1d8] sm:$0xff]  }
  0x4a   :  { %2689 = vmatmul.mubr.bf16.gmra.mrb[4].mxu0 %v3499_v56  ;;  %2118 = vmatprep.mubr.bf16.mxu1 %v3504_v57  ;;  %v79_v56 = vld [vmem:[%s5585_s0 + $0x200] sm:$0xff] }
  0x4b   :  { %2696 = vmatprep.mubr.bf16.mxu0 %v3508_v58  ;;  %2364 = vmatpush1.bf16.msra.mxu1 %v4228_v59  ;;  %v83_v57 = vld [vmem:[%s5585_s0 + $0x220] sm:$0xff]  ;;  %v81_v58 = vld [vmem:[%s5585_s0 + $0x210] sm:$0xff] }
  0x4c   :  { %2942 = vmatpush1.bf16.msra.mxu0 %v4229_v60  ;;  %2365 = vmatprep.subr.bf16.mxu1 %v4257_v0  ;;  %v85_v59 = vld [vmem:[%s5585_s0 + $0x230] sm:$0xff]  ;;  %v3543_v60 = vcombine.low %v71_v46, %v75_v47  ;;  %v3552_v62 = vcombine.high %v79_v56, %v83_v57  ;;  %v127_v47 = vld [vmem:[%s5585_s0 + $0x380] sm:$0xff] }
  0x4d   :  { %2943 = vmatprep.subr.bf16.mxu0 %v4257_v0  ;;  %v3556_v63 = vcombine.high %v81_v58, %v85_v59  ;;  %v4253_v46 = vld [vmem:[%s5584_s1 + $0x1f0] sm:$0xff]  }
  0x4f   :  { %2366 = vmatpush1.bf16.msra.mxu1 %v4230_v2  ;;  %v91_v2 = vld [vmem:[%s5585_s0 + $0x260] sm:$0xff] }
  0x50   :  { %2944 = vmatpush1.bf16.msra.mxu0 %v4231_v3  ;;  %2367 = vmatprep.subr.bf16.mxu1 %v4257_v0  ;;  %v89_v3 = vld [vmem:[%s5585_s0 + $0x250] sm:$0xff] }
  0x51   :  { %2119 = vmatmul.mubr.bf16.gmra.mrb[8].mxu1 %v3503_v4  ;;  %2945 = vmatprep.subr.bf16.mxu0 %v4257_v0  ;;  %v93_v4 = vld [vmem:[%s5585_s0 + $0x270] sm:$0xff] }
  0x52   :  { %2697 = vmatmul.mubr.bf16.gmra.mrb[8].mxu0 %v3507_v6  ;;  %2126 = vmatprep.mubr.bf16.mxu1 %v3512_v7  ;;  %v3555_v6 = vcombine.low %v81_v58, %v85_v59  ;;  %v3560_v7 = vcombine.high %v87_v1, %v91_v2  ;;  %v3599_v58 = vcombine.low %v127_v47, %v131_v48 }
  0x53   :  { %2704 = vmatprep.mubr.bf16.mxu0 %v3516_v9  ;;  %2368 = vmatpush1.bf16.msra.mxu1 %v4232_v5  ;;  %v3551_v5 = vcombine.low %v79_v56, %v83_v57  ;;  %v4248_v9 = vld [vmem:[%s5584_s1 + $0xe0] sm:$0xff]   ;;  %v137_v57 = vld [vmem:[%s5585_s0 + $0x3d0] sm:$0xff] }
  0x54   :  { %2946 = vmatpush1.bf16.msra.mxu0 %v4233_v8  ;;  %2369 = vmatprep.subr.bf16.mxu1 %v4257_v0  ;;  %v3564_v8 = vcombine.high %v89_v3, %v93_v4  ;;  %v139_v56 = vld [vmem:[%s5585_s0 + $0x3e0] sm:$0xff] }
  0x55   :  { %2947 = vmatprep.subr.bf16.mxu0 %v4257_v0 }
  0x57   :  { %2370 = vmatpush1.bf16.msra.mxu1 %v4234_v14  ;;  %v101_v14 = vld [vmem:[%s5585_s0 + $0x2b0] sm:$0xff] }
  0x58   :  { %2948 = vmatpush1.bf16.msra.mxu0 %v4235_v15  ;;  %2371 = vmatprep.subr.bf16.mxu1 %v4257_v0  ;;  %v3559_v15 = vcombine.low %v87_v1, %v91_v2  ;;  %v143_v1 = vld [vmem:[%s5585_s0 + $0x400] sm:$0xff] }
  0x59   :  { %2127 = vmatmul.mubr.bf16.gmra.mrb[12].mxu1 %v3511_v16  ;;  %2949 = vmatprep.subr.bf16.mxu0 %v4257_v0  ;;  %v3563_v16 = vcombine.low %v89_v3, %v93_v4  ;;  %v147_v2 = vld [vmem:[%s5585_s0 + $0x420] sm:$0xff]  ;;  %v145_v3 = vld [vmem:[%s5585_s0 + $0x410] sm:$0xff] }
  0x5a   :  { %2705 = vmatmul.mubr.bf16.gmra.mrb[12].mxu0 %v3515_v17  ;;  %2134 = vmatprep.mubr.bf16.mxu1 %v3520_v18  ;;  %v3568_v17 = vcombine.high %v95_v11, %v99_v12  ;;  %v3572_v18 = vcombine.high %v97_v13, %v101_v14  ;;  %v149_v4 = vld [vmem:[%s5585_s0 + $0x430] sm:$0xff] }
  0x5b   :  { %2712 = vmatprep.mubr.bf16.mxu0 %v3524_v19  ;;  %2372 = vmatpush1.bf16.msra.mxu1 %v4236_v20  ;;  %v103_v19 = vld [vmem:[%s5585_s0 + $0x2c0] sm:$0xff]  ;;  %v153_v11 = vld [vmem:[%s5585_s0 + $0x450] sm:$0xff] }
  0x5c   :  { %2950 = vmatpush1.bf16.msra.mxu0 %v4237_v21  ;;  %2373 = vmatprep.subr.bf16.mxu1 %v4257_v0  ;;  %v107_v20 = vld [vmem:[%s5585_s0 + $0x2e0] sm:$0xff]  ;;  %v105_v21 = vld [vmem:[%s5585_s0 + $0x2d0] sm:$0xff] }
  0x5d   :  { %2951 = vmatprep.subr.bf16.mxu0 %v4257_v0  ;;  %v3576_v25 = vcombine.high %v103_v19, %v107_v20  ;;  %v3580_v26 = vcombine.high %v105_v21, %v109_v22  ;;  %v3579_v34 = vcombine.low %v105_v21, %v109_v22  ;;  %v157_v12 = vld [vmem:[%s5585_s0 + $0x470] sm:$0xff] }
  0x5e   :  { %v3627_v22 = vcombine.low %v153_v11, %v157_v12 }
  0x5f   :  { %2374 = vmatpush1.bf16.msra.mxu1 %v4238_v24  ;;  %v3571_v24 = vcombine.low %v97_v13, %v101_v14  ;;  %v3615_v13 = vcombine.low %v143_v1, %v147_v2  ;;  %v3619_v14 = vcombine.low %v145_v3, %v149_v4 }
  0x60   :  { %2952 = vmatpush1.bf16.msra.mxu0 %v4239_v27  ;;  %2375 = vmatprep.subr.bf16.mxu1 %v4257_v0  ;;  %v4250_v27 = vld [vmem:[%s5584_s1 + $0xe8] sm:$0xff]  }
  0x61   :  { %2135 = vmatmul.mubr.bf16.gmra.mrb[16].mxu1 %v3519_v28  ;;  %2953 = vmatprep.subr.bf16.mxu0 %v4257_v0  ;;  %v4251_v28 = vld [vmem:[%s5584_s1 + $0x1e8] sm:$0xff]  }
  0x62   :  { %2713 = vmatmul.mubr.bf16.gmra.mrb[16].mxu0 %v3523_v29  ;;  %2142 = vmatprep.mubr.bf16.mxu1 %v3528_v30  ;;  %v111_v29 = vld [vmem:[%s5585_s0 + $0x300] sm:$0xff] }
  0x63   :  { %2720 = vmatprep.mubr.bf16.mxu0 %v3532_v31  ;;  %2376 = vmatpush1.bf16.msra.mxu1 %v4240_v32  ;;  %v115_v30 = vld [vmem:[%s5585_s0 + $0x320] sm:$0xff]  ;;  %v113_v31 = vld [vmem:[%s5585_s0 + $0x310] sm:$0xff] }
  0x64   :  { %2954 = vmatpush1.bf16.msra.mxu0 %v4241_v33  ;;  %2377 = vmatprep.subr.bf16.mxu1 %v4257_v0  ;;  %v117_v32 = vld [vmem:[%s5585_s0 + $0x330] sm:$0xff]  ;;  %v3575_v33 = vcombine.low %v103_v19, %v107_v20  ;;  %v3584_v35 = vcombine.high %v111_v29, %v115_v30 }
  0x65   :  { %2955 = vmatprep.subr.bf16.mxu0 %v4257_v0  ;;  %v161_v19 = vld [vmem:[%s5585_s0 + $0x490] sm:$0xff] }
  0x66   :  { %v165_v20 = vld [vmem:[%s5585_s0 + $0x4b0] sm:$0xff] }
  0x67   :  { %2378 = vmatpush1.bf16.msra.mxu1 %v4242_v36  ;;  %v3588_v36 = vcombine.high %v113_v31, %v117_v32 }
  0x68   :  { %2956 = vmatpush1.bf16.msra.mxu0 %v4243_v39  ;;  %2379 = vmatprep.subr.bf16.mxu1 %v4257_v0  ;;  %v121_v39 = vld [vmem:[%s5585_s0 + $0x350] sm:$0xff] }
  0x69   :  { %2143 = vmatmul.mubr.bf16.gmra.mrb[20].mxu1 %v3527_v40  ;;  %2957 = vmatprep.subr.bf16.mxu0 %v4257_v0  ;;  %v125_v40 = vld [vmem:[%s5585_s0 + $0x370] sm:$0xff] }
  0x6a   :  { %2721 = vmatmul.mubr.bf16.gmra.mrb[20].mxu0 %v3531_v41  ;;  %2150 = vmatprep.mubr.bf16.mxu1 %v3536_v42  ;;  %v3583_v41 = vcombine.low %v111_v29, %v115_v30  ;;  %v3587_v42 = vcombine.low %v113_v31, %v117_v32  ;;  %v3635_v30 = vcombine.low %v161_v19, %v165_v20 }
  0x6b   :  { %2728 = vmatprep.mubr.bf16.mxu0 %v3540_v43  ;;  %2380 = vmatpush1.bf16.msra.mxu1 %v4244_v44  ;;  %v3592_v43 = vcombine.high %v119_v37, %v123_v38  ;;  %v3596_v44 = vcombine.high %v121_v39, %v125_v40 }
  0x6c   :  { %2958 = vmatpush1.bf16.msra.mxu0 %v4245_v45  ;;  %2381 = vmatprep.subr.bf16.mxu1 %v4257_v0  ;;  %v4252_v45 = vld [vmem:[%s5584_s1 + $0xf0] sm:$0xff]  }
  0x6d   :  { %2959 = vmatprep.subr.bf16.mxu0 %v4257_v0 }
  0x6f   :  { %2382 = vmatpush1.bf16.msra.mxu1 %v4246_v54 }
  0x70   :  { %2960 = vmatpush1.bf16.msra.mxu0 %v4247_v55  ;;  %2383 = vmatprep.subr.bf16.mxu1 %v4257_v0  ;;  %v135_v55 = vld [vmem:[%s5585_s0 + $0x3c0] sm:$0xff] }
  0x71   :  { %2151 = vmatmul.mubr.bf16.gmra.mrb[24].mxu1 %v3535_v50  ;;  %2961 = vmatprep.subr.bf16.mxu0 %v4257_v0  ;;  %v133_v50 = vld [vmem:[%s5585_s0 + $0x3b0] sm:$0xff] }
  0x72   :  { %2729 = vmatmul.mubr.bf16.gmra.mrb[24].mxu0 %v3539_v51  ;;  %2158 = vmatprep.mubr.bf16.mxu1 %v3544_v52  ;;  %v3591_v51 = vcombine.low %v119_v37, %v123_v38  ;;  %v3595_v52 = vcombine.low %v121_v39, %v125_v40  ;;  %v3604_v54 = vcombine.high %v129_v49, %v133_v50 }
  0x73   :  { %2736 = vmatprep.mubr.bf16.mxu0 %v3548_v53  ;;  %2384 = vmatpush1.bf16.msra.mxu1 %v4248_v9  ;;  %v3600_v53 = vcombine.high %v127_v47, %v131_v48  ;;  %v3603_v59 = vcombine.low %v129_v49, %v133_v50  ;;  %v151_v9 = vld [vmem:[%s5585_s0 + $0x440] sm:$0xff] }
  0x74   :  { %2962 = vmatpush1.bf16.msra.mxu0 %v4249_v10  ;;  %2385 = vmatprep.subr.bf16.mxu1 %v4257_v0  ;;  %v155_v10 = vld [vmem:[%s5585_s0 + $0x460] sm:$0xff] }
  0x75   :  { %2963 = vmatprep.subr.bf16.mxu0 %v4257_v0  ;;  %v3623_v21 = vcombine.low %v151_v9, %v155_v10  ;;  %v191_v49 = vld [vmem:[%s5585_s0 + $0x580] sm:$0xff] }
  0x76   :  { %v195_v50 = vld [vmem:[%s5585_s0 + $0x5a0] sm:$0xff] }
  0x77   :  { %2386 = vmatpush1.bf16.msra.mxu1 %v4250_v27  ;;  %v169_v27 = vld [vmem:[%s5585_s0 + $0x4d0] sm:$0xff] }
  0x78   :  { %2964 = vmatpush1.bf16.msra.mxu0 %v4251_v28  ;;  %2387 = vmatprep.subr.bf16.mxu1 %v4257_v0  ;;  %v173_v28 = vld [vmem:[%s5585_s0 + $0x4f0] sm:$0xff] }
  0x79   :  { %2159 = vmatmul.mubr.bf16.gmra.mrb[28].mxu1 %v3543_v60  ;;  %2965 = vmatprep.subr.bf16.mxu0 %v4257_v0  ;;  %v3608_v60 = vcombine.high %v135_v55, %v139_v56  ;;  %v3644_v32 = vcombine.high %v169_v27, %v173_v28  ;;  %v3643_v38 = vcombine.low %v169_v27, %v173_v28  ;;  %v233_v27 = vld [vmem:[%s5585_s0 + $0x6d0] sm:$0xff] }
  0x7a   :  { %2737 = vmatmul.mubr.bf16.gmra.mrb[28].mxu0 %v3547_v61  ;;  %2166 = vmatprep.mubr.bf16.mxu1 %v3552_v62  ;;  %v4254_v62 = vld [vmem:[%s5584_s1 + $0xf8] sm:$0xff]   ;;  %v237_v28 = vld [vmem:[%s5585_s0 + $0x6f0] sm:$0xff] }
  0x7b   :  { %2744 = vmatprep.mubr.bf16.mxu0 %v3556_v63  ;;  %2388 = vmatpush1.bf16.msra.mxu1 %v4252_v45  ;;  %v4255_v63 = vld [vmem:[%s5584_s1 + $0x1f8] sm:$0xff]  }
  0x7c   :  { %2966 = vmatpush1.bf16.msra.mxu0 %v4253_v46  ;;  %2389 = vmatprep.subr.bf16.mxu1 %v4257_v0 }
  0x7d   :  { %2967 = vmatprep.subr.bf16.mxu0 %v4257_v0  ;;  %v141_v0 = vld [vmem:[%s5585_s0 + $0x3f0] sm:$0xff] }
  0x7e   :  { %v3612_v61 = vcombine.high %v137_v57, %v141_v0 }
  0x7f   :  { %2390 = vmatpush1.bf16.msra.mxu1 %v4254_v62 }
  0x80   :  { %2968 = vmatpush1.bf16.msra.mxu0 %v4255_v63 }
  0x81   :  { %2167 = vmatmul.mubr.bf16.gmra.mrb[32].mxu1 %v3551_v5  ;;  %v3607_v5 = vcombine.low %v135_v55, %v139_v56  ;;  %v3664_v55 = vcombine.high %v191_v49, %v195_v50 }
  0x82   :  { %2745 = vmatmul.mubr.bf16.gmra.mrb[32].mxu0 %v3555_v6  ;;  %2174 = vmatprep.mubr.bf16.mxu1 %v3560_v7  ;;  %v3611_v6 = vcombine.low %v137_v57, %v141_v0  ;;  %v3616_v7 = vcombine.high %v143_v1, %v147_v2  ;;  %v199_v57 = vld [vmem:[%s5585_s0 + $0x5c0] sm:$0xff] }
  0x83   :  { %2752 = vmatprep.mubr.bf16.mxu0 %v3564_v8  ;;  %v3620_v8 = vcombine.high %v145_v3, %v149_v4  ;;  %v203_v0 = vld [vmem:[%s5585_s0 + $0x5e0] sm:$0xff]  ;;  %v209_v3 = vld [vmem:[%s5585_s0 + $0x610] sm:$0xff] }
  0x84   :  { %v3672_v62 = vcombine.high %v199_v57, %v203_v0  ;;  %v207_v1 = vld [vmem:[%s5585_s0 + $0x600] sm:$0xff]  ;;  %v213_v4 = vld [vmem:[%s5585_s0 + $0x630] sm:$0xff] }
  0x85   :  { %v211_v2 = vld [vmem:[%s5585_s0 + $0x620] sm:$0xff] }
  0x89   :  { %2175 = vmatmul.mubr.bf16.gmra.mrb[36].mxu1 %v3559_v15  ;;  %v3624_v15 = vcombine.high %v151_v9, %v155_v10  ;;  %v215_v9 = vld [vmem:[%s5585_s0 + $0x640] sm:$0xff] }
  0x8a   :  { %2753 = vmatmul.mubr.bf16.gmra.mrb[36].mxu0 %v3563_v16  ;;  %2182 = vmatprep.mubr.bf16.mxu1 %v3568_v17  ;;  %v3628_v16 = vcombine.high %v153_v11, %v157_v12  ;;  %v159_v17 = vld [vmem:[%s5585_s0 + $0x480] sm:$0xff]  ;;  %v217_v11 = vld [vmem:[%s5585_s0 + $0x650] sm:$0xff] }
  0x8b   :  { %2760 = vmatprep.mubr.bf16.mxu0 %v3572_v18  ;;  %v163_v18 = vld [vmem:[%s5585_s0 + $0x4a0] sm:$0xff]  ;;  %v221_v12 = vld [vmem:[%s5585_s0 + $0x670] sm:$0xff] }
  0x8c   :  { %v3631_v29 = vcombine.low %v159_v17, %v163_v18  ;;  %v219_v10 = vld [vmem:[%s5585_s0 + $0x660] sm:$0xff] }
  0x91   :  { %2183 = vmatmul.mubr.bf16.gmra.mrb[40].mxu1 %v3567_v23  ;;  %v3632_v23 = vcombine.high %v159_v17, %v163_v18  ;;  %v223_v17 = vld [vmem:[%s5585_s0 + $0x680] sm:$0xff] }
  0x92   :  { %2761 = vmatmul.mubr.bf16.gmra.mrb[40].mxu0 %v3571_v24  ;;  %2190 = vmatprep.mubr.bf16.mxu1 %v3576_v25  ;;  %v3636_v24 = vcombine.high %v161_v19, %v165_v20  ;;  %v167_v25 = vld [vmem:[%s5585_s0 + $0x4c0] sm:$0xff]  ;;  %v225_v19 = vld [vmem:[%s5585_s0 + $0x690] sm:$0xff] }
  0x93   :  { %2768 = vmatprep.mubr.bf16.mxu0 %v3580_v26  ;;  %v171_v26 = vld [vmem:[%s5585_s0 + $0x4e0] sm:$0xff]  ;;  %v229_v20 = vld [vmem:[%s5585_s0 + $0x6b0] sm:$0xff] }
  0x94   :  { %v3640_v31 = vcombine.high %v167_v25, %v171_v26  ;;  %v3639_v37 = vcombine.low %v167_v25, %v171_v26  ;;  %v227_v18 = vld [vmem:[%s5585_s0 + $0x6a0] sm:$0xff] }
  0x95   :  { %v231_v25 = vld [vmem:[%s5585_s0 + $0x6c0] sm:$0xff] }
  0x96   :  { %v235_v26 = vld [vmem:[%s5585_s0 + $0x6e0] sm:$0xff] }
  0x99   :  { %2191 = vmatmul.mubr.bf16.gmra.mrb[44].mxu1 %v3575_v33  ;;  %v175_v33 = vld [vmem:[%s5585_s0 + $0x500] sm:$0xff] }
  0x9a   :  { %2769 = vmatmul.mubr.bf16.gmra.mrb[44].mxu0 %v3579_v34  ;;  %2198 = vmatprep.mubr.bf16.mxu1 %v3584_v35  ;;  %v179_v34 = vld [vmem:[%s5585_s0 + $0x520] sm:$0xff]  ;;  %v177_v35 = vld [vmem:[%s5585_s0 + $0x510] sm:$0xff] }
  0x9b   :  { %2776 = vmatprep.mubr.bf16.mxu0 %v3588_v36  ;;  %v181_v36 = vld [vmem:[%s5585_s0 + $0x530] sm:$0xff]  ;;  %v3648_v39 = vcombine.high %v175_v33, %v179_v34  ;;  %v3647_v45 = vcombine.low %v175_v33, %v179_v34  ;;  %v239_v33 = vld [vmem:[%s5585_s0 + $0x700] sm:$0xff] }
  0x9c   :  { %v3652_v40 = vcombine.high %v177_v35, %v181_v36  ;;  %v3651_v46 = vcombine.low %v177_v35, %v181_v36  ;;  %v243_v34 = vld [vmem:[%s5585_s0 + $0x720] sm:$0xff]  ;;  %v241_v35 = vld [vmem:[%s5585_s0 + $0x710] sm:$0xff] }
  0x9d   :  { %v245_v36 = vld [vmem:[%s5585_s0 + $0x730] sm:$0xff] }
  0xa1   :  { %2199 = vmatmul.mubr.bf16.gmra.mrb[48].mxu1 %v3583_v41  ;;  %v183_v41 = vld [vmem:[%s5585_s0 + $0x540] sm:$0xff] }
  0xa2   :  { %2777 = vmatmul.mubr.bf16.gmra.mrb[48].mxu0 %v3587_v42  ;;  %2206 = vmatprep.mubr.bf16.mxu1 %v3592_v43  ;;  %v187_v42 = vld [vmem:[%s5585_s0 + $0x560] sm:$0xff]  ;;  %v185_v43 = vld [vmem:[%s5585_s0 + $0x550] sm:$0xff] }
  0xa3   :  { %2784 = vmatprep.mubr.bf16.mxu0 %v3596_v44  ;;  %v189_v44 = vld [vmem:[%s5585_s0 + $0x570] sm:$0xff]  ;;  %v3656_v47 = vcombine.high %v183_v41, %v187_v42 }
  0xa4   :  { %v3660_v48 = vcombine.high %v185_v43, %v189_v44 }
  0xa9   :  { %2207 = vmatmul.mubr.bf16.gmra.mrb[52].mxu1 %v3591_v51  ;;  %v193_v51 = vld [vmem:[%s5585_s0 + $0x590] sm:$0xff] }
  0xaa   :  { %2785 = vmatmul.mubr.bf16.gmra.mrb[52].mxu0 %v3595_v52  ;;  %2214 = vmatprep.mubr.bf16.mxu1 %v3600_v53  ;;  %v197_v52 = vld [vmem:[%s5585_s0 + $0x5b0] sm:$0xff]  ;;  %v3655_v53 = vcombine.low %v183_v41, %v187_v42  ;;  %v247_v41 = vld [vmem:[%s5585_s0 + $0x740] sm:$0xff] }
  0xab   :  { %2792 = vmatprep.mubr.bf16.mxu0 %v3604_v54  ;;  %v3659_v54 = vcombine.low %v185_v43, %v189_v44  ;;  %v3668_v56 = vcombine.high %v193_v51, %v197_v52  ;;  %v251_v42 = vld [vmem:[%s5585_s0 + $0x760] sm:$0xff]  ;;  %v249_v43 = vld [vmem:[%s5585_s0 + $0x750] sm:$0xff] }
  0xac   :  { %v253_v44 = vld [vmem:[%s5585_s0 + $0x770] sm:$0xff] }
  0xb1   :  { %2215 = vmatmul.mubr.bf16.gmra.mrb[56].mxu1 %v3599_v58  ;;  %v201_v58 = vld [vmem:[%s5585_s0 + $0x5d0] sm:$0xff] }
  0xb2   :  { %2793 = vmatmul.mubr.bf16.gmra.mrb[56].mxu0 %v3603_v59  ;;  %2222 = vmatprep.mubr.bf16.mxu1 %v3608_v60  ;;  %v205_v59 = vld [vmem:[%s5585_s0 + $0x5f0] sm:$0xff]  ;;  %v3663_v60 = vcombine.low %v191_v49, %v195_v50  ;;  %v255_v49 = vld [vmem:[%s5585_s0 + $0x780] sm:$0xff] }
  0xb3   :  { %2800 = vmatprep.mubr.bf16.mxu0 %v3612_v61  ;;  %v3667_v61 = vcombine.low %v193_v51, %v197_v52  ;;  %v3676_v63 = vcombine.high %v201_v58, %v205_v59  ;;  %v259_v50 = vld [vmem:[%s5585_s0 + $0x7a0] sm:$0xff]  ;;  %v257_v51 = vld [vmem:[%s5585_s0 + $0x790] sm:$0xff] }
  0xb4   :  { %v261_v52 = vld [vmem:[%s5585_s0 + $0x7b0] sm:$0xff] }
  0xb9   :  { %2223 = vmatmul.mubr.bf16.gmra.mrb[60].mxu1 %v3607_v5  ;;  %v3671_v5 = vcombine.low %v199_v57, %v203_v0  ;;  %v263_v57 = vld [vmem:[%s5585_s0 + $0x7c0] sm:$0xff] }
  0xba   :  { %2801 = vmatmul.mubr.bf16.gmra.mrb[60].mxu0 %v3611_v6  ;;  %2230 = vmatprep.mubr.bf16.mxu1 %v3616_v7  ;;  %v3675_v6 = vcombine.low %v201_v58, %v205_v59  ;;  %v3680_v7 = vcombine.high %v207_v1, %v211_v2  ;;  %v267_v0 = vld [vmem:[%s5585_s0 + $0x7e0] sm:$0xff]  ;;  %v265_v58 = vld [vmem:[%s5585_s0 + $0x7d0] sm:$0xff] }
  0xbb   :  { %2808 = vmatprep.mubr.bf16.mxu0 %v3620_v8  ;;  %v3684_v8 = vcombine.high %v209_v3, %v213_v4  ;;  %v269_v59 = vld [vmem:[%s5585_s0 + $0x7f0] sm:$0xff] }
  0xc1   :  { %2231 = vmatmul.mubr.bf16.gmra.mrb[64].mxu1 %v3615_v13  ;;  %v3679_v13 = vcombine.low %v207_v1, %v211_v2  ;;  %v16_v1 = vld [vmem:[%s5585_s0 + $0x8] sm:$0xff] }
  0xc2   :  { %2809 = vmatmul.mubr.bf16.gmra.mrb[64].mxu0 %v3619_v14  ;;  %2238 = vmatprep.mubr.bf16.mxu1 %v3624_v15  ;;  %v3683_v14 = vcombine.low %v209_v3, %v213_v4  ;;  %v3688_v15 = vcombine.high %v215_v9, %v219_v10  ;;  %v20_v2 = vld [vmem:[%s5585_s0 + $0x28] sm:$0xff]  ;;  %v18_v3 = vld [vmem:[%s5585_s0 + $0x18] sm:$0xff] }
  0xc3   :  { %2816 = vmatprep.mubr.bf16.mxu0 %v3628_v16  ;;  %v3692_v16 = vcombine.high %v217_v11, %v221_v12  ;;  %v22_v4 = vld [vmem:[%s5585_s0 + $0x38] sm:$0xff] }
  0xc9   :  { %2239 = vmatmul.mubr.bf16.gmra.mrb[68].mxu1 %v3623_v21  ;;  %v3687_v21 = vcombine.low %v215_v9, %v219_v10  ;;  %v24_v9 = vld [vmem:[%s5585_s0 + $0x48] sm:$0xff] }
  0xca   :  { %2817 = vmatmul.mubr.bf16.gmra.mrb[68].mxu0 %v3627_v22  ;;  %2246 = vmatprep.mubr.bf16.mxu1 %v3632_v23  ;;  %v3691_v22 = vcombine.low %v217_v11, %v221_v12  ;;  %v3696_v23 = vcombine.high %v223_v17, %v227_v18  ;;  %v28_v10 = vld [vmem:[%s5585_s0 + $0x68] sm:$0xff]  ;;  %v26_v11 = vld [vmem:[%s5585_s0 + $0x58] sm:$0xff] }
  0xcb   :  { %2824 = vmatprep.mubr.bf16.mxu0 %v3636_v24  ;;  %v3700_v24 = vcombine.high %v225_v19, %v229_v20  ;;  %v30_v12 = vld [vmem:[%s5585_s0 + $0x78] sm:$0xff] }
  0xd1   :  { %2247 = vmatmul.mubr.bf16.gmra.mrb[72].mxu1 %v3631_v29  ;;  %v3695_v29 = vcombine.low %v223_v17, %v227_v18  ;;  %v32_v17 = vld [vmem:[%s5585_s0 + $0x88] sm:$0xff] }
  0xd2   :  { %2825 = vmatmul.mubr.bf16.gmra.mrb[72].mxu0 %v3635_v30  ;;  %2254 = vmatprep.mubr.bf16.mxu1 %v3640_v31  ;;  %v3699_v30 = vcombine.low %v225_v19, %v229_v20  ;;  %v3704_v31 = vcombine.high %v231_v25, %v235_v26  ;;  %v36_v18 = vld [vmem:[%s5585_s0 + $0xa8] sm:$0xff]  ;;  %v34_v19 = vld [vmem:[%s5585_s0 + $0x98] sm:$0xff] }
  0xd3   :  { %2832 = vmatprep.mubr.bf16.mxu0 %v3644_v32  ;;  %v3708_v32 = vcombine.high %v233_v27, %v237_v28  ;;  %v38_v20 = vld [vmem:[%s5585_s0 + $0xb8] sm:$0xff] }
  0xd9   :  { %2255 = vmatmul.mubr.bf16.gmra.mrb[76].mxu1 %v3639_v37  ;;  %v3703_v37 = vcombine.low %v231_v25, %v235_v26  ;;  %v40_v25 = vld [vmem:[%s5585_s0 + $0xc8] sm:$0xff] }
  0xda   :  { %2833 = vmatmul.mubr.bf16.gmra.mrb[76].mxu0 %v3643_v38  ;;  %2262 = vmatprep.mubr.bf16.mxu1 %v3648_v39  ;;  %v3707_v38 = vcombine.low %v233_v27, %v237_v28  ;;  %v3712_v39 = vcombine.high %v239_v33, %v243_v34  ;;  %v44_v26 = vld [vmem:[%s5585_s0 + $0xe8] sm:$0xff]  ;;  %v42_v27 = vld [vmem:[%s5585_s0 + $0xd8] sm:$0xff] }
  0xdb   :  { %2840 = vmatprep.mubr.bf16.mxu0 %v3652_v40  ;;  %v3716_v40 = vcombine.high %v241_v35, %v245_v36  ;;  %v46_v28 = vld [vmem:[%s5585_s0 + $0xf8] sm:$0xff] }
  0xe1   :  { %2263 = vmatmul.mubr.bf16.gmra.mrb[80].mxu1 %v3647_v45  ;;  %v3711_v45 = vcombine.low %v239_v33, %v243_v34  ;;  %v48_v33 = vld [vmem:[%s5585_s0 + $0x108] sm:$0xff] }
  0xe2   :  { %2841 = vmatmul.mubr.bf16.gmra.mrb[80].mxu0 %v3651_v46  ;;  %2270 = vmatprep.mubr.bf16.mxu1 %v3656_v47  ;;  %v3715_v46 = vcombine.low %v241_v35, %v245_v36  ;;  %v3720_v47 = vcombine.high %v247_v41, %v251_v42  ;;  %v52_v34 = vld [vmem:[%s5585_s0 + $0x128] sm:$0xff]  ;;  %v50_v35 = vld [vmem:[%s5585_s0 + $0x118] sm:$0xff] }
  0xe3   :  { %2848 = vmatprep.mubr.bf16.mxu0 %v3660_v48  ;;  %v3724_v48 = vcombine.high %v249_v43, %v253_v44  ;;  %v54_v36 = vld [vmem:[%s5585_s0 + $0x138] sm:$0xff] }
  0xe9   :  { %2271 = vmatmul.mubr.bf16.gmra.mrb[84].mxu1 %v3655_v53  ;;  %v3719_v53 = vcombine.low %v247_v41, %v251_v42  ;;  %v56_v41 = vld [vmem:[%s5585_s0 + $0x148] sm:$0xff] }
  0xea   :  { %2849 = vmatmul.mubr.bf16.gmra.mrb[84].mxu0 %v3659_v54  ;;  %2278 = vmatprep.mubr.bf16.mxu1 %v3664_v55  ;;  %v3723_v54 = vcombine.low %v249_v43, %v253_v44  ;;  %v3728_v55 = vcombine.high %v255_v49, %v259_v50  ;;  %v60_v42 = vld [vmem:[%s5585_s0 + $0x168] sm:$0xff]  ;;  %v58_v43 = vld [vmem:[%s5585_s0 + $0x158] sm:$0xff] }
  0xeb   :  { %2856 = vmatprep.mubr.bf16.mxu0 %v3668_v56  ;;  %v3732_v56 = vcombine.high %v257_v51, %v261_v52  ;;  %v62_v44 = vld [vmem:[%s5585_s0 + $0x178] sm:$0xff] }
  0xf1   :  { %2279 = vmatmul.mubr.bf16.gmra.mrb[88].mxu1 %v3663_v60  ;;  %v3727_v60 = vcombine.low %v255_v49, %v259_v50  ;;  %v64_v49 = vld [vmem:[%s5585_s0 + $0x188] sm:$0xff] }
  0xf2   :  { %2857 = vmatmul.mubr.bf16.gmra.mrb[88].mxu0 %v3667_v61  ;;  %2286 = vmatprep.mubr.bf16.mxu1 %v3672_v62  ;;  %v3731_v61 = vcombine.low %v257_v51, %v261_v52  ;;  %v3736_v62 = vcombine.high %v263_v57, %v267_v0  ;;  %v68_v50 = vld [vmem:[%s5585_s0 + $0x1a8] sm:$0xff]  ;;  %v66_v51 = vld [vmem:[%s5585_s0 + $0x198] sm:$0xff] }
  0xf3   :  { %2864 = vmatprep.mubr.bf16.mxu0 %v3676_v63  ;;  %v3740_v63 = vcombine.high %v265_v58, %v269_v59  ;;  %v70_v52 = vld [vmem:[%s5585_s0 + $0x1b8] sm:$0xff] }
  0xf9   :  { %2287 = vmatmul.mubr.bf16.gmra.mrb[92].mxu1 %v3671_v5  ;;  %v3735_v5 = vcombine.low %v263_v57, %v267_v0  ;;  %v72_v57 = vld [vmem:[%s5585_s0 + $0x1c8] sm:$0xff] }
  0xfa   :  { %2865 = vmatmul.mubr.bf16.gmra.mrb[92].mxu0 %v3675_v6  ;;  %2294 = vmatprep.mubr.bf16.mxu1 %v3680_v7  ;;  %v3739_v6 = vcombine.low %v265_v58, %v269_v59  ;;  %v3490_v7 = vcombine.high %v16_v1, %v20_v2  ;;  %v76_v0 = vld [vmem:[%s5585_s0 + $0x1e8] sm:$0xff]  ;;  %v74_v58 = vld [vmem:[%s5585_s0 + $0x1d8] sm:$0xff] }
  0xfb   :  { %2872 = vmatprep.mubr.bf16.mxu0 %v3684_v8  ;;  %v3494_v8 = vcombine.high %v18_v3, %v22_v4  ;;  %v78_v59 = vld [vmem:[%s5585_s0 + $0x1f8] sm:$0xff] }
 0x101   :  { %2295 = vmatmul.mubr.bf16.gmra.mrb[96].mxu1 %v3679_v13  ;;  %v3489_v13 = vcombine.low %v16_v1, %v20_v2  ;;  %v80_v1 = vld [vmem:[%s5585_s0 + $0x208] sm:$0xff] }
 0x102   :  { %2873 = vmatmul.mubr.bf16.gmra.mrb[96].mxu0 %v3683_v14  ;;  %2302 = vmatprep.mubr.bf16.mxu1 %v3688_v15  ;;  %v3493_v14 = vcombine.low %v18_v3, %v22_v4  ;;  %v3498_v15 = vcombine.high %v24_v9, %v28_v10  ;;  %v84_v2 = vld [vmem:[%s5585_s0 + $0x228] sm:$0xff]  ;;  %v82_v3 = vld [vmem:[%s5585_s0 + $0x218] sm:$0xff] }
 0x103   :  { %2880 = vmatprep.mubr.bf16.mxu0 %v3692_v16  ;;  %v3502_v16 = vcombine.high %v26_v11, %v30_v12  ;;  %v86_v4 = vld [vmem:[%s5585_s0 + $0x238] sm:$0xff] }
 0x109   :  { %2303 = vmatmul.mubr.bf16.gmra.mrb[100].mxu1 %v3687_v21  ;;  %v3497_v21 = vcombine.low %v24_v9, %v28_v10  ;;  %v88_v9 = vld [vmem:[%s5585_s0 + $0x248] sm:$0xff] }
 0x10a   :  { %2881 = vmatmul.mubr.bf16.gmra.mrb[100].mxu0 %v3691_v22  ;;  %2310 = vmatprep.mubr.bf16.mxu1 %v3696_v23  ;;  %v3501_v22 = vcombine.low %v26_v11, %v30_v12  ;;  %v3506_v23 = vcombine.high %v32_v17, %v36_v18  ;;  %v92_v10 = vld [vmem:[%s5585_s0 + $0x268] sm:$0xff]  ;;  %v90_v11 = vld [vmem:[%s5585_s0 + $0x258] sm:$0xff] }
 0x10b   :  { %2888 = vmatprep.mubr.bf16.mxu0 %v3700_v24  ;;  %v3510_v24 = vcombine.high %v34_v19, %v38_v20  ;;  %v94_v12 = vld [vmem:[%s5585_s0 + $0x278] sm:$0xff] }
 0x111   :  { %2311 = vmatmul.mubr.bf16.gmra.mrb[104].mxu1 %v3695_v29  ;;  %v3505_v29 = vcombine.low %v32_v17, %v36_v18  ;;  %v96_v17 = vld [vmem:[%s5585_s0 + $0x288] sm:$0xff] }
 0x112   :  { %2889 = vmatmul.mubr.bf16.gmra.mrb[104].mxu0 %v3699_v30  ;;  %2318 = vmatprep.mubr.bf16.mxu1 %v3704_v31  ;;  %v3509_v30 = vcombine.low %v34_v19, %v38_v20  ;;  %v3514_v31 = vcombine.high %v40_v25, %v44_v26  ;;  %v100_v18 = vld [vmem:[%s5585_s0 + $0x2a8] sm:$0xff]  ;;  %v98_v19 = vld [vmem:[%s5585_s0 + $0x298] sm:$0xff] }
 0x113   :  { %2896 = vmatprep.mubr.bf16.mxu0 %v3708_v32  ;;  %v3518_v32 = vcombine.high %v42_v27, %v46_v28  ;;  %v102_v20 = vld [vmem:[%s5585_s0 + $0x2b8] sm:$0xff] }
 0x119   :  { %2319 = vmatmul.mubr.bf16.gmra.mrb[108].mxu1 %v3703_v37  ;;  %v3513_v37 = vcombine.low %v40_v25, %v44_v26  ;;  %v104_v25 = vld [vmem:[%s5585_s0 + $0x2c8] sm:$0xff] }
 0x11a   :  { %2897 = vmatmul.mubr.bf16.gmra.mrb[108].mxu0 %v3707_v38  ;;  %2326 = vmatprep.mubr.bf16.mxu1 %v3712_v39  ;;  %v3517_v38 = vcombine.low %v42_v27, %v46_v28  ;;  %v3522_v39 = vcombine.high %v48_v33, %v52_v34  ;;  %v108_v26 = vld [vmem:[%s5585_s0 + $0x2e8] sm:$0xff]  ;;  %v106_v27 = vld [vmem:[%s5585_s0 + $0x2d8] sm:$0xff] }
 0x11b   :  { %2904 = vmatprep.mubr.bf16.mxu0 %v3716_v40  ;;  %v3526_v40 = vcombine.high %v50_v35, %v54_v36  ;;  %v110_v28 = vld [vmem:[%s5585_s0 + $0x2f8] sm:$0xff] }
 0x121   :  { %2327 = vmatmul.mubr.bf16.gmra.mrb[112].mxu1 %v3711_v45  ;;  %v3521_v45 = vcombine.low %v48_v33, %v52_v34  ;;  %v112_v33 = vld [vmem:[%s5585_s0 + $0x308] sm:$0xff] }
 0x122   :  { %2905 = vmatmul.mubr.bf16.gmra.mrb[112].mxu0 %v3715_v46  ;;  %2334 = vmatprep.mubr.bf16.mxu1 %v3720_v47  ;;  %v3525_v46 = vcombine.low %v50_v35, %v54_v36  ;;  %v3530_v47 = vcombine.high %v56_v41, %v60_v42  ;;  %v116_v34 = vld [vmem:[%s5585_s0 + $0x328] sm:$0xff]  ;;  %v114_v35 = vld [vmem:[%s5585_s0 + $0x318] sm:$0xff] }
 0x123   :  { %2912 = vmatprep.mubr.bf16.mxu0 %v3724_v48  ;;  %v3534_v48 = vcombine.high %v58_v43, %v62_v44  ;;  %v118_v36 = vld [vmem:[%s5585_s0 + $0x338] sm:$0xff] }
 0x129   :  { %2335 = vmatmul.mubr.bf16.gmra.mrb[116].mxu1 %v3719_v53  ;;  %v3529_v53 = vcombine.low %v56_v41, %v60_v42  ;;  %v120_v41 = vld [vmem:[%s5585_s0 + $0x348] sm:$0xff] }
 0x12a   :  { %2913 = vmatmul.mubr.bf16.gmra.mrb[116].mxu0 %v3723_v54  ;;  %2342 = vmatprep.mubr.bf16.mxu1 %v3728_v55  ;;  %v3533_v54 = vcombine.low %v58_v43, %v62_v44  ;;  %v3538_v55 = vcombine.high %v64_v49, %v68_v50  ;;  %v124_v42 = vld [vmem:[%s5585_s0 + $0x368] sm:$0xff]  ;;  %v122_v43 = vld [vmem:[%s5585_s0 + $0x358] sm:$0xff] }
 0x12b   :  { %2920 = vmatprep.mubr.bf16.mxu0 %v3732_v56  ;;  %v3542_v56 = vcombine.high %v66_v51, %v70_v52  ;;  %v126_v44 = vld [vmem:[%s5585_s0 + $0x378] sm:$0xff] }
 0x131   :  { %2343 = vmatmul.mubr.bf16.gmra.mrb[120].mxu1 %v3727_v60  ;;  %v3537_v60 = vcombine.low %v64_v49, %v68_v50  ;;  %v128_v49 = vld [vmem:[%s5585_s0 + $0x388] sm:$0xff] }
 0x132   :  { %2921 = vmatmul.mubr.bf16.gmra.mrb[120].mxu0 %v3731_v61  ;;  %2350 = vmatprep.mubr.bf16.mxu1 %v3736_v62  ;;  %v3541_v61 = vcombine.low %v66_v51, %v70_v52  ;;  %v3546_v62 = vcombine.high %v72_v57, %v76_v0  ;;  %v132_v50 = vld [vmem:[%s5585_s0 + $0x3a8] sm:$0xff]  ;;  %v130_v51 = vld [vmem:[%s5585_s0 + $0x398] sm:$0xff] }
 0x133   :  { %2928 = vmatprep.mubr.bf16.mxu0 %v3740_v63  ;;  %v3550_v63 = vcombine.high %v74_v58, %v78_v59  ;;  %v134_v52 = vld [vmem:[%s5585_s0 + $0x3b8] sm:$0xff] }
 0x139   :  { %2351 = vmatmul.mubr.bf16.gmra.mrb[124].mxu1 %v3735_v5  ;;  %v3545_v5 = vcombine.low %v72_v57, %v76_v0  ;;  %v136_v57 = vld [vmem:[%s5585_s0 + $0x3c8] sm:$0xff] }
 0x13a   :  { %2929 = vmatmul.mubr.bf16.gmra.mrb[124].mxu0 %v3739_v6  ;;  %2391 = vmatprep.mubr.bf16.mxu1 %v3490_v7  ;;  %v3549_v6 = vcombine.low %v74_v58, %v78_v59  ;;  %v3554_v7 = vcombine.high %v80_v1, %v84_v2  ;;  %v140_v0 = vld [vmem:[%s5585_s0 + $0x3e8] sm:$0xff]  ;;  %v138_v58 = vld [vmem:[%s5585_s0 + $0x3d8] sm:$0xff] }
 0x13b   :  { %2969 = vmatprep.mubr.bf16.mxu0 %v3494_v8  ;;  %v3558_v8 = vcombine.high %v82_v3, %v86_v4  ;;  %v142_v59 = vld [vmem:[%s5585_s0 + $0x3f8] sm:$0xff] }
 0x141   :  { %2392 = vmatmul.mubr.bf16.vlgmr.msra.gmra.mrb[0].mxu1 %v3489_v13  ;;  %v3553_v13 = vcombine.low %v80_v1, %v84_v2  ;;  %v144_v1 = vld [vmem:[%s5585_s0 + $0x408] sm:$0xff] }
 0x142   :  { %2970 = vmatmul.mubr.bf16.vlgmr.msra.gmra.mrb[0].mxu0 %v3493_v14  ;;  %2399 = vmatprep.mubr.bf16.mxu1 %v3498_v15  ;;  %v3557_v14 = vcombine.low %v82_v3, %v86_v4  ;;  %v3562_v15 = vcombine.high %v88_v9, %v92_v10  ;;  %v148_v2 = vld [vmem:[%s5585_s0 + $0x428] sm:$0xff]  ;;  %v146_v3 = vld [vmem:[%s5585_s0 + $0x418] sm:$0xff] }
 0x143   :  { %2977 = vmatprep.mubr.bf16.mxu0 %v3502_v16  ;;  %v3566_v16 = vcombine.high %v90_v11, %v94_v12  ;;  %v150_v4 = vld [vmem:[%s5585_s0 + $0x438] sm:$0xff] }
 0x149   :  { %2400 = vmatmul.mubr.bf16.gmra.mrb[4].mxu1 %v3497_v21  ;;  %v3561_v21 = vcombine.low %v88_v9, %v92_v10  ;;  %v152_v9 = vld [vmem:[%s5585_s0 + $0x448] sm:$0xff] }
 0x14a   :  { %2978 = vmatmul.mubr.bf16.gmra.mrb[4].mxu0 %v3501_v22  ;;  %2407 = vmatprep.mubr.bf16.mxu1 %v3506_v23  ;;  %v3565_v22 = vcombine.low %v90_v11, %v94_v12  ;;  %v3570_v23 = vcombine.high %v96_v17, %v100_v18  ;;  %v156_v10 = vld [vmem:[%s5585_s0 + $0x468] sm:$0xff]  ;;  %v154_v11 = vld [vmem:[%s5585_s0 + $0x458] sm:$0xff] }
 0x14b   :  { %2985 = vmatprep.mubr.bf16.mxu0 %v3510_v24  ;;  %v3574_v24 = vcombine.high %v98_v19, %v102_v20  ;;  %v158_v12 = vld [vmem:[%s5585_s0 + $0x478] sm:$0xff] }
 0x151   :  { %2408 = vmatmul.mubr.bf16.gmra.mrb[8].mxu1 %v3505_v29  ;;  %v3569_v29 = vcombine.low %v96_v17, %v100_v18  ;;  %v160_v17 = vld [vmem:[%s5585_s0 + $0x488] sm:$0xff] }
 0x152   :  { %2986 = vmatmul.mubr.bf16.gmra.mrb[8].mxu0 %v3509_v30  ;;  %2415 = vmatprep.mubr.bf16.mxu1 %v3514_v31  ;;  %v3573_v30 = vcombine.low %v98_v19, %v102_v20  ;;  %v3578_v31 = vcombine.high %v104_v25, %v108_v26  ;;  %v164_v18 = vld [vmem:[%s5585_s0 + $0x4a8] sm:$0xff]  ;;  %v162_v19 = vld [vmem:[%s5585_s0 + $0x498] sm:$0xff] }
 0x153   :  { %2993 = vmatprep.mubr.bf16.mxu0 %v3518_v32  ;;  %v3582_v32 = vcombine.high %v106_v27, %v110_v28  ;;  %v166_v20 = vld [vmem:[%s5585_s0 + $0x4b8] sm:$0xff] }
 0x159   :  { %2416 = vmatmul.mubr.bf16.gmra.mrb[12].mxu1 %v3513_v37  ;;  %v3577_v37 = vcombine.low %v104_v25, %v108_v26  ;;  %v168_v25 = vld [vmem:[%s5585_s0 + $0x4c8] sm:$0xff] }
 0x15a   :  { %2994 = vmatmul.mubr.bf16.gmra.mrb[12].mxu0 %v3517_v38  ;;  %2423 = vmatprep.mubr.bf16.mxu1 %v3522_v39  ;;  %v3581_v38 = vcombine.low %v106_v27, %v110_v28  ;;  %v3586_v39 = vcombine.high %v112_v33, %v116_v34  ;;  %v172_v26 = vld [vmem:[%s5585_s0 + $0x4e8] sm:$0xff]  ;;  %v170_v27 = vld [vmem:[%s5585_s0 + $0x4d8] sm:$0xff] }
 0x15b   :  { %3001 = vmatprep.mubr.bf16.mxu0 %v3526_v40  ;;  %v3590_v40 = vcombine.high %v114_v35, %v118_v36  ;;  %v174_v28 = vld [vmem:[%s5585_s0 + $0x4f8] sm:$0xff] }
 0x161   :  { %2424 = vmatmul.mubr.bf16.gmra.mrb[16].mxu1 %v3521_v45  ;;  %v3585_v45 = vcombine.low %v112_v33, %v116_v34  ;;  %v176_v33 = vld [vmem:[%s5585_s0 + $0x508] sm:$0xff] }
 0x162   :  { %3002 = vmatmul.mubr.bf16.gmra.mrb[16].mxu0 %v3525_v46  ;;  %2431 = vmatprep.mubr.bf16.mxu1 %v3530_v47  ;;  %v3589_v46 = vcombine.low %v114_v35, %v118_v36  ;;  %v3594_v47 = vcombine.high %v120_v41, %v124_v42  ;;  %v180_v34 = vld [vmem:[%s5585_s0 + $0x528] sm:$0xff]  ;;  %v178_v35 = vld [vmem:[%s5585_s0 + $0x518] sm:$0xff] }
 0x163   :  { %3009 = vmatprep.mubr.bf16.mxu0 %v3534_v48  ;;  %v3598_v48 = vcombine.high %v122_v43, %v126_v44  ;;  %v182_v36 = vld [vmem:[%s5585_s0 + $0x538] sm:$0xff] }
 0x169   :  { %2432 = vmatmul.mubr.bf16.gmra.mrb[20].mxu1 %v3529_v53  ;;  %v3593_v53 = vcombine.low %v120_v41, %v124_v42  ;;  %v184_v41 = vld [vmem:[%s5585_s0 + $0x548] sm:$0xff] }
 0x16a   :  { %3010 = vmatmul.mubr.bf16.gmra.mrb[20].mxu0 %v3533_v54  ;;  %2439 = vmatprep.mubr.bf16.mxu1 %v3538_v55  ;;  %v3597_v54 = vcombine.low %v122_v43, %v126_v44  ;;  %v3602_v55 = vcombine.high %v128_v49, %v132_v50  ;;  %v188_v42 = vld [vmem:[%s5585_s0 + $0x568] sm:$0xff]  ;;  %v186_v43 = vld [vmem:[%s5585_s0 + $0x558] sm:$0xff] }
 0x16b   :  { %3017 = vmatprep.mubr.bf16.mxu0 %v3542_v56  ;;  %v3606_v56 = vcombine.high %v130_v51, %v134_v52  ;;  %v190_v44 = vld [vmem:[%s5585_s0 + $0x578] sm:$0xff] }
 0x171   :  { %2440 = vmatmul.mubr.bf16.gmra.mrb[24].mxu1 %v3537_v60  ;;  %v3601_v60 = vcombine.low %v128_v49, %v132_v50  ;;  %v192_v49 = vld [vmem:[%s5585_s0 + $0x588] sm:$0xff] }
 0x172   :  { %3018 = vmatmul.mubr.bf16.gmra.mrb[24].mxu0 %v3541_v61  ;;  %2447 = vmatprep.mubr.bf16.mxu1 %v3546_v62  ;;  %v3605_v61 = vcombine.low %v130_v51, %v134_v52  ;;  %v3610_v62 = vcombine.high %v136_v57, %v140_v0  ;;  %v196_v50 = vld [vmem:[%s5585_s0 + $0x5a8] sm:$0xff]  ;;  %v194_v51 = vld [vmem:[%s5585_s0 + $0x598] sm:$0xff] }
 0x173   :  { %3025 = vmatprep.mubr.bf16.mxu0 %v3550_v63  ;;  %v3614_v63 = vcombine.high %v138_v58, %v142_v59  ;;  %v198_v52 = vld [vmem:[%s5585_s0 + $0x5b8] sm:$0xff] }
 0x179   :  { %2448 = vmatmul.mubr.bf16.gmra.mrb[28].mxu1 %v3545_v5  ;;  %v3609_v5 = vcombine.low %v136_v57, %v140_v0  ;;  %v200_v57 = vld [vmem:[%s5585_s0 + $0x5c8] sm:$0xff] }
 0x17a   :  { %3026 = vmatmul.mubr.bf16.gmra.mrb[28].mxu0 %v3549_v6  ;;  %2455 = vmatprep.mubr.bf16.mxu1 %v3554_v7  ;;  %v3613_v6 = vcombine.low %v138_v58, %v142_v59  ;;  %v3618_v7 = vcombine.high %v144_v1, %v148_v2  ;;  %v204_v0 = vld [vmem:[%s5585_s0 + $0x5e8] sm:$0xff]  ;;  %v202_v58 = vld [vmem:[%s5585_s0 + $0x5d8] sm:$0xff] }
 0x17b   :  { %3033 = vmatprep.mubr.bf16.mxu0 %v3558_v8  ;;  %v3622_v8 = vcombine.high %v146_v3, %v150_v4  ;;  %v206_v59 = vld [vmem:[%s5585_s0 + $0x5f8] sm:$0xff] }
 0x181   :  { %2456 = vmatmul.mubr.bf16.gmra.mrb[32].mxu1 %v3553_v13  ;;  %v3617_v13 = vcombine.low %v144_v1, %v148_v2  ;;  %v208_v1 = vld [vmem:[%s5585_s0 + $0x608] sm:$0xff] }
 0x182   :  { %3034 = vmatmul.mubr.bf16.gmra.mrb[32].mxu0 %v3557_v14  ;;  %2463 = vmatprep.mubr.bf16.mxu1 %v3562_v15  ;;  %v3621_v14 = vcombine.low %v146_v3, %v150_v4  ;;  %v3626_v15 = vcombine.high %v152_v9, %v156_v10  ;;  %v212_v2 = vld [vmem:[%s5585_s0 + $0x628] sm:$0xff]  ;;  %v210_v3 = vld [vmem:[%s5585_s0 + $0x618] sm:$0xff] }
 0x183   :  { %3041 = vmatprep.mubr.bf16.mxu0 %v3566_v16  ;;  %v3630_v16 = vcombine.high %v154_v11, %v158_v12  ;;  %v214_v4 = vld [vmem:[%s5585_s0 + $0x638] sm:$0xff] }
 0x189   :  { %2464 = vmatmul.mubr.bf16.gmra.mrb[36].mxu1 %v3561_v21  ;;  %v3625_v21 = vcombine.low %v152_v9, %v156_v10  ;;  %v216_v9 = vld [vmem:[%s5585_s0 + $0x648] sm:$0xff] }
 0x18a   :  { %3042 = vmatmul.mubr.bf16.gmra.mrb[36].mxu0 %v3565_v22  ;;  %2471 = vmatprep.mubr.bf16.mxu1 %v3570_v23  ;;  %v3629_v22 = vcombine.low %v154_v11, %v158_v12  ;;  %v3634_v23 = vcombine.high %v160_v17, %v164_v18  ;;  %v220_v10 = vld [vmem:[%s5585_s0 + $0x668] sm:$0xff]  ;;  %v218_v11 = vld [vmem:[%s5585_s0 + $0x658] sm:$0xff] }
 0x18b   :  { %3049 = vmatprep.mubr.bf16.mxu0 %v3574_v24  ;;  %v3638_v24 = vcombine.high %v162_v19, %v166_v20  ;;  %v222_v12 = vld [vmem:[%s5585_s0 + $0x678] sm:$0xff] }
 0x191   :  { %2472 = vmatmul.mubr.bf16.gmra.mrb[40].mxu1 %v3569_v29  ;;  %v3633_v29 = vcombine.low %v160_v17, %v164_v18  ;;  %v224_v17 = vld [vmem:[%s5585_s0 + $0x688] sm:$0xff] }
 0x192   :  { %3050 = vmatmul.mubr.bf16.gmra.mrb[40].mxu0 %v3573_v30  ;;  %2479 = vmatprep.mubr.bf16.mxu1 %v3578_v31  ;;  %v3637_v30 = vcombine.low %v162_v19, %v166_v20  ;;  %v3642_v31 = vcombine.high %v168_v25, %v172_v26  ;;  %v228_v18 = vld [vmem:[%s5585_s0 + $0x6a8] sm:$0xff]  ;;  %v226_v19 = vld [vmem:[%s5585_s0 + $0x698] sm:$0xff] }
 0x193   :  { %3057 = vmatprep.mubr.bf16.mxu0 %v3582_v32  ;;  %v3646_v32 = vcombine.high %v170_v27, %v174_v28  ;;  %v230_v20 = vld [vmem:[%s5585_s0 + $0x6b8] sm:$0xff] }
 0x199   :  { %2480 = vmatmul.mubr.bf16.gmra.mrb[44].mxu1 %v3577_v37  ;;  %v3641_v37 = vcombine.low %v168_v25, %v172_v26  ;;  %v232_v25 = vld [vmem:[%s5585_s0 + $0x6c8] sm:$0xff] }
 0x19a   :  { %3058 = vmatmul.mubr.bf16.gmra.mrb[44].mxu0 %v3581_v38  ;;  %2487 = vmatprep.mubr.bf16.mxu1 %v3586_v39  ;;  %v3645_v38 = vcombine.low %v170_v27, %v174_v28  ;;  %v3650_v39 = vcombine.high %v176_v33, %v180_v34  ;;  %v236_v26 = vld [vmem:[%s5585_s0 + $0x6e8] sm:$0xff]  ;;  %v234_v27 = vld [vmem:[%s5585_s0 + $0x6d8] sm:$0xff] }
 0x19b   :  { %3065 = vmatprep.mubr.bf16.mxu0 %v3590_v40  ;;  %v3654_v40 = vcombine.high %v178_v35, %v182_v36  ;;  %v238_v28 = vld [vmem:[%s5585_s0 + $0x6f8] sm:$0xff] }
 0x1a1   :  { %2488 = vmatmul.mubr.bf16.gmra.mrb[48].mxu1 %v3585_v45  ;;  %v3649_v45 = vcombine.low %v176_v33, %v180_v34  ;;  %v5273_v33 = vld [vmem:[%s5586_s2] ss:$0 sm:$0xff]  ;;  %v240_v34 = vld [vmem:[%s5585_s0 + $0x708] sm:$0xff] }
 0x1a2   :  { %3066 = vmatmul.mubr.bf16.gmra.mrb[48].mxu0 %v3589_v46  ;;  %2495 = vmatprep.mubr.bf16.mxu1 %v3594_v47  ;;  %v3653_v46 = vcombine.low %v178_v35, %v182_v36  ;;  %v3658_v47 = vcombine.high %v184_v41, %v188_v42  ;;  %v244_v35 = vld [vmem:[%s5585_s0 + $0x728] sm:$0xff] }
 0x1a3   :  { %3073 = vmatprep.mubr.bf16.mxu0 %v3598_v48  ;;  %v3662_v48 = vcombine.high %v186_v43, %v190_v44 }
 0x1a9   :  { %2496 = vmatmul.mubr.bf16.gmra.mrb[52].mxu1 %v3593_v53  ;;  %v3657_v53 = vcombine.low %v184_v41, %v188_v42  ;;  %v3705_v42 = vcombine.low %v232_v25, %v236_v26 }
 0x1aa   :  { %3074 = vmatmul.mubr.bf16.gmra.mrb[52].mxu0 %v3597_v54  ;;  %2503 = vmatprep.mubr.bf16.mxu1 %v3602_v55  ;;  %v3661_v54 = vcombine.low %v186_v43, %v190_v44  ;;  %v3666_v55 = vcombine.high %v192_v49, %v196_v50 }
 0x1ab   :  { %3081 = vmatprep.mubr.bf16.mxu0 %v3606_v56  ;;  %v3670_v56 = vcombine.high %v194_v51, %v198_v52 }
 0x1b1   :  { %2504 = vmatmul.mubr.bf16.gmra.mrb[56].mxu1 %v3601_v60  ;;  %v3665_v60 = vcombine.low %v192_v49, %v196_v50 }
 0x1b2   :  { %3082 = vmatmul.mubr.bf16.gmra.mrb[56].mxu0 %v3605_v61  ;;  %2511 = vmatprep.mubr.bf16.mxu1 %v3610_v62  ;;  %v3669_v61 = vcombine.low %v194_v51, %v198_v52  ;;  %v3674_v62 = vcombine.high %v200_v57, %v204_v0 }
 0x1b3   :  { %3089 = vmatprep.mubr.bf16.mxu0 %v3614_v63  ;;  %v3678_v63 = vcombine.high %v202_v58, %v206_v59 }
 0x1b9   :  { %2512 = vmatmul.mubr.bf16.gmra.mrb[60].mxu1 %v3609_v5  ;;  %v3673_v5 = vcombine.low %v200_v57, %v204_v0  ;;  %v248_v57 = vld [vmem:[%s5585_s0 + $0x748] sm:$0xff] }
 0x1ba   :  { %3090 = vmatmul.mubr.bf16.gmra.mrb[60].mxu0 %v3613_v6  ;;  %2519 = vmatprep.mubr.bf16.mxu1 %v3618_v7  ;;  %v3677_v6 = vcombine.low %v202_v58, %v206_v59  ;;  %v3682_v7 = vcombine.high %v208_v1, %v212_v2  ;;  %v252_v0 = vld [vmem:[%s5585_s0 + $0x768] sm:$0xff]  ;;  %v250_v59 = vld [vmem:[%s5585_s0 + $0x758] sm:$0xff] }
 0x1bb   :  { %3097 = vmatprep.mubr.bf16.mxu0 %v3622_v8  ;;  %v3686_v8 = vcombine.high %v210_v3, %v214_v4 }
 0x1c1   :  { %2520 = vmatmul.mubr.bf16.gmra.mrb[64].mxu1 %v3617_v13  ;;  %v3681_v13 = vcombine.low %v208_v1, %v212_v2  ;;  %v3713_v2 = vcombine.low %v240_v34, %v244_v35 }
 0x1c2   :  { %3098 = vmatmul.mubr.bf16.gmra.mrb[64].mxu0 %v3621_v14  ;;  %2527 = vmatprep.mubr.bf16.mxu1 %v3626_v15  ;;  %v3685_v14 = vcombine.low %v210_v3, %v214_v4  ;;  %v3690_v15 = vcombine.high %v216_v9, %v220_v10 }
 0x1c3   :  { %3105 = vmatprep.mubr.bf16.mxu0 %v3630_v16  ;;  %v3694_v16 = vcombine.high %v218_v11, %v222_v12 }
 0x1c9   :  { %2528 = vmatmul.mubr.bf16.gmra.mrb[68].mxu1 %v3625_v21  ;;  %v3689_v21 = vcombine.low %v216_v9, %v220_v10 }
 0x1ca   :  { %3106 = vmatmul.mubr.bf16.gmra.mrb[68].mxu0 %v3629_v22  ;;  %2535 = vmatprep.mubr.bf16.mxu1 %v3634_v23  ;;  %v3693_v22 = vcombine.low %v218_v11, %v222_v12  ;;  %v3698_v23 = vcombine.high %v224_v17, %v228_v18 }
 0x1cb   :  { %3113 = vmatprep.mubr.bf16.mxu0 %v3638_v24  ;;  %v3702_v24 = vcombine.high %v226_v19, %v230_v20 }
 0x1d1   :  { %2536 = vmatmul.mubr.bf16.gmra.mrb[72].mxu1 %v3633_v29  ;;  %v3697_v29 = vcombine.low %v224_v17, %v228_v18  ;;  %v256_v17 = vld [vmem:[%s5585_s0 + $0x788] sm:$0xff] }
 0x1d2   :  { %3114 = vmatmul.mubr.bf16.gmra.mrb[72].mxu0 %v3637_v30  ;;  %2543 = vmatprep.mubr.bf16.mxu1 %v3642_v31  ;;  %v3701_v30 = vcombine.low %v226_v19, %v230_v20  ;;  %v3706_v31 = vcombine.high %v232_v25, %v236_v26  ;;  %v260_v18 = vld [vmem:[%s5585_s0 + $0x7a8] sm:$0xff]  ;;  %v258_v20 = vld [vmem:[%s5585_s0 + $0x798] sm:$0xff]  ;;  %v3721_v26 = vcombine.low %v248_v57, %v252_v0 }
 0x1d3   :  { %3121 = vmatprep.mubr.bf16.mxu0 %v3646_v32  ;;  %v3710_v32 = vcombine.high %v234_v27, %v238_v28 }
 0x1d9   :  { %2544 = vmatmul.mubr.bf16.gmra.mrb[76].mxu1 %v3641_v37  ;;  %v242_v37 = vld [vmem:[%s5585_s0 + $0x718] sm:$0xff] }
 0x1da   :  { %3122 = vmatmul.mubr.bf16.gmra.mrb[76].mxu0 %v3645_v38  ;;  %2551 = vmatprep.mubr.bf16.mxu1 %v3650_v39  ;;  %v246_v38 = vld [vmem:[%s5585_s0 + $0x738] sm:$0xff] }
 0x1db   :  { %3129 = vmatprep.mubr.bf16.mxu0 %v3654_v40  ;;  %v3718_v51 = vcombine.high %v242_v37, %v246_v38 }
 0x1e1   :  { %2552 = vmatmul.mubr.bf16.gmra.mrb[80].mxu1 %v3649_v45  ;;  %v3709_v45 = vcombine.low %v234_v27, %v238_v28 }
 0x1e2   :  { %3130 = vmatmul.mubr.bf16.gmra.mrb[80].mxu0 %v3653_v46  ;;  %2559 = vmatprep.mubr.bf16.mxu1 %v3658_v47  ;;  %v3714_v46 = vcombine.high %v240_v34, %v244_v35 }
 0x1e3   :  { %3137 = vmatprep.mubr.bf16.mxu0 %v3662_v48 }
 0x1e9   :  { %2560 = vmatmul.mubr.bf16.gmra.mrb[84].mxu1 %v3657_v53 }
 0x1ea   :  { %3138 = vmatmul.mubr.bf16.gmra.mrb[84].mxu0 %v3661_v54  ;;  %2567 = vmatprep.mubr.bf16.mxu1 %v3666_v55 }
 0x1eb   :  { %3145 = vmatprep.mubr.bf16.mxu0 %v3670_v56 }
 0x1f1   :  { %2568 = vmatmul.mubr.bf16.gmra.mrb[88].mxu1 %v3665_v60  ;;  %v254_v60 = vld [vmem:[%s5585_s0 + $0x778] sm:$0xff] }
 0x1f2   :  { %3146 = vmatmul.mubr.bf16.gmra.mrb[88].mxu0 %v3669_v61  ;;  %2575 = vmatprep.mubr.bf16.mxu1 %v3674_v62  ;;  %v3726_v11 = vcombine.high %v250_v59, %v254_v60 }
 0x1f3   :  { %3153 = vmatprep.mubr.bf16.mxu0 %v3678_v63 }
 0x1f9   :  { %2576 = vmatmul.mubr.bf16.gmra.mrb[92].mxu1 %v3673_v5  ;;  %v3717_v5 = vcombine.low %v242_v37, %v246_v38 }
 0x1fa   :  { %3154 = vmatmul.mubr.bf16.gmra.mrb[92].mxu0 %v3677_v6  ;;  %2583 = vmatprep.mubr.bf16.mxu1 %v3682_v7  ;;  %v3722_v6 = vcombine.high %v248_v57, %v252_v0 }
 0x1fb   :  { %3161 = vmatprep.mubr.bf16.mxu0 %v3686_v8 }
 0x201   :  { %2584 = vmatmul.mubr.bf16.gmra.mrb[96].mxu1 %v3681_v13 }
 0x202   :  { %3162 = vmatmul.mubr.bf16.gmra.mrb[96].mxu0 %v3685_v14  ;;  %2591 = vmatprep.mubr.bf16.mxu1 %v3690_v15 }
 0x203   :  { %3169 = vmatprep.mubr.bf16.mxu0 %v3694_v16 }
 0x209   :  { %2592 = vmatmul.mubr.bf16.gmra.mrb[100].mxu1 %v3689_v21  ;;  %v262_v21 = vld [vmem:[%s5585_s0 + $0x7b8] sm:$0xff] }
 0x20a   :  { %3170 = vmatmul.mubr.bf16.gmra.mrb[100].mxu0 %v3693_v22  ;;  %2599 = vmatprep.mubr.bf16.mxu1 %v3698_v23 }
 0x20b   :  { %3177 = vmatprep.mubr.bf16.mxu0 %v3702_v24 }
 0x211   :  { %2600 = vmatmul.mubr.bf16.gmra.mrb[104].mxu1 %v3697_v29  ;;  %v3725_v29 = vcombine.low %v250_v59, %v254_v60 }
 0x212   :  { %3178 = vmatmul.mubr.bf16.gmra.mrb[104].mxu0 %v3701_v30  ;;  %2607 = vmatprep.mubr.bf16.mxu1 %v3706_v31  ;;  %v3730_v30 = vcombine.high %v256_v17, %v260_v18 }
 0x213   :  { %3185 = vmatprep.mubr.bf16.mxu0 %v3710_v32 }
 0x214   :  { %v2393_v36 = vpop.f32.mrb[0].mxu1 }
 0x215   :  { %v3807_v39 = vadd.f32 %v5273_v33, %v2393_v36  ;;  %v2971_v40 = vpop.f32.mrb[0].mxu0  ;;  %v2395_v41 = vpop.f32.mrb[1].mxu1  ;;  %v3734_v36 = vcombine.high %v258_v20, %v262_v21 }
 0x216   :  { %v2973_v43 = vpop.f32.mrb[1].mxu0  ;;  %v2396_v44 = vpop.f32.mrb[2].mxu1 }
 0x217   :  { %v3808_v47 = vadd.f32 %v3807_v39, %v2971_v40  ;;  %v3809_v48 = vadd.f32 %v5273_v33, %v2396_v44  ;;  %v2974_v49 = vpop.f32.mrb[2].mxu0  ;;  %v2398_v50 = vpop.f32.mrb[3].mxu1  ;;  %v268_v43 = vld [vmem:[%s5585_s0 + $0x7e8] sm:$0xff] }
 0x218   :  { %v2976_v52 = vpop.f32.mrb[3].mxu0 }
 0x219   :  { %vm3226_vm0 = vcmp.gt.f32.partialorder %v3808_v47, 0.0  ;;  %v3290_v53 = vmul.f32 0.2, %v3808_v47  ;;  %v3810_v54 = vadd.f32 %v3809_v48, %v2974_v49  ;;  %2608 = vmatmul.mubr.bf16.gmra.mrb[108].mxu1 %v3705_v42  ;;  %v264_v42 = vld [vmem:[%s5585_s0 + $0x7c8] sm:$0xff] }
 0x21a   :  { %3186 = vmatmul.mubr.bf16.gmra.mrb[108].mxu0 %v3709_v45  ;;  %2615 = vmatprep.mubr.bf16.mxu1 %v3714_v46  ;;  %v266_v45 = vld [vmem:[%s5585_s0 + $0x7d8] sm:$0xff] }
 0x21b   :  { %v3354_v55 = vsel %vm3226_vm0, %v3808_v47, %v3290_v53  ;;  %vm3227_vm1 = vcmp.gt.f32.partialorder %v3810_v54, 0.0  ;;  %v3291_v56 = vmul.f32 0.2, %v3810_v54  ;;  %3193 = vmatprep.mubr.bf16.mxu0 %v3718_v51  ;;  %v270_v46 = vld [vmem:[%s5585_s0 + $0x7f8] sm:$0xff]  ;;  %v3729_v51 = vcombine.low %v256_v17, %v260_v18 }
 0x21c   :  { %3418 = vst [vmem:[%s5587_s3] sm:$0xff] %v3354_v55  ;;  %v2401_v58 = vpop.f32.mrb[4].mxu1  ;;  %v3738_v55 = vcombine.high %v264_v42, %v268_v43  ;;  %v3742_v59 = vcombine.high %v266_v45, %v270_v46 }
 0x21d   :  { %v3355_v61 = vsel %vm3227_vm1, %v3810_v54, %v3291_v56  ;;  %v3811_v62 = vadd.f32 %v5273_v33, %v2401_v58  ;;  %v2979_v63 = vpop.f32.mrb[4].mxu0  ;;  %v2403_v1 = vpop.f32.mrb[5].mxu1  ;;  %v3733_v54 = vcombine.low %v258_v20, %v262_v21 }
 0x21e   :  { %3419 = vst [vmem:[%s5587_s3 + $0x8] sm:$0xff] %v3355_v61  ;;  %v2981_v3 = vpop.f32.mrb[5].mxu0  ;;  %v2404_v4 = vpop.f32.mrb[6].mxu1 }
 0x21f   :  { %v3812_v7 = vadd.f32 %v3811_v62, %v2979_v63  ;;  %v3813_v8 = vadd.f32 %v5273_v33, %v2404_v4  ;;  %v2982_v9 = vpop.f32.mrb[6].mxu0  ;;  %v2406_v10 = vpop.f32.mrb[7].mxu1 }
 0x220   :  { %v2984_v12 = vpop.f32.mrb[7].mxu0  ;;  %v3741_v10 = vcombine.low %v266_v45, %v270_v46 }
 0x221   :  { %vm3228_vm2 = vcmp.gt.f32.partialorder %v3812_v7, 0.0  ;;  %v3292_v13 = vmul.f32 0.2, %v3812_v7  ;;  %v3814_v14 = vadd.f32 %v3813_v8, %v2982_v9  ;;  %2616 = vmatmul.mubr.bf16.gmra.mrb[112].mxu1 %v3713_v2 }
 0x222   :  { %3194 = vmatmul.mubr.bf16.gmra.mrb[112].mxu0 %v3717_v5  ;;  %2623 = vmatprep.mubr.bf16.mxu1 %v3722_v6 }
 0x223   :  { %v3356_v15 = vsel %vm3228_vm2, %v3812_v7, %v3292_v13  ;;  %vm3229_vm3 = vcmp.gt.f32.partialorder %v3814_v14, 0.0  ;;  %v3293_v16 = vmul.f32 0.2, %v3814_v14  ;;  %3201 = vmatprep.mubr.bf16.mxu0 %v3726_v11  ;;  %v3737_v7 = vcombine.low %v264_v42, %v268_v43 }
 0x224   :  { %3420 = vst [vmem:[%s5587_s3 + $0x10] sm:$0xff] %v3356_v15  ;;  %v2409_v19 = vpop.f32.mrb[8].mxu1 }
 0x225   :  { %v3357_v22 = vsel %vm3229_vm3, %v3814_v14, %v3293_v16  ;;  %v3815_v23 = vadd.f32 %v5273_v33, %v2409_v19  ;;  %v2987_v24 = vpop.f32.mrb[8].mxu0  ;;  %v2411_v25 = vpop.f32.mrb[9].mxu1 }
 0x226   :  { %3421 = vst [vmem:[%s5587_s3 + $0x18] sm:$0xff] %v3357_v22  ;;  %v2989_v27 = vpop.f32.mrb[9].mxu0  ;;  %v2412_v28 = vpop.f32.mrb[10].mxu1 }
 0x227   :  { %v3816_v31 = vadd.f32 %v3815_v23, %v2987_v24  ;;  %v3817_v32 = vadd.f32 %v5273_v33, %v2412_v28  ;;  %v2990_v34 = vpop.f32.mrb[10].mxu0  ;;  %v2414_v35 = vpop.f32.mrb[11].mxu1 }
 0x228   :  { %v2992_v37 = vpop.f32.mrb[11].mxu0 }
 0x229   :  { %vm3230_vm4 = vcmp.gt.f32.partialorder %v3816_v31, 0.0  ;;  %v3294_v38 = vmul.f32 0.2, %v3816_v31  ;;  %v3818_v39 = vadd.f32 %v3817_v32, %v2990_v34  ;;  %2624 = vmatmul.mubr.bf16.gmra.mrb[116].mxu1 %v3721_v26 }
 0x22a   :  { %3202 = vmatmul.mubr.bf16.gmra.mrb[116].mxu0 %v3725_v29  ;;  %2631 = vmatprep.mubr.bf16.mxu1 %v3730_v30 }
 0x22b   :  { %v3358_v40 = vsel %vm3230_vm4, %v3816_v31, %v3294_v38  ;;  %vm3231_vm5 = vcmp.gt.f32.partialorder %v3818_v39, 0.0  ;;  %v3295_v41 = vmul.f32 0.2, %v3818_v39  ;;  %3209 = vmatprep.mubr.bf16.mxu0 %v3734_v36 }
 0x22c   :  { %3422 = vst [vmem:[%s5587_s3 + $0x20] sm:$0xff] %v3358_v40  ;;  %v2417_v44 = vpop.f32.mrb[12].mxu1 }
 0x22d   :  { %v3359_v47 = vsel %vm3231_vm5, %v3818_v39, %v3295_v41  ;;  %v3819_v48 = vadd.f32 %v5273_v33, %v2417_v44  ;;  %v2995_v49 = vpop.f32.mrb[12].mxu0  ;;  %v2419_v50 = vpop.f32.mrb[13].mxu1 }
 0x22e   :  { %3423 = vst [vmem:[%s5587_s3 + $0x28] sm:$0xff] %v3359_v47  ;;  %v2997_v52 = vpop.f32.mrb[13].mxu0  ;;  %v2420_v53 = vpop.f32.mrb[14].mxu1 }
 0x22f   :  { %v3820_v56 = vadd.f32 %v3819_v48, %v2995_v49  ;;  %v3821_v57 = vadd.f32 %v5273_v33, %v2420_v53  ;;  %v2998_v0 = vpop.f32.mrb[14].mxu0  ;;  %v2422_v58 = vpop.f32.mrb[15].mxu1 }
 0x230   :  { %v3000_v60 = vpop.f32.mrb[15].mxu0 }
 0x231   :  { %vm3232_vm6 = vcmp.gt.f32.partialorder %v3820_v56, 0.0  ;;  %v3296_v61 = vmul.f32 0.2, %v3820_v56  ;;  %v3822_v62 = vadd.f32 %v3821_v57, %v2998_v0  ;;  %2632 = vmatmul.mubr.bf16.gmra.mrb[120].mxu1 %v3729_v51 }
 0x232   :  { %3210 = vmatmul.mubr.bf16.gmra.mrb[120].mxu0 %v3733_v54  ;;  %2639 = vmatprep.mubr.bf16.mxu1 %v3738_v55 }
 0x233   :  { %v3360_v63 = vsel %vm3232_vm6, %v3820_v56, %v3296_v61  ;;  %vm3233_vm7 = vcmp.gt.f32.partialorder %v3822_v62, 0.0  ;;  %v3297_v1 = vmul.f32 0.2, %v3822_v62  ;;  %3217 = vmatprep.mubr.bf16.mxu0 %v3742_v59 }
 0x234   :  { %3424 = vst [vmem:[%s5587_s3 + $0x30] sm:$0xff] %v3360_v63  ;;  %v2425_v2 = vpop.f32.mrb[16].mxu1 }
 0x235   :  { %v3361_v3 = vsel %vm3233_vm7, %v3822_v62, %v3297_v1  ;;  %v3823_v4 = vadd.f32 %v5273_v33, %v2425_v2  ;;  %v3003_v5 = vpop.f32.mrb[16].mxu0  ;;  %v2427_v6 = vpop.f32.mrb[17].mxu1 }
 0x236   :  { %3425 = vst [vmem:[%s5587_s3 + $0x38] sm:$0xff] %v3361_v3  ;;  %v3005_v8 = vpop.f32.mrb[17].mxu0  ;;  %v2428_v9 = vpop.f32.mrb[18].mxu1 }
 0x237   :  { %v3824_v11 = vadd.f32 %v3823_v4, %v3003_v5  ;;  %v3825_v12 = vadd.f32 %v5273_v33, %v2428_v9  ;;  %v3006_v13 = vpop.f32.mrb[18].mxu0  ;;  %v2430_v14 = vpop.f32.mrb[19].mxu1 }
 0x238   :  { %v3008_v15 = vpop.f32.mrb[19].mxu0 }
 0x239   :  { %vm3234_vm8 = vcmp.gt.f32.partialorder %v3824_v11, 0.0  ;;  %v3298_v16 = vmul.f32 0.2, %v3824_v11  ;;  %v3826_v17 = vadd.f32 %v3825_v12, %v3006_v13  ;;  %2640 = vmatmul.mubr.bf16.gmra.mrb[124].mxu1 %v3737_v7 }
 0x23a   :  { %3218 = vmatmul.mubr.bf16.gmra.mrb[124].mxu0 %v3741_v10 }
 0x23b   :  { %v3362_v18 = vsel %vm3234_vm8, %v3824_v11, %v3298_v16  ;;  %vm3235_vm9 = vcmp.gt.f32.partialorder %v3826_v17, 0.0  ;;  %v3299_v19 = vmul.f32 0.2, %v3826_v17 }
 0x23c   :  { %3426 = vst [vmem:[%s5587_s3 + $0x40] sm:$0xff] %v3362_v18  ;;  %v2433_v20 = vpop.f32.mrb[20].mxu1 }
 0x23d   :  { %v3363_v21 = vsel %vm3235_vm9, %v3826_v17, %v3299_v19  ;;  %v3827_v22 = vadd.f32 %v5273_v33, %v2433_v20  ;;  %v3011_v23 = vpop.f32.mrb[20].mxu0  ;;  %v2435_v24 = vpop.f32.mrb[21].mxu1 }
 0x23e   :  { %3427 = vst [vmem:[%s5587_s3 + $0x48] sm:$0xff] %v3363_v21  ;;  %v3013_v25 = vpop.f32.mrb[21].mxu0  ;;  %v2436_v26 = vpop.f32.mrb[22].mxu1 }
 0x23f   :  { %v3828_v27 = vadd.f32 %v3827_v22, %v3011_v23  ;;  %v3829_v28 = vadd.f32 %v5273_v33, %v2436_v26  ;;  %v3014_v29 = vpop.f32.mrb[22].mxu0  ;;  %v2438_v30 = vpop.f32.mrb[23].mxu1 }
 0x240   :  { %v3016_v31 = vpop.f32.mrb[23].mxu0 }
 0x241   :  { %vm3236_vm10 = vcmp.gt.f32.partialorder %v3828_v27, 0.0  ;;  %v3300_v32 = vmul.f32 0.2, %v3828_v27  ;;  %v3830_v34 = vadd.f32 %v3829_v28, %v3014_v29 }
 0x243   :  { %v3364_v35 = vsel %vm3236_vm10, %v3828_v27, %v3300_v32  ;;  %vm3237_vm11 = vcmp.gt.f32.partialorder %v3830_v34, 0.0  ;;  %v3301_v36 = vmul.f32 0.2, %v3830_v34 }
 0x244   :  { %3428 = vst [vmem:[%s5587_s3 + $0x50] sm:$0xff] %v3364_v35  ;;  %v2441_v37 = vpop.f32.mrb[24].mxu1 }
 0x245   :  { %v3365_v38 = vsel %vm3237_vm11, %v3830_v34, %v3301_v36  ;;  %v3831_v39 = vadd.f32 %v5273_v33, %v2441_v37  ;;  %v3019_v40 = vpop.f32.mrb[24].mxu0  ;;  %v2443_v41 = vpop.f32.mrb[25].mxu1 }
 0x246   :  { %3429 = vst [vmem:[%s5587_s3 + $0x58] sm:$0xff] %v3365_v38  ;;  %v3021_v42 = vpop.f32.mrb[25].mxu0  ;;  %v2444_v43 = vpop.f32.mrb[26].mxu1 }
 0x247   :  { %v3832_v44 = vadd.f32 %v3831_v39, %v3019_v40  ;;  %v3833_v45 = vadd.f32 %v5273_v33, %v2444_v43  ;;  %v3022_v46 = vpop.f32.mrb[26].mxu0  ;;  %v2446_v47 = vpop.f32.mrb[27].mxu1 }
 0x248   :  { %v3024_v48 = vpop.f32.mrb[27].mxu0 }
 0x249   :  { %vm3238_vm12 = vcmp.gt.f32.partialorder %v3832_v44, 0.0  ;;  %v3302_v49 = vmul.f32 0.2, %v3832_v44  ;;  %v3834_v50 = vadd.f32 %v3833_v45, %v3022_v46 }
 0x24b   :  { %v3366_v51 = vsel %vm3238_vm12, %v3832_v44, %v3302_v49  ;;  %vm3239_vm13 = vcmp.gt.f32.partialorder %v3834_v50, 0.0  ;;  %v3303_v52 = vmul.f32 0.2, %v3834_v50 }
 0x24c   :  { %3430 = vst [vmem:[%s5587_s3 + $0x60] sm:$0xff] %v3366_v51  ;;  %v2449_v53 = vpop.f32.mrb[28].mxu1 }
 0x24d   :  { %v3367_v54 = vsel %vm3239_vm13, %v3834_v50, %v3303_v52  ;;  %v3835_v55 = vadd.f32 %v5273_v33, %v2449_v53  ;;  %v3027_v56 = vpop.f32.mrb[28].mxu0  ;;  %v2451_v57 = vpop.f32.mrb[29].mxu1 }
 0x24e   :  { %3431 = vst [vmem:[%s5587_s3 + $0x68] sm:$0xff] %v3367_v54  ;;  %v3029_v0 = vpop.f32.mrb[29].mxu0  ;;  %v2452_v58 = vpop.f32.mrb[30].mxu1 }
 0x24f   :  { %v3836_v59 = vadd.f32 %v3835_v55, %v3027_v56  ;;  %v3837_v60 = vadd.f32 %v5273_v33, %v2452_v58  ;;  %v3030_v61 = vpop.f32.mrb[30].mxu0  ;;  %v2454_v62 = vpop.f32.mrb[31].mxu1 }
 0x250   :  { %v3032_v63 = vpop.f32.mrb[31].mxu0 }
 0x251   :  { %vm3240_vm14 = vcmp.gt.f32.partialorder %v3836_v59, 0.0  ;;  %v3304_v1 = vmul.f32 0.2, %v3836_v59  ;;  %v3838_v2 = vadd.f32 %v3837_v60, %v3030_v61 }
 0x253   :  { %v3368_v3 = vsel %vm3240_vm14, %v3836_v59, %v3304_v1  ;;  %vm3241_vm15 = vcmp.gt.f32.partialorder %v3838_v2, 0.0  ;;  %v3305_v4 = vmul.f32 0.2, %v3838_v2 }
 0x254   :  { %3432 = vst [vmem:[%s5587_s3 + $0x70] sm:$0xff] %v3368_v3  ;;  %v2457_v5 = vpop.f32.mrb[32].mxu1 }
 0x255   :  { %v3369_v6 = vsel %vm3241_vm15, %v3838_v2, %v3305_v4  ;;  %v3839_v7 = vadd.f32 %v5273_v33, %v2457_v5  ;;  %v3035_v8 = vpop.f32.mrb[32].mxu0  ;;  %v2459_v9 = vpop.f32.mrb[33].mxu1 }
 0x256   :  { %3433 = vst [vmem:[%s5587_s3 + $0x78] sm:$0xff] %v3369_v6  ;;  %v3037_v10 = vpop.f32.mrb[33].mxu0  ;;  %v2460_v11 = vpop.f32.mrb[34].mxu1 }
 0x257   :  { %v3840_v12 = vadd.f32 %v3839_v7, %v3035_v8  ;;  %v3841_v13 = vadd.f32 %v5273_v33, %v2460_v11  ;;  %v3038_v14 = vpop.f32.mrb[34].mxu0  ;;  %v2462_v15 = vpop.f32.mrb[35].mxu1 }
 0x258   :  { %v3040_v16 = vpop.f32.mrb[35].mxu0 }
 0x259   :  { %vm3242_vm0 = vcmp.gt.f32.partialorder %v3840_v12, 0.0  ;;  %v3306_v17 = vmul.f32 0.2, %v3840_v12  ;;  %v3842_v18 = vadd.f32 %v3841_v13, %v3038_v14 }
 0x25b   :  { %v3370_v19 = vsel %vm3242_vm0, %v3840_v12, %v3306_v17  ;;  %vm3243_vm1 = vcmp.gt.f32.partialorder %v3842_v18, 0.0  ;;  %v3307_v20 = vmul.f32 0.2, %v3842_v18 }
 0x25c   :  { %3434 = vst [vmem:[%s5587_s3 + $0x80] sm:$0xff] %v3370_v19  ;;  %v2465_v21 = vpop.f32.mrb[36].mxu1 }
 0x25d   :  { %v3371_v22 = vsel %vm3243_vm1, %v3842_v18, %v3307_v20  ;;  %v3843_v23 = vadd.f32 %v5273_v33, %v2465_v21  ;;  %v3043_v24 = vpop.f32.mrb[36].mxu0  ;;  %v2467_v25 = vpop.f32.mrb[37].mxu1 }
 0x25e   :  { %3435 = vst [vmem:[%s5587_s3 + $0x88] sm:$0xff] %v3371_v22  ;;  %v3045_v26 = vpop.f32.mrb[37].mxu0  ;;  %v2468_v27 = vpop.f32.mrb[38].mxu1 }
 0x25f   :  { %v3844_v28 = vadd.f32 %v3843_v23, %v3043_v24  ;;  %v3845_v29 = vadd.f32 %v5273_v33, %v2468_v27  ;;  %v3046_v30 = vpop.f32.mrb[38].mxu0  ;;  %v2470_v31 = vpop.f32.mrb[39].mxu1 }
 0x260   :  { %v3048_v32 = vpop.f32.mrb[39].mxu0 }
 0x261   :  { %vm3244_vm2 = vcmp.gt.f32.partialorder %v3844_v28, 0.0  ;;  %v3308_v34 = vmul.f32 0.2, %v3844_v28  ;;  %v3846_v35 = vadd.f32 %v3845_v29, %v3046_v30 }
 0x263   :  { %v3372_v36 = vsel %vm3244_vm2, %v3844_v28, %v3308_v34  ;;  %vm3245_vm3 = vcmp.gt.f32.partialorder %v3846_v35, 0.0  ;;  %v3309_v37 = vmul.f32 0.2, %v3846_v35 }
 0x264   :  { %3436 = vst [vmem:[%s5587_s3 + $0x90] sm:$0xff] %v3372_v36  ;;  %v2473_v38 = vpop.f32.mrb[40].mxu1 }
 0x265   :  { %v3373_v39 = vsel %vm3245_vm3, %v3846_v35, %v3309_v37  ;;  %v3847_v40 = vadd.f32 %v5273_v33, %v2473_v38  ;;  %v3051_v41 = vpop.f32.mrb[40].mxu0  ;;  %v2475_v42 = vpop.f32.mrb[41].mxu1 }
 0x266   :  { %3437 = vst [vmem:[%s5587_s3 + $0x98] sm:$0xff] %v3373_v39  ;;  %v3053_v43 = vpop.f32.mrb[41].mxu0  ;;  %v2476_v44 = vpop.f32.mrb[42].mxu1 }
 0x267   :  { %v3848_v45 = vadd.f32 %v3847_v40, %v3051_v41  ;;  %v3849_v46 = vadd.f32 %v5273_v33, %v2476_v44  ;;  %v3054_v47 = vpop.f32.mrb[42].mxu0  ;;  %v2478_v48 = vpop.f32.mrb[43].mxu1 }
 0x268   :  { %v3056_v49 = vpop.f32.mrb[43].mxu0 }
 0x269   :  { %vm3246_vm4 = vcmp.gt.f32.partialorder %v3848_v45, 0.0  ;;  %v3310_v50 = vmul.f32 0.2, %v3848_v45  ;;  %v3850_v51 = vadd.f32 %v3849_v46, %v3054_v47 }
 0x26b   :  { %v3374_v52 = vsel %vm3246_vm4, %v3848_v45, %v3310_v50  ;;  %vm3247_vm5 = vcmp.gt.f32.partialorder %v3850_v51, 0.0  ;;  %v3311_v53 = vmul.f32 0.2, %v3850_v51 }
 0x26c   :  { %3438 = vst [vmem:[%s5587_s3 + $0xa0] sm:$0xff] %v3374_v52  ;;  %v2481_v54 = vpop.f32.mrb[44].mxu1 }
 0x26d   :  { %v3375_v55 = vsel %vm3247_vm5, %v3850_v51, %v3311_v53  ;;  %v3851_v56 = vadd.f32 %v5273_v33, %v2481_v54  ;;  %v3059_v57 = vpop.f32.mrb[44].mxu0  ;;  %v2483_v0 = vpop.f32.mrb[45].mxu1 }
 0x26e   :  { %3439 = vst [vmem:[%s5587_s3 + $0xa8] sm:$0xff] %v3375_v55  ;;  %v3061_v58 = vpop.f32.mrb[45].mxu0  ;;  %v2484_v59 = vpop.f32.mrb[46].mxu1 }
 0x26f   :  { %v3852_v60 = vadd.f32 %v3851_v56, %v3059_v57  ;;  %v3853_v61 = vadd.f32 %v5273_v33, %v2484_v59  ;;  %v3062_v62 = vpop.f32.mrb[46].mxu0  ;;  %v2486_v63 = vpop.f32.mrb[47].mxu1 }
 0x270   :  { %v3064_v1 = vpop.f32.mrb[47].mxu0 }
 0x271   :  { %vm3248_vm6 = vcmp.gt.f32.partialorder %v3852_v60, 0.0  ;;  %v3312_v2 = vmul.f32 0.2, %v3852_v60  ;;  %v3854_v3 = vadd.f32 %v3853_v61, %v3062_v62 }
 0x273   :  { %v3376_v4 = vsel %vm3248_vm6, %v3852_v60, %v3312_v2  ;;  %vm3249_vm7 = vcmp.gt.f32.partialorder %v3854_v3, 0.0  ;;  %v3313_v5 = vmul.f32 0.2, %v3854_v3 }
 0x274   :  { %3440 = vst [vmem:[%s5587_s3 + $0xb0] sm:$0xff] %v3376_v4  ;;  %v2489_v6 = vpop.f32.mrb[48].mxu1 }
 0x275   :  { %v3377_v7 = vsel %vm3249_vm7, %v3854_v3, %v3313_v5  ;;  %v3855_v8 = vadd.f32 %v5273_v33, %v2489_v6  ;;  %v3067_v9 = vpop.f32.mrb[48].mxu0  ;;  %v2491_v10 = vpop.f32.mrb[49].mxu1 }
 0x276   :  { %3441 = vst [vmem:[%s5587_s3 + $0xb8] sm:$0xff] %v3377_v7  ;;  %v3069_v11 = vpop.f32.mrb[49].mxu0  ;;  %v2492_v12 = vpop.f32.mrb[50].mxu1 }
 0x277   :  { %v3856_v13 = vadd.f32 %v3855_v8, %v3067_v9  ;;  %v3857_v14 = vadd.f32 %v5273_v33, %v2492_v12  ;;  %v3070_v15 = vpop.f32.mrb[50].mxu0  ;;  %v2494_v16 = vpop.f32.mrb[51].mxu1 }
 0x278   :  { %v3072_v17 = vpop.f32.mrb[51].mxu0 }
 0x279   :  { %vm3250_vm8 = vcmp.gt.f32.partialorder %v3856_v13, 0.0  ;;  %v3314_v18 = vmul.f32 0.2, %v3856_v13  ;;  %v3858_v19 = vadd.f32 %v3857_v14, %v3070_v15 }
 0x27b   :  { %v3378_v20 = vsel %vm3250_vm8, %v3856_v13, %v3314_v18  ;;  %vm3251_vm9 = vcmp.gt.f32.partialorder %v3858_v19, 0.0  ;;  %v3315_v21 = vmul.f32 0.2, %v3858_v19 }
 0x27c   :  { %3442 = vst [vmem:[%s5587_s3 + $0xc0] sm:$0xff] %v3378_v20  ;;  %v2497_v22 = vpop.f32.mrb[52].mxu1 }
 0x27d   :  { %v3379_v23 = vsel %vm3251_vm9, %v3858_v19, %v3315_v21  ;;  %v3859_v24 = vadd.f32 %v5273_v33, %v2497_v22  ;;  %v3075_v25 = vpop.f32.mrb[52].mxu0  ;;  %v2499_v26 = vpop.f32.mrb[53].mxu1 }
 0x27e   :  { %3443 = vst [vmem:[%s5587_s3 + $0xc8] sm:$0xff] %v3379_v23  ;;  %v3077_v27 = vpop.f32.mrb[53].mxu0  ;;  %v2500_v28 = vpop.f32.mrb[54].mxu1 }
 0x27f   :  { %v3860_v29 = vadd.f32 %v3859_v24, %v3075_v25  ;;  %v3861_v30 = vadd.f32 %v5273_v33, %v2500_v28  ;;  %v3078_v31 = vpop.f32.mrb[54].mxu0  ;;  %v2502_v32 = vpop.f32.mrb[55].mxu1 }
 0x280   :  { %v3080_v34 = vpop.f32.mrb[55].mxu0 }
 0x281   :  { %vm3252_vm10 = vcmp.gt.f32.partialorder %v3860_v29, 0.0  ;;  %v3316_v35 = vmul.f32 0.2, %v3860_v29  ;;  %v3862_v36 = vadd.f32 %v3861_v30, %v3078_v31 }
 0x283   :  { %v3380_v37 = vsel %vm3252_vm10, %v3860_v29, %v3316_v35  ;;  %vm3253_vm11 = vcmp.gt.f32.partialorder %v3862_v36, 0.0  ;;  %v3317_v38 = vmul.f32 0.2, %v3862_v36 }
 0x284   :  { %3444 = vst [vmem:[%s5587_s3 + $0xd0] sm:$0xff] %v3380_v37  ;;  %v2505_v39 = vpop.f32.mrb[56].mxu1 }
 0x285   :  { %v3381_v40 = vsel %vm3253_vm11, %v3862_v36, %v3317_v38  ;;  %v3863_v41 = vadd.f32 %v5273_v33, %v2505_v39  ;;  %v3083_v42 = vpop.f32.mrb[56].mxu0  ;;  %v2507_v43 = vpop.f32.mrb[57].mxu1 }
 0x286   :  { %3445 = vst [vmem:[%s5587_s3 + $0xd8] sm:$0xff] %v3381_v40  ;;  %v3085_v44 = vpop.f32.mrb[57].mxu0  ;;  %v2508_v45 = vpop.f32.mrb[58].mxu1 }
 0x287   :  { %v3864_v46 = vadd.f32 %v3863_v41, %v3083_v42  ;;  %v3865_v47 = vadd.f32 %v5273_v33, %v2508_v45  ;;  %v3086_v48 = vpop.f32.mrb[58].mxu0  ;;  %v2510_v49 = vpop.f32.mrb[59].mxu1 }
 0x288   :  { %v3088_v50 = vpop.f32.mrb[59].mxu0 }
 0x289   :  { %vm3254_vm12 = vcmp.gt.f32.partialorder %v3864_v46, 0.0  ;;  %v3318_v51 = vmul.f32 0.2, %v3864_v46  ;;  %v3866_v52 = vadd.f32 %v3865_v47, %v3086_v48 }
 0x28b   :  { %v3382_v53 = vsel %vm3254_vm12, %v3864_v46, %v3318_v51  ;;  %vm3255_vm13 = vcmp.gt.f32.partialorder %v3866_v52, 0.0  ;;  %v3319_v54 = vmul.f32 0.2, %v3866_v52 }
 0x28c   :  { %3446 = vst [vmem:[%s5587_s3 + $0xe0] sm:$0xff] %v3382_v53  ;;  %v2513_v55 = vpop.f32.mrb[60].mxu1 }
 0x28d   :  { %v3383_v56 = vsel %vm3255_vm13, %v3866_v52, %v3319_v54  ;;  %v3867_v57 = vadd.f32 %v5273_v33, %v2513_v55  ;;  %v3091_v0 = vpop.f32.mrb[60].mxu0  ;;  %v2515_v58 = vpop.f32.mrb[61].mxu1 }
 0x28e   :  { %3447 = vst [vmem:[%s5587_s3 + $0xe8] sm:$0xff] %v3383_v56  ;;  %v3093_v59 = vpop.f32.mrb[61].mxu0  ;;  %v2516_v60 = vpop.f32.mrb[62].mxu1 }
 0x28f   :  { %v3868_v61 = vadd.f32 %v3867_v57, %v3091_v0  ;;  %v3869_v62 = vadd.f32 %v5273_v33, %v2516_v60  ;;  %v3094_v63 = vpop.f32.mrb[62].mxu0  ;;  %v2518_v1 = vpop.f32.mrb[63].mxu1 }
 0x290   :  { %v3096_v2 = vpop.f32.mrb[63].mxu0 }
 0x291   :  { %vm3256_vm14 = vcmp.gt.f32.partialorder %v3868_v61, 0.0  ;;  %v3320_v3 = vmul.f32 0.2, %v3868_v61  ;;  %v3870_v4 = vadd.f32 %v3869_v62, %v3094_v63 }
 0x293   :  { %v3384_v5 = vsel %vm3256_vm14, %v3868_v61, %v3320_v3  ;;  %vm3257_vm15 = vcmp.gt.f32.partialorder %v3870_v4, 0.0  ;;  %v3321_v6 = vmul.f32 0.2, %v3870_v4 }
 0x294   :  { %3448 = vst [vmem:[%s5587_s3 + $0xf0] sm:$0xff] %v3384_v5  ;;  %v2521_v7 = vpop.f32.mrb[64].mxu1 }
 0x295   :  { %v3385_v8 = vsel %vm3257_vm15, %v3870_v4, %v3321_v6  ;;  %v3871_v9 = vadd.f32 %v5273_v33, %v2521_v7  ;;  %v3099_v10 = vpop.f32.mrb[64].mxu0  ;;  %v2523_v11 = vpop.f32.mrb[65].mxu1 }
 0x296   :  { %3449 = vst [vmem:[%s5587_s3 + $0xf8] sm:$0xff] %v3385_v8  ;;  %v3101_v12 = vpop.f32.mrb[65].mxu0  ;;  %v2524_v13 = vpop.f32.mrb[66].mxu1 }
 0x297   :  { %v3872_v14 = vadd.f32 %v3871_v9, %v3099_v10  ;;  %v3873_v15 = vadd.f32 %v5273_v33, %v2524_v13  ;;  %v3102_v16 = vpop.f32.mrb[66].mxu0  ;;  %v2526_v17 = vpop.f32.mrb[67].mxu1 }
 0x298   :  { %v3104_v18 = vpop.f32.mrb[67].mxu0 }
 0x299   :  { %vm3258_vm0 = vcmp.gt.f32.partialorder %v3872_v14, 0.0  ;;  %v3322_v19 = vmul.f32 0.2, %v3872_v14  ;;  %v3874_v20 = vadd.f32 %v3873_v15, %v3102_v16 }
 0x29b   :  { %v3386_v21 = vsel %vm3258_vm0, %v3872_v14, %v3322_v19  ;;  %vm3259_vm1 = vcmp.gt.f32.partialorder %v3874_v20, 0.0  ;;  %v3323_v22 = vmul.f32 0.2, %v3874_v20 }
 0x29c   :  { %3450 = vst [vmem:[%s5587_s3 + $0x100] sm:$0xff] %v3386_v21  ;;  %v2529_v23 = vpop.f32.mrb[68].mxu1 }
 0x29d   :  { %v3387_v24 = vsel %vm3259_vm1, %v3874_v20, %v3323_v22  ;;  %v3875_v25 = vadd.f32 %v5273_v33, %v2529_v23  ;;  %v3107_v26 = vpop.f32.mrb[68].mxu0  ;;  %v2531_v27 = vpop.f32.mrb[69].mxu1 }
 0x29e   :  { %3451 = vst [vmem:[%s5587_s3 + $0x108] sm:$0xff] %v3387_v24  ;;  %v3109_v28 = vpop.f32.mrb[69].mxu0  ;;  %v2532_v29 = vpop.f32.mrb[70].mxu1 }
 0x29f   :  { %v3876_v30 = vadd.f32 %v3875_v25, %v3107_v26  ;;  %v3877_v31 = vadd.f32 %v5273_v33, %v2532_v29  ;;  %v3110_v32 = vpop.f32.mrb[70].mxu0  ;;  %v2534_v34 = vpop.f32.mrb[71].mxu1 }
 0x2a0   :  { %v3112_v35 = vpop.f32.mrb[71].mxu0 }
 0x2a1   :  { %vm3260_vm2 = vcmp.gt.f32.partialorder %v3876_v30, 0.0  ;;  %v3324_v36 = vmul.f32 0.2, %v3876_v30  ;;  %v3878_v37 = vadd.f32 %v3877_v31, %v3110_v32 }
 0x2a3   :  { %v3388_v38 = vsel %vm3260_vm2, %v3876_v30, %v3324_v36  ;;  %vm3261_vm3 = vcmp.gt.f32.partialorder %v3878_v37, 0.0  ;;  %v3325_v39 = vmul.f32 0.2, %v3878_v37 }
 0x2a4   :  { %3452 = vst [vmem:[%s5587_s3 + $0x110] sm:$0xff] %v3388_v38  ;;  %v2537_v40 = vpop.f32.mrb[72].mxu1 }
 0x2a5   :  { %v3389_v41 = vsel %vm3261_vm3, %v3878_v37, %v3325_v39  ;;  %v3879_v42 = vadd.f32 %v5273_v33, %v2537_v40  ;;  %v3115_v43 = vpop.f32.mrb[72].mxu0  ;;  %v2539_v44 = vpop.f32.mrb[73].mxu1 }
 0x2a6   :  { %3453 = vst [vmem:[%s5587_s3 + $0x118] sm:$0xff] %v3389_v41  ;;  %v3117_v45 = vpop.f32.mrb[73].mxu0  ;;  %v2540_v46 = vpop.f32.mrb[74].mxu1 }
 0x2a7   :  { %v3880_v47 = vadd.f32 %v3879_v42, %v3115_v43  ;;  %v3881_v48 = vadd.f32 %v5273_v33, %v2540_v46  ;;  %v3118_v49 = vpop.f32.mrb[74].mxu0  ;;  %v2542_v50 = vpop.f32.mrb[75].mxu1 }
 0x2a8   :  { %v3120_v51 = vpop.f32.mrb[75].mxu0 }
 0x2a9   :  { %vm3262_vm4 = vcmp.gt.f32.partialorder %v3880_v47, 0.0  ;;  %v3326_v52 = vmul.f32 0.2, %v3880_v47  ;;  %v3882_v53 = vadd.f32 %v3881_v48, %v3118_v49 }
 0x2ab   :  { %v3390_v54 = vsel %vm3262_vm4, %v3880_v47, %v3326_v52  ;;  %vm3263_vm5 = vcmp.gt.f32.partialorder %v3882_v53, 0.0  ;;  %v3327_v55 = vmul.f32 0.2, %v3882_v53 }
 0x2ac   :  { %3454 = vst [vmem:[%s5587_s3 + $0x120] sm:$0xff] %v3390_v54  ;;  %v2545_v56 = vpop.f32.mrb[76].mxu1 }
 0x2ad   :  { %v3391_v57 = vsel %vm3263_vm5, %v3882_v53, %v3327_v55  ;;  %v3883_v0 = vadd.f32 %v5273_v33, %v2545_v56  ;;  %v3123_v58 = vpop.f32.mrb[76].mxu0  ;;  %v2547_v59 = vpop.f32.mrb[77].mxu1 }
 0x2ae   :  { %3455 = vst [vmem:[%s5587_s3 + $0x128] sm:$0xff] %v3391_v57  ;;  %v3125_v60 = vpop.f32.mrb[77].mxu0  ;;  %v2548_v61 = vpop.f32.mrb[78].mxu1 }
 0x2af   :  { %v3884_v62 = vadd.f32 %v3883_v0, %v3123_v58  ;;  %v3885_v63 = vadd.f32 %v5273_v33, %v2548_v61  ;;  %v3126_v1 = vpop.f32.mrb[78].mxu0  ;;  %v2550_v2 = vpop.f32.mrb[79].mxu1  ;;  %v5507_v58 = vld [vmem:[%s5586_s2] ss:$0 sm:$0xff] }
 0x2b0   :  { %v3128_v3 = vpop.f32.mrb[79].mxu0 }
 0x2b1   :  { %vm3264_vm6 = vcmp.gt.f32.partialorder %v3884_v62, 0.0  ;;  %v3328_v4 = vmul.f32 0.2, %v3884_v62  ;;  %v3886_v5 = vadd.f32 %v3885_v63, %v3126_v1 }
 0x2b3   :  { %v3392_v6 = vsel %vm3264_vm6, %v3884_v62, %v3328_v4  ;;  %vm3265_vm7 = vcmp.gt.f32.partialorder %v3886_v5, 0.0  ;;  %v3329_v7 = vmul.f32 0.2, %v3886_v5 }
 0x2b4   :  { %3456 = vst [vmem:[%s5587_s3 + $0x130] sm:$0xff] %v3392_v6  ;;  %v2553_v8 = vpop.f32.mrb[80].mxu1 }
 0x2b5   :  { %v3393_v9 = vsel %vm3265_vm7, %v3886_v5, %v3329_v7  ;;  %v3887_v10 = vadd.f32 %v5273_v33, %v2553_v8  ;;  %v3131_v11 = vpop.f32.mrb[80].mxu0  ;;  %v2555_v12 = vpop.f32.mrb[81].mxu1 }
 0x2b6   :  { %3457 = vst [vmem:[%s5587_s3 + $0x138] sm:$0xff] %v3393_v9  ;;  %v3133_v13 = vpop.f32.mrb[81].mxu0  ;;  %v2556_v14 = vpop.f32.mrb[82].mxu1 }
 0x2b7   :  { %v3888_v15 = vadd.f32 %v3887_v10, %v3131_v11  ;;  %v3889_v16 = vadd.f32 %v5273_v33, %v2556_v14  ;;  %v3134_v17 = vpop.f32.mrb[82].mxu0  ;;  %v2558_v18 = vpop.f32.mrb[83].mxu1 }
 0x2b8   :  { %v3136_v19 = vpop.f32.mrb[83].mxu0 }
 0x2b9   :  { %vm3266_vm8 = vcmp.gt.f32.partialorder %v3888_v15, 0.0  ;;  %v3330_v20 = vmul.f32 0.2, %v3888_v15  ;;  %v3890_v21 = vadd.f32 %v3889_v16, %v3134_v17 }
 0x2bb   :  { %v3394_v22 = vsel %vm3266_vm8, %v3888_v15, %v3330_v20  ;;  %vm3267_vm9 = vcmp.gt.f32.partialorder %v3890_v21, 0.0  ;;  %v3331_v23 = vmul.f32 0.2, %v3890_v21 }
 0x2bc   :  { %3458 = vst [vmem:[%s5587_s3 + $0x140] sm:$0xff] %v3394_v22  ;;  %v2561_v24 = vpop.f32.mrb[84].mxu1 }
 0x2bd   :  { %v3395_v25 = vsel %vm3267_vm9, %v3890_v21, %v3331_v23  ;;  %v3891_v26 = vadd.f32 %v5273_v33, %v2561_v24  ;;  %v3139_v27 = vpop.f32.mrb[84].mxu0  ;;  %v2563_v28 = vpop.f32.mrb[85].mxu1 }
 0x2be   :  { %3459 = vst [vmem:[%s5587_s3 + $0x148] sm:$0xff] %v3395_v25  ;;  %v3141_v29 = vpop.f32.mrb[85].mxu0  ;;  %v2564_v30 = vpop.f32.mrb[86].mxu1 }
 0x2bf   :  { %v3892_v31 = vadd.f32 %v3891_v26, %v3139_v27  ;;  %v3893_v32 = vadd.f32 %v5273_v33, %v2564_v30  ;;  %v3142_v34 = vpop.f32.mrb[86].mxu0  ;;  %v2566_v35 = vpop.f32.mrb[87].mxu1 }
 0x2c0   :  { %v3144_v36 = vpop.f32.mrb[87].mxu0 }
 0x2c1   :  { %vm3268_vm10 = vcmp.gt.f32.partialorder %v3892_v31, 0.0  ;;  %v3332_v37 = vmul.f32 0.2, %v3892_v31  ;;  %v3894_v38 = vadd.f32 %v3893_v32, %v3142_v34 }
 0x2c3   :  { %v3396_v39 = vsel %vm3268_vm10, %v3892_v31, %v3332_v37  ;;  %vm3269_vm11 = vcmp.gt.f32.partialorder %v3894_v38, 0.0  ;;  %v3333_v40 = vmul.f32 0.2, %v3894_v38 }
 0x2c4   :  { %3460 = vst [vmem:[%s5587_s3 + $0x150] sm:$0xff] %v3396_v39  ;;  %v2569_v41 = vpop.f32.mrb[88].mxu1 }
 0x2c5   :  { %v3397_v42 = vsel %vm3269_vm11, %v3894_v38, %v3333_v40  ;;  %v3895_v43 = vadd.f32 %v5273_v33, %v2569_v41  ;;  %v3147_v44 = vpop.f32.mrb[88].mxu0  ;;  %v2571_v45 = vpop.f32.mrb[89].mxu1 }
 0x2c6   :  { %3461 = vst [vmem:[%s5587_s3 + $0x158] sm:$0xff] %v3397_v42  ;;  %v3149_v46 = vpop.f32.mrb[89].mxu0  ;;  %v2572_v47 = vpop.f32.mrb[90].mxu1 }
 0x2c7   :  { %v3896_v48 = vadd.f32 %v3895_v43, %v3147_v44  ;;  %v3897_v49 = vadd.f32 %v5273_v33, %v2572_v47  ;;  %v3150_v50 = vpop.f32.mrb[90].mxu0  ;;  %v2574_v51 = vpop.f32.mrb[91].mxu1 }
 0x2c8   :  { %v3152_v52 = vpop.f32.mrb[91].mxu0 }
 0x2c9   :  { %vm3270_vm12 = vcmp.gt.f32.partialorder %v3896_v48, 0.0  ;;  %v3334_v53 = vmul.f32 0.2, %v3896_v48  ;;  %v3898_v54 = vadd.f32 %v3897_v49, %v3150_v50 }
 0x2cb   :  { %v3398_v55 = vsel %vm3270_vm12, %v3896_v48, %v3334_v53  ;;  %vm3271_vm13 = vcmp.gt.f32.partialorder %v3898_v54, 0.0  ;;  %v3335_v56 = vmul.f32 0.2, %v3898_v54 }
 0x2cc   :  { %3462 = vst [vmem:[%s5587_s3 + $0x160] sm:$0xff] %v3398_v55  ;;  %v2577_v57 = vpop.f32.mrb[92].mxu1 }
 0x2cd   :  { %v3399_v0 = vsel %vm3271_vm13, %v3898_v54, %v3335_v56  ;;  %v3899_v33 = vadd.f32 %v5507_v58, %v2577_v57  ;;  %v3155_v59 = vpop.f32.mrb[92].mxu0  ;;  %v2579_v60 = vpop.f32.mrb[93].mxu1 }
 0x2ce   :  { %3463 = vst [vmem:[%s5587_s3 + $0x168] sm:$0xff] %v3399_v0  ;;  %v3157_v61 = vpop.f32.mrb[93].mxu0  ;;  %v2580_v62 = vpop.f32.mrb[94].mxu1 }
 0x2cf   :  { %v3900_v63 = vadd.f32 %v3899_v33, %v3155_v59  ;;  %v3901_v1 = vadd.f32 %v5507_v58, %v2580_v62  ;;  %v3158_v2 = vpop.f32.mrb[94].mxu0  ;;  %v2582_v3 = vpop.f32.mrb[95].mxu1 }
 0x2d0   :  { %v3160_v4 = vpop.f32.mrb[95].mxu0 }
 0x2d1   :  { %vm3272_vm14 = vcmp.gt.f32.partialorder %v3900_v63, 0.0  ;;  %v3336_v5 = vmul.f32 0.2, %v3900_v63  ;;  %v3902_v6 = vadd.f32 %v3901_v1, %v3158_v2 }
 0x2d3   :  { %v3400_v7 = vsel %vm3272_vm14, %v3900_v63, %v3336_v5  ;;  %vm3273_vm15 = vcmp.gt.f32.partialorder %v3902_v6, 0.0  ;;  %v3337_v8 = vmul.f32 0.2, %v3902_v6 }
 0x2d4   :  { %3464 = vst [vmem:[%s5587_s3 + $0x170] sm:$0xff] %v3400_v7  ;;  %v2585_v9 = vpop.f32.mrb[96].mxu1 }
 0x2d5   :  { %v3401_v10 = vsel %vm3273_vm15, %v3902_v6, %v3337_v8  ;;  %v3903_v11 = vadd.f32 %v5507_v58, %v2585_v9  ;;  %v3163_v12 = vpop.f32.mrb[96].mxu0  ;;  %v2587_v13 = vpop.f32.mrb[97].mxu1 }
 0x2d6   :  { %3465 = vst [vmem:[%s5587_s3 + $0x178] sm:$0xff] %v3401_v10  ;;  %v3165_v14 = vpop.f32.mrb[97].mxu0  ;;  %v2588_v15 = vpop.f32.mrb[98].mxu1 }
 0x2d7   :  { %v3904_v16 = vadd.f32 %v3903_v11, %v3163_v12  ;;  %v3905_v17 = vadd.f32 %v5507_v58, %v2588_v15  ;;  %v3166_v18 = vpop.f32.mrb[98].mxu0  ;;  %v2590_v19 = vpop.f32.mrb[99].mxu1 }
 0x2d8   :  { %v3168_v20 = vpop.f32.mrb[99].mxu0 }
 0x2d9   :  { %vm3274_vm0 = vcmp.gt.f32.partialorder %v3904_v16, 0.0  ;;  %v3338_v21 = vmul.f32 0.2, %v3904_v16  ;;  %v3906_v22 = vadd.f32 %v3905_v17, %v3166_v18 }
 0x2db   :  { %v3402_v23 = vsel %vm3274_vm0, %v3904_v16, %v3338_v21  ;;  %vm3275_vm1 = vcmp.gt.f32.partialorder %v3906_v22, 0.0  ;;  %v3339_v24 = vmul.f32 0.2, %v3906_v22 }
 0x2dc   :  { %3466 = vst [vmem:[%s5587_s3 + $0x180] sm:$0xff] %v3402_v23  ;;  %v2593_v25 = vpop.f32.mrb[100].mxu1 }
 0x2dd   :  { %v3403_v26 = vsel %vm3275_vm1, %v3906_v22, %v3339_v24  ;;  %v3907_v27 = vadd.f32 %v5507_v58, %v2593_v25  ;;  %v3171_v28 = vpop.f32.mrb[100].mxu0  ;;  %v2595_v29 = vpop.f32.mrb[101].mxu1 }
 0x2de   :  { %3467 = vst [vmem:[%s5587_s3 + $0x188] sm:$0xff] %v3403_v26  ;;  %v3173_v30 = vpop.f32.mrb[101].mxu0  ;;  %v2596_v31 = vpop.f32.mrb[102].mxu1 }
 0x2df   :  { %v3908_v32 = vadd.f32 %v3907_v27, %v3171_v28  ;;  %v3909_v34 = vadd.f32 %v5507_v58, %v2596_v31  ;;  %v3174_v35 = vpop.f32.mrb[102].mxu0  ;;  %v2598_v36 = vpop.f32.mrb[103].mxu1 }
 0x2e0   :  { %v3176_v37 = vpop.f32.mrb[103].mxu0 }
 0x2e1   :  { %vm3276_vm2 = vcmp.gt.f32.partialorder %v3908_v32, 0.0  ;;  %v3340_v38 = vmul.f32 0.2, %v3908_v32  ;;  %v3910_v39 = vadd.f32 %v3909_v34, %v3174_v35 }
 0x2e3   :  { %v3404_v40 = vsel %vm3276_vm2, %v3908_v32, %v3340_v38  ;;  %vm3277_vm3 = vcmp.gt.f32.partialorder %v3910_v39, 0.0  ;;  %v3341_v41 = vmul.f32 0.2, %v3910_v39 }
 0x2e4   :  { %3468 = vst [vmem:[%s5587_s3 + $0x190] sm:$0xff] %v3404_v40  ;;  %v2601_v42 = vpop.f32.mrb[104].mxu1 }
 0x2e5   :  { %v3405_v43 = vsel %vm3277_vm3, %v3910_v39, %v3341_v41  ;;  %v3911_v44 = vadd.f32 %v5507_v58, %v2601_v42  ;;  %v3179_v45 = vpop.f32.mrb[104].mxu0  ;;  %v2603_v46 = vpop.f32.mrb[105].mxu1 }
 0x2e6   :  { %3469 = vst [vmem:[%s5587_s3 + $0x198] sm:$0xff] %v3405_v43  ;;  %v3181_v47 = vpop.f32.mrb[105].mxu0  ;;  %v2604_v48 = vpop.f32.mrb[106].mxu1 }
 0x2e7   :  { %v3912_v49 = vadd.f32 %v3911_v44, %v3179_v45  ;;  %v3913_v50 = vadd.f32 %v5507_v58, %v2604_v48  ;;  %v3182_v51 = vpop.f32.mrb[106].mxu0  ;;  %v2606_v52 = vpop.f32.mrb[107].mxu1 }
 0x2e8   :  { %v3184_v53 = vpop.f32.mrb[107].mxu0 }
 0x2e9   :  { %vm3278_vm4 = vcmp.gt.f32.partialorder %v3912_v49, 0.0  ;;  %v3342_v54 = vmul.f32 0.2, %v3912_v49  ;;  %v3914_v55 = vadd.f32 %v3913_v50, %v3182_v51 }
 0x2eb   :  { %v3406_v56 = vsel %vm3278_vm4, %v3912_v49, %v3342_v54  ;;  %vm3279_vm5 = vcmp.gt.f32.partialorder %v3914_v55, 0.0  ;;  %v3343_v57 = vmul.f32 0.2, %v3914_v55 }
 0x2ec   :  { %3470 = vst [vmem:[%s5587_s3 + $0x1a0] sm:$0xff] %v3406_v56  ;;  %v2609_v0 = vpop.f32.mrb[108].mxu1 }
 0x2ed   :  { %v3407_v33 = vsel %vm3279_vm5, %v3914_v55, %v3343_v57  ;;  %v3915_v59 = vadd.f32 %v5507_v58, %v2609_v0  ;;  %v3187_v60 = vpop.f32.mrb[108].mxu0  ;;  %v2611_v61 = vpop.f32.mrb[109].mxu1 }
 0x2ee   :  { %3471 = vst [vmem:[%s5587_s3 + $0x1a8] sm:$0xff] %v3407_v33  ;;  %v3189_v62 = vpop.f32.mrb[109].mxu0  ;;  %v2612_v63 = vpop.f32.mrb[110].mxu1 }
 0x2ef   :  { %v3916_v1 = vadd.f32 %v3915_v59, %v3187_v60  ;;  %v3917_v2 = vadd.f32 %v5507_v58, %v2612_v63  ;;  %v3190_v3 = vpop.f32.mrb[110].mxu0  ;;  %v2614_v4 = vpop.f32.mrb[111].mxu1 }
 0x2f0   :  { %v3192_v5 = vpop.f32.mrb[111].mxu0 }
 0x2f1   :  { %vm3280_vm6 = vcmp.gt.f32.partialorder %v3916_v1, 0.0  ;;  %v3344_v6 = vmul.f32 0.2, %v3916_v1  ;;  %v3918_v7 = vadd.f32 %v3917_v2, %v3190_v3 }
 0x2f3   :  { %v3408_v8 = vsel %vm3280_vm6, %v3916_v1, %v3344_v6  ;;  %vm3281_vm7 = vcmp.gt.f32.partialorder %v3918_v7, 0.0  ;;  %v3345_v9 = vmul.f32 0.2, %v3918_v7 }
 0x2f4   :  { %3472 = vst [vmem:[%s5587_s3 + $0x1b0] sm:$0xff] %v3408_v8  ;;  %v2617_v10 = vpop.f32.mrb[112].mxu1 }
 0x2f5   :  { %v3409_v11 = vsel %vm3281_vm7, %v3918_v7, %v3345_v9  ;;  %v3919_v12 = vadd.f32 %v5507_v58, %v2617_v10  ;;  %v3195_v13 = vpop.f32.mrb[112].mxu0  ;;  %v2619_v14 = vpop.f32.mrb[113].mxu1 }
 0x2f6   :  { %3473 = vst [vmem:[%s5587_s3 + $0x1b8] sm:$0xff] %v3409_v11  ;;  %v3197_v15 = vpop.f32.mrb[113].mxu0  ;;  %v2620_v16 = vpop.f32.mrb[114].mxu1 }
 0x2f7   :  { %v3920_v17 = vadd.f32 %v3919_v12, %v3195_v13  ;;  %v3921_v18 = vadd.f32 %v5507_v58, %v2620_v16  ;;  %v3198_v19 = vpop.f32.mrb[114].mxu0  ;;  %v2622_v20 = vpop.f32.mrb[115].mxu1 }
 0x2f8   :  { %v3200_v21 = vpop.f32.mrb[115].mxu0 }
 0x2f9   :  { %vm3282_vm8 = vcmp.gt.f32.partialorder %v3920_v17, 0.0  ;;  %v3346_v22 = vmul.f32 0.2, %v3920_v17  ;;  %v3922_v23 = vadd.f32 %v3921_v18, %v3198_v19 }
 0x2fb   :  { %v3410_v24 = vsel %vm3282_vm8, %v3920_v17, %v3346_v22  ;;  %vm3283_vm9 = vcmp.gt.f32.partialorder %v3922_v23, 0.0  ;;  %v3347_v25 = vmul.f32 0.2, %v3922_v23 }
 0x2fc   :  { %3474 = vst [vmem:[%s5587_s3 + $0x1c0] sm:$0xff] %v3410_v24  ;;  %v2625_v26 = vpop.f32.mrb[116].mxu1 }
 0x2fd   :  { %v3411_v27 = vsel %vm3283_vm9, %v3922_v23, %v3347_v25  ;;  %v3923_v28 = vadd.f32 %v5507_v58, %v2625_v26  ;;  %v3203_v29 = vpop.f32.mrb[116].mxu0  ;;  %v2627_v30 = vpop.f32.mrb[117].mxu1 }
 0x2fe   :  { %3475 = vst [vmem:[%s5587_s3 + $0x1c8] sm:$0xff] %v3411_v27  ;;  %v3205_v31 = vpop.f32.mrb[117].mxu0  ;;  %v2628_v32 = vpop.f32.mrb[118].mxu1 }
 0x2ff   :  { %v3924_v34 = vadd.f32 %v3923_v28, %v3203_v29  ;;  %v3925_v35 = vadd.f32 %v5507_v58, %v2628_v32  ;;  %v3206_v36 = vpop.f32.mrb[118].mxu0  ;;  %v2630_v37 = vpop.f32.mrb[119].mxu1 }
 0x300   :  { %v3208_v38 = vpop.f32.mrb[119].mxu0 }
 0x301   :  { %vm3284_vm10 = vcmp.gt.f32.partialorder %v3924_v34, 0.0  ;;  %v3348_v39 = vmul.f32 0.2, %v3924_v34  ;;  %v3926_v40 = vadd.f32 %v3925_v35, %v3206_v36 }
 0x303   :  { %v3412_v41 = vsel %vm3284_vm10, %v3924_v34, %v3348_v39  ;;  %vm3285_vm11 = vcmp.gt.f32.partialorder %v3926_v40, 0.0  ;;  %v3349_v42 = vmul.f32 0.2, %v3926_v40 }
 0x304   :  { %3476 = vst [vmem:[%s5587_s3 + $0x1d0] sm:$0xff] %v3412_v41  ;;  %v2633_v43 = vpop.f32.mrb[120].mxu1 }
 0x305   :  { %v3413_v44 = vsel %vm3285_vm11, %v3926_v40, %v3349_v42  ;;  %v3927_v45 = vadd.f32 %v5507_v58, %v2633_v43  ;;  %v3211_v46 = vpop.f32.mrb[120].mxu0  ;;  %v2635_v47 = vpop.f32.mrb[121].mxu1 }
 0x306   :  { %3477 = vst [vmem:[%s5587_s3 + $0x1d8] sm:$0xff] %v3413_v44  ;;  %v3213_v48 = vpop.f32.mrb[121].mxu0  ;;  %v2636_v49 = vpop.f32.mrb[122].mxu1 }
 0x307   :  { %v3928_v50 = vadd.f32 %v3927_v45, %v3211_v46  ;;  %v3929_v51 = vadd.f32 %v5507_v58, %v2636_v49  ;;  %v3214_v52 = vpop.f32.mrb[122].mxu0  ;;  %v2638_v53 = vpop.f32.mrb[123].mxu1 }
 0x308   :  { %v3216_v54 = vpop.f32.mrb[123].mxu0 }
 0x309   :  { %vm3286_vm12 = vcmp.gt.f32.partialorder %v3928_v50, 0.0  ;;  %v3350_v55 = vmul.f32 0.2, %v3928_v50  ;;  %v3930_v56 = vadd.f32 %v3929_v51, %v3214_v52 }
 0x30b   :  { %v3414_v57 = vsel %vm3286_vm12, %v3928_v50, %v3350_v55  ;;  %vm3287_vm13 = vcmp.gt.f32.partialorder %v3930_v56, 0.0  ;;  %v3351_v0 = vmul.f32 0.2, %v3930_v56 }
 0x30c   :  { %3478 = vst [vmem:[%s5587_s3 + $0x1e0] sm:$0xff] %v3414_v57  ;;  %v2641_v33 = vpop.f32.mrb[124].mxu1 }
 0x30d   :  { %v3415_v59 = vsel %vm3287_vm13, %v3930_v56, %v3351_v0  ;;  %v3931_v60 = vadd.f32 %v5507_v58, %v2641_v33  ;;  %v3219_v61 = vpop.f32.mrb[124].mxu0  ;;  %v2643_v62 = vpop.f32.mrb[125].mxu1 }
 0x30e   :  { %3479 = vst [vmem:[%s5587_s3 + $0x1e8] sm:$0xff] %v3415_v59  ;;  %v3221_v63 = vpop.f32.mrb[125].mxu0  ;;  %v2644_v1 = vpop.f32.mrb[126].mxu1 }
 0x30f   :  { %v3932_v2 = vadd.f32 %v3931_v60, %v3219_v61  ;;  %v3933_v3 = vadd.f32 %v5507_v58, %v2644_v1  ;;  %v3222_v4 = vpop.f32.mrb[126].mxu0  ;;  %v2646_v5 = vpop.f32.mrb[127].mxu1 }
 0x310   :  { %v3224_v6 = vpop.f32.mrb[127].mxu0 }
 0x311   :  { %vm3288_vm14 = vcmp.gt.f32.partialorder %v3932_v2, 0.0  ;;  %v3352_v7 = vmul.f32 0.2, %v3932_v2  ;;  %v3934_v8 = vadd.f32 %v3933_v3, %v3222_v4 }
 0x313   :  { %v3416_v9 = vsel %vm3288_vm14, %v3932_v2, %v3352_v7  ;;  %vm3289_vm15 = vcmp.gt.f32.partialorder %v3934_v8, 0.0  ;;  %v3353_v10 = vmul.f32 0.2, %v3934_v8 }
 0x314   :  { %3480 = vst [vmem:[%s5587_s3 + $0x1f0] sm:$0xff] %v3416_v9 }
 0x315   :  { %v3417_v11 = vsel %vm3289_vm15, %v3934_v8, %v3353_v10 }
 0x316   :  { %3481 = vst [vmem:[%s5587_s3 + $0x1f8] sm:$0xff] %v3417_v11 }

// kernel: discriminator64_forward.7
= control target key start
LH: loop header
LB: loop body
LE: loop exit
PB: predicated region body
PF: predicated region fallthrough
CT: control target
= control target key end

     0   :  { %s5697_s1 = inlined_call_operand.vmem [shape: bf16[2048,256], index: 1, kind: input, shape index: {}]   ;;  %s5698_s0 = inlined_call_operand.vmem [shape: bf16[128,2048], index: 0, kind: input, shape index: {}]   ;;  %s5699_s2 = inlined_call_operand.vmem [shape: f32[1,256], index: 2, kind: input, shape index: {}]   ;;  %s5700_s3 = inlined_call_operand.vmem [shape: f32[128,256], index: 3, kind: output, shape index: {}]  }
   0x1   :  { %v4006_v0 = vld [vmem:[%s5697_s1 + $0x4] ss:$8 sps:$4 sm:$0xff]   ;;  %v4010_v2 = vld [vmem:[%s5697_s1] ss:$8 sps:$4 sm:$0xff]   ;;  %v4012_v4 = vld [vmem:[%s5697_s1 + $0x14] ss:$8 sps:$4 sm:$0xff]  }
   0x2   :  { %v4008_v1 = vld [vmem:[%s5697_s1 + $0x404] ss:$8 sps:$4 sm:$0xff]   ;;  %2330 = vmatprep.subr.bf16.mxu1 %v4006_v0  ;;  %v4011_v3 = vld [vmem:[%s5697_s1 + $0x400] ss:$8 sps:$4 sm:$0xff]   ;;  %v4014_v5 = vld [vmem:[%s5697_s1 + $0x414] ss:$8 sps:$4 sm:$0xff]  }
   0x3   :  { %2782 = vmatprep.subr.bf16.mxu0 %v4008_v1  ;;  %2331 = vmatpush1.bf16.msra.mxu1 %v4010_v2  ;;  %v4016_v6 = vld [vmem:[%s5697_s1 + $0x10] ss:$8 sps:$4 sm:$0xff]   ;;  %v4018_v8 = vld [vmem:[%s5697_s1 + $0x24] ss:$8 sps:$4 sm:$0xff]   ;;  %v4022_v10 = vld [vmem:[%s5697_s1 + $0x20] ss:$8 sps:$4 sm:$0xff]  }
   0x4   :  { %2783 = vmatpush1.bf16.msra.mxu0 %v4011_v3  ;;  %2332 = vmatprep.subr.bf16.mxu1 %v4012_v4  ;;  %v4017_v7 = vld [vmem:[%s5697_s1 + $0x410] ss:$8 sps:$4 sm:$0xff]   ;;  %v4020_v9 = vld [vmem:[%s5697_s1 + $0x424] ss:$8 sps:$4 sm:$0xff]   ;;  %v4023_v11 = vld [vmem:[%s5697_s1 + $0x420] ss:$8 sps:$4 sm:$0xff]  }
   0x5   :  { %2784 = vmatprep.subr.bf16.mxu0 %v4014_v5  ;;  %v4024_v12 = vld [vmem:[%s5697_s1 + $0x34] ss:$8 sps:$4 sm:$0xff]   ;;  %v4028_v14 = vld [vmem:[%s5697_s1 + $0x30] ss:$8 sps:$4 sm:$0xff]   ;;  %v4030_v16 = vld [vmem:[%s5697_s1 + $0x44] ss:$8 sps:$4 sm:$0xff]  }
   0x6   :  { %v4026_v13 = vld [vmem:[%s5697_s1 + $0x434] ss:$8 sps:$4 sm:$0xff]   ;;  %v4029_v15 = vld [vmem:[%s5697_s1 + $0x430] ss:$8 sps:$4 sm:$0xff]   ;;  %v4032_v17 = vld [vmem:[%s5697_s1 + $0x444] ss:$8 sps:$4 sm:$0xff]  }
   0x7   :  { %2333 = vmatpush1.bf16.msra.mxu1 %v4016_v6  ;;  %v4034_v18 = vld [vmem:[%s5697_s1 + $0x40] ss:$8 sps:$4 sm:$0xff]   ;;  %v4036_v20 = vld [vmem:[%s5697_s1 + $0x54] ss:$8 sps:$4 sm:$0xff]   ;;  %v4040_v22 = vld [vmem:[%s5697_s1 + $0x50] ss:$8 sps:$4 sm:$0xff]  }
   0x8   :  { %2785 = vmatpush1.bf16.msra.mxu0 %v4017_v7  ;;  %2334 = vmatprep.subr.bf16.mxu1 %v4018_v8  ;;  %v4035_v19 = vld [vmem:[%s5697_s1 + $0x440] ss:$8 sps:$4 sm:$0xff]   ;;  %v4038_v21 = vld [vmem:[%s5697_s1 + $0x454] ss:$8 sps:$4 sm:$0xff]   ;;  %v4041_v23 = vld [vmem:[%s5697_s1 + $0x450] ss:$8 sps:$4 sm:$0xff]  }
   0x9   :  { %2786 = vmatprep.subr.bf16.mxu0 %v4020_v9  ;;  %v4042_v24 = vld [vmem:[%s5697_s1 + $0x64] ss:$8 sps:$4 sm:$0xff]   ;;  %v4046_v26 = vld [vmem:[%s5697_s1 + $0x60] ss:$8 sps:$4 sm:$0xff]   ;;  %v4048_v28 = vld [vmem:[%s5697_s1 + $0x74] ss:$8 sps:$4 sm:$0xff]  }
   0xa   :  { %v4044_v25 = vld [vmem:[%s5697_s1 + $0x464] ss:$8 sps:$4 sm:$0xff]   ;;  %v4047_v27 = vld [vmem:[%s5697_s1 + $0x460] ss:$8 sps:$4 sm:$0xff]   ;;  %v4050_v29 = vld [vmem:[%s5697_s1 + $0x474] ss:$8 sps:$4 sm:$0xff]  }
   0xb   :  { %2335 = vmatpush1.bf16.msra.mxu1 %v4022_v10  ;;  %v4052_v30 = vld [vmem:[%s5697_s1 + $0x70] ss:$8 sps:$4 sm:$0xff]   ;;  %v4054_v32 = vld [vmem:[%s5697_s1 + $0x84] ss:$8 sps:$4 sm:$0xff]   ;;  %v4058_v34 = vld [vmem:[%s5697_s1 + $0x80] ss:$8 sps:$4 sm:$0xff]  }
   0xc   :  { %2787 = vmatpush1.bf16.msra.mxu0 %v4023_v11  ;;  %2336 = vmatprep.subr.bf16.mxu1 %v4024_v12  ;;  %v4053_v31 = vld [vmem:[%s5697_s1 + $0x470] ss:$8 sps:$4 sm:$0xff]   ;;  %v4056_v33 = vld [vmem:[%s5697_s1 + $0x484] ss:$8 sps:$4 sm:$0xff]   ;;  %v4059_v35 = vld [vmem:[%s5697_s1 + $0x480] ss:$8 sps:$4 sm:$0xff]  }
   0xd   :  { %2788 = vmatprep.subr.bf16.mxu0 %v4026_v13  ;;  %v4060_v36 = vld [vmem:[%s5697_s1 + $0x94] ss:$8 sps:$4 sm:$0xff]   ;;  %v4064_v38 = vld [vmem:[%s5697_s1 + $0x90] ss:$8 sps:$4 sm:$0xff]   ;;  %v4066_v40 = vld [vmem:[%s5697_s1 + $0xa4] ss:$8 sps:$4 sm:$0xff]  }
   0xe   :  { %v4062_v37 = vld [vmem:[%s5697_s1 + $0x494] ss:$8 sps:$4 sm:$0xff]   ;;  %v4065_v39 = vld [vmem:[%s5697_s1 + $0x490] ss:$8 sps:$4 sm:$0xff]   ;;  %v4068_v41 = vld [vmem:[%s5697_s1 + $0x4a4] ss:$8 sps:$4 sm:$0xff]  }
   0xf   :  { %2337 = vmatpush1.bf16.msra.mxu1 %v4028_v14  ;;  %v4070_v42 = vld [vmem:[%s5697_s1 + $0xa0] ss:$8 sps:$4 sm:$0xff]   ;;  %v4072_v44 = vld [vmem:[%s5697_s1 + $0xb4] ss:$8 sps:$4 sm:$0xff]   ;;  %v4076_v46 = vld [vmem:[%s5697_s1 + $0xb0] ss:$8 sps:$4 sm:$0xff]  }
  0x10   :  { %2789 = vmatpush1.bf16.msra.mxu0 %v4029_v15  ;;  %2338 = vmatprep.subr.bf16.mxu1 %v4030_v16  ;;  %v4071_v43 = vld [vmem:[%s5697_s1 + $0x4a0] ss:$8 sps:$4 sm:$0xff]   ;;  %v4074_v45 = vld [vmem:[%s5697_s1 + $0x4b4] ss:$8 sps:$4 sm:$0xff]   ;;  %v4077_v47 = vld [vmem:[%s5697_s1 + $0x4b0] ss:$8 sps:$4 sm:$0xff]  }
  0x11   :  { %2790 = vmatprep.subr.bf16.mxu0 %v4032_v17  ;;  %v14_v48 = vld [vmem:[%s5698_s0] sm:$0xff]  ;;  %v4084_v58 = vld [vmem:[%s5697_s1 + $0xd4] ss:$8 sps:$4 sm:$0xff]   ;;  %v4088_v60 = vld [vmem:[%s5697_s1 + $0xd0] ss:$8 sps:$4 sm:$0xff]  }
  0x12   :  { %v22_v49 = vld [vmem:[%s5698_s0 + $0x40] sm:$0xff]  ;;  %v4086_v59 = vld [vmem:[%s5697_s1 + $0x4d4] ss:$8 sps:$4 sm:$0xff]   ;;  %v4089_v61 = vld [vmem:[%s5697_s1 + $0x4d0] ss:$8 sps:$4 sm:$0xff]  }
  0x13   :  { %2339 = vmatpush1.bf16.msra.mxu1 %v4034_v18  ;;  %v18_v50 = vld [vmem:[%s5698_s0 + $0x20] sm:$0xff]  ;;  %v3367_v53 = vcombine.high %v14_v48, %v22_v49  ;;  %v4096_v2 = vld [vmem:[%s5697_s1 + $0xf4] ss:$8 sps:$4 sm:$0xff]   ;;  %v4100_v4 = vld [vmem:[%s5697_s1 + $0xf0] ss:$8 sps:$4 sm:$0xff]   ;;  %v3366_v11 = vcombine.low %v14_v48, %v22_v49 }
  0x14   :  { %2791 = vmatpush1.bf16.msra.mxu0 %v4035_v19  ;;  %2340 = vmatprep.subr.bf16.mxu1 %v4036_v20  ;;  %v26_v51 = vld [vmem:[%s5698_s0 + $0x60] sm:$0xff]  ;;  %v4098_v3 = vld [vmem:[%s5697_s1 + $0x4f4] ss:$8 sps:$4 sm:$0xff]   ;;  %v4101_v5 = vld [vmem:[%s5697_s1 + $0x4f0] ss:$8 sps:$4 sm:$0xff]  }
  0x15   :  { %2792 = vmatprep.subr.bf16.mxu0 %v4038_v21  ;;  %v4078_v52 = vld [vmem:[%s5697_s1 + $0xc4] ss:$8 sps:$4 sm:$0xff]   ;;  %v3375_v55 = vcombine.high %v18_v50, %v26_v51  ;;  %2362 = vmatprep.mubr.bf16.mxu1 %v3367_v53  ;;  %v4082_v56 = vld [vmem:[%s5697_s1 + $0xc0] ss:$8 sps:$4 sm:$0xff]   ;;  %v3374_v12 = vcombine.low %v18_v50, %v26_v51  ;;  %v4110_v16 = vld [vmem:[%s5697_s1 + $0x114] ss:$8 sps:$4 sm:$0xff]  }
  0x16   :  { %v4080_v54 = vld [vmem:[%s5697_s1 + $0x4c4] ss:$8 sps:$4 sm:$0xff]   ;;  %v4083_v57 = vld [vmem:[%s5697_s1 + $0x4c0] ss:$8 sps:$4 sm:$0xff]   ;;  %v4113_v17 = vld [vmem:[%s5697_s1 + $0x514] ss:$8 sps:$4 sm:$0xff]  }
  0x17   :  { %2341 = vmatpush1.bf16.msra.mxu1 %v4040_v22  ;;  %2814 = vmatprep.mubr.bf16.mxu0 %v3375_v55  ;;  %v4090_v62 = vld [vmem:[%s5697_s1 + $0xe4] ss:$8 sps:$4 sm:$0xff]   ;;  %v4094_v0 = vld [vmem:[%s5697_s1 + $0xe0] ss:$8 sps:$4 sm:$0xff]   ;;  %v4108_v20 = vld [vmem:[%s5697_s1 + $0x110] ss:$8 sps:$4 sm:$0xff]  }
  0x18   :  { %2793 = vmatpush1.bf16.msra.mxu0 %v4041_v23  ;;  %2342 = vmatprep.subr.bf16.mxu1 %v4042_v24  ;;  %v4092_v63 = vld [vmem:[%s5697_s1 + $0x4e4] ss:$8 sps:$4 sm:$0xff]   ;;  %v4095_v1 = vld [vmem:[%s5697_s1 + $0x4e0] ss:$8 sps:$4 sm:$0xff]   ;;  %v4111_v21 = vld [vmem:[%s5697_s1 + $0x510] ss:$8 sps:$4 sm:$0xff]  }
  0x19   :  { %2794 = vmatprep.subr.bf16.mxu0 %v4044_v25  ;;  %v4104_v6 = vld [vmem:[%s5697_s1 + $0x104] ss:$8 sps:$4 sm:$0xff]   ;;  %v4102_v8 = vld [vmem:[%s5697_s1 + $0x100] ss:$8 sps:$4 sm:$0xff]   ;;  %v4134_v48 = vld [vmem:[%s5697_s1 + $0x154] ss:$8 sps:$4 sm:$0xff]  }
  0x1a   :  { %v4107_v7 = vld [vmem:[%s5697_s1 + $0x504] ss:$8 sps:$4 sm:$0xff]   ;;  %v4105_v9 = vld [vmem:[%s5697_s1 + $0x500] ss:$8 sps:$4 sm:$0xff]   ;;  %v4137_v49 = vld [vmem:[%s5697_s1 + $0x554] ss:$8 sps:$4 sm:$0xff]  }
  0x1b   :  { %2343 = vmatpush1.bf16.msra.mxu1 %v4046_v26  ;;  %v30_v10 = vld [vmem:[%s5698_s0 + $0x80] sm:$0xff]  ;;  %v4135_v53 = vld [vmem:[%s5697_s1 + $0x550] ss:$8 sps:$4 sm:$0xff]  }
  0x1c   :  { %2795 = vmatpush1.bf16.msra.mxu0 %v4047_v27  ;;  %2344 = vmatprep.subr.bf16.mxu1 %v4048_v28  ;;  %v38_v13 = vld [vmem:[%s5698_s0 + $0xc0] sm:$0xff] }
  0x1d   :  { %2796 = vmatprep.subr.bf16.mxu0 %v4050_v29  ;;  %v34_v14 = vld [vmem:[%s5698_s0 + $0xa0] sm:$0xff]  ;;  %v3383_v18 = vcombine.high %v30_v10, %v38_v13  ;;  %v3382_v28 = vcombine.low %v30_v10, %v38_v13 }
  0x1e   :  { %v42_v15 = vld [vmem:[%s5698_s0 + $0xe0] sm:$0xff] }
  0x1f   :  { %2345 = vmatpush1.bf16.msra.mxu1 %v4052_v30  ;;  %v3391_v19 = vcombine.high %v34_v14, %v42_v15  ;;  %v4116_v22 = vld [vmem:[%s5697_s1 + $0x124] ss:$8 sps:$4 sm:$0xff]   ;;  %v4114_v24 = vld [vmem:[%s5697_s1 + $0x120] ss:$8 sps:$4 sm:$0xff]   ;;  %v3390_v29 = vcombine.low %v34_v14, %v42_v15 }
  0x20   :  { %2797 = vmatpush1.bf16.msra.mxu0 %v4053_v31  ;;  %2346 = vmatprep.subr.bf16.mxu1 %v4054_v32  ;;  %v4119_v23 = vld [vmem:[%s5697_s1 + $0x524] ss:$8 sps:$4 sm:$0xff]   ;;  %v4117_v25 = vld [vmem:[%s5697_s1 + $0x520] ss:$8 sps:$4 sm:$0xff]   ;;  %v4122_v32 = vld [vmem:[%s5697_s1 + $0x134] ss:$8 sps:$4 sm:$0xff]  }
  0x21   :  { %2798 = vmatprep.subr.bf16.mxu0 %v4056_v33  ;;  %v46_v26 = vld [vmem:[%s5698_s0 + $0x100] sm:$0xff]  ;;  %v4125_v33 = vld [vmem:[%s5697_s1 + $0x534] ss:$8 sps:$4 sm:$0xff]  }
  0x22   :  { %v54_v27 = vld [vmem:[%s5698_s0 + $0x140] sm:$0xff] }
  0x23   :  { %2347 = vmatpush1.bf16.msra.mxu1 %v4058_v34  ;;  %v50_v30 = vld [vmem:[%s5698_s0 + $0x120] sm:$0xff]  ;;  %v3399_v34 = vcombine.high %v46_v26, %v54_v27 }
  0x24   :  { %2799 = vmatpush1.bf16.msra.mxu0 %v4059_v35  ;;  %2348 = vmatprep.subr.bf16.mxu1 %v4060_v36  ;;  %v58_v31 = vld [vmem:[%s5698_s0 + $0x160] sm:$0xff]  ;;  %v4120_v36 = vld [vmem:[%s5697_s1 + $0x130] ss:$8 sps:$4 sm:$0xff]  }
  0x25   :  { %2800 = vmatprep.subr.bf16.mxu0 %v4062_v37  ;;  %v3407_v35 = vcombine.high %v50_v30, %v58_v31  ;;  %v4123_v37 = vld [vmem:[%s5697_s1 + $0x530] ss:$8 sps:$4 sm:$0xff]   ;;  %v4143_v55 = vld [vmem:[%s5697_s1 + $0x564] ss:$8 sps:$4 sm:$0xff]   ;;  %v4150_v14 = vld [vmem:[%s5697_s1 + $0x180] ss:$8 sps:$4 sm:$0xff]  }
  0x26   :  { %v106_v13 = vld [vmem:[%s5698_s0 + $0x2e0] sm:$0xff] }
  0x27   :  { %2349 = vmatpush1.bf16.msra.mxu1 %v4064_v38  ;;  %v4128_v38 = vld [vmem:[%s5697_s1 + $0x144] ss:$8 sps:$4 sm:$0xff]   ;;  %v4153_v15 = vld [vmem:[%s5697_s1 + $0x580] ss:$8 sps:$4 sm:$0xff]  }
  0x28   :  { %2801 = vmatpush1.bf16.msra.mxu0 %v4065_v39  ;;  %2350 = vmatprep.subr.bf16.mxu1 %v4066_v40  ;;  %v4131_v39 = vld [vmem:[%s5697_s1 + $0x544] ss:$8 sps:$4 sm:$0xff]   ;;  %v4126_v40 = vld [vmem:[%s5697_s1 + $0x140] ss:$8 sps:$4 sm:$0xff]  }
  0x29   :  { %2802 = vmatprep.subr.bf16.mxu0 %v4068_v41  ;;  %v4129_v41 = vld [vmem:[%s5697_s1 + $0x540] ss:$8 sps:$4 sm:$0xff]  }
  0x2b   :  { %2351 = vmatpush1.bf16.msra.mxu1 %v4070_v42  ;;  %v62_v42 = vld [vmem:[%s5698_s0 + $0x180] sm:$0xff] }
  0x2c   :  { %2803 = vmatpush1.bf16.msra.mxu0 %v4071_v43  ;;  %2352 = vmatprep.subr.bf16.mxu1 %v4072_v44  ;;  %v70_v43 = vld [vmem:[%s5698_s0 + $0x1c0] sm:$0xff]  ;;  %v3398_v44 = vcombine.low %v46_v26, %v54_v27 }
  0x2d   :  { %2804 = vmatprep.subr.bf16.mxu0 %v4074_v45  ;;  %v3406_v45 = vcombine.low %v50_v30, %v58_v31  ;;  %v3415_v50 = vcombine.high %v62_v42, %v70_v43  ;;  %v110_v26 = vld [vmem:[%s5698_s0 + $0x300] sm:$0xff] }
  0x2e   :  { %v114_v30 = vld [vmem:[%s5698_s0 + $0x320] sm:$0xff] }
  0x2f   :  { %2353 = vmatpush1.bf16.msra.mxu1 %v4076_v46  ;;  %v66_v46 = vld [vmem:[%s5698_s0 + $0x1a0] sm:$0xff] }
  0x30   :  { %2805 = vmatpush1.bf16.msra.mxu0 %v4077_v47  ;;  %2354 = vmatprep.subr.bf16.mxu1 %v4078_v52  ;;  %v74_v47 = vld [vmem:[%s5698_s0 + $0x1e0] sm:$0xff]  ;;  %v4132_v52 = vld [vmem:[%s5697_s1 + $0x150] ss:$8 sps:$4 sm:$0xff]  }
  0x31   :  { %2806 = vmatprep.subr.bf16.mxu0 %v4080_v54  ;;  %v3423_v51 = vcombine.high %v66_v46, %v74_v47  ;;  %v4140_v54 = vld [vmem:[%s5697_s1 + $0x164] ss:$8 sps:$4 sm:$0xff]  }
  0x32   :  { %v122_v31 = vld [vmem:[%s5698_s0 + $0x360] sm:$0xff] }
  0x33   :  { %2355 = vmatpush1.bf16.msra.mxu1 %v4082_v56  ;;  %v4138_v56 = vld [vmem:[%s5697_s1 + $0x160] ss:$8 sps:$4 sm:$0xff]  }
  0x34   :  { %2807 = vmatpush1.bf16.msra.mxu0 %v4083_v57  ;;  %2356 = vmatprep.subr.bf16.mxu1 %v4084_v58  ;;  %v78_v57 = vld [vmem:[%s5698_s0 + $0x200] sm:$0xff] }
  0x35   :  { %2808 = vmatprep.subr.bf16.mxu0 %v4086_v59  ;;  %v86_v58 = vld [vmem:[%s5698_s0 + $0x240] sm:$0xff]  ;;  %v3414_v59 = vcombine.low %v62_v42, %v70_v43 }
  0x36   :  { %v3430_v10 = vcombine.low %v78_v57, %v86_v58  ;;  %v126_v42 = vld [vmem:[%s5698_s0 + $0x380] sm:$0xff] }
  0x37   :  { %2357 = vmatpush1.bf16.msra.mxu1 %v4088_v60  ;;  %v3422_v60 = vcombine.low %v66_v46, %v74_v47  ;;  %v134_v43 = vld [vmem:[%s5698_s0 + $0x3c0] sm:$0xff] }
  0x38   :  { %2809 = vmatpush1.bf16.msra.mxu0 %v4089_v61  ;;  %2358 = vmatprep.subr.bf16.mxu1 %v4090_v62  ;;  %v82_v61 = vld [vmem:[%s5698_s0 + $0x220] sm:$0xff] }
  0x39   :  { %2810 = vmatprep.subr.bf16.mxu0 %v4092_v63  ;;  %v90_v62 = vld [vmem:[%s5698_s0 + $0x260] sm:$0xff] }
  0x3a   :  { %v4141_v63 = vld [vmem:[%s5697_s1 + $0x560] ss:$8 sps:$4 sm:$0xff]  }
  0x3b   :  { %2359 = vmatpush1.bf16.msra.mxu1 %v4094_v0  ;;  %v4146_v0 = vld [vmem:[%s5697_s1 + $0x174] ss:$8 sps:$4 sm:$0xff]   ;;  %v130_v46 = vld [vmem:[%s5698_s0 + $0x3a0] sm:$0xff] }
  0x3c   :  { %2811 = vmatpush1.bf16.msra.mxu0 %v4095_v1  ;;  %2360 = vmatprep.subr.bf16.mxu1 %v4096_v2  ;;  %v4149_v1 = vld [vmem:[%s5697_s1 + $0x574] ss:$8 sps:$4 sm:$0xff]   ;;  %v3431_v2 = vcombine.high %v78_v57, %v86_v58  ;;  %v138_v47 = vld [vmem:[%s5698_s0 + $0x3e0] sm:$0xff]  ;;  %v15_v58 = vld [vmem:[%s5698_s0 + $0x8] sm:$0xff] }
  0x3d   :  { %2812 = vmatprep.subr.bf16.mxu0 %v4098_v3  ;;  %v3439_v3 = vcombine.high %v82_v61, %v90_v62  ;;  %v4189_v57 = vld [vmem:[%s5697_s1 + $0x5e0] ss:$8 sps:$4 sm:$0xff]  }
  0x3f   :  { %2361 = vmatpush1.bf16.msra.mxu1 %v4100_v4  ;;  %v4144_v4 = vld [vmem:[%s5697_s1 + $0x170] ss:$8 sps:$4 sm:$0xff]  }
  0x40   :  { %2813 = vmatpush1.bf16.msra.mxu0 %v4101_v5  ;;  %2443 = vmatprep.subr.bf16.mxu1 %v4104_v6  ;;  %v4147_v5 = vld [vmem:[%s5697_s1 + $0x570] ss:$8 sps:$4 sm:$0xff]   ;;  %v4152_v6 = vld [vmem:[%s5697_s1 + $0x184] ss:$8 sps:$4 sm:$0xff]  }
  0x41   :  { %2895 = vmatprep.subr.bf16.mxu0 %v4107_v7  ;;  %v4155_v7 = vld [vmem:[%s5697_s1 + $0x584] ss:$8 sps:$4 sm:$0xff]  }
  0x42   :  { %2363 = vmatmul.mubr.bf16.vlgmr.msra.gmra.mrb[0].mxu1 %v3366_v11  ;;  %v3438_v11 = vcombine.low %v82_v61, %v90_v62  ;;  %v3486_v61 = vcombine.low %v130_v46, %v138_v47  ;;  %v19_v62 = vld [vmem:[%s5698_s0 + $0x28] sm:$0xff] }
  0x43   :  { %2815 = vmatmul.mubr.bf16.vlgmr.msra.gmra.mrb[0].mxu0 %v3374_v12  ;;  %2444 = vmatpush1.bf16.msra.mxu1 %v4102_v8  ;;  %v94_v8 = vld [vmem:[%s5698_s0 + $0x280] sm:$0xff] }
  0x44   :  { %2896 = vmatpush1.bf16.msra.mxu0 %v4105_v9  ;;  %2445 = vmatprep.subr.bf16.mxu1 %v4110_v16  ;;  %v102_v9 = vld [vmem:[%s5698_s0 + $0x2c0] sm:$0xff]  ;;  %v4158_v16 = vld [vmem:[%s5697_s1 + $0x194] ss:$8 sps:$4 sm:$0xff]  }
  0x45   :  { %2897 = vmatprep.subr.bf16.mxu0 %v4113_v17  ;;  %2372 = vmatprep.mubr.bf16.mxu1 %v3383_v18  ;;  %v98_v12 = vld [vmem:[%s5698_s0 + $0x2a0] sm:$0xff]  ;;  %v4161_v17 = vld [vmem:[%s5697_s1 + $0x594] ss:$8 sps:$4 sm:$0xff]   ;;  %v3447_v18 = vcombine.high %v94_v8, %v102_v9  ;;  %v3446_v27 = vcombine.low %v94_v8, %v102_v9  ;;  %v31_v9 = vld [vmem:[%s5698_s0 + $0x88] sm:$0xff] }
  0x46   :  { %2824 = vmatprep.mubr.bf16.mxu0 %v3391_v19  ;;  %v3455_v19 = vcombine.high %v98_v12, %v106_v13  ;;  %v4198_v8 = vld [vmem:[%s5697_s1 + $0x200] ss:$8 sps:$4 sm:$0xff]  }
  0x47   :  { %2446 = vmatpush1.bf16.msra.mxu1 %v4108_v20  ;;  %v4156_v20 = vld [vmem:[%s5697_s1 + $0x190] ss:$8 sps:$4 sm:$0xff]  }
  0x48   :  { %2898 = vmatpush1.bf16.msra.mxu0 %v4111_v21  ;;  %2447 = vmatprep.subr.bf16.mxu1 %v4116_v22  ;;  %v4159_v21 = vld [vmem:[%s5697_s1 + $0x590] ss:$8 sps:$4 sm:$0xff]   ;;  %v4164_v22 = vld [vmem:[%s5697_s1 + $0x1a4] ss:$8 sps:$4 sm:$0xff]  }
  0x49   :  { %2899 = vmatprep.subr.bf16.mxu0 %v4119_v23  ;;  %v4167_v23 = vld [vmem:[%s5697_s1 + $0x5a4] ss:$8 sps:$4 sm:$0xff]  }
  0x4a   :  { %2373 = vmatmul.mubr.bf16.gmra.mrb[4].mxu1 %v3382_v28  ;;  %v3454_v28 = vcombine.low %v98_v12, %v106_v13  ;;  %v35_v13 = vld [vmem:[%s5698_s0 + $0xa8] sm:$0xff] }
  0x4b   :  { %2825 = vmatmul.mubr.bf16.gmra.mrb[4].mxu0 %v3390_v29  ;;  %2448 = vmatpush1.bf16.msra.mxu1 %v4114_v24  ;;  %v4162_v24 = vld [vmem:[%s5697_s1 + $0x1a0] ss:$8 sps:$4 sm:$0xff]  }
  0x4c   :  { %2900 = vmatpush1.bf16.msra.mxu0 %v4117_v25  ;;  %2449 = vmatprep.subr.bf16.mxu1 %v4122_v32  ;;  %v4165_v25 = vld [vmem:[%s5697_s1 + $0x5a0] ss:$8 sps:$4 sm:$0xff]   ;;  %v4170_v32 = vld [vmem:[%s5697_s1 + $0x1b4] ss:$8 sps:$4 sm:$0xff]  }
  0x4d   :  { %2901 = vmatprep.subr.bf16.mxu0 %v4125_v33  ;;  %2382 = vmatprep.mubr.bf16.mxu1 %v3399_v34  ;;  %v118_v29 = vld [vmem:[%s5698_s0 + $0x340] sm:$0xff]  ;;  %v4173_v33 = vld [vmem:[%s5697_s1 + $0x5b4] ss:$8 sps:$4 sm:$0xff]  }
  0x4e   :  { %2834 = vmatprep.mubr.bf16.mxu0 %v3407_v35  ;;  %v3463_v34 = vcombine.high %v110_v26, %v118_v29  ;;  %v3471_v35 = vcombine.high %v114_v30, %v122_v31 }
  0x4f   :  { %2450 = vmatpush1.bf16.msra.mxu1 %v4120_v36  ;;  %v4168_v36 = vld [vmem:[%s5697_s1 + $0x1b0] ss:$8 sps:$4 sm:$0xff]  }
  0x50   :  { %2902 = vmatpush1.bf16.msra.mxu0 %v4123_v37  ;;  %2451 = vmatprep.subr.bf16.mxu1 %v4128_v38  ;;  %v4171_v37 = vld [vmem:[%s5697_s1 + $0x5b0] ss:$8 sps:$4 sm:$0xff]   ;;  %v4176_v38 = vld [vmem:[%s5697_s1 + $0x1c4] ss:$8 sps:$4 sm:$0xff]  }
  0x51   :  { %2903 = vmatprep.subr.bf16.mxu0 %v4131_v39  ;;  %v4179_v39 = vld [vmem:[%s5697_s1 + $0x5c4] ss:$8 sps:$4 sm:$0xff]  }
  0x52   :  { %2383 = vmatmul.mubr.bf16.gmra.mrb[8].mxu1 %v3398_v44  ;;  %v3462_v44 = vcombine.low %v110_v26, %v118_v29  ;;  %v59_v29 = vld [vmem:[%s5698_s0 + $0x168] sm:$0xff] }
  0x53   :  { %2835 = vmatmul.mubr.bf16.gmra.mrb[8].mxu0 %v3406_v45  ;;  %2452 = vmatpush1.bf16.msra.mxu1 %v4126_v40  ;;  %v4174_v40 = vld [vmem:[%s5697_s1 + $0x1c0] ss:$8 sps:$4 sm:$0xff]   ;;  %v3470_v45 = vcombine.low %v114_v30, %v122_v31 }
  0x54   :  { %2904 = vmatpush1.bf16.msra.mxu0 %v4129_v41  ;;  %2453 = vmatprep.subr.bf16.mxu1 %v4134_v48  ;;  %v4177_v41 = vld [vmem:[%s5697_s1 + $0x5c0] ss:$8 sps:$4 sm:$0xff]   ;;  %v4182_v48 = vld [vmem:[%s5697_s1 + $0x1d4] ss:$8 sps:$4 sm:$0xff]  }
  0x55   :  { %2905 = vmatprep.subr.bf16.mxu0 %v4137_v49  ;;  %2392 = vmatprep.mubr.bf16.mxu1 %v3415_v50  ;;  %v4185_v49 = vld [vmem:[%s5697_s1 + $0x5d4] ss:$8 sps:$4 sm:$0xff]   ;;  %v3479_v50 = vcombine.high %v126_v42, %v134_v43  ;;  %v4210_v30 = vld [vmem:[%s5697_s1 + $0x220] ss:$8 sps:$4 sm:$0xff]  }
  0x56   :  { %2844 = vmatprep.mubr.bf16.mxu0 %v3423_v51  ;;  %v3487_v51 = vcombine.high %v130_v46, %v138_v47  ;;  %v4213_v31 = vld [vmem:[%s5697_s1 + $0x620] ss:$8 sps:$4 sm:$0xff]  }
  0x57   :  { %2454 = vmatpush1.bf16.msra.mxu1 %v4132_v52  ;;  %v4180_v52 = vld [vmem:[%s5697_s1 + $0x1d0] ss:$8 sps:$4 sm:$0xff]   ;;  %v67_v46 = vld [vmem:[%s5698_s0 + $0x1a8] sm:$0xff] }
  0x58   :  { %2906 = vmatpush1.bf16.msra.mxu0 %v4135_v53  ;;  %2455 = vmatprep.subr.bf16.mxu1 %v4140_v54  ;;  %v4183_v53 = vld [vmem:[%s5697_s1 + $0x5d0] ss:$8 sps:$4 sm:$0xff]   ;;  %v4188_v54 = vld [vmem:[%s5697_s1 + $0x1e4] ss:$8 sps:$4 sm:$0xff]  }
  0x59   :  { %2907 = vmatprep.subr.bf16.mxu0 %v4143_v55  ;;  %v4191_v55 = vld [vmem:[%s5697_s1 + $0x5e4] ss:$8 sps:$4 sm:$0xff]  }
  0x5a   :  { %2393 = vmatmul.mubr.bf16.gmra.mrb[12].mxu1 %v3414_v59  ;;  %v23_v59 = vld [vmem:[%s5698_s0 + $0x48] sm:$0xff] }
  0x5b   :  { %2845 = vmatmul.mubr.bf16.gmra.mrb[12].mxu0 %v3422_v60  ;;  %2456 = vmatpush1.bf16.msra.mxu1 %v4138_v56  ;;  %v4186_v56 = vld [vmem:[%s5697_s1 + $0x1e0] ss:$8 sps:$4 sm:$0xff]   ;;  %v3478_v60 = vcombine.low %v126_v42, %v134_v43 }
  0x5c   :  { %2908 = vmatpush1.bf16.msra.mxu0 %v4141_v63  ;;  %2457 = vmatprep.subr.bf16.mxu1 %v4146_v0  ;;  %v27_v63 = vld [vmem:[%s5698_s0 + $0x68] sm:$0xff]  ;;  %v4194_v0 = vld [vmem:[%s5697_s1 + $0x1f4] ss:$8 sps:$4 sm:$0xff]  }
  0x5d   :  { %2909 = vmatprep.subr.bf16.mxu0 %v4149_v1  ;;  %2402 = vmatprep.mubr.bf16.mxu1 %v3431_v2  ;;  %v4197_v1 = vld [vmem:[%s5697_s1 + $0x5f4] ss:$8 sps:$4 sm:$0xff]   ;;  %v3369_v2 = vcombine.high %v15_v58, %v23_v59  ;;  %v3376_v12 = vcombine.low %v19_v62, %v27_v63  ;;  %v63_v42 = vld [vmem:[%s5698_s0 + $0x188] sm:$0xff] }
  0x5e   :  { %2854 = vmatprep.mubr.bf16.mxu0 %v3439_v3  ;;  %v3377_v3 = vcombine.high %v19_v62, %v27_v63  ;;  %v75_v47 = vld [vmem:[%s5698_s0 + $0x1e8] sm:$0xff] }
  0x5f   :  { %2458 = vmatpush1.bf16.msra.mxu1 %v4144_v4  ;;  %v4192_v4 = vld [vmem:[%s5697_s1 + $0x1f0] ss:$8 sps:$4 sm:$0xff]   ;;  %v83_v62 = vld [vmem:[%s5698_s0 + $0x228] sm:$0xff] }
  0x60   :  { %2910 = vmatpush1.bf16.msra.mxu0 %v4147_v5  ;;  %2459 = vmatprep.subr.bf16.mxu1 %v4152_v6  ;;  %v4195_v5 = vld [vmem:[%s5697_s1 + $0x5f0] ss:$8 sps:$4 sm:$0xff]   ;;  %v4200_v6 = vld [vmem:[%s5697_s1 + $0x204] ss:$8 sps:$4 sm:$0xff]  }
  0x61   :  { %2911 = vmatprep.subr.bf16.mxu0 %v4155_v7  ;;  %v4203_v7 = vld [vmem:[%s5697_s1 + $0x604] ss:$8 sps:$4 sm:$0xff]  }
  0x62   :  { %2403 = vmatmul.mubr.bf16.gmra.mrb[16].mxu1 %v3430_v10  ;;  %v39_v10 = vld [vmem:[%s5698_s0 + $0xc8] sm:$0xff] }
  0x63   :  { %2855 = vmatmul.mubr.bf16.gmra.mrb[16].mxu0 %v3438_v11  ;;  %2460 = vmatpush1.bf16.msra.mxu1 %v4150_v14  ;;  %v3368_v11 = vcombine.low %v15_v58, %v23_v59  ;;  %v43_v14 = vld [vmem:[%s5698_s0 + $0xe8] sm:$0xff]  ;;  %v3384_v26 = vcombine.low %v31_v9, %v39_v10 }
  0x64   :  { %2912 = vmatpush1.bf16.msra.mxu0 %v4153_v15  ;;  %2461 = vmatprep.subr.bf16.mxu1 %v4158_v16  ;;  %v4201_v15 = vld [vmem:[%s5697_s1 + $0x600] ss:$8 sps:$4 sm:$0xff]   ;;  %v4206_v16 = vld [vmem:[%s5697_s1 + $0x214] ss:$8 sps:$4 sm:$0xff]  }
  0x65   :  { %2913 = vmatprep.subr.bf16.mxu0 %v4161_v17  ;;  %2412 = vmatprep.mubr.bf16.mxu1 %v3447_v18  ;;  %v4209_v17 = vld [vmem:[%s5697_s1 + $0x614] ss:$8 sps:$4 sm:$0xff]   ;;  %v3385_v18 = vcombine.high %v31_v9, %v39_v10  ;;  %v79_v58 = vld [vmem:[%s5698_s0 + $0x208] sm:$0xff] }
  0x66   :  { %2864 = vmatprep.mubr.bf16.mxu0 %v3455_v19  ;;  %v3393_v19 = vcombine.high %v35_v13, %v43_v14  ;;  %v87_v59 = vld [vmem:[%s5698_s0 + $0x248] sm:$0xff] }
  0x67   :  { %2462 = vmatpush1.bf16.msra.mxu1 %v4156_v20  ;;  %v4204_v20 = vld [vmem:[%s5697_s1 + $0x210] ss:$8 sps:$4 sm:$0xff]   ;;  %v91_v63 = vld [vmem:[%s5698_s0 + $0x268] sm:$0xff] }
  0x68   :  { %2914 = vmatpush1.bf16.msra.mxu0 %v4159_v21  ;;  %2463 = vmatprep.subr.bf16.mxu1 %v4164_v22  ;;  %v4207_v21 = vld [vmem:[%s5697_s1 + $0x610] ss:$8 sps:$4 sm:$0xff]   ;;  %v4212_v22 = vld [vmem:[%s5697_s1 + $0x224] ss:$8 sps:$4 sm:$0xff]   ;;  %v4249_v9 = vld [vmem:[%s5697_s1 + $0x680] ss:$8 sps:$4 sm:$0xff]  }
  0x69   :  { %2915 = vmatprep.subr.bf16.mxu0 %v4167_v23  ;;  %v4215_v23 = vld [vmem:[%s5697_s1 + $0x624] ss:$8 sps:$4 sm:$0xff]  }
  0x6a   :  { %2413 = vmatmul.mubr.bf16.gmra.mrb[20].mxu1 %v3446_v27  ;;  %v3392_v27 = vcombine.low %v35_v13, %v43_v14  ;;  %v95_v10 = vld [vmem:[%s5698_s0 + $0x288] sm:$0xff]  ;;  %v3440_v13 = vcombine.low %v83_v62, %v91_v63 }
  0x6b   :  { %2865 = vmatmul.mubr.bf16.gmra.mrb[20].mxu0 %v3454_v28  ;;  %2464 = vmatpush1.bf16.msra.mxu1 %v4162_v24  ;;  %v47_v24 = vld [vmem:[%s5698_s0 + $0x108] sm:$0xff] }
  0x6c   :  { %2916 = vmatpush1.bf16.msra.mxu0 %v4165_v25  ;;  %2465 = vmatprep.subr.bf16.mxu1 %v4170_v32  ;;  %v55_v25 = vld [vmem:[%s5698_s0 + $0x148] sm:$0xff]  ;;  %v4218_v32 = vld [vmem:[%s5697_s1 + $0x234] ss:$8 sps:$4 sm:$0xff]  }
  0x6d   :  { %2917 = vmatprep.subr.bf16.mxu0 %v4173_v33  ;;  %2422 = vmatprep.mubr.bf16.mxu1 %v3463_v34  ;;  %v51_v28 = vld [vmem:[%s5698_s0 + $0x128] sm:$0xff]  ;;  %v4221_v33 = vld [vmem:[%s5697_s1 + $0x634] ss:$8 sps:$4 sm:$0xff]   ;;  %v3401_v34 = vcombine.high %v47_v24, %v55_v25  ;;  %v3400_v43 = vcombine.low %v47_v24, %v55_v25 }
  0x6e   :  { %2874 = vmatprep.mubr.bf16.mxu0 %v3471_v35  ;;  %v3409_v35 = vcombine.high %v51_v28, %v59_v29  ;;  %v99_v14 = vld [vmem:[%s5698_s0 + $0x2a8] sm:$0xff] }
  0x6f   :  { %2466 = vmatpush1.bf16.msra.mxu1 %v4168_v36  ;;  %v4216_v36 = vld [vmem:[%s5697_s1 + $0x230] ss:$8 sps:$4 sm:$0xff]   ;;  %v4258_v24 = vld [vmem:[%s5697_s1 + $0x2a0] ss:$8 sps:$4 sm:$0xff]  }
  0x70   :  { %2918 = vmatpush1.bf16.msra.mxu0 %v4171_v37  ;;  %2467 = vmatprep.subr.bf16.mxu1 %v4176_v38  ;;  %v4219_v37 = vld [vmem:[%s5697_s1 + $0x630] ss:$8 sps:$4 sm:$0xff]   ;;  %v4224_v38 = vld [vmem:[%s5697_s1 + $0x244] ss:$8 sps:$4 sm:$0xff]  }
  0x71   :  { %2919 = vmatprep.subr.bf16.mxu0 %v4179_v39  ;;  %v4227_v39 = vld [vmem:[%s5697_s1 + $0x644] ss:$8 sps:$4 sm:$0xff]  }
  0x72   :  { %2423 = vmatmul.mubr.bf16.gmra.mrb[24].mxu1 %v3462_v44  ;;  %v3408_v44 = vcombine.low %v51_v28, %v59_v29  ;;  %v111_v25 = vld [vmem:[%s5698_s0 + $0x308] sm:$0xff] }
  0x73   :  { %2875 = vmatmul.mubr.bf16.gmra.mrb[24].mxu0 %v3470_v45  ;;  %2468 = vmatpush1.bf16.msra.mxu1 %v4174_v40  ;;  %v4222_v40 = vld [vmem:[%s5697_s1 + $0x240] ss:$8 sps:$4 sm:$0xff]  }
  0x74   :  { %2920 = vmatpush1.bf16.msra.mxu0 %v4177_v41  ;;  %2469 = vmatprep.subr.bf16.mxu1 %v4182_v48  ;;  %v4225_v41 = vld [vmem:[%s5697_s1 + $0x640] ss:$8 sps:$4 sm:$0xff]   ;;  %v4230_v48 = vld [vmem:[%s5697_s1 + $0x254] ss:$8 sps:$4 sm:$0xff]  }
  0x75   :  { %2921 = vmatprep.subr.bf16.mxu0 %v4185_v49  ;;  %2432 = vmatprep.mubr.bf16.mxu1 %v3479_v50  ;;  %v71_v45 = vld [vmem:[%s5698_s0 + $0x1c8] sm:$0xff]  ;;  %v4233_v49 = vld [vmem:[%s5697_s1 + $0x654] ss:$8 sps:$4 sm:$0xff]  }
  0x76   :  { %2884 = vmatprep.mubr.bf16.mxu0 %v3487_v51  ;;  %v3417_v50 = vcombine.high %v63_v42, %v71_v45  ;;  %v3425_v51 = vcombine.high %v67_v46, %v75_v47  ;;  %v115_v29 = vld [vmem:[%s5698_s0 + $0x328] sm:$0xff] }
  0x77   :  { %2470 = vmatpush1.bf16.msra.mxu1 %v4180_v52  ;;  %v4228_v52 = vld [vmem:[%s5697_s1 + $0x250] ss:$8 sps:$4 sm:$0xff]  }
  0x78   :  { %2922 = vmatpush1.bf16.msra.mxu0 %v4183_v53  ;;  %2471 = vmatprep.subr.bf16.mxu1 %v4188_v54  ;;  %v4231_v53 = vld [vmem:[%s5697_s1 + $0x650] ss:$8 sps:$4 sm:$0xff]   ;;  %v4236_v54 = vld [vmem:[%s5697_s1 + $0x264] ss:$8 sps:$4 sm:$0xff]  }
  0x79   :  { %2923 = vmatprep.subr.bf16.mxu0 %v4191_v55  ;;  %v4239_v55 = vld [vmem:[%s5697_s1 + $0x664] ss:$8 sps:$4 sm:$0xff]  }
  0x7a   :  { %2433 = vmatmul.mubr.bf16.gmra.mrb[28].mxu1 %v3478_v60  ;;  %v3416_v60 = vcombine.low %v63_v42, %v71_v45  ;;  %v139_v45 = vld [vmem:[%s5698_s0 + $0x3e8] sm:$0xff] }
  0x7b   :  { %2885 = vmatmul.mubr.bf16.gmra.mrb[28].mxu0 %v3486_v61  ;;  %2472 = vmatpush1.bf16.msra.mxu1 %v4186_v56  ;;  %v4234_v56 = vld [vmem:[%s5697_s1 + $0x260] ss:$8 sps:$4 sm:$0xff]   ;;  %v3424_v61 = vcombine.low %v67_v46, %v75_v47 }
  0x7c   :  { %2924 = vmatpush1.bf16.msra.mxu0 %v4189_v57  ;;  %2473 = vmatprep.subr.bf16.mxu1 %v4194_v0  ;;  %v4237_v57 = vld [vmem:[%s5697_s1 + $0x660] ss:$8 sps:$4 sm:$0xff]   ;;  %v4242_v0 = vld [vmem:[%s5697_s1 + $0x274] ss:$8 sps:$4 sm:$0xff]  }
  0x7d   :  { %2925 = vmatprep.subr.bf16.mxu0 %v4197_v1  ;;  %2475 = vmatprep.mubr.bf16.mxu1 %v3369_v2  ;;  %v4245_v1 = vld [vmem:[%s5697_s1 + $0x674] ss:$8 sps:$4 sm:$0xff]   ;;  %v3433_v2 = vcombine.high %v79_v58, %v87_v59  ;;  %v4270_v46 = vld [vmem:[%s5697_s1 + $0x2c0] ss:$8 sps:$4 sm:$0xff]  }
  0x7e   :  { %2927 = vmatprep.mubr.bf16.mxu0 %v3377_v3  ;;  %v3441_v3 = vcombine.high %v83_v62, %v91_v63  ;;  %v4273_v47 = vld [vmem:[%s5697_s1 + $0x6c0] ss:$8 sps:$4 sm:$0xff]   ;;  %v20_v62 = vld [vmem:[%s5698_s0 + $0x30] sm:$0xff] }
  0x7f   :  { %2474 = vmatpush1.bf16.msra.mxu1 %v4192_v4  ;;  %v4240_v4 = vld [vmem:[%s5697_s1 + $0x270] ss:$8 sps:$4 sm:$0xff]  }
  0x80   :  { %2926 = vmatpush1.bf16.msra.mxu0 %v4195_v5  ;;  %2556 = vmatprep.subr.bf16.mxu1 %v4200_v6  ;;  %v4243_v5 = vld [vmem:[%s5697_s1 + $0x670] ss:$8 sps:$4 sm:$0xff]   ;;  %v4248_v6 = vld [vmem:[%s5697_s1 + $0x284] ss:$8 sps:$4 sm:$0xff]  }
  0x81   :  { %3008 = vmatprep.subr.bf16.mxu0 %v4203_v7  ;;  %v4251_v7 = vld [vmem:[%s5697_s1 + $0x684] ss:$8 sps:$4 sm:$0xff]   ;;  %v28_v63 = vld [vmem:[%s5698_s0 + $0x70] sm:$0xff] }
  0x82   :  { %2476 = vmatmul.mubr.bf16.vlgmr.msra.gmra.mrb[0].mxu1 %v3368_v11  ;;  %v103_v11 = vld [vmem:[%s5698_s0 + $0x2c8] sm:$0xff] }
  0x83   :  { %2928 = vmatmul.mubr.bf16.vlgmr.msra.gmra.mrb[0].mxu0 %v3376_v12  ;;  %2557 = vmatpush1.bf16.msra.mxu1 %v4198_v8  ;;  %v4246_v8 = vld [vmem:[%s5697_s1 + $0x280] ss:$8 sps:$4 sm:$0xff]   ;;  %v3432_v12 = vcombine.low %v79_v58, %v87_v59  ;;  %v16_v58 = vld [vmem:[%s5698_s0 + $0x10] sm:$0xff] }
  0x84   :  { %3009 = vmatpush1.bf16.msra.mxu0 %v4201_v15  ;;  %2558 = vmatprep.subr.bf16.mxu1 %v4206_v16  ;;  %v107_v15 = vld [vmem:[%s5698_s0 + $0x2e8] sm:$0xff]  ;;  %v4254_v16 = vld [vmem:[%s5697_s1 + $0x294] ss:$8 sps:$4 sm:$0xff]  }
  0x85   :  { %3010 = vmatprep.subr.bf16.mxu0 %v4209_v17  ;;  %2485 = vmatprep.mubr.bf16.mxu1 %v3385_v18  ;;  %v4257_v17 = vld [vmem:[%s5697_s1 + $0x694] ss:$8 sps:$4 sm:$0xff]   ;;  %v3449_v18 = vcombine.high %v95_v10, %v103_v11  ;;  %v3456_v28 = vcombine.low %v99_v14, %v107_v15 }
  0x86   :  { %2937 = vmatprep.mubr.bf16.mxu0 %v3393_v19  ;;  %v3457_v19 = vcombine.high %v99_v14, %v107_v15  ;;  %v36_v14 = vld [vmem:[%s5698_s0 + $0xb0] sm:$0xff] }
  0x87   :  { %2559 = vmatpush1.bf16.msra.mxu1 %v4204_v20  ;;  %v4252_v20 = vld [vmem:[%s5697_s1 + $0x290] ss:$8 sps:$4 sm:$0xff]  }
  0x88   :  { %3011 = vmatpush1.bf16.msra.mxu0 %v4207_v21  ;;  %2560 = vmatprep.subr.bf16.mxu1 %v4212_v22  ;;  %v4255_v21 = vld [vmem:[%s5697_s1 + $0x690] ss:$8 sps:$4 sm:$0xff]   ;;  %v4260_v22 = vld [vmem:[%s5697_s1 + $0x2a4] ss:$8 sps:$4 sm:$0xff]  }
  0x89   :  { %3012 = vmatprep.subr.bf16.mxu0 %v4215_v23  ;;  %v4263_v23 = vld [vmem:[%s5697_s1 + $0x6a4] ss:$8 sps:$4 sm:$0xff]   ;;  %v44_v15 = vld [vmem:[%s5698_s0 + $0xf0] sm:$0xff] }
  0x8a   :  { %2486 = vmatmul.mubr.bf16.gmra.mrb[4].mxu1 %v3384_v26  ;;  %v119_v26 = vld [vmem:[%s5698_s0 + $0x348] sm:$0xff] }
  0x8b   :  { %2938 = vmatmul.mubr.bf16.gmra.mrb[4].mxu0 %v3392_v27  ;;  %2561 = vmatpush1.bf16.msra.mxu1 %v4210_v30  ;;  %v3448_v27 = vcombine.low %v95_v10, %v103_v11  ;;  %v123_v30 = vld [vmem:[%s5698_s0 + $0x368] sm:$0xff]  ;;  %v3464_v42 = vcombine.low %v111_v25, %v119_v26  ;;  %v32_v10 = vld [vmem:[%s5698_s0 + $0x90] sm:$0xff] }
  0x8c   :  { %3013 = vmatpush1.bf16.msra.mxu0 %v4213_v31  ;;  %2562 = vmatprep.subr.bf16.mxu1 %v4218_v32  ;;  %v4261_v31 = vld [vmem:[%s5697_s1 + $0x6a0] ss:$8 sps:$4 sm:$0xff]   ;;  %v4266_v32 = vld [vmem:[%s5697_s1 + $0x2b4] ss:$8 sps:$4 sm:$0xff]  }
  0x8d   :  { %3014 = vmatprep.subr.bf16.mxu0 %v4221_v33  ;;  %2495 = vmatprep.mubr.bf16.mxu1 %v3401_v34  ;;  %v4269_v33 = vld [vmem:[%s5697_s1 + $0x6b4] ss:$8 sps:$4 sm:$0xff]   ;;  %v3465_v34 = vcombine.high %v111_v25, %v119_v26  ;;  %v4309_v25 = vld [vmem:[%s5697_s1 + $0x720] ss:$8 sps:$4 sm:$0xff]  }
  0x8e   :  { %2947 = vmatprep.mubr.bf16.mxu0 %v3409_v35  ;;  %v3473_v35 = vcombine.high %v115_v29, %v123_v30  ;;  %v40_v11 = vld [vmem:[%s5698_s0 + $0xd0] sm:$0xff] }
  0x8f   :  { %2563 = vmatpush1.bf16.msra.mxu1 %v4216_v36  ;;  %v4264_v36 = vld [vmem:[%s5697_s1 + $0x2b0] ss:$8 sps:$4 sm:$0xff]  }
  0x90   :  { %3015 = vmatpush1.bf16.msra.mxu0 %v4219_v37  ;;  %2564 = vmatprep.subr.bf16.mxu1 %v4224_v38  ;;  %v4267_v37 = vld [vmem:[%s5697_s1 + $0x6b0] ss:$8 sps:$4 sm:$0xff]   ;;  %v4272_v38 = vld [vmem:[%s5697_s1 + $0x2c4] ss:$8 sps:$4 sm:$0xff]  }
  0x91   :  { %3016 = vmatprep.subr.bf16.mxu0 %v4227_v39  ;;  %v4275_v39 = vld [vmem:[%s5697_s1 + $0x6c4] ss:$8 sps:$4 sm:$0xff]   ;;  %v48_v26 = vld [vmem:[%s5698_s0 + $0x110] sm:$0xff] }
  0x92   :  { %2496 = vmatmul.mubr.bf16.gmra.mrb[8].mxu1 %v3400_v43  ;;  %v3472_v43 = vcombine.low %v115_v29, %v123_v30  ;;  %v3394_v29 = vcombine.low %v36_v14, %v44_v15  ;;  %v52_v30 = vld [vmem:[%s5698_s0 + $0x130] sm:$0xff] }
  0x93   :  { %2948 = vmatmul.mubr.bf16.gmra.mrb[8].mxu0 %v3408_v44  ;;  %2565 = vmatpush1.bf16.msra.mxu1 %v4222_v40  ;;  %v127_v40 = vld [vmem:[%s5698_s0 + $0x388] sm:$0xff] }
  0x94   :  { %3017 = vmatpush1.bf16.msra.mxu0 %v4225_v41  ;;  %2566 = vmatprep.subr.bf16.mxu1 %v4230_v48  ;;  %v135_v41 = vld [vmem:[%s5698_s0 + $0x3c8] sm:$0xff]  ;;  %v4278_v48 = vld [vmem:[%s5697_s1 + $0x2d4] ss:$8 sps:$4 sm:$0xff]  }
  0x95   :  { %3018 = vmatprep.subr.bf16.mxu0 %v4233_v49  ;;  %2505 = vmatprep.mubr.bf16.mxu1 %v3417_v50  ;;  %v131_v44 = vld [vmem:[%s5698_s0 + $0x3a8] sm:$0xff]  ;;  %v4281_v49 = vld [vmem:[%s5697_s1 + $0x6d4] ss:$8 sps:$4 sm:$0xff]   ;;  %v3481_v50 = vcombine.high %v127_v40, %v135_v41  ;;  %v3480_v59 = vcombine.low %v127_v40, %v135_v41 }
  0x96   :  { %2957 = vmatprep.mubr.bf16.mxu0 %v3425_v51  ;;  %v3489_v51 = vcombine.high %v131_v44, %v139_v45  ;;  %v64_v40 = vld [vmem:[%s5698_s0 + $0x190] sm:$0xff] }
  0x97   :  { %2567 = vmatpush1.bf16.msra.mxu1 %v4228_v52  ;;  %v4276_v52 = vld [vmem:[%s5697_s1 + $0x2d0] ss:$8 sps:$4 sm:$0xff]  }
  0x98   :  { %3019 = vmatpush1.bf16.msra.mxu0 %v4231_v53  ;;  %2568 = vmatprep.subr.bf16.mxu1 %v4236_v54  ;;  %v4279_v53 = vld [vmem:[%s5697_s1 + $0x6d0] ss:$8 sps:$4 sm:$0xff]   ;;  %v4284_v54 = vld [vmem:[%s5697_s1 + $0x2e4] ss:$8 sps:$4 sm:$0xff]  }
  0x99   :  { %3020 = vmatprep.subr.bf16.mxu0 %v4239_v55  ;;  %v4287_v55 = vld [vmem:[%s5697_s1 + $0x6e4] ss:$8 sps:$4 sm:$0xff]  }
  0x9a   :  { %2506 = vmatmul.mubr.bf16.gmra.mrb[12].mxu1 %v3416_v60  ;;  %v3488_v60 = vcombine.low %v131_v44, %v139_v45  ;;  %v68_v44 = vld [vmem:[%s5698_s0 + $0x1b0] sm:$0xff] }
  0x9b   :  { %2958 = vmatmul.mubr.bf16.gmra.mrb[12].mxu0 %v3424_v61  ;;  %2569 = vmatpush1.bf16.msra.mxu1 %v4234_v56  ;;  %v4282_v56 = vld [vmem:[%s5697_s1 + $0x2e0] ss:$8 sps:$4 sm:$0xff]   ;;  %v24_v61 = vld [vmem:[%s5698_s0 + $0x50] sm:$0xff] }
  0x9c   :  { %3021 = vmatpush1.bf16.msra.mxu0 %v4237_v57  ;;  %2570 = vmatprep.subr.bf16.mxu1 %v4242_v0  ;;  %v4285_v57 = vld [vmem:[%s5697_s1 + $0x6e0] ss:$8 sps:$4 sm:$0xff]   ;;  %v4290_v0 = vld [vmem:[%s5697_s1 + $0x2f4] ss:$8 sps:$4 sm:$0xff]  }
  0x9d   :  { %3022 = vmatprep.subr.bf16.mxu0 %v4245_v1  ;;  %2515 = vmatprep.mubr.bf16.mxu1 %v3433_v2  ;;  %v4293_v1 = vld [vmem:[%s5697_s1 + $0x6f4] ss:$8 sps:$4 sm:$0xff]   ;;  %v3371_v2 = vcombine.high %v16_v58, %v24_v61 }
  0x9e   :  { %2967 = vmatprep.mubr.bf16.mxu0 %v3441_v3  ;;  %v3379_v3 = vcombine.high %v20_v62, %v28_v63  ;;  %v76_v45 = vld [vmem:[%s5698_s0 + $0x1f0] sm:$0xff] }
  0x9f   :  { %2571 = vmatpush1.bf16.msra.mxu1 %v4240_v4  ;;  %v4288_v4 = vld [vmem:[%s5697_s1 + $0x2f0] ss:$8 sps:$4 sm:$0xff]  }
  0xa0   :  { %3023 = vmatpush1.bf16.msra.mxu0 %v4243_v5  ;;  %2572 = vmatprep.subr.bf16.mxu1 %v4248_v6  ;;  %v4291_v5 = vld [vmem:[%s5697_s1 + $0x6f0] ss:$8 sps:$4 sm:$0xff]   ;;  %v4296_v6 = vld [vmem:[%s5697_s1 + $0x304] ss:$8 sps:$4 sm:$0xff]  }
  0xa1   :  { %3024 = vmatprep.subr.bf16.mxu0 %v4251_v7  ;;  %v4299_v7 = vld [vmem:[%s5697_s1 + $0x704] ss:$8 sps:$4 sm:$0xff]  }
  0xa2   :  { %2516 = vmatmul.mubr.bf16.gmra.mrb[16].mxu1 %v3432_v12  ;;  %v3370_v12 = vcombine.low %v16_v58, %v24_v61  ;;  %v3426_v58 = vcombine.low %v68_v44, %v76_v45  ;;  %v92_v61 = vld [vmem:[%s5698_s0 + $0x270] sm:$0xff] }
  0xa3   :  { %2968 = vmatmul.mubr.bf16.gmra.mrb[16].mxu0 %v3440_v13  ;;  %2573 = vmatpush1.bf16.msra.mxu1 %v4246_v8  ;;  %v4294_v8 = vld [vmem:[%s5697_s1 + $0x300] ss:$8 sps:$4 sm:$0xff]   ;;  %v3378_v13 = vcombine.low %v20_v62, %v28_v63 }
  0xa4   :  { %3025 = vmatpush1.bf16.msra.mxu0 %v4249_v9  ;;  %2574 = vmatprep.subr.bf16.mxu1 %v4254_v16  ;;  %v4297_v9 = vld [vmem:[%s5697_s1 + $0x700] ss:$8 sps:$4 sm:$0xff]   ;;  %v4302_v16 = vld [vmem:[%s5697_s1 + $0x314] ss:$8 sps:$4 sm:$0xff]  }
  0xa5   :  { %3026 = vmatprep.subr.bf16.mxu0 %v4257_v17  ;;  %2525 = vmatprep.mubr.bf16.mxu1 %v3449_v18  ;;  %v4305_v17 = vld [vmem:[%s5697_s1 + $0x714] ss:$8 sps:$4 sm:$0xff]   ;;  %v3387_v18 = vcombine.high %v32_v10, %v40_v11  ;;  %v4330_v62 = vld [vmem:[%s5697_s1 + $0x360] ss:$8 sps:$4 sm:$0xff]  }
  0xa6   :  { %2977 = vmatprep.mubr.bf16.mxu0 %v3457_v19  ;;  %v3395_v19 = vcombine.high %v36_v14, %v44_v15  ;;  %v4333_v63 = vld [vmem:[%s5697_s1 + $0x760] ss:$8 sps:$4 sm:$0xff]  }
  0xa7   :  { %2575 = vmatpush1.bf16.msra.mxu1 %v4252_v20  ;;  %v4300_v20 = vld [vmem:[%s5697_s1 + $0x310] ss:$8 sps:$4 sm:$0xff]   ;;  %v4342_v14 = vld [vmem:[%s5697_s1 + $0x380] ss:$8 sps:$4 sm:$0xff]  }
  0xa8   :  { %3027 = vmatpush1.bf16.msra.mxu0 %v4255_v21  ;;  %2576 = vmatprep.subr.bf16.mxu1 %v4260_v22  ;;  %v4303_v21 = vld [vmem:[%s5697_s1 + $0x710] ss:$8 sps:$4 sm:$0xff]   ;;  %v4308_v22 = vld [vmem:[%s5697_s1 + $0x324] ss:$8 sps:$4 sm:$0xff]   ;;  %v4345_v15 = vld [vmem:[%s5697_s1 + $0x780] ss:$8 sps:$4 sm:$0xff]  }
  0xa9   :  { %3028 = vmatprep.subr.bf16.mxu0 %v4263_v23  ;;  %v4311_v23 = vld [vmem:[%s5697_s1 + $0x724] ss:$8 sps:$4 sm:$0xff]  }
  0xaa   :  { %2526 = vmatmul.mubr.bf16.gmra.mrb[20].mxu1 %v3448_v27  ;;  %v56_v27 = vld [vmem:[%s5698_s0 + $0x150] sm:$0xff] }
  0xab   :  { %2978 = vmatmul.mubr.bf16.gmra.mrb[20].mxu0 %v3456_v28  ;;  %2577 = vmatpush1.bf16.msra.mxu1 %v4258_v24  ;;  %v4306_v24 = vld [vmem:[%s5697_s1 + $0x320] ss:$8 sps:$4 sm:$0xff]   ;;  %v3386_v28 = vcombine.low %v32_v10, %v40_v11  ;;  %v3402_v41 = vcombine.low %v48_v26, %v56_v27  ;;  %v104_v11 = vld [vmem:[%s5698_s0 + $0x2d0] sm:$0xff] }
  0xac   :  { %3029 = vmatpush1.bf16.msra.mxu0 %v4261_v31  ;;  %2578 = vmatprep.subr.bf16.mxu1 %v4266_v32  ;;  %v60_v31 = vld [vmem:[%s5698_s0 + $0x170] sm:$0xff] }
  0xad   :  { %3030 = vmatprep.subr.bf16.mxu0 %v4269_v33  ;;  %2535 = vmatprep.mubr.bf16.mxu1 %v3465_v34  ;;  %v4314_v32 = vld [vmem:[%s5697_s1 + $0x334] ss:$8 sps:$4 sm:$0xff]   ;;  %v3403_v34 = vcombine.high %v48_v26, %v56_v27 }
  0xae   :  { %2987 = vmatprep.mubr.bf16.mxu0 %v3473_v35  ;;  %v4317_v33 = vld [vmem:[%s5697_s1 + $0x734] ss:$8 sps:$4 sm:$0xff]   ;;  %v3411_v35 = vcombine.high %v52_v30, %v60_v31 }
  0xaf   :  { %2579 = vmatpush1.bf16.msra.mxu1 %v4264_v36  ;;  %v4312_v36 = vld [vmem:[%s5697_s1 + $0x330] ss:$8 sps:$4 sm:$0xff]  }
  0xb0   :  { %3031 = vmatpush1.bf16.msra.mxu0 %v4267_v37  ;;  %2580 = vmatprep.subr.bf16.mxu1 %v4272_v38  ;;  %v4315_v37 = vld [vmem:[%s5697_s1 + $0x730] ss:$8 sps:$4 sm:$0xff]   ;;  %v4320_v38 = vld [vmem:[%s5697_s1 + $0x344] ss:$8 sps:$4 sm:$0xff]  }
  0xb1   :  { %3032 = vmatprep.subr.bf16.mxu0 %v4275_v39  ;;  %v4323_v39 = vld [vmem:[%s5697_s1 + $0x744] ss:$8 sps:$4 sm:$0xff]   ;;  %v120_v27 = vld [vmem:[%s5698_s0 + $0x350] sm:$0xff] }
  0xb2   :  { %2536 = vmatmul.mubr.bf16.gmra.mrb[24].mxu1 %v3464_v42  ;;  %v3410_v42 = vcombine.low %v52_v30, %v60_v31  ;;  %v4354_v30 = vld [vmem:[%s5697_s1 + $0x3a0] ss:$8 sps:$4 sm:$0xff]  }
  0xb3   :  { %2988 = vmatmul.mubr.bf16.gmra.mrb[24].mxu0 %v3472_v43  ;;  %2581 = vmatpush1.bf16.msra.mxu1 %v4270_v46  ;;  %v72_v43 = vld [vmem:[%s5698_s0 + $0x1d0] sm:$0xff]  ;;  %v4318_v46 = vld [vmem:[%s5697_s1 + $0x340] ss:$8 sps:$4 sm:$0xff]  }
  0xb4   :  { %3033 = vmatpush1.bf16.msra.mxu0 %v4273_v47  ;;  %2582 = vmatprep.subr.bf16.mxu1 %v4278_v48  ;;  %v4321_v47 = vld [vmem:[%s5697_s1 + $0x740] ss:$8 sps:$4 sm:$0xff]   ;;  %v4326_v48 = vld [vmem:[%s5697_s1 + $0x354] ss:$8 sps:$4 sm:$0xff]  }
  0xb5   :  { %3034 = vmatprep.subr.bf16.mxu0 %v4281_v49  ;;  %2545 = vmatprep.mubr.bf16.mxu1 %v3481_v50  ;;  %v4329_v49 = vld [vmem:[%s5697_s1 + $0x754] ss:$8 sps:$4 sm:$0xff]   ;;  %v3419_v50 = vcombine.high %v64_v40, %v72_v43  ;;  %v4357_v31 = vld [vmem:[%s5697_s1 + $0x7a0] ss:$8 sps:$4 sm:$0xff]  }
  0xb6   :  { %2997 = vmatprep.mubr.bf16.mxu0 %v3489_v51  ;;  %v3427_v51 = vcombine.high %v68_v44, %v76_v45  ;;  %v132_v44 = vld [vmem:[%s5698_s0 + $0x3b0] sm:$0xff] }
  0xb7   :  { %2583 = vmatpush1.bf16.msra.mxu1 %v4276_v52  ;;  %v4324_v52 = vld [vmem:[%s5697_s1 + $0x350] ss:$8 sps:$4 sm:$0xff]  }
  0xb8   :  { %3035 = vmatpush1.bf16.msra.mxu0 %v4279_v53  ;;  %2584 = vmatprep.subr.bf16.mxu1 %v4284_v54  ;;  %v4327_v53 = vld [vmem:[%s5697_s1 + $0x750] ss:$8 sps:$4 sm:$0xff]   ;;  %v4332_v54 = vld [vmem:[%s5697_s1 + $0x364] ss:$8 sps:$4 sm:$0xff]  }
  0xb9   :  { %3036 = vmatprep.subr.bf16.mxu0 %v4287_v55  ;;  %v4335_v55 = vld [vmem:[%s5697_s1 + $0x764] ss:$8 sps:$4 sm:$0xff]   ;;  %v140_v45 = vld [vmem:[%s5698_s0 + $0x3f0] sm:$0xff] }
  0xba   :  { %2546 = vmatmul.mubr.bf16.gmra.mrb[28].mxu1 %v3480_v59  ;;  %v88_v59 = vld [vmem:[%s5698_s0 + $0x250] sm:$0xff] }
  0xbb   :  { %2998 = vmatmul.mubr.bf16.gmra.mrb[28].mxu0 %v3488_v60  ;;  %2585 = vmatpush1.bf16.msra.mxu1 %v4282_v56  ;;  %v80_v56 = vld [vmem:[%s5698_s0 + $0x210] sm:$0xff] }
  0xbc   :  { %3037 = vmatpush1.bf16.msra.mxu0 %v4285_v57  ;;  %2586 = vmatprep.subr.bf16.mxu1 %v4290_v0  ;;  %v3418_v57 = vcombine.low %v64_v40, %v72_v43  ;;  %v84_v60 = vld [vmem:[%s5698_s0 + $0x230] sm:$0xff] }
  0xbd   :  { %3038 = vmatprep.subr.bf16.mxu0 %v4293_v1  ;;  %2588 = vmatprep.mubr.bf16.mxu1 %v3371_v2  ;;  %v4338_v0 = vld [vmem:[%s5697_s1 + $0x374] ss:$8 sps:$4 sm:$0xff]   ;;  %v3435_v2 = vcombine.high %v80_v56, %v88_v59  ;;  %v3442_v10 = vcombine.low %v84_v60, %v92_v61 }
  0xbe   :  { %3040 = vmatprep.mubr.bf16.mxu0 %v3379_v3  ;;  %v4341_v1 = vld [vmem:[%s5697_s1 + $0x774] ss:$8 sps:$4 sm:$0xff]   ;;  %v3443_v3 = vcombine.high %v84_v60, %v92_v61 }
  0xbf   :  { %2587 = vmatpush1.bf16.msra.mxu1 %v4288_v4  ;;  %v4336_v4 = vld [vmem:[%s5697_s1 + $0x370] ss:$8 sps:$4 sm:$0xff]  }
  0xc0   :  { %3039 = vmatpush1.bf16.msra.mxu0 %v4291_v5  ;;  %2669 = vmatprep.subr.bf16.mxu1 %v4296_v6  ;;  %v4339_v5 = vld [vmem:[%s5697_s1 + $0x770] ss:$8 sps:$4 sm:$0xff]   ;;  %v4344_v6 = vld [vmem:[%s5697_s1 + $0x384] ss:$8 sps:$4 sm:$0xff]  }
  0xc1   :  { %3121 = vmatprep.subr.bf16.mxu0 %v4299_v7  ;;  %v4347_v7 = vld [vmem:[%s5697_s1 + $0x784] ss:$8 sps:$4 sm:$0xff]   ;;  %v128_v40 = vld [vmem:[%s5698_s0 + $0x390] sm:$0xff]  ;;  %v21_v60 = vld [vmem:[%s5698_s0 + $0x38] sm:$0xff] }
  0xc2   :  { %2589 = vmatmul.mubr.bf16.vlgmr.msra.gmra.mrb[0].mxu1 %v3370_v12  ;;  %v100_v12 = vld [vmem:[%s5698_s0 + $0x2b0] sm:$0xff]  ;;  %v29_v61 = vld [vmem:[%s5698_s0 + $0x78] sm:$0xff] }
  0xc3   :  { %3041 = vmatmul.mubr.bf16.vlgmr.msra.gmra.mrb[0].mxu0 %v3378_v13  ;;  %2670 = vmatpush1.bf16.msra.mxu1 %v4294_v8  ;;  %v96_v8 = vld [vmem:[%s5698_s0 + $0x290] sm:$0xff] }
  0xc4   :  { %3122 = vmatpush1.bf16.msra.mxu0 %v4297_v9  ;;  %2671 = vmatprep.subr.bf16.mxu1 %v4302_v16  ;;  %v3434_v9 = vcombine.low %v80_v56, %v88_v59  ;;  %v108_v13 = vld [vmem:[%s5698_s0 + $0x2f0] sm:$0xff]  ;;  %v17_v56 = vld [vmem:[%s5698_s0 + $0x18] sm:$0xff] }
  0xc5   :  { %3123 = vmatprep.subr.bf16.mxu0 %v4305_v17  ;;  %2598 = vmatprep.mubr.bf16.mxu1 %v3387_v18  ;;  %v4350_v16 = vld [vmem:[%s5697_s1 + $0x394] ss:$8 sps:$4 sm:$0xff]   ;;  %v3451_v18 = vcombine.high %v96_v8, %v104_v11  ;;  %v3458_v26 = vcombine.low %v100_v12, %v108_v13 }
  0xc6   :  { %3050 = vmatprep.mubr.bf16.mxu0 %v3395_v19  ;;  %v4353_v17 = vld [vmem:[%s5697_s1 + $0x794] ss:$8 sps:$4 sm:$0xff]   ;;  %v3459_v19 = vcombine.high %v100_v12, %v108_v13 }
  0xc7   :  { %2672 = vmatpush1.bf16.msra.mxu1 %v4300_v20  ;;  %v4348_v20 = vld [vmem:[%s5697_s1 + $0x390] ss:$8 sps:$4 sm:$0xff]  }
  0xc8   :  { %3124 = vmatpush1.bf16.msra.mxu0 %v4303_v21  ;;  %2673 = vmatprep.subr.bf16.mxu1 %v4308_v22  ;;  %v4351_v21 = vld [vmem:[%s5697_s1 + $0x790] ss:$8 sps:$4 sm:$0xff]   ;;  %v4356_v22 = vld [vmem:[%s5697_s1 + $0x3a4] ss:$8 sps:$4 sm:$0xff]  }
  0xc9   :  { %3125 = vmatprep.subr.bf16.mxu0 %v4311_v23  ;;  %v4359_v23 = vld [vmem:[%s5697_s1 + $0x7a4] ss:$8 sps:$4 sm:$0xff]   ;;  %v136_v43 = vld [vmem:[%s5698_s0 + $0x3d0] sm:$0xff]  ;;  %v25_v59 = vld [vmem:[%s5698_s0 + $0x58] sm:$0xff] }
  0xca   :  { %2599 = vmatmul.mubr.bf16.gmra.mrb[4].mxu1 %v3386_v28  ;;  %v116_v28 = vld [vmem:[%s5698_s0 + $0x330] sm:$0xff] }
  0xcb   :  { %3051 = vmatmul.mubr.bf16.gmra.mrb[4].mxu0 %v3394_v29  ;;  %2674 = vmatpush1.bf16.msra.mxu1 %v4306_v24  ;;  %v112_v24 = vld [vmem:[%s5698_s0 + $0x310] sm:$0xff] }
  0xcc   :  { %3126 = vmatpush1.bf16.msra.mxu0 %v4309_v25  ;;  %2675 = vmatprep.subr.bf16.mxu1 %v4314_v32  ;;  %v3450_v25 = vcombine.low %v96_v8, %v104_v11  ;;  %v124_v29 = vld [vmem:[%s5698_s0 + $0x370] sm:$0xff]  ;;  %v37_v8 = vld [vmem:[%s5698_s0 + $0xb8] sm:$0xff]  ;;  %v3380_v11 = vcombine.low %v21_v60, %v29_v61 }
  0xcd   :  { %3127 = vmatprep.subr.bf16.mxu0 %v4317_v33  ;;  %2608 = vmatprep.mubr.bf16.mxu1 %v3403_v34  ;;  %v4362_v32 = vld [vmem:[%s5697_s1 + $0x3b4] ss:$8 sps:$4 sm:$0xff]   ;;  %v3467_v34 = vcombine.high %v112_v24, %v120_v27 }
  0xce   :  { %3060 = vmatprep.mubr.bf16.mxu0 %v3411_v35  ;;  %v4365_v33 = vld [vmem:[%s5697_s1 + $0x7b4] ss:$8 sps:$4 sm:$0xff]   ;;  %v3475_v35 = vcombine.high %v116_v28, %v124_v29 }
  0xcf   :  { %2676 = vmatpush1.bf16.msra.mxu1 %v4312_v36  ;;  %v4360_v36 = vld [vmem:[%s5697_s1 + $0x3b0] ss:$8 sps:$4 sm:$0xff]  }
  0xd0   :  { %3128 = vmatpush1.bf16.msra.mxu0 %v4315_v37  ;;  %2677 = vmatprep.subr.bf16.mxu1 %v4320_v38  ;;  %v4363_v37 = vld [vmem:[%s5697_s1 + $0x7b0] ss:$8 sps:$4 sm:$0xff]   ;;  %v4368_v38 = vld [vmem:[%s5697_s1 + $0x3c4] ss:$8 sps:$4 sm:$0xff]  }
  0xd1   :  { %3129 = vmatprep.subr.bf16.mxu0 %v4323_v39  ;;  %v4371_v39 = vld [vmem:[%s5697_s1 + $0x7c4] ss:$8 sps:$4 sm:$0xff]  }
  0xd2   :  { %2609 = vmatmul.mubr.bf16.gmra.mrb[8].mxu1 %v3402_v41  ;;  %v3466_v41 = vcombine.low %v112_v24, %v120_v27  ;;  %v69_v24 = vld [vmem:[%s5698_s0 + $0x1b8] sm:$0xff] }
  0xd3   :  { %3061 = vmatmul.mubr.bf16.gmra.mrb[8].mxu0 %v3410_v42  ;;  %2678 = vmatpush1.bf16.msra.mxu1 %v4318_v46  ;;  %v3474_v42 = vcombine.low %v116_v28, %v124_v29  ;;  %v4366_v46 = vld [vmem:[%s5697_s1 + $0x3c0] ss:$8 sps:$4 sm:$0xff]  }
  0xd4   :  { %3130 = vmatpush1.bf16.msra.mxu0 %v4321_v47  ;;  %2679 = vmatprep.subr.bf16.mxu1 %v4326_v48  ;;  %v4369_v47 = vld [vmem:[%s5697_s1 + $0x7c0] ss:$8 sps:$4 sm:$0xff]   ;;  %v4374_v48 = vld [vmem:[%s5697_s1 + $0x3d4] ss:$8 sps:$4 sm:$0xff]  }
  0xd5   :  { %3131 = vmatprep.subr.bf16.mxu0 %v4329_v49  ;;  %2618 = vmatprep.mubr.bf16.mxu1 %v3419_v50  ;;  %v4377_v49 = vld [vmem:[%s5697_s1 + $0x7d4] ss:$8 sps:$4 sm:$0xff]   ;;  %v3483_v50 = vcombine.high %v128_v40, %v136_v43 }
  0xd6   :  { %3070 = vmatprep.mubr.bf16.mxu0 %v3427_v51  ;;  %v3491_v51 = vcombine.high %v132_v44, %v140_v45 }
  0xd7   :  { %2680 = vmatpush1.bf16.msra.mxu1 %v4324_v52  ;;  %v4372_v52 = vld [vmem:[%s5697_s1 + $0x3d0] ss:$8 sps:$4 sm:$0xff]  }
  0xd8   :  { %3132 = vmatpush1.bf16.msra.mxu0 %v4327_v53  ;;  %2681 = vmatprep.subr.bf16.mxu1 %v4332_v54  ;;  %v4375_v53 = vld [vmem:[%s5697_s1 + $0x7d0] ss:$8 sps:$4 sm:$0xff]   ;;  %v4380_v54 = vld [vmem:[%s5697_s1 + $0x3e4] ss:$8 sps:$4 sm:$0xff]  }
  0xd9   :  { %3133 = vmatprep.subr.bf16.mxu0 %v4335_v55  ;;  %v4383_v55 = vld [vmem:[%s5697_s1 + $0x7e4] ss:$8 sps:$4 sm:$0xff]  }
  0xda   :  { %2619 = vmatmul.mubr.bf16.gmra.mrb[12].mxu1 %v3418_v57  ;;  %v3482_v57 = vcombine.low %v128_v40, %v136_v43  ;;  %v101_v40 = vld [vmem:[%s5698_s0 + $0x2b8] sm:$0xff] }
  0xdb   :  { %3071 = vmatmul.mubr.bf16.gmra.mrb[12].mxu0 %v3426_v58  ;;  %2682 = vmatpush1.bf16.msra.mxu1 %v4330_v62  ;;  %v3490_v58 = vcombine.low %v132_v44, %v140_v45  ;;  %v4378_v62 = vld [vmem:[%s5697_s1 + $0x3e0] ss:$8 sps:$4 sm:$0xff]  }
  0xdc   :  { %3134 = vmatpush1.bf16.msra.mxu0 %v4333_v63  ;;  %2683 = vmatprep.subr.bf16.mxu1 %v4338_v0  ;;  %v4381_v63 = vld [vmem:[%s5697_s1 + $0x7e0] ss:$8 sps:$4 sm:$0xff]   ;;  %v4386_v0 = vld [vmem:[%s5697_s1 + $0x3f4] ss:$8 sps:$4 sm:$0xff]  }
  0xdd   :  { %3135 = vmatprep.subr.bf16.mxu0 %v4341_v1  ;;  %2628 = vmatprep.mubr.bf16.mxu1 %v3435_v2  ;;  %v4389_v1 = vld [vmem:[%s5697_s1 + $0x7f4] ss:$8 sps:$4 sm:$0xff]   ;;  %v3373_v2 = vcombine.high %v17_v56, %v25_v59 }
  0xde   :  { %3080 = vmatprep.mubr.bf16.mxu0 %v3443_v3  ;;  %v3381_v3 = vcombine.high %v21_v60, %v29_v61 }
  0xdf   :  { %2684 = vmatpush1.bf16.msra.mxu1 %v4336_v4  ;;  %v4384_v4 = vld [vmem:[%s5697_s1 + $0x3f0] ss:$8 sps:$4 sm:$0xff]  }
  0xe0   :  { %3136 = vmatpush1.bf16.msra.mxu0 %v4339_v5  ;;  %2685 = vmatprep.subr.bf16.mxu1 %v4344_v6  ;;  %v4387_v5 = vld [vmem:[%s5697_s1 + $0x7f0] ss:$8 sps:$4 sm:$0xff]  }
  0xe1   :  { %3137 = vmatprep.subr.bf16.mxu0 %v4347_v7  ;;  %v33_v6 = vld [vmem:[%s5698_s0 + $0x98] sm:$0xff] }
  0xe2   :  { %2629 = vmatmul.mubr.bf16.gmra.mrb[16].mxu1 %v3434_v9  ;;  %v41_v7 = vld [vmem:[%s5698_s0 + $0xd8] sm:$0xff] }
  0xe3   :  { %3081 = vmatmul.mubr.bf16.gmra.mrb[16].mxu0 %v3442_v10  ;;  %2686 = vmatpush1.bf16.msra.mxu1 %v4342_v14  ;;  %v45_v9 = vld [vmem:[%s5698_s0 + $0xf8] sm:$0xff]  ;;  %v3372_v10 = vcombine.low %v17_v56, %v25_v59  ;;  %v3389_v12 = vcombine.high %v33_v6, %v41_v7 }
  0xe4   :  { %3138 = vmatpush1.bf16.msra.mxu0 %v4345_v15  ;;  %2687 = vmatprep.subr.bf16.mxu1 %v4350_v16  ;;  %v3397_v13 = vcombine.high %v37_v8, %v45_v9  ;;  %v49_v14 = vld [vmem:[%s5698_s0 + $0x118] sm:$0xff] }
  0xe5   :  { %3139 = vmatprep.subr.bf16.mxu0 %v4353_v17  ;;  %2638 = vmatprep.mubr.bf16.mxu1 %v3451_v18  ;;  %v57_v15 = vld [vmem:[%s5698_s0 + $0x158] sm:$0xff]  ;;  %v3388_v18 = vcombine.low %v33_v6, %v41_v7 }
  0xe6   :  { %3090 = vmatprep.mubr.bf16.mxu0 %v3459_v19  ;;  %v53_v16 = vld [vmem:[%s5698_s0 + $0x138] sm:$0xff]  ;;  %v3396_v19 = vcombine.low %v37_v8, %v45_v9 }
  0xe7   :  { %2688 = vmatpush1.bf16.msra.mxu1 %v4348_v20  ;;  %v61_v17 = vld [vmem:[%s5698_s0 + $0x178] sm:$0xff]  ;;  %v3405_v20 = vcombine.high %v49_v14, %v57_v15 }
  0xe8   :  { %3140 = vmatpush1.bf16.msra.mxu0 %v4351_v21  ;;  %2689 = vmatprep.subr.bf16.mxu1 %v4356_v22  ;;  %v3413_v21 = vcombine.high %v53_v16, %v61_v17  ;;  %v65_v22 = vld [vmem:[%s5698_s0 + $0x198] sm:$0xff]  ;;  %v3412_v27 = vcombine.low %v53_v16, %v61_v17 }
  0xe9   :  { %3141 = vmatprep.subr.bf16.mxu0 %v4359_v23  ;;  %v73_v23 = vld [vmem:[%s5698_s0 + $0x1d8] sm:$0xff] }
  0xea   :  { %2639 = vmatmul.mubr.bf16.gmra.mrb[20].mxu1 %v3450_v25  ;;  %v77_v25 = vld [vmem:[%s5698_s0 + $0x1f8] sm:$0xff]  ;;  %v3421_v28 = vcombine.high %v65_v22, %v73_v23 }
  0xeb   :  { %3091 = vmatmul.mubr.bf16.gmra.mrb[20].mxu0 %v3458_v26  ;;  %2690 = vmatpush1.bf16.msra.mxu1 %v4354_v30  ;;  %v3404_v26 = vcombine.low %v49_v14, %v57_v15  ;;  %v3429_v29 = vcombine.high %v69_v24, %v77_v25  ;;  %v81_v30 = vld [vmem:[%s5698_s0 + $0x218] sm:$0xff] }
  0xec   :  { %3142 = vmatpush1.bf16.msra.mxu0 %v4357_v31  ;;  %2691 = vmatprep.subr.bf16.mxu1 %v4362_v32  ;;  %v89_v31 = vld [vmem:[%s5698_s0 + $0x258] sm:$0xff] }
  0xed   :  { %3143 = vmatprep.subr.bf16.mxu0 %v4365_v33  ;;  %2648 = vmatprep.mubr.bf16.mxu1 %v3467_v34  ;;  %v85_v32 = vld [vmem:[%s5698_s0 + $0x238] sm:$0xff]  ;;  %v3420_v34 = vcombine.low %v65_v22, %v73_v23 }
  0xee   :  { %3100 = vmatprep.mubr.bf16.mxu0 %v3475_v35  ;;  %v93_v33 = vld [vmem:[%s5698_s0 + $0x278] sm:$0xff]  ;;  %v3428_v35 = vcombine.low %v69_v24, %v77_v25 }
  0xef   :  { %2692 = vmatpush1.bf16.msra.mxu1 %v4360_v36  ;;  %v3437_v36 = vcombine.high %v81_v30, %v89_v31  ;;  %v3444_v43 = vcombine.low %v85_v32, %v93_v33  ;;  %v133_v56 = vld [vmem:[%s5698_s0 + $0x3b8] sm:$0xff] }
  0xf0   :  { %3144 = vmatpush1.bf16.msra.mxu0 %v4363_v37  ;;  %2693 = vmatprep.subr.bf16.mxu1 %v4368_v38  ;;  %v3445_v37 = vcombine.high %v85_v32, %v93_v33  ;;  %v97_v38 = vld [vmem:[%s5698_s0 + $0x298] sm:$0xff] }
  0xf1   :  { %3145 = vmatprep.subr.bf16.mxu0 %v4371_v39  ;;  %v105_v39 = vld [vmem:[%s5698_s0 + $0x2d8] sm:$0xff] }
  0xf2   :  { %2649 = vmatmul.mubr.bf16.gmra.mrb[24].mxu1 %v3466_v41  ;;  %v109_v41 = vld [vmem:[%s5698_s0 + $0x2f8] sm:$0xff]  ;;  %v3453_v44 = vcombine.high %v97_v38, %v105_v39 }
  0xf3   :  { %3101 = vmatmul.mubr.bf16.gmra.mrb[24].mxu0 %v3474_v42  ;;  %2694 = vmatpush1.bf16.msra.mxu1 %v4366_v46  ;;  %v3436_v42 = vcombine.low %v81_v30, %v89_v31  ;;  %v3461_v45 = vcombine.high %v101_v40, %v109_v41  ;;  %v113_v46 = vld [vmem:[%s5698_s0 + $0x318] sm:$0xff] }
  0xf4   :  { %3146 = vmatpush1.bf16.msra.mxu0 %v4369_v47  ;;  %2695 = vmatprep.subr.bf16.mxu1 %v4374_v48  ;;  %v121_v47 = vld [vmem:[%s5698_s0 + $0x358] sm:$0xff] }
  0xf5   :  { %3147 = vmatprep.subr.bf16.mxu0 %v4377_v49  ;;  %2658 = vmatprep.mubr.bf16.mxu1 %v3483_v50  ;;  %v117_v48 = vld [vmem:[%s5698_s0 + $0x338] sm:$0xff]  ;;  %v3452_v50 = vcombine.low %v97_v38, %v105_v39 }
  0xf6   :  { %3110 = vmatprep.mubr.bf16.mxu0 %v3491_v51  ;;  %v125_v49 = vld [vmem:[%s5698_s0 + $0x378] sm:$0xff]  ;;  %v3460_v51 = vcombine.low %v101_v40, %v109_v41 }
  0xf7   :  { %2696 = vmatpush1.bf16.msra.mxu1 %v4372_v52  ;;  %v3469_v52 = vcombine.high %v113_v46, %v121_v47  ;;  %v3476_v59 = vcombine.low %v117_v48, %v125_v49 }
  0xf8   :  { %3148 = vmatpush1.bf16.msra.mxu0 %v4375_v53  ;;  %2697 = vmatprep.subr.bf16.mxu1 %v4380_v54  ;;  %v3477_v53 = vcombine.high %v117_v48, %v125_v49  ;;  %v129_v54 = vld [vmem:[%s5698_s0 + $0x398] sm:$0xff] }
  0xf9   :  { %3149 = vmatprep.subr.bf16.mxu0 %v4383_v55  ;;  %v137_v55 = vld [vmem:[%s5698_s0 + $0x3d8] sm:$0xff] }
  0xfa   :  { %2659 = vmatmul.mubr.bf16.gmra.mrb[28].mxu1 %v3482_v57  ;;  %v141_v57 = vld [vmem:[%s5698_s0 + $0x3f8] sm:$0xff]  ;;  %v3485_v60 = vcombine.high %v129_v54, %v137_v55 }
  0xfb   :  { %3111 = vmatmul.mubr.bf16.gmra.mrb[28].mxu0 %v3490_v58  ;;  %2698 = vmatpush1.bf16.msra.mxu1 %v4378_v62  ;;  %v3468_v58 = vcombine.low %v113_v46, %v121_v47  ;;  %v3493_v61 = vcombine.high %v133_v56, %v141_v57  ;;  %v3484_v62 = vcombine.low %v129_v54, %v137_v55 }
  0xfc   :  { %3150 = vmatpush1.bf16.msra.mxu0 %v4381_v63  ;;  %2699 = vmatprep.subr.bf16.mxu1 %v4386_v0  ;;  %v3492_v63 = vcombine.low %v133_v56, %v141_v57  ;;  %v400_v0 = vlaneseq }
  0xfd   :  { %3151 = vmatprep.subr.bf16.mxu0 %v4389_v1  ;;  %2701 = vmatprep.mubr.bf16.mxu1 %v3373_v2 }
  0xfe   :  { %3153 = vmatprep.mubr.bf16.mxu0 %v3381_v3  ;;  %v401_v1 = vshrl.u32 %v400_v0, 7  ;;  %v398_v3 = vld [vmem:[%s5699_s2] sm:$0x3] }
  0xff   :  { %2700 = vmatpush1.bf16.msra.mxu1 %v4384_v4 }
 0x100   :  { %3152 = vmatpush1.bf16.msra.mxu0 %v4387_v5  ;;  %v402_v2 = vsub.s32 0, %v401_v1  ;;  %v406_v4 = vsub.s32 1, %v401_v1 }
 0x102   :  { %2702 = vmatmul.mubr.bf16.vlgmr.msra.gmra.mrb[0].mxu1 %v3372_v10  ;;  %v5565_v5 = vrot.slane %v398_v3, %v402_v2  ;;  %v5567_v6 = vrot.slane %v398_v3, %v406_v4 }
 0x103   :  { %3154 = vmatmul.mubr.bf16.vlgmr.msra.gmra.mrb[0].mxu0 %v3380_v11  ;;  %2711 = vmatprep.mubr.bf16.mxu1 %v3389_v12 }
 0x104   :  { %3163 = vmatprep.mubr.bf16.mxu0 %v3397_v13 }
 0x10a   :  { %2712 = vmatmul.mubr.bf16.gmra.mrb[4].mxu1 %v3388_v18 }
 0x10b   :  { %3164 = vmatmul.mubr.bf16.gmra.mrb[4].mxu0 %v3396_v19  ;;  %2721 = vmatprep.mubr.bf16.mxu1 %v3405_v20 }
 0x10c   :  { %3173 = vmatprep.mubr.bf16.mxu0 %v3413_v21 }
 0x112   :  { %2722 = vmatmul.mubr.bf16.gmra.mrb[8].mxu1 %v3404_v26 }
 0x113   :  { %3174 = vmatmul.mubr.bf16.gmra.mrb[8].mxu0 %v3412_v27  ;;  %2731 = vmatprep.mubr.bf16.mxu1 %v3421_v28 }
 0x114   :  { %3183 = vmatprep.mubr.bf16.mxu0 %v3429_v29 }
 0x11a   :  { %2732 = vmatmul.mubr.bf16.gmra.mrb[12].mxu1 %v3420_v34 }
 0x11b   :  { %3184 = vmatmul.mubr.bf16.gmra.mrb[12].mxu0 %v3428_v35  ;;  %2741 = vmatprep.mubr.bf16.mxu1 %v3437_v36 }
 0x11c   :  { %3193 = vmatprep.mubr.bf16.mxu0 %v3445_v37 }
 0x122   :  { %2742 = vmatmul.mubr.bf16.gmra.mrb[16].mxu1 %v3436_v42 }
 0x123   :  { %3194 = vmatmul.mubr.bf16.gmra.mrb[16].mxu0 %v3444_v43  ;;  %2751 = vmatprep.mubr.bf16.mxu1 %v3453_v44 }
 0x124   :  { %3203 = vmatprep.mubr.bf16.mxu0 %v3461_v45 }
 0x12a   :  { %2752 = vmatmul.mubr.bf16.gmra.mrb[20].mxu1 %v3452_v50 }
 0x12b   :  { %3204 = vmatmul.mubr.bf16.gmra.mrb[20].mxu0 %v3460_v51  ;;  %2761 = vmatprep.mubr.bf16.mxu1 %v3469_v52 }
 0x12c   :  { %3213 = vmatprep.mubr.bf16.mxu0 %v3477_v53 }
 0x132   :  { %2762 = vmatmul.mubr.bf16.gmra.mrb[24].mxu1 %v3468_v58 }
 0x133   :  { %3214 = vmatmul.mubr.bf16.gmra.mrb[24].mxu0 %v3476_v59  ;;  %2771 = vmatprep.mubr.bf16.mxu1 %v3485_v60 }
 0x134   :  { %3223 = vmatprep.mubr.bf16.mxu0 %v3493_v61 }
 0x13a   :  { %2772 = vmatmul.mubr.bf16.gmra.mrb[28].mxu1 %v3484_v62 }
 0x13b   :  { %3224 = vmatmul.mubr.bf16.gmra.mrb[28].mxu0 %v3492_v63 }
 0x1d5   :  { %v2703_v7 = vpop.f32.mrb[0].mxu1 }
 0x1d6   :  { %v3155_v8 = vpop.f32.mrb[0].mxu0  ;;  %v3750_v9 = vadd.f32 %v2703_v7, %v5565_v5  ;;  %v2705_v10 = vpop.f32.mrb[1].mxu1 }
 0x1d7   :  { %v3157_v11 = vpop.f32.mrb[1].mxu0  ;;  %v3752_v12 = vadd.f32 %v2705_v10, %v5567_v6  ;;  %v2707_v13 = vpop.f32.mrb[2].mxu1 }
 0x1d8   :  { %v3159_v14 = vpop.f32.mrb[2].mxu0  ;;  %v3751_v15 = vadd.f32 %v3750_v9, %v3155_v8  ;;  %v3754_v16 = vadd.f32 %v2707_v13, %v5565_v5  ;;  %v2709_v17 = vpop.f32.mrb[3].mxu1 }
 0x1d9   :  { %v3161_v18 = vpop.f32.mrb[3].mxu0  ;;  %v3753_v19 = vadd.f32 %v3752_v12, %v3157_v11  ;;  %v3756_v20 = vadd.f32 %v2709_v17, %v5567_v6 }
 0x1da   :  { %vm3234_vm0 = vcmp.gt.f32.partialorder %v3751_v15, 0.0  ;;  %v3266_v21 = vmul.f32 0.2, %v3751_v15  ;;  %v3755_v22 = vadd.f32 %v3754_v16, %v3159_v14 }
 0x1db   :  { %vm3235_vm1 = vcmp.gt.f32.partialorder %v3753_v19, 0.0  ;;  %v3267_v23 = vmul.f32 0.2, %v3753_v19  ;;  %v3757_v24 = vadd.f32 %v3756_v20, %v3161_v18 }
 0x1dc   :  { %v3298_v25 = vsel %vm3234_vm0, %v3751_v15, %v3266_v21  ;;  %vm3236_vm2 = vcmp.gt.f32.partialorder %v3755_v22, 0.0  ;;  %v3268_v26 = vmul.f32 0.2, %v3755_v22 }
 0x1dd   :  { %3330 = vst [vmem:[%s5700_s3] sm:$0xff] %v3298_v25  ;;  %v3299_v27 = vsel %vm3235_vm1, %v3753_v19, %v3267_v23  ;;  %vm3237_vm3 = vcmp.gt.f32.partialorder %v3757_v24, 0.0  ;;  %v3269_v28 = vmul.f32 0.2, %v3757_v24  ;;  %v2713_v29 = vpop.f32.mrb[4].mxu1 }
 0x1de   :  { %v3165_v30 = vpop.f32.mrb[4].mxu0  ;;  %3331 = vst [vmem:[%s5700_s3 + $0x8] sm:$0xff] %v3299_v27  ;;  %v3300_v31 = vsel %vm3236_vm2, %v3755_v22, %v3268_v26  ;;  %v3758_v32 = vadd.f32 %v2713_v29, %v5565_v5  ;;  %v2715_v33 = vpop.f32.mrb[5].mxu1 }
 0x1df   :  { %v3167_v34 = vpop.f32.mrb[5].mxu0  ;;  %3332 = vst [vmem:[%s5700_s3 + $0x10] sm:$0xff] %v3300_v31  ;;  %v3301_v35 = vsel %vm3237_vm3, %v3757_v24, %v3269_v28  ;;  %v3760_v36 = vadd.f32 %v2715_v33, %v5567_v6  ;;  %v2717_v37 = vpop.f32.mrb[6].mxu1 }
 0x1e0   :  { %v3169_v38 = vpop.f32.mrb[6].mxu0  ;;  %3333 = vst [vmem:[%s5700_s3 + $0x18] sm:$0xff] %v3301_v35  ;;  %v3759_v39 = vadd.f32 %v3758_v32, %v3165_v30  ;;  %v3762_v40 = vadd.f32 %v2717_v37, %v5565_v5  ;;  %v2719_v41 = vpop.f32.mrb[7].mxu1 }
 0x1e1   :  { %v3171_v42 = vpop.f32.mrb[7].mxu0  ;;  %v3761_v43 = vadd.f32 %v3760_v36, %v3167_v34  ;;  %v3764_v44 = vadd.f32 %v2719_v41, %v5567_v6 }
 0x1e2   :  { %vm3238_vm4 = vcmp.gt.f32.partialorder %v3759_v39, 0.0  ;;  %v3270_v45 = vmul.f32 0.2, %v3759_v39  ;;  %v3763_v46 = vadd.f32 %v3762_v40, %v3169_v38 }
 0x1e3   :  { %vm3239_vm5 = vcmp.gt.f32.partialorder %v3761_v43, 0.0  ;;  %v3271_v47 = vmul.f32 0.2, %v3761_v43  ;;  %v3765_v48 = vadd.f32 %v3764_v44, %v3171_v42 }
 0x1e4   :  { %v3302_v49 = vsel %vm3238_vm4, %v3759_v39, %v3270_v45  ;;  %vm3240_vm6 = vcmp.gt.f32.partialorder %v3763_v46, 0.0  ;;  %v3272_v50 = vmul.f32 0.2, %v3763_v46 }
 0x1e5   :  { %3334 = vst [vmem:[%s5700_s3 + $0x20] sm:$0xff] %v3302_v49  ;;  %v3303_v51 = vsel %vm3239_vm5, %v3761_v43, %v3271_v47  ;;  %vm3241_vm7 = vcmp.gt.f32.partialorder %v3765_v48, 0.0  ;;  %v3273_v52 = vmul.f32 0.2, %v3765_v48  ;;  %v2723_v53 = vpop.f32.mrb[8].mxu1 }
 0x1e6   :  { %v3175_v54 = vpop.f32.mrb[8].mxu0  ;;  %3335 = vst [vmem:[%s5700_s3 + $0x28] sm:$0xff] %v3303_v51  ;;  %v3304_v55 = vsel %vm3240_vm6, %v3763_v46, %v3272_v50  ;;  %v3766_v56 = vadd.f32 %v2723_v53, %v5565_v5  ;;  %v2725_v57 = vpop.f32.mrb[9].mxu1 }
 0x1e7   :  { %v3177_v58 = vpop.f32.mrb[9].mxu0  ;;  %3336 = vst [vmem:[%s5700_s3 + $0x30] sm:$0xff] %v3304_v55  ;;  %v3305_v59 = vsel %vm3241_vm7, %v3765_v48, %v3273_v52  ;;  %v3768_v60 = vadd.f32 %v2725_v57, %v5567_v6  ;;  %v2727_v61 = vpop.f32.mrb[10].mxu1 }
 0x1e8   :  { %v3179_v62 = vpop.f32.mrb[10].mxu0  ;;  %3337 = vst [vmem:[%s5700_s3 + $0x38] sm:$0xff] %v3305_v59  ;;  %v3767_v63 = vadd.f32 %v3766_v56, %v3175_v54  ;;  %v3770_v0 = vadd.f32 %v2727_v61, %v5565_v5  ;;  %v2729_v1 = vpop.f32.mrb[11].mxu1 }
 0x1e9   :  { %v3181_v2 = vpop.f32.mrb[11].mxu0  ;;  %v3769_v3 = vadd.f32 %v3768_v60, %v3177_v58  ;;  %v3772_v4 = vadd.f32 %v2729_v1, %v5567_v6 }
 0x1ea   :  { %vm3242_vm8 = vcmp.gt.f32.partialorder %v3767_v63, 0.0  ;;  %v3274_v7 = vmul.f32 0.2, %v3767_v63  ;;  %v3771_v8 = vadd.f32 %v3770_v0, %v3179_v62 }
 0x1eb   :  { %vm3243_vm9 = vcmp.gt.f32.partialorder %v3769_v3, 0.0  ;;  %v3275_v9 = vmul.f32 0.2, %v3769_v3  ;;  %v3773_v10 = vadd.f32 %v3772_v4, %v3181_v2 }
 0x1ec   :  { %v3306_v11 = vsel %vm3242_vm8, %v3767_v63, %v3274_v7  ;;  %vm3244_vm10 = vcmp.gt.f32.partialorder %v3771_v8, 0.0  ;;  %v3276_v12 = vmul.f32 0.2, %v3771_v8 }
 0x1ed   :  { %3338 = vst [vmem:[%s5700_s3 + $0x40] sm:$0xff] %v3306_v11  ;;  %v3307_v13 = vsel %vm3243_vm9, %v3769_v3, %v3275_v9  ;;  %vm3245_vm11 = vcmp.gt.f32.partialorder %v3773_v10, 0.0  ;;  %v3277_v14 = vmul.f32 0.2, %v3773_v10  ;;  %v2733_v15 = vpop.f32.mrb[12].mxu1 }
 0x1ee   :  { %v3185_v16 = vpop.f32.mrb[12].mxu0  ;;  %3339 = vst [vmem:[%s5700_s3 + $0x48] sm:$0xff] %v3307_v13  ;;  %v3308_v17 = vsel %vm3244_vm10, %v3771_v8, %v3276_v12  ;;  %v3774_v18 = vadd.f32 %v2733_v15, %v5565_v5  ;;  %v2735_v19 = vpop.f32.mrb[13].mxu1 }
 0x1ef   :  { %v3187_v20 = vpop.f32.mrb[13].mxu0  ;;  %3340 = vst [vmem:[%s5700_s3 + $0x50] sm:$0xff] %v3308_v17  ;;  %v3309_v21 = vsel %vm3245_vm11, %v3773_v10, %v3277_v14  ;;  %v3776_v22 = vadd.f32 %v2735_v19, %v5567_v6  ;;  %v2737_v23 = vpop.f32.mrb[14].mxu1 }
 0x1f0   :  { %v3189_v24 = vpop.f32.mrb[14].mxu0  ;;  %3341 = vst [vmem:[%s5700_s3 + $0x58] sm:$0xff] %v3309_v21  ;;  %v3775_v25 = vadd.f32 %v3774_v18, %v3185_v16  ;;  %v3778_v26 = vadd.f32 %v2737_v23, %v5565_v5  ;;  %v2739_v27 = vpop.f32.mrb[15].mxu1 }
 0x1f1   :  { %v3191_v28 = vpop.f32.mrb[15].mxu0  ;;  %v3777_v29 = vadd.f32 %v3776_v22, %v3187_v20  ;;  %v3780_v30 = vadd.f32 %v2739_v27, %v5567_v6 }
 0x1f2   :  { %vm3246_vm12 = vcmp.gt.f32.partialorder %v3775_v25, 0.0  ;;  %v3278_v31 = vmul.f32 0.2, %v3775_v25  ;;  %v3779_v32 = vadd.f32 %v3778_v26, %v3189_v24 }
 0x1f3   :  { %vm3247_vm13 = vcmp.gt.f32.partialorder %v3777_v29, 0.0  ;;  %v3279_v33 = vmul.f32 0.2, %v3777_v29  ;;  %v3781_v34 = vadd.f32 %v3780_v30, %v3191_v28 }
 0x1f4   :  { %v3310_v35 = vsel %vm3246_vm12, %v3775_v25, %v3278_v31  ;;  %vm3248_vm14 = vcmp.gt.f32.partialorder %v3779_v32, 0.0  ;;  %v3280_v36 = vmul.f32 0.2, %v3779_v32 }
 0x1f5   :  { %3342 = vst [vmem:[%s5700_s3 + $0x60] sm:$0xff] %v3310_v35  ;;  %v3311_v37 = vsel %vm3247_vm13, %v3777_v29, %v3279_v33  ;;  %vm3249_vm15 = vcmp.gt.f32.partialorder %v3781_v34, 0.0  ;;  %v3281_v38 = vmul.f32 0.2, %v3781_v34  ;;  %v2743_v39 = vpop.f32.mrb[16].mxu1 }
 0x1f6   :  { %v3195_v40 = vpop.f32.mrb[16].mxu0  ;;  %3343 = vst [vmem:[%s5700_s3 + $0x68] sm:$0xff] %v3311_v37  ;;  %v3312_v41 = vsel %vm3248_vm14, %v3779_v32, %v3280_v36  ;;  %v3782_v42 = vadd.f32 %v2743_v39, %v5565_v5  ;;  %v2745_v43 = vpop.f32.mrb[17].mxu1 }
 0x1f7   :  { %v3197_v44 = vpop.f32.mrb[17].mxu0  ;;  %3344 = vst [vmem:[%s5700_s3 + $0x70] sm:$0xff] %v3312_v41  ;;  %v3313_v45 = vsel %vm3249_vm15, %v3781_v34, %v3281_v38  ;;  %v3784_v46 = vadd.f32 %v2745_v43, %v5567_v6  ;;  %v2747_v47 = vpop.f32.mrb[18].mxu1 }
 0x1f8   :  { %v3199_v48 = vpop.f32.mrb[18].mxu0  ;;  %3345 = vst [vmem:[%s5700_s3 + $0x78] sm:$0xff] %v3313_v45  ;;  %v3783_v49 = vadd.f32 %v3782_v42, %v3195_v40  ;;  %v3786_v50 = vadd.f32 %v2747_v47, %v5565_v5  ;;  %v2749_v51 = vpop.f32.mrb[19].mxu1 }
 0x1f9   :  { %v3201_v52 = vpop.f32.mrb[19].mxu0  ;;  %v3785_v53 = vadd.f32 %v3784_v46, %v3197_v44  ;;  %v3788_v54 = vadd.f32 %v2749_v51, %v5567_v6 }
 0x1fa   :  { %vm3250_vm0 = vcmp.gt.f32.partialorder %v3783_v49, 0.0  ;;  %v3282_v55 = vmul.f32 0.2, %v3783_v49  ;;  %v3787_v56 = vadd.f32 %v3786_v50, %v3199_v48 }
 0x1fb   :  { %vm3251_vm1 = vcmp.gt.f32.partialorder %v3785_v53, 0.0  ;;  %v3283_v57 = vmul.f32 0.2, %v3785_v53  ;;  %v3789_v58 = vadd.f32 %v3788_v54, %v3201_v52 }
 0x1fc   :  { %v3314_v59 = vsel %vm3250_vm0, %v3783_v49, %v3282_v55  ;;  %vm3252_vm2 = vcmp.gt.f32.partialorder %v3787_v56, 0.0  ;;  %v3284_v60 = vmul.f32 0.2, %v3787_v56 }
 0x1fd   :  { %3346 = vst [vmem:[%s5700_s3 + $0x80] sm:$0xff] %v3314_v59  ;;  %v3315_v61 = vsel %vm3251_vm1, %v3785_v53, %v3283_v57  ;;  %vm3253_vm3 = vcmp.gt.f32.partialorder %v3789_v58, 0.0  ;;  %v3285_v62 = vmul.f32 0.2, %v3789_v58  ;;  %v2753_v63 = vpop.f32.mrb[20].mxu1 }
 0x1fe   :  { %v3205_v0 = vpop.f32.mrb[20].mxu0  ;;  %3347 = vst [vmem:[%s5700_s3 + $0x88] sm:$0xff] %v3315_v61  ;;  %v3316_v1 = vsel %vm3252_vm2, %v3787_v56, %v3284_v60  ;;  %v3790_v2 = vadd.f32 %v2753_v63, %v5565_v5  ;;  %v2755_v3 = vpop.f32.mrb[21].mxu1 }
 0x1ff   :  { %v3207_v4 = vpop.f32.mrb[21].mxu0  ;;  %3348 = vst [vmem:[%s5700_s3 + $0x90] sm:$0xff] %v3316_v1  ;;  %v3317_v7 = vsel %vm3253_vm3, %v3789_v58, %v3285_v62  ;;  %v3792_v8 = vadd.f32 %v2755_v3, %v5567_v6  ;;  %v2757_v9 = vpop.f32.mrb[22].mxu1 }
 0x200   :  { %v3209_v10 = vpop.f32.mrb[22].mxu0  ;;  %3349 = vst [vmem:[%s5700_s3 + $0x98] sm:$0xff] %v3317_v7  ;;  %v3791_v11 = vadd.f32 %v3790_v2, %v3205_v0  ;;  %v3794_v12 = vadd.f32 %v2757_v9, %v5565_v5  ;;  %v2759_v13 = vpop.f32.mrb[23].mxu1 }
 0x201   :  { %v3211_v14 = vpop.f32.mrb[23].mxu0  ;;  %v3793_v15 = vadd.f32 %v3792_v8, %v3207_v4  ;;  %v3796_v16 = vadd.f32 %v2759_v13, %v5567_v6 }
 0x202   :  { %vm3254_vm4 = vcmp.gt.f32.partialorder %v3791_v11, 0.0  ;;  %v3286_v17 = vmul.f32 0.2, %v3791_v11  ;;  %v3795_v18 = vadd.f32 %v3794_v12, %v3209_v10 }
 0x203   :  { %vm3255_vm5 = vcmp.gt.f32.partialorder %v3793_v15, 0.0  ;;  %v3287_v19 = vmul.f32 0.2, %v3793_v15  ;;  %v3797_v20 = vadd.f32 %v3796_v16, %v3211_v14 }
 0x204   :  { %v3318_v21 = vsel %vm3254_vm4, %v3791_v11, %v3286_v17  ;;  %vm3256_vm6 = vcmp.gt.f32.partialorder %v3795_v18, 0.0  ;;  %v3288_v22 = vmul.f32 0.2, %v3795_v18 }
 0x205   :  { %3350 = vst [vmem:[%s5700_s3 + $0xa0] sm:$0xff] %v3318_v21  ;;  %v3319_v23 = vsel %vm3255_vm5, %v3793_v15, %v3287_v19  ;;  %vm3257_vm7 = vcmp.gt.f32.partialorder %v3797_v20, 0.0  ;;  %v3289_v24 = vmul.f32 0.2, %v3797_v20  ;;  %v2763_v25 = vpop.f32.mrb[24].mxu1 }
 0x206   :  { %v3215_v26 = vpop.f32.mrb[24].mxu0  ;;  %3351 = vst [vmem:[%s5700_s3 + $0xa8] sm:$0xff] %v3319_v23  ;;  %v3320_v27 = vsel %vm3256_vm6, %v3795_v18, %v3288_v22  ;;  %v3798_v28 = vadd.f32 %v2763_v25, %v5565_v5  ;;  %v2765_v29 = vpop.f32.mrb[25].mxu1 }
 0x207   :  { %v3217_v30 = vpop.f32.mrb[25].mxu0  ;;  %3352 = vst [vmem:[%s5700_s3 + $0xb0] sm:$0xff] %v3320_v27  ;;  %v3321_v31 = vsel %vm3257_vm7, %v3797_v20, %v3289_v24  ;;  %v3800_v32 = vadd.f32 %v2765_v29, %v5567_v6  ;;  %v2767_v33 = vpop.f32.mrb[26].mxu1 }
 0x208   :  { %v3219_v34 = vpop.f32.mrb[26].mxu0  ;;  %3353 = vst [vmem:[%s5700_s3 + $0xb8] sm:$0xff] %v3321_v31  ;;  %v3799_v35 = vadd.f32 %v3798_v28, %v3215_v26  ;;  %v3802_v36 = vadd.f32 %v2767_v33, %v5565_v5  ;;  %v2769_v37 = vpop.f32.mrb[27].mxu1 }
 0x209   :  { %v3221_v38 = vpop.f32.mrb[27].mxu0  ;;  %v3801_v39 = vadd.f32 %v3800_v32, %v3217_v30  ;;  %v3804_v40 = vadd.f32 %v2769_v37, %v5567_v6 }
 0x20a   :  { %vm3258_vm8 = vcmp.gt.f32.partialorder %v3799_v35, 0.0  ;;  %v3290_v41 = vmul.f32 0.2, %v3799_v35  ;;  %v3803_v42 = vadd.f32 %v3802_v36, %v3219_v34 }
 0x20b   :  { %vm3259_vm9 = vcmp.gt.f32.partialorder %v3801_v39, 0.0  ;;  %v3291_v43 = vmul.f32 0.2, %v3801_v39  ;;  %v3805_v44 = vadd.f32 %v3804_v40, %v3221_v38 }
 0x20c   :  { %v3322_v45 = vsel %vm3258_vm8, %v3799_v35, %v3290_v41  ;;  %vm3260_vm10 = vcmp.gt.f32.partialorder %v3803_v42, 0.0  ;;  %v3292_v46 = vmul.f32 0.2, %v3803_v42 }
 0x20d   :  { %3354 = vst [vmem:[%s5700_s3 + $0xc0] sm:$0xff] %v3322_v45  ;;  %v3323_v47 = vsel %vm3259_vm9, %v3801_v39, %v3291_v43  ;;  %vm3261_vm11 = vcmp.gt.f32.partialorder %v3805_v44, 0.0  ;;  %v3293_v48 = vmul.f32 0.2, %v3805_v44  ;;  %v2773_v49 = vpop.f32.mrb[28].mxu1 }
 0x20e   :  { %v3225_v50 = vpop.f32.mrb[28].mxu0  ;;  %3355 = vst [vmem:[%s5700_s3 + $0xc8] sm:$0xff] %v3323_v47  ;;  %v3324_v51 = vsel %vm3260_vm10, %v3803_v42, %v3292_v46  ;;  %v3806_v52 = vadd.f32 %v2773_v49, %v5565_v5  ;;  %v2775_v53 = vpop.f32.mrb[29].mxu1 }
 0x20f   :  { %v3227_v54 = vpop.f32.mrb[29].mxu0  ;;  %3356 = vst [vmem:[%s5700_s3 + $0xd0] sm:$0xff] %v3324_v51  ;;  %v3325_v55 = vsel %vm3261_vm11, %v3805_v44, %v3293_v48  ;;  %v3808_v56 = vadd.f32 %v2775_v53, %v5567_v6  ;;  %v2777_v57 = vpop.f32.mrb[30].mxu1 }
 0x210   :  { %v3229_v58 = vpop.f32.mrb[30].mxu0  ;;  %3357 = vst [vmem:[%s5700_s3 + $0xd8] sm:$0xff] %v3325_v55  ;;  %v3807_v59 = vadd.f32 %v3806_v52, %v3225_v50  ;;  %v3810_v60 = vadd.f32 %v2777_v57, %v5565_v5  ;;  %v2779_v61 = vpop.f32.mrb[31].mxu1 }
 0x211   :  { %v3231_v62 = vpop.f32.mrb[31].mxu0  ;;  %v3809_v63 = vadd.f32 %v3808_v56, %v3227_v54  ;;  %v3812_v0 = vadd.f32 %v2779_v61, %v5567_v6 }
 0x212   :  { %vm3262_vm12 = vcmp.gt.f32.partialorder %v3807_v59, 0.0  ;;  %v3294_v1 = vmul.f32 0.2, %v3807_v59  ;;  %v3811_v2 = vadd.f32 %v3810_v60, %v3229_v58 }
 0x213   :  { %vm3263_vm13 = vcmp.gt.f32.partialorder %v3809_v63, 0.0  ;;  %v3295_v3 = vmul.f32 0.2, %v3809_v63  ;;  %v3813_v4 = vadd.f32 %v3812_v0, %v3231_v62 }
 0x214   :  { %v3326_v7 = vsel %vm3262_vm12, %v3807_v59, %v3294_v1  ;;  %vm3264_vm14 = vcmp.gt.f32.partialorder %v3811_v2, 0.0  ;;  %v3296_v8 = vmul.f32 0.2, %v3811_v2 }
 0x215   :  { %3358 = vst [vmem:[%s5700_s3 + $0xe0] sm:$0xff] %v3326_v7  ;;  %v3327_v9 = vsel %vm3263_vm13, %v3809_v63, %v3295_v3  ;;  %vm3265_vm15 = vcmp.gt.f32.partialorder %v3813_v4, 0.0  ;;  %v3297_v5 = vmul.f32 0.2, %v3813_v4 }
 0x216   :  { %3359 = vst [vmem:[%s5700_s3 + $0xe8] sm:$0xff] %v3327_v9  ;;  %v3328_v6 = vsel %vm3264_vm14, %v3811_v2, %v3296_v8 }
 0x217   :  { %3360 = vst [vmem:[%s5700_s3 + $0xf0] sm:$0xff] %v3328_v6  ;;  %v3329_v10 = vsel %vm3265_vm15, %v3813_v4, %v3297_v5 }
 0x218   :  { %3361 = vst [vmem:[%s5700_s3 + $0xf8] sm:$0xff] %v3329_v10 }

// kernel: discriminator64_forward.8
= control target key start
LH: loop header
LB: loop body
LE: loop exit
PB: predicated region body
PF: predicated region fallthrough
CT: control target
= control target key end

     0   :  { %s14687_s1 = inlined_call_operand.vmem [shape: bf16[4096,512], index: 1, kind: input, shape index: {}]   ;;  %s14688_s0 = inlined_call_operand.vmem [shape: bf16[32,4096], index: 0, kind: input, shape index: {}]   ;;  %s14689_s2 = inlined_call_operand.vmem [shape: f32[1,512], index: 2, kind: input, shape index: {}]   ;;  %s14690_s3 = inlined_call_operand.vmem [shape: f32[32,512], index: 3, kind: output, shape index: {}]  }
   0x1   :  { %v9672_v0 = vld [vmem:[%s14687_s1 + $0x4] ss:$16 sps:$4 sm:$0xff]   ;;  %v9674_v1 = vld [vmem:[%s14687_s1 + $0xc] ss:$16 sps:$4 sm:$0xff]   ;;  %v9676_v2 = vld [vmem:[%s14687_s1] ss:$16 sps:$4 sm:$0xff]  }
   0x2   :  { %6564 = vmatprep.subr.bf16.mxu0 %v9672_v0  ;;  %v9677_v3 = vld [vmem:[%s14687_s1 + $0x8] ss:$16 sps:$4 sm:$0xff]   ;;  %7412 = vmatprep.subr.bf16.mxu1 %v9674_v1  ;;  %v9678_v4 = vld [vmem:[%s14687_s1 + $0x24] ss:$16 sps:$4 sm:$0xff]   ;;  %v9680_v5 = vld [vmem:[%s14687_s1 + $0x2c] ss:$16 sps:$4 sm:$0xff]  }
   0x3   :  { %6565 = vmatpush1.bf16.msra.mxu0 %v9676_v2  ;;  %7413 = vmatpush1.bf16.msra.mxu1 %v9677_v3  ;;  %v9682_v6 = vld [vmem:[%s14687_s1 + $0x20] ss:$16 sps:$4 sm:$0xff]   ;;  %v9683_v7 = vld [vmem:[%s14687_s1 + $0x28] ss:$16 sps:$4 sm:$0xff]   ;;  %v9684_v8 = vld [vmem:[%s14687_s1 + $0x44] ss:$16 sps:$4 sm:$0xff]  }
   0x4   :  { %6566 = vmatprep.subr.bf16.mxu0 %v9678_v4  ;;  %7414 = vmatprep.subr.bf16.mxu1 %v9680_v5  ;;  %v9686_v9 = vld [vmem:[%s14687_s1 + $0x4c] ss:$16 sps:$4 sm:$0xff]   ;;  %v9688_v10 = vld [vmem:[%s14687_s1 + $0x40] ss:$16 sps:$4 sm:$0xff]   ;;  %v9689_v11 = vld [vmem:[%s14687_s1 + $0x48] ss:$16 sps:$4 sm:$0xff]  }
   0x5   :  { %v9690_v12 = vld [vmem:[%s14687_s1 + $0x64] ss:$16 sps:$4 sm:$0xff]   ;;  %v9692_v13 = vld [vmem:[%s14687_s1 + $0x6c] ss:$16 sps:$4 sm:$0xff]   ;;  %v9694_v14 = vld [vmem:[%s14687_s1 + $0x60] ss:$16 sps:$4 sm:$0xff]  }
   0x6   :  { %v9695_v15 = vld [vmem:[%s14687_s1 + $0x68] ss:$16 sps:$4 sm:$0xff]   ;;  %v9696_v16 = vld [vmem:[%s14687_s1 + $0x84] ss:$16 sps:$4 sm:$0xff]   ;;  %v9698_v17 = vld [vmem:[%s14687_s1 + $0x8c] ss:$16 sps:$4 sm:$0xff]  }
   0x7   :  { %6567 = vmatpush1.bf16.msra.mxu0 %v9682_v6  ;;  %7415 = vmatpush1.bf16.msra.mxu1 %v9683_v7  ;;  %v9700_v18 = vld [vmem:[%s14687_s1 + $0x80] ss:$16 sps:$4 sm:$0xff]   ;;  %v9701_v19 = vld [vmem:[%s14687_s1 + $0x88] ss:$16 sps:$4 sm:$0xff]   ;;  %v9702_v20 = vld [vmem:[%s14687_s1 + $0xa4] ss:$16 sps:$4 sm:$0xff]  }
   0x8   :  { %6568 = vmatprep.subr.bf16.mxu0 %v9684_v8  ;;  %7416 = vmatprep.subr.bf16.mxu1 %v9686_v9  ;;  %v9704_v21 = vld [vmem:[%s14687_s1 + $0xac] ss:$16 sps:$4 sm:$0xff]   ;;  %v9706_v22 = vld [vmem:[%s14687_s1 + $0xa0] ss:$16 sps:$4 sm:$0xff]   ;;  %v9707_v23 = vld [vmem:[%s14687_s1 + $0xa8] ss:$16 sps:$4 sm:$0xff]  }
   0x9   :  { %v9708_v24 = vld [vmem:[%s14687_s1 + $0xc4] ss:$16 sps:$4 sm:$0xff]   ;;  %v9710_v25 = vld [vmem:[%s14687_s1 + $0xcc] ss:$16 sps:$4 sm:$0xff]   ;;  %v9712_v26 = vld [vmem:[%s14687_s1 + $0xc0] ss:$16 sps:$4 sm:$0xff]  }
   0xa   :  { %v9713_v27 = vld [vmem:[%s14687_s1 + $0xc8] ss:$16 sps:$4 sm:$0xff]   ;;  %v9714_v28 = vld [vmem:[%s14687_s1 + $0xe4] ss:$16 sps:$4 sm:$0xff]   ;;  %v9716_v29 = vld [vmem:[%s14687_s1 + $0xec] ss:$16 sps:$4 sm:$0xff]  }
   0xb   :  { %6569 = vmatpush1.bf16.msra.mxu0 %v9688_v10  ;;  %7417 = vmatpush1.bf16.msra.mxu1 %v9689_v11  ;;  %v9718_v30 = vld [vmem:[%s14687_s1 + $0xe0] ss:$16 sps:$4 sm:$0xff]   ;;  %v9719_v31 = vld [vmem:[%s14687_s1 + $0xe8] ss:$16 sps:$4 sm:$0xff]   ;;  %v9720_v32 = vld [vmem:[%s14687_s1 + $0x104] ss:$16 sps:$4 sm:$0xff]  }
   0xc   :  { %6570 = vmatprep.subr.bf16.mxu0 %v9690_v12  ;;  %7418 = vmatprep.subr.bf16.mxu1 %v9692_v13  ;;  %v9722_v33 = vld [vmem:[%s14687_s1 + $0x10c] ss:$16 sps:$4 sm:$0xff]   ;;  %v9724_v34 = vld [vmem:[%s14687_s1 + $0x100] ss:$16 sps:$4 sm:$0xff]   ;;  %v9725_v35 = vld [vmem:[%s14687_s1 + $0x108] ss:$16 sps:$4 sm:$0xff]  }
   0xd   :  { %v9726_v36 = vld [vmem:[%s14687_s1 + $0x124] ss:$16 sps:$4 sm:$0xff]   ;;  %v9728_v37 = vld [vmem:[%s14687_s1 + $0x12c] ss:$16 sps:$4 sm:$0xff]   ;;  %v9730_v38 = vld [vmem:[%s14687_s1 + $0x120] ss:$16 sps:$4 sm:$0xff]  }
   0xe   :  { %v9731_v39 = vld [vmem:[%s14687_s1 + $0x128] ss:$16 sps:$4 sm:$0xff]   ;;  %v9732_v40 = vld [vmem:[%s14687_s1 + $0x144] ss:$16 sps:$4 sm:$0xff]   ;;  %v9734_v41 = vld [vmem:[%s14687_s1 + $0x14c] ss:$16 sps:$4 sm:$0xff]  }
   0xf   :  { %6571 = vmatpush1.bf16.msra.mxu0 %v9694_v14  ;;  %7419 = vmatpush1.bf16.msra.mxu1 %v9695_v15  ;;  %v9736_v42 = vld [vmem:[%s14687_s1 + $0x140] ss:$16 sps:$4 sm:$0xff]   ;;  %v9737_v43 = vld [vmem:[%s14687_s1 + $0x148] ss:$16 sps:$4 sm:$0xff]   ;;  %v9738_v44 = vld [vmem:[%s14687_s1 + $0x164] ss:$16 sps:$4 sm:$0xff]  }
  0x10   :  { %6572 = vmatprep.subr.bf16.mxu0 %v9696_v16  ;;  %7420 = vmatprep.subr.bf16.mxu1 %v9698_v17  ;;  %v9740_v45 = vld [vmem:[%s14687_s1 + $0x16c] ss:$16 sps:$4 sm:$0xff]   ;;  %v14_v46 = vld [vmem:[%s14688_s0] sm:$0xff]  ;;  %v9743_v49 = vld [vmem:[%s14687_s1 + $0x168] ss:$16 sps:$4 sm:$0xff]  }
  0x11   :  { %v30_v47 = vld [vmem:[%s14688_s0 + $0x80] sm:$0xff]  ;;  %v9746_v52 = vld [vmem:[%s14687_s1 + $0x18c] ss:$16 sps:$4 sm:$0xff]   ;;  %v9749_v54 = vld [vmem:[%s14687_s1 + $0x188] ss:$16 sps:$4 sm:$0xff]  }
  0x12   :  { %v9742_v48 = vld [vmem:[%s14687_s1 + $0x160] ss:$16 sps:$4 sm:$0xff]   ;;  %v8329_v50 = vcombine.high %v14_v46, %v30_v47  ;;  %v9744_v51 = vld [vmem:[%s14687_s1 + $0x184] ss:$16 sps:$4 sm:$0xff]   ;;  %v9752_v56 = vld [vmem:[%s14687_s1 + $0x1ac] ss:$16 sps:$4 sm:$0xff]   ;;  %v8328_v5 = vcombine.low %v14_v46, %v30_v47 }
  0x13   :  { %6573 = vmatpush1.bf16.msra.mxu0 %v9700_v18  ;;  %7421 = vmatpush1.bf16.msra.mxu1 %v9701_v19  ;;  %v9748_v53 = vld [vmem:[%s14687_s1 + $0x180] ss:$16 sps:$4 sm:$0xff]   ;;  %v9750_v55 = vld [vmem:[%s14687_s1 + $0x1a4] ss:$16 sps:$4 sm:$0xff]   ;;  %v9755_v58 = vld [vmem:[%s14687_s1 + $0x1a8] ss:$16 sps:$4 sm:$0xff]  }
  0x14   :  { %6574 = vmatprep.subr.bf16.mxu0 %v9702_v20  ;;  %7422 = vmatprep.subr.bf16.mxu1 %v9704_v21  ;;  %v9754_v57 = vld [vmem:[%s14687_s1 + $0x1a0] ss:$16 sps:$4 sm:$0xff]   ;;  %v9756_v59 = vld [vmem:[%s14687_s1 + $0x1c4] ss:$16 sps:$4 sm:$0xff]   ;;  %v9758_v60 = vld [vmem:[%s14687_s1 + $0x1cc] ss:$16 sps:$4 sm:$0xff]  }
  0x15   :  { %6596 = vmatprep.mubr.bf16.mxu0 %v8329_v50  ;;  %7444 = vmatprep.mubr.bf16.mxu1 %v8329_v50  ;;  %v9760_v61 = vld [vmem:[%s14687_s1 + $0x1c0] ss:$16 sps:$4 sm:$0xff]   ;;  %v9761_v62 = vld [vmem:[%s14687_s1 + $0x1c8] ss:$16 sps:$4 sm:$0xff]   ;;  %v9762_v63 = vld [vmem:[%s14687_s1 + $0x1e4] ss:$16 sps:$4 sm:$0xff]  }
  0x16   :  { %v9764_v0 = vld [vmem:[%s14687_s1 + $0x1ec] ss:$16 sps:$4 sm:$0xff]   ;;  %v9766_v1 = vld [vmem:[%s14687_s1 + $0x1e0] ss:$16 sps:$4 sm:$0xff]   ;;  %v9767_v2 = vld [vmem:[%s14687_s1 + $0x1e8] ss:$16 sps:$4 sm:$0xff]  }
  0x17   :  { %6575 = vmatpush1.bf16.msra.mxu0 %v9706_v22  ;;  %7423 = vmatpush1.bf16.msra.mxu1 %v9707_v23  ;;  %v9770_v3 = vld [vmem:[%s14687_s1 + $0x204] ss:$16 sps:$4 sm:$0xff]   ;;  %v9773_v4 = vld [vmem:[%s14687_s1 + $0x20c] ss:$16 sps:$4 sm:$0xff]   ;;  %v9768_v6 = vld [vmem:[%s14687_s1 + $0x200] ss:$16 sps:$4 sm:$0xff]  }
  0x18   :  { %6576 = vmatprep.subr.bf16.mxu0 %v9708_v24  ;;  %7424 = vmatprep.subr.bf16.mxu1 %v9710_v25  ;;  %v9771_v7 = vld [vmem:[%s14687_s1 + $0x208] ss:$16 sps:$4 sm:$0xff]   ;;  %v9776_v8 = vld [vmem:[%s14687_s1 + $0x224] ss:$16 sps:$4 sm:$0xff]   ;;  %v9779_v9 = vld [vmem:[%s14687_s1 + $0x22c] ss:$16 sps:$4 sm:$0xff]  }
  0x19   :  { %v9774_v10 = vld [vmem:[%s14687_s1 + $0x220] ss:$16 sps:$4 sm:$0xff]   ;;  %v9777_v11 = vld [vmem:[%s14687_s1 + $0x228] ss:$16 sps:$4 sm:$0xff]   ;;  %v9782_v12 = vld [vmem:[%s14687_s1 + $0x244] ss:$16 sps:$4 sm:$0xff]  }
  0x1a   :  { %v9785_v13 = vld [vmem:[%s14687_s1 + $0x24c] ss:$16 sps:$4 sm:$0xff]   ;;  %v9780_v14 = vld [vmem:[%s14687_s1 + $0x240] ss:$16 sps:$4 sm:$0xff]   ;;  %v9783_v15 = vld [vmem:[%s14687_s1 + $0x248] ss:$16 sps:$4 sm:$0xff]  }
  0x1b   :  { %6577 = vmatpush1.bf16.msra.mxu0 %v9712_v26  ;;  %7425 = vmatpush1.bf16.msra.mxu1 %v9713_v27  ;;  %v9788_v16 = vld [vmem:[%s14687_s1 + $0x264] ss:$16 sps:$4 sm:$0xff]   ;;  %v9791_v17 = vld [vmem:[%s14687_s1 + $0x26c] ss:$16 sps:$4 sm:$0xff]   ;;  %v9786_v18 = vld [vmem:[%s14687_s1 + $0x260] ss:$16 sps:$4 sm:$0xff]  }
  0x1c   :  { %6578 = vmatprep.subr.bf16.mxu0 %v9714_v28  ;;  %7426 = vmatprep.subr.bf16.mxu1 %v9716_v29  ;;  %v9789_v19 = vld [vmem:[%s14687_s1 + $0x268] ss:$16 sps:$4 sm:$0xff]   ;;  %v9794_v20 = vld [vmem:[%s14687_s1 + $0x284] ss:$16 sps:$4 sm:$0xff]   ;;  %v9797_v21 = vld [vmem:[%s14687_s1 + $0x28c] ss:$16 sps:$4 sm:$0xff]  }
  0x1d   :  { %v9792_v22 = vld [vmem:[%s14687_s1 + $0x280] ss:$16 sps:$4 sm:$0xff]   ;;  %v9795_v23 = vld [vmem:[%s14687_s1 + $0x288] ss:$16 sps:$4 sm:$0xff]   ;;  %v9800_v24 = vld [vmem:[%s14687_s1 + $0x2a4] ss:$16 sps:$4 sm:$0xff]  }
  0x1e   :  { %v9803_v25 = vld [vmem:[%s14687_s1 + $0x2ac] ss:$16 sps:$4 sm:$0xff]   ;;  %v46_v26 = vld [vmem:[%s14688_s0 + $0x100] sm:$0xff]  ;;  %v9819_v46 = vld [vmem:[%s14687_s1 + $0x308] ss:$16 sps:$4 sm:$0xff]  }
  0x1f   :  { %6579 = vmatpush1.bf16.msra.mxu0 %v9718_v30  ;;  %7427 = vmatpush1.bf16.msra.mxu1 %v9719_v31  ;;  %v62_v27 = vld [vmem:[%s14688_s0 + $0x180] sm:$0xff]  ;;  %v9801_v30 = vld [vmem:[%s14687_s1 + $0x2a8] ss:$16 sps:$4 sm:$0xff]  }
  0x20   :  { %6580 = vmatprep.subr.bf16.mxu0 %v9720_v32  ;;  %7428 = vmatprep.subr.bf16.mxu1 %v9722_v33  ;;  %v8361_v28 = vcombine.high %v46_v26, %v62_v27  ;;  %v9798_v29 = vld [vmem:[%s14687_s1 + $0x2a0] ss:$16 sps:$4 sm:$0xff]   ;;  %v8360_v31 = vcombine.low %v46_v26, %v62_v27  ;;  %v9806_v32 = vld [vmem:[%s14687_s1 + $0x2c4] ss:$16 sps:$4 sm:$0xff]   ;;  %v9809_v33 = vld [vmem:[%s14687_s1 + $0x2cc] ss:$16 sps:$4 sm:$0xff]  }
  0x21   :  { %v9824_v47 = vld [vmem:[%s14687_s1 + $0x324] ss:$16 sps:$4 sm:$0xff]   ;;  %v9825_v50 = vld [vmem:[%s14687_s1 + $0x328] ss:$16 sps:$4 sm:$0xff]  }
  0x22   :  { %v11682_v27 = vld [vmem:[%s14688_s0 + $0x90] sm:$0xff] }
  0x23   :  { %6581 = vmatpush1.bf16.msra.mxu0 %v9724_v34  ;;  %7429 = vmatpush1.bf16.msra.mxu1 %v9725_v35  ;;  %v11513_v34 = vld [vmem:[%s14688_s0 + $0x8] sm:$0xff] }
  0x24   :  { %6582 = vmatprep.subr.bf16.mxu0 %v9726_v36  ;;  %7430 = vmatprep.subr.bf16.mxu1 %v9728_v37  ;;  %v11518_v35 = vld [vmem:[%s14688_s0 + $0x88] sm:$0xff]  ;;  %v9804_v36 = vld [vmem:[%s14687_s1 + $0x2c0] ss:$16 sps:$4 sm:$0xff]  }
  0x25   :  { %v9807_v37 = vld [vmem:[%s14687_s1 + $0x2c8] ss:$16 sps:$4 sm:$0xff]  }
  0x27   :  { %6583 = vmatpush1.bf16.msra.mxu0 %v9730_v38  ;;  %7431 = vmatpush1.bf16.msra.mxu1 %v9731_v39  ;;  %v8331_v38 = vcombine.high %v11513_v34, %v11518_v35  ;;  %v9812_v39 = vld [vmem:[%s14687_s1 + $0x2e4] ss:$16 sps:$4 sm:$0xff]  }
  0x28   :  { %6584 = vmatprep.subr.bf16.mxu0 %v9732_v40  ;;  %7432 = vmatprep.subr.bf16.mxu1 %v9734_v41  ;;  %v9815_v40 = vld [vmem:[%s14687_s1 + $0x2ec] ss:$16 sps:$4 sm:$0xff]   ;;  %v9810_v41 = vld [vmem:[%s14687_s1 + $0x2e0] ss:$16 sps:$4 sm:$0xff]  }
  0x2b   :  { %6585 = vmatpush1.bf16.msra.mxu0 %v9736_v42  ;;  %7433 = vmatpush1.bf16.msra.mxu1 %v9737_v43  ;;  %v9813_v42 = vld [vmem:[%s14687_s1 + $0x2e8] ss:$16 sps:$4 sm:$0xff]   ;;  %v9818_v43 = vld [vmem:[%s14687_s1 + $0x304] ss:$16 sps:$4 sm:$0xff]  }
  0x2c   :  { %6586 = vmatprep.subr.bf16.mxu0 %v9738_v44  ;;  %7434 = vmatprep.subr.bf16.mxu1 %v9740_v45  ;;  %v9821_v44 = vld [vmem:[%s14687_s1 + $0x30c] ss:$16 sps:$4 sm:$0xff]   ;;  %v9816_v45 = vld [vmem:[%s14687_s1 + $0x300] ss:$16 sps:$4 sm:$0xff]  }
  0x2f   :  { %6587 = vmatpush1.bf16.msra.mxu0 %v9742_v48  ;;  %7435 = vmatpush1.bf16.msra.mxu1 %v9743_v49  ;;  %v9827_v48 = vld [vmem:[%s14687_s1 + $0x32c] ss:$16 sps:$4 sm:$0xff]   ;;  %v9822_v49 = vld [vmem:[%s14687_s1 + $0x320] ss:$16 sps:$4 sm:$0xff]  }
  0x30   :  { %6588 = vmatprep.subr.bf16.mxu0 %v9744_v51  ;;  %7436 = vmatprep.subr.bf16.mxu1 %v9746_v52  ;;  %v9830_v51 = vld [vmem:[%s14687_s1 + $0x344] ss:$16 sps:$4 sm:$0xff]   ;;  %v9833_v52 = vld [vmem:[%s14687_s1 + $0x34c] ss:$16 sps:$4 sm:$0xff]  }
  0x33   :  { %6589 = vmatpush1.bf16.msra.mxu0 %v9748_v53  ;;  %7437 = vmatpush1.bf16.msra.mxu1 %v9749_v54  ;;  %v9828_v53 = vld [vmem:[%s14687_s1 + $0x340] ss:$16 sps:$4 sm:$0xff]   ;;  %v9831_v54 = vld [vmem:[%s14687_s1 + $0x348] ss:$16 sps:$4 sm:$0xff]  }
  0x34   :  { %6590 = vmatprep.subr.bf16.mxu0 %v9750_v55  ;;  %7438 = vmatprep.subr.bf16.mxu1 %v9752_v56  ;;  %v9836_v55 = vld [vmem:[%s14687_s1 + $0x364] ss:$16 sps:$4 sm:$0xff]   ;;  %v9839_v56 = vld [vmem:[%s14687_s1 + $0x36c] ss:$16 sps:$4 sm:$0xff]  }
  0x37   :  { %6591 = vmatpush1.bf16.msra.mxu0 %v9754_v57  ;;  %7439 = vmatpush1.bf16.msra.mxu1 %v9755_v58  ;;  %v9834_v57 = vld [vmem:[%s14687_s1 + $0x360] ss:$16 sps:$4 sm:$0xff]   ;;  %v9837_v58 = vld [vmem:[%s14687_s1 + $0x368] ss:$16 sps:$4 sm:$0xff]  }
  0x38   :  { %6592 = vmatprep.subr.bf16.mxu0 %v9756_v59  ;;  %7440 = vmatprep.subr.bf16.mxu1 %v9758_v60  ;;  %v9842_v59 = vld [vmem:[%s14687_s1 + $0x384] ss:$16 sps:$4 sm:$0xff]   ;;  %v9845_v60 = vld [vmem:[%s14687_s1 + $0x38c] ss:$16 sps:$4 sm:$0xff]  }
  0x3b   :  { %6593 = vmatpush1.bf16.msra.mxu0 %v9760_v61  ;;  %7441 = vmatpush1.bf16.msra.mxu1 %v9761_v62  ;;  %v9840_v61 = vld [vmem:[%s14687_s1 + $0x380] ss:$16 sps:$4 sm:$0xff]   ;;  %v9843_v62 = vld [vmem:[%s14687_s1 + $0x388] ss:$16 sps:$4 sm:$0xff]  }
  0x3c   :  { %6594 = vmatprep.subr.bf16.mxu0 %v9762_v63  ;;  %7442 = vmatprep.subr.bf16.mxu1 %v9764_v0  ;;  %v9848_v63 = vld [vmem:[%s14687_s1 + $0x3a4] ss:$16 sps:$4 sm:$0xff]   ;;  %v9851_v0 = vld [vmem:[%s14687_s1 + $0x3ac] ss:$16 sps:$4 sm:$0xff]  }
  0x3f   :  { %6595 = vmatpush1.bf16.msra.mxu0 %v9766_v1  ;;  %7443 = vmatpush1.bf16.msra.mxu1 %v9767_v2  ;;  %v9846_v1 = vld [vmem:[%s14687_s1 + $0x3a0] ss:$16 sps:$4 sm:$0xff]   ;;  %v9849_v2 = vld [vmem:[%s14687_s1 + $0x3a8] ss:$16 sps:$4 sm:$0xff]  }
  0x40   :  { %6617 = vmatprep.subr.bf16.mxu0 %v9770_v3  ;;  %7465 = vmatprep.subr.bf16.mxu1 %v9773_v4  ;;  %v9854_v3 = vld [vmem:[%s14687_s1 + $0x3c4] ss:$16 sps:$4 sm:$0xff]   ;;  %v9857_v4 = vld [vmem:[%s14687_s1 + $0x3cc] ss:$16 sps:$4 sm:$0xff]  }
  0x42   :  { %6597 = vmatmul.mubr.bf16.vlgmr.msra.gmra.mrb[0].mxu0 %v8328_v5  ;;  %7445 = vmatmul.mubr.bf16.vlgmr.msra.gmra.mrb[0].mxu1 %v8328_v5  ;;  %v9852_v5 = vld [vmem:[%s14687_s1 + $0x3c0] ss:$16 sps:$4 sm:$0xff]  }
  0x43   :  { %6618 = vmatpush1.bf16.msra.mxu0 %v9768_v6  ;;  %7466 = vmatpush1.bf16.msra.mxu1 %v9771_v7  ;;  %v9855_v6 = vld [vmem:[%s14687_s1 + $0x3c8] ss:$16 sps:$4 sm:$0xff]   ;;  %v9860_v7 = vld [vmem:[%s14687_s1 + $0x3e4] ss:$16 sps:$4 sm:$0xff]  }
  0x44   :  { %6619 = vmatprep.subr.bf16.mxu0 %v9776_v8  ;;  %7467 = vmatprep.subr.bf16.mxu1 %v9779_v9  ;;  %v9863_v8 = vld [vmem:[%s14687_s1 + $0x3ec] ss:$16 sps:$4 sm:$0xff]   ;;  %v9858_v9 = vld [vmem:[%s14687_s1 + $0x3e0] ss:$16 sps:$4 sm:$0xff]  }
  0x45   :  { %6606 = vmatprep.mubr.bf16.mxu0 %v8361_v28  ;;  %7454 = vmatprep.mubr.bf16.mxu1 %v8361_v28  ;;  %v9876_v28 = vld [vmem:[%s14687_s1 + $0x440] ss:$16 sps:$4 sm:$0xff]  }
  0x47   :  { %6620 = vmatpush1.bf16.msra.mxu0 %v9774_v10  ;;  %7468 = vmatpush1.bf16.msra.mxu1 %v9777_v11  ;;  %v9861_v10 = vld [vmem:[%s14687_s1 + $0x3e8] ss:$16 sps:$4 sm:$0xff]   ;;  %v9866_v11 = vld [vmem:[%s14687_s1 + $0x404] ss:$16 sps:$4 sm:$0xff]  }
  0x48   :  { %6621 = vmatprep.subr.bf16.mxu0 %v9782_v12  ;;  %7469 = vmatprep.subr.bf16.mxu1 %v9785_v13  ;;  %v9869_v12 = vld [vmem:[%s14687_s1 + $0x40c] ss:$16 sps:$4 sm:$0xff]   ;;  %v9864_v13 = vld [vmem:[%s14687_s1 + $0x400] ss:$16 sps:$4 sm:$0xff]  }
  0x4a   :  { %6607 = vmatmul.mubr.bf16.gmra.mrb[4].mxu0 %v8360_v31  ;;  %7455 = vmatmul.mubr.bf16.gmra.mrb[4].mxu1 %v8360_v31  ;;  %v9887_v31 = vld [vmem:[%s14687_s1 + $0x46c] ss:$16 sps:$4 sm:$0xff]  }
  0x4b   :  { %6622 = vmatpush1.bf16.msra.mxu0 %v9780_v14  ;;  %7470 = vmatpush1.bf16.msra.mxu1 %v9783_v15  ;;  %v9867_v14 = vld [vmem:[%s14687_s1 + $0x408] ss:$16 sps:$4 sm:$0xff]   ;;  %v8330_v15 = vcombine.low %v11513_v34, %v11518_v35  ;;  %v9890_v35 = vld [vmem:[%s14687_s1 + $0x484] ss:$16 sps:$4 sm:$0xff]  }
  0x4c   :  { %6623 = vmatprep.subr.bf16.mxu0 %v9788_v16  ;;  %7471 = vmatprep.subr.bf16.mxu1 %v9791_v17  ;;  %v47_v16 = vld [vmem:[%s14688_s0 + $0x108] sm:$0xff] }
  0x4d   :  { %6649 = vmatprep.mubr.bf16.mxu0 %v8331_v38  ;;  %7497 = vmatprep.mubr.bf16.mxu1 %v8331_v38  ;;  %v63_v17 = vld [vmem:[%s14688_s0 + $0x188] sm:$0xff] }
  0x4e   :  { %v8362_v26 = vcombine.low %v47_v16, %v63_v17  ;;  %v9885_v34 = vld [vmem:[%s14687_s1 + $0x468] ss:$16 sps:$4 sm:$0xff]  }
  0x4f   :  { %6624 = vmatpush1.bf16.msra.mxu0 %v9786_v18  ;;  %7472 = vmatpush1.bf16.msra.mxu1 %v9789_v19  ;;  %v9872_v18 = vld [vmem:[%s14687_s1 + $0x424] ss:$16 sps:$4 sm:$0xff]   ;;  %v9875_v19 = vld [vmem:[%s14687_s1 + $0x42c] ss:$16 sps:$4 sm:$0xff]   ;;  %v9891_v38 = vld [vmem:[%s14687_s1 + $0x488] ss:$16 sps:$4 sm:$0xff]  }
  0x50   :  { %6625 = vmatprep.subr.bf16.mxu0 %v9794_v20  ;;  %7473 = vmatprep.subr.bf16.mxu1 %v9797_v21  ;;  %v8363_v20 = vcombine.high %v47_v16, %v63_v17  ;;  %v9870_v21 = vld [vmem:[%s14687_s1 + $0x420] ss:$16 sps:$4 sm:$0xff]   ;;  %v9959_v16 = vld [vmem:[%s14687_s1 + $0x5ec] ss:$16 sps:$4 sm:$0xff]  }
  0x51   :  { %v9954_v17 = vld [vmem:[%s14687_s1 + $0x5e0] ss:$16 sps:$4 sm:$0xff]  }
  0x53   :  { %6626 = vmatpush1.bf16.msra.mxu0 %v9792_v22  ;;  %7474 = vmatpush1.bf16.msra.mxu1 %v9795_v23  ;;  %v9873_v22 = vld [vmem:[%s14687_s1 + $0x428] ss:$16 sps:$4 sm:$0xff]   ;;  %v9878_v23 = vld [vmem:[%s14687_s1 + $0x444] ss:$16 sps:$4 sm:$0xff]  }
  0x54   :  { %6627 = vmatprep.subr.bf16.mxu0 %v9800_v24  ;;  %7475 = vmatprep.subr.bf16.mxu1 %v9803_v25  ;;  %v9881_v24 = vld [vmem:[%s14687_s1 + $0x44c] ss:$16 sps:$4 sm:$0xff]   ;;  %v11677_v25 = vld [vmem:[%s14688_s0 + $0x10] sm:$0xff] }
  0x57   :  { %6628 = vmatpush1.bf16.msra.mxu0 %v9798_v29  ;;  %7476 = vmatpush1.bf16.msra.mxu1 %v9801_v30  ;;  %v9879_v29 = vld [vmem:[%s14687_s1 + $0x448] ss:$16 sps:$4 sm:$0xff]   ;;  %v9884_v30 = vld [vmem:[%s14687_s1 + $0x464] ss:$16 sps:$4 sm:$0xff]  }
  0x58   :  { %6629 = vmatprep.subr.bf16.mxu0 %v9806_v32  ;;  %7477 = vmatprep.subr.bf16.mxu1 %v9809_v33  ;;  %v8333_v32 = vcombine.high %v11677_v25, %v11682_v27  ;;  %v9882_v33 = vld [vmem:[%s14687_s1 + $0x460] ss:$16 sps:$4 sm:$0xff]  }
  0x5b   :  { %6630 = vmatpush1.bf16.msra.mxu0 %v9804_v36  ;;  %7478 = vmatpush1.bf16.msra.mxu1 %v9807_v37  ;;  %v9893_v36 = vld [vmem:[%s14687_s1 + $0x48c] ss:$16 sps:$4 sm:$0xff]   ;;  %v9888_v37 = vld [vmem:[%s14687_s1 + $0x480] ss:$16 sps:$4 sm:$0xff]  }
  0x5c   :  { %6631 = vmatprep.subr.bf16.mxu0 %v9812_v39  ;;  %7479 = vmatprep.subr.bf16.mxu1 %v9815_v40  ;;  %v9896_v39 = vld [vmem:[%s14687_s1 + $0x4a4] ss:$16 sps:$4 sm:$0xff]   ;;  %v9899_v40 = vld [vmem:[%s14687_s1 + $0x4ac] ss:$16 sps:$4 sm:$0xff]  }
  0x5f   :  { %6632 = vmatpush1.bf16.msra.mxu0 %v9810_v41  ;;  %7480 = vmatpush1.bf16.msra.mxu1 %v9813_v42  ;;  %v9894_v41 = vld [vmem:[%s14687_s1 + $0x4a0] ss:$16 sps:$4 sm:$0xff]   ;;  %v9897_v42 = vld [vmem:[%s14687_s1 + $0x4a8] ss:$16 sps:$4 sm:$0xff]  }
  0x60   :  { %6633 = vmatprep.subr.bf16.mxu0 %v9818_v43  ;;  %7481 = vmatprep.subr.bf16.mxu1 %v9821_v44  ;;  %v9902_v43 = vld [vmem:[%s14687_s1 + $0x4c4] ss:$16 sps:$4 sm:$0xff]   ;;  %v9905_v44 = vld [vmem:[%s14687_s1 + $0x4cc] ss:$16 sps:$4 sm:$0xff]  }
  0x63   :  { %6634 = vmatpush1.bf16.msra.mxu0 %v9816_v45  ;;  %7482 = vmatpush1.bf16.msra.mxu1 %v9819_v46  ;;  %v9900_v45 = vld [vmem:[%s14687_s1 + $0x4c0] ss:$16 sps:$4 sm:$0xff]   ;;  %v9903_v46 = vld [vmem:[%s14687_s1 + $0x4c8] ss:$16 sps:$4 sm:$0xff]  }
  0x64   :  { %6635 = vmatprep.subr.bf16.mxu0 %v9824_v47  ;;  %7483 = vmatprep.subr.bf16.mxu1 %v9827_v48  ;;  %v9908_v47 = vld [vmem:[%s14687_s1 + $0x4e4] ss:$16 sps:$4 sm:$0xff]   ;;  %v9911_v48 = vld [vmem:[%s14687_s1 + $0x4ec] ss:$16 sps:$4 sm:$0xff]  }
  0x67   :  { %6636 = vmatpush1.bf16.msra.mxu0 %v9822_v49  ;;  %7484 = vmatpush1.bf16.msra.mxu1 %v9825_v50  ;;  %v9906_v49 = vld [vmem:[%s14687_s1 + $0x4e0] ss:$16 sps:$4 sm:$0xff]   ;;  %v9909_v50 = vld [vmem:[%s14687_s1 + $0x4e8] ss:$16 sps:$4 sm:$0xff]  }
  0x68   :  { %6637 = vmatprep.subr.bf16.mxu0 %v9830_v51  ;;  %7485 = vmatprep.subr.bf16.mxu1 %v9833_v52  ;;  %v9914_v51 = vld [vmem:[%s14687_s1 + $0x504] ss:$16 sps:$4 sm:$0xff]   ;;  %v9917_v52 = vld [vmem:[%s14687_s1 + $0x50c] ss:$16 sps:$4 sm:$0xff]  }
  0x6b   :  { %6638 = vmatpush1.bf16.msra.mxu0 %v9828_v53  ;;  %7486 = vmatpush1.bf16.msra.mxu1 %v9831_v54  ;;  %v9912_v53 = vld [vmem:[%s14687_s1 + $0x500] ss:$16 sps:$4 sm:$0xff]   ;;  %v9915_v54 = vld [vmem:[%s14687_s1 + $0x508] ss:$16 sps:$4 sm:$0xff]  }
  0x6c   :  { %6639 = vmatprep.subr.bf16.mxu0 %v9836_v55  ;;  %7487 = vmatprep.subr.bf16.mxu1 %v9839_v56  ;;  %v9920_v55 = vld [vmem:[%s14687_s1 + $0x524] ss:$16 sps:$4 sm:$0xff]   ;;  %v9923_v56 = vld [vmem:[%s14687_s1 + $0x52c] ss:$16 sps:$4 sm:$0xff]  }
  0x6f   :  { %6640 = vmatpush1.bf16.msra.mxu0 %v9834_v57  ;;  %7488 = vmatpush1.bf16.msra.mxu1 %v9837_v58  ;;  %v9918_v57 = vld [vmem:[%s14687_s1 + $0x520] ss:$16 sps:$4 sm:$0xff]   ;;  %v9921_v58 = vld [vmem:[%s14687_s1 + $0x528] ss:$16 sps:$4 sm:$0xff]  }
  0x70   :  { %6641 = vmatprep.subr.bf16.mxu0 %v9842_v59  ;;  %7489 = vmatprep.subr.bf16.mxu1 %v9845_v60  ;;  %v9926_v59 = vld [vmem:[%s14687_s1 + $0x544] ss:$16 sps:$4 sm:$0xff]   ;;  %v9929_v60 = vld [vmem:[%s14687_s1 + $0x54c] ss:$16 sps:$4 sm:$0xff]  }
  0x73   :  { %6642 = vmatpush1.bf16.msra.mxu0 %v9840_v61  ;;  %7490 = vmatpush1.bf16.msra.mxu1 %v9843_v62  ;;  %v9924_v61 = vld [vmem:[%s14687_s1 + $0x540] ss:$16 sps:$4 sm:$0xff]   ;;  %v9927_v62 = vld [vmem:[%s14687_s1 + $0x548] ss:$16 sps:$4 sm:$0xff]  }
  0x74   :  { %6643 = vmatprep.subr.bf16.mxu0 %v9848_v63  ;;  %7491 = vmatprep.subr.bf16.mxu1 %v9851_v0  ;;  %v9932_v63 = vld [vmem:[%s14687_s1 + $0x564] ss:$16 sps:$4 sm:$0xff]   ;;  %v9935_v0 = vld [vmem:[%s14687_s1 + $0x56c] ss:$16 sps:$4 sm:$0xff]  }
  0x77   :  { %6644 = vmatpush1.bf16.msra.mxu0 %v9846_v1  ;;  %7492 = vmatpush1.bf16.msra.mxu1 %v9849_v2  ;;  %v9930_v1 = vld [vmem:[%s14687_s1 + $0x560] ss:$16 sps:$4 sm:$0xff]   ;;  %v9933_v2 = vld [vmem:[%s14687_s1 + $0x568] ss:$16 sps:$4 sm:$0xff]  }
  0x78   :  { %6645 = vmatprep.subr.bf16.mxu0 %v9854_v3  ;;  %7493 = vmatprep.subr.bf16.mxu1 %v9857_v4  ;;  %v9938_v3 = vld [vmem:[%s14687_s1 + $0x584] ss:$16 sps:$4 sm:$0xff]   ;;  %v9941_v4 = vld [vmem:[%s14687_s1 + $0x58c] ss:$16 sps:$4 sm:$0xff]  }
  0x7b   :  { %6646 = vmatpush1.bf16.msra.mxu0 %v9852_v5  ;;  %7494 = vmatpush1.bf16.msra.mxu1 %v9855_v6  ;;  %v9936_v5 = vld [vmem:[%s14687_s1 + $0x580] ss:$16 sps:$4 sm:$0xff]   ;;  %v9939_v6 = vld [vmem:[%s14687_s1 + $0x588] ss:$16 sps:$4 sm:$0xff]  }
  0x7c   :  { %6647 = vmatprep.subr.bf16.mxu0 %v9860_v7  ;;  %7495 = vmatprep.subr.bf16.mxu1 %v9863_v8  ;;  %v9944_v7 = vld [vmem:[%s14687_s1 + $0x5a4] ss:$16 sps:$4 sm:$0xff]   ;;  %v9947_v8 = vld [vmem:[%s14687_s1 + $0x5ac] ss:$16 sps:$4 sm:$0xff]  }
  0x7f   :  { %6648 = vmatpush1.bf16.msra.mxu0 %v9858_v9  ;;  %7496 = vmatpush1.bf16.msra.mxu1 %v9861_v10  ;;  %v9942_v9 = vld [vmem:[%s14687_s1 + $0x5a0] ss:$16 sps:$4 sm:$0xff]   ;;  %v9945_v10 = vld [vmem:[%s14687_s1 + $0x5a8] ss:$16 sps:$4 sm:$0xff]  }
  0x80   :  { %6670 = vmatprep.subr.bf16.mxu0 %v9866_v11  ;;  %7518 = vmatprep.subr.bf16.mxu1 %v9869_v12  ;;  %v9950_v11 = vld [vmem:[%s14687_s1 + $0x5c4] ss:$16 sps:$4 sm:$0xff]   ;;  %v9953_v12 = vld [vmem:[%s14687_s1 + $0x5cc] ss:$16 sps:$4 sm:$0xff]  }
  0x82   :  { %6650 = vmatmul.mubr.bf16.vlgmr.msra.gmra.mrb[0].mxu0 %v8330_v15  ;;  %7498 = vmatmul.mubr.bf16.vlgmr.msra.gmra.mrb[0].mxu1 %v8330_v15  ;;  %v9956_v15 = vld [vmem:[%s14687_s1 + $0x5e4] ss:$16 sps:$4 sm:$0xff]  }
  0x83   :  { %6671 = vmatpush1.bf16.msra.mxu0 %v9864_v13  ;;  %7519 = vmatpush1.bf16.msra.mxu1 %v9867_v14  ;;  %v9948_v13 = vld [vmem:[%s14687_s1 + $0x5c0] ss:$16 sps:$4 sm:$0xff]   ;;  %v9951_v14 = vld [vmem:[%s14687_s1 + $0x5c8] ss:$16 sps:$4 sm:$0xff]  }
  0x84   :  { %6672 = vmatprep.subr.bf16.mxu0 %v9872_v18  ;;  %7520 = vmatprep.subr.bf16.mxu1 %v9875_v19  ;;  %v9957_v18 = vld [vmem:[%s14687_s1 + $0x5e8] ss:$16 sps:$4 sm:$0xff]   ;;  %v9962_v19 = vld [vmem:[%s14687_s1 + $0x604] ss:$16 sps:$4 sm:$0xff]  }
  0x85   :  { %6659 = vmatprep.mubr.bf16.mxu0 %v8363_v20  ;;  %7507 = vmatprep.mubr.bf16.mxu1 %v8363_v20  ;;  %v9965_v20 = vld [vmem:[%s14687_s1 + $0x60c] ss:$16 sps:$4 sm:$0xff]  }
  0x87   :  { %6673 = vmatpush1.bf16.msra.mxu0 %v9870_v21  ;;  %7521 = vmatpush1.bf16.msra.mxu1 %v9873_v22  ;;  %v48_v21 = vld [vmem:[%s14688_s0 + $0x110] sm:$0xff]  ;;  %v8332_v22 = vcombine.low %v11677_v25, %v11682_v27  ;;  %v9971_v27 = vld [vmem:[%s14687_s1 + $0x62c] ss:$16 sps:$4 sm:$0xff]  }
  0x88   :  { %6674 = vmatprep.subr.bf16.mxu0 %v9878_v23  ;;  %7522 = vmatprep.subr.bf16.mxu1 %v9881_v24  ;;  %v64_v23 = vld [vmem:[%s14688_s0 + $0x190] sm:$0xff] }
  0x89   :  { %v9960_v24 = vld [vmem:[%s14687_s1 + $0x600] ss:$16 sps:$4 sm:$0xff]   ;;  %v9968_v25 = vld [vmem:[%s14687_s1 + $0x624] ss:$16 sps:$4 sm:$0xff]  }
  0x8a   :  { %6660 = vmatmul.mubr.bf16.gmra.mrb[4].mxu0 %v8362_v26  ;;  %7508 = vmatmul.mubr.bf16.gmra.mrb[4].mxu1 %v8362_v26  ;;  %v9963_v26 = vld [vmem:[%s14687_s1 + $0x608] ss:$16 sps:$4 sm:$0xff]  }
  0x8b   :  { %6675 = vmatpush1.bf16.msra.mxu0 %v9876_v28  ;;  %7523 = vmatpush1.bf16.msra.mxu1 %v9879_v29  ;;  %v8365_v28 = vcombine.high %v48_v21, %v64_v23  ;;  %v9966_v29 = vld [vmem:[%s14687_s1 + $0x620] ss:$16 sps:$4 sm:$0xff]  }
  0x8c   :  { %6676 = vmatprep.subr.bf16.mxu0 %v9884_v30  ;;  %7524 = vmatprep.subr.bf16.mxu1 %v9887_v31  ;;  %v9969_v30 = vld [vmem:[%s14687_s1 + $0x628] ss:$16 sps:$4 sm:$0xff]   ;;  %v9974_v31 = vld [vmem:[%s14687_s1 + $0x644] ss:$16 sps:$4 sm:$0xff]  }
  0x8d   :  { %6702 = vmatprep.mubr.bf16.mxu0 %v8333_v32  ;;  %7550 = vmatprep.mubr.bf16.mxu1 %v8333_v32  ;;  %v9977_v32 = vld [vmem:[%s14687_s1 + $0x64c] ss:$16 sps:$4 sm:$0xff]  }
  0x8f   :  { %6677 = vmatpush1.bf16.msra.mxu0 %v9882_v33  ;;  %7525 = vmatpush1.bf16.msra.mxu1 %v9885_v34  ;;  %v11889_v33 = vld [vmem:[%s14688_s0 + $0x18] sm:$0xff]  ;;  %v8364_v34 = vcombine.low %v48_v21, %v64_v23  ;;  %v10044_v21 = vld [vmem:[%s14687_s1 + $0x7c0] ss:$16 sps:$4 sm:$0xff]   ;;  %v10052_v23 = vld [vmem:[%s14687_s1 + $0x7e4] ss:$16 sps:$4 sm:$0xff]  }
  0x90   :  { %6678 = vmatprep.subr.bf16.mxu0 %v9890_v35  ;;  %7526 = vmatprep.subr.bf16.mxu1 %v9893_v36  ;;  %v11894_v35 = vld [vmem:[%s14688_s0 + $0x98] sm:$0xff]  ;;  %v9972_v36 = vld [vmem:[%s14687_s1 + $0x640] ss:$16 sps:$4 sm:$0xff]  }
  0x93   :  { %6679 = vmatpush1.bf16.msra.mxu0 %v9888_v37  ;;  %7527 = vmatpush1.bf16.msra.mxu1 %v9891_v38  ;;  %v9975_v37 = vld [vmem:[%s14687_s1 + $0x648] ss:$16 sps:$4 sm:$0xff]   ;;  %v9980_v38 = vld [vmem:[%s14687_s1 + $0x664] ss:$16 sps:$4 sm:$0xff]  }
  0x94   :  { %6680 = vmatprep.subr.bf16.mxu0 %v9896_v39  ;;  %7528 = vmatprep.subr.bf16.mxu1 %v9899_v40  ;;  %v9983_v39 = vld [vmem:[%s14687_s1 + $0x66c] ss:$16 sps:$4 sm:$0xff]   ;;  %v8335_v40 = vcombine.high %v11889_v33, %v11894_v35 }
  0x97   :  { %6681 = vmatpush1.bf16.msra.mxu0 %v9894_v41  ;;  %7529 = vmatpush1.bf16.msra.mxu1 %v9897_v42  ;;  %v9978_v41 = vld [vmem:[%s14687_s1 + $0x660] ss:$16 sps:$4 sm:$0xff]   ;;  %v9981_v42 = vld [vmem:[%s14687_s1 + $0x668] ss:$16 sps:$4 sm:$0xff]  }
  0x98   :  { %6682 = vmatprep.subr.bf16.mxu0 %v9902_v43  ;;  %7530 = vmatprep.subr.bf16.mxu1 %v9905_v44  ;;  %v9986_v43 = vld [vmem:[%s14687_s1 + $0x684] ss:$16 sps:$4 sm:$0xff]   ;;  %v9989_v44 = vld [vmem:[%s14687_s1 + $0x68c] ss:$16 sps:$4 sm:$0xff]  }
  0x9b   :  { %6683 = vmatpush1.bf16.msra.mxu0 %v9900_v45  ;;  %7531 = vmatpush1.bf16.msra.mxu1 %v9903_v46  ;;  %v9984_v45 = vld [vmem:[%s14687_s1 + $0x680] ss:$16 sps:$4 sm:$0xff]   ;;  %v9987_v46 = vld [vmem:[%s14687_s1 + $0x688] ss:$16 sps:$4 sm:$0xff]  }
  0x9c   :  { %6684 = vmatprep.subr.bf16.mxu0 %v9908_v47  ;;  %7532 = vmatprep.subr.bf16.mxu1 %v9911_v48  ;;  %v9992_v47 = vld [vmem:[%s14687_s1 + $0x6a4] ss:$16 sps:$4 sm:$0xff]   ;;  %v9995_v48 = vld [vmem:[%s14687_s1 + $0x6ac] ss:$16 sps:$4 sm:$0xff]  }
  0x9f   :  { %6685 = vmatpush1.bf16.msra.mxu0 %v9906_v49  ;;  %7533 = vmatpush1.bf16.msra.mxu1 %v9909_v50  ;;  %v9990_v49 = vld [vmem:[%s14687_s1 + $0x6a0] ss:$16 sps:$4 sm:$0xff]   ;;  %v9993_v50 = vld [vmem:[%s14687_s1 + $0x6a8] ss:$16 sps:$4 sm:$0xff]  }
  0xa0   :  { %6686 = vmatprep.subr.bf16.mxu0 %v9914_v51  ;;  %7534 = vmatprep.subr.bf16.mxu1 %v9917_v52  ;;  %v9998_v51 = vld [vmem:[%s14687_s1 + $0x6c4] ss:$16 sps:$4 sm:$0xff]   ;;  %v10001_v52 = vld [vmem:[%s14687_s1 + $0x6cc] ss:$16 sps:$4 sm:$0xff]  }
  0xa3   :  { %6687 = vmatpush1.bf16.msra.mxu0 %v9912_v53  ;;  %7535 = vmatpush1.bf16.msra.mxu1 %v9915_v54  ;;  %v9996_v53 = vld [vmem:[%s14687_s1 + $0x6c0] ss:$16 sps:$4 sm:$0xff]   ;;  %v9999_v54 = vld [vmem:[%s14687_s1 + $0x6c8] ss:$16 sps:$4 sm:$0xff]  }
  0xa4   :  { %6688 = vmatprep.subr.bf16.mxu0 %v9920_v55  ;;  %7536 = vmatprep.subr.bf16.mxu1 %v9923_v56  ;;  %v10004_v55 = vld [vmem:[%s14687_s1 + $0x6e4] ss:$16 sps:$4 sm:$0xff]   ;;  %v10007_v56 = vld [vmem:[%s14687_s1 + $0x6ec] ss:$16 sps:$4 sm:$0xff]  }
  0xa7   :  { %6689 = vmatpush1.bf16.msra.mxu0 %v9918_v57  ;;  %7537 = vmatpush1.bf16.msra.mxu1 %v9921_v58  ;;  %v10002_v57 = vld [vmem:[%s14687_s1 + $0x6e0] ss:$16 sps:$4 sm:$0xff]   ;;  %v10005_v58 = vld [vmem:[%s14687_s1 + $0x6e8] ss:$16 sps:$4 sm:$0xff]  }
  0xa8   :  { %6690 = vmatprep.subr.bf16.mxu0 %v9926_v59  ;;  %7538 = vmatprep.subr.bf16.mxu1 %v9929_v60  ;;  %v10010_v59 = vld [vmem:[%s14687_s1 + $0x704] ss:$16 sps:$4 sm:$0xff]   ;;  %v10013_v60 = vld [vmem:[%s14687_s1 + $0x70c] ss:$16 sps:$4 sm:$0xff]  }
  0xab   :  { %6691 = vmatpush1.bf16.msra.mxu0 %v9924_v61  ;;  %7539 = vmatpush1.bf16.msra.mxu1 %v9927_v62  ;;  %v10008_v61 = vld [vmem:[%s14687_s1 + $0x700] ss:$16 sps:$4 sm:$0xff]   ;;  %v10011_v62 = vld [vmem:[%s14687_s1 + $0x708] ss:$16 sps:$4 sm:$0xff]  }
  0xac   :  { %6692 = vmatprep.subr.bf16.mxu0 %v9932_v63  ;;  %7540 = vmatprep.subr.bf16.mxu1 %v9935_v0  ;;  %v10016_v63 = vld [vmem:[%s14687_s1 + $0x724] ss:$16 sps:$4 sm:$0xff]   ;;  %v10019_v0 = vld [vmem:[%s14687_s1 + $0x72c] ss:$16 sps:$4 sm:$0xff]  }
  0xaf   :  { %6693 = vmatpush1.bf16.msra.mxu0 %v9930_v1  ;;  %7541 = vmatpush1.bf16.msra.mxu1 %v9933_v2  ;;  %v10014_v1 = vld [vmem:[%s14687_s1 + $0x720] ss:$16 sps:$4 sm:$0xff]   ;;  %v10017_v2 = vld [vmem:[%s14687_s1 + $0x728] ss:$16 sps:$4 sm:$0xff]  }
  0xb0   :  { %6694 = vmatprep.subr.bf16.mxu0 %v9938_v3  ;;  %7542 = vmatprep.subr.bf16.mxu1 %v9941_v4  ;;  %v10022_v3 = vld [vmem:[%s14687_s1 + $0x744] ss:$16 sps:$4 sm:$0xff]   ;;  %v10025_v4 = vld [vmem:[%s14687_s1 + $0x74c] ss:$16 sps:$4 sm:$0xff]  }
  0xb3   :  { %6695 = vmatpush1.bf16.msra.mxu0 %v9936_v5  ;;  %7543 = vmatpush1.bf16.msra.mxu1 %v9939_v6  ;;  %v10020_v5 = vld [vmem:[%s14687_s1 + $0x740] ss:$16 sps:$4 sm:$0xff]   ;;  %v10023_v6 = vld [vmem:[%s14687_s1 + $0x748] ss:$16 sps:$4 sm:$0xff]  }
  0xb4   :  { %6696 = vmatprep.subr.bf16.mxu0 %v9944_v7  ;;  %7544 = vmatprep.subr.bf16.mxu1 %v9947_v8  ;;  %v10028_v7 = vld [vmem:[%s14687_s1 + $0x764] ss:$16 sps:$4 sm:$0xff]   ;;  %v10031_v8 = vld [vmem:[%s14687_s1 + $0x76c] ss:$16 sps:$4 sm:$0xff]  }
  0xb7   :  { %6697 = vmatpush1.bf16.msra.mxu0 %v9942_v9  ;;  %7545 = vmatpush1.bf16.msra.mxu1 %v9945_v10  ;;  %v10026_v9 = vld [vmem:[%s14687_s1 + $0x760] ss:$16 sps:$4 sm:$0xff]   ;;  %v10029_v10 = vld [vmem:[%s14687_s1 + $0x768] ss:$16 sps:$4 sm:$0xff]  }
  0xb8   :  { %6698 = vmatprep.subr.bf16.mxu0 %v9950_v11  ;;  %7546 = vmatprep.subr.bf16.mxu1 %v9953_v12  ;;  %v10034_v11 = vld [vmem:[%s14687_s1 + $0x784] ss:$16 sps:$4 sm:$0xff]   ;;  %v10037_v12 = vld [vmem:[%s14687_s1 + $0x78c] ss:$16 sps:$4 sm:$0xff]  }
  0xbb   :  { %6699 = vmatpush1.bf16.msra.mxu0 %v9948_v13  ;;  %7547 = vmatpush1.bf16.msra.mxu1 %v9951_v14  ;;  %v10032_v13 = vld [vmem:[%s14687_s1 + $0x780] ss:$16 sps:$4 sm:$0xff]   ;;  %v10035_v14 = vld [vmem:[%s14687_s1 + $0x788] ss:$16 sps:$4 sm:$0xff]  }
  0xbc   :  { %6700 = vmatprep.subr.bf16.mxu0 %v9956_v15  ;;  %7548 = vmatprep.subr.bf16.mxu1 %v9959_v16  ;;  %v10040_v15 = vld [vmem:[%s14687_s1 + $0x7a4] ss:$16 sps:$4 sm:$0xff]   ;;  %v10043_v16 = vld [vmem:[%s14687_s1 + $0x7ac] ss:$16 sps:$4 sm:$0xff]  }
  0xbf   :  { %6701 = vmatpush1.bf16.msra.mxu0 %v9954_v17  ;;  %7549 = vmatpush1.bf16.msra.mxu1 %v9957_v18  ;;  %v10038_v17 = vld [vmem:[%s14687_s1 + $0x7a0] ss:$16 sps:$4 sm:$0xff]   ;;  %v10041_v18 = vld [vmem:[%s14687_s1 + $0x7a8] ss:$16 sps:$4 sm:$0xff]  }
  0xc0   :  { %6723 = vmatprep.subr.bf16.mxu0 %v9962_v19  ;;  %7571 = vmatprep.subr.bf16.mxu1 %v9965_v20  ;;  %v10046_v19 = vld [vmem:[%s14687_s1 + $0x7c4] ss:$16 sps:$4 sm:$0xff]   ;;  %v10049_v20 = vld [vmem:[%s14687_s1 + $0x7cc] ss:$16 sps:$4 sm:$0xff]  }
  0xc2   :  { %6703 = vmatmul.mubr.bf16.vlgmr.msra.gmra.mrb[0].mxu0 %v8332_v22  ;;  %7551 = vmatmul.mubr.bf16.vlgmr.msra.gmra.mrb[0].mxu1 %v8332_v22  ;;  %v10047_v22 = vld [vmem:[%s14687_s1 + $0x7c8] ss:$16 sps:$4 sm:$0xff]  }
  0xc3   :  { %6724 = vmatpush1.bf16.msra.mxu0 %v9960_v24  ;;  %7572 = vmatpush1.bf16.msra.mxu1 %v9963_v26  ;;  %v10055_v24 = vld [vmem:[%s14687_s1 + $0x7ec] ss:$16 sps:$4 sm:$0xff]   ;;  %v10050_v26 = vld [vmem:[%s14687_s1 + $0x7e0] ss:$16 sps:$4 sm:$0xff]  }
  0xc4   :  { %6725 = vmatprep.subr.bf16.mxu0 %v9968_v25  ;;  %7573 = vmatprep.subr.bf16.mxu1 %v9971_v27  ;;  %v10053_v25 = vld [vmem:[%s14687_s1 + $0x7e8] ss:$16 sps:$4 sm:$0xff]   ;;  %v10058_v27 = vld [vmem:[%s14687_s1 + $0x804] ss:$16 sps:$4 sm:$0xff]  }
  0xc5   :  { %6712 = vmatprep.mubr.bf16.mxu0 %v8365_v28  ;;  %7560 = vmatprep.mubr.bf16.mxu1 %v8365_v28  ;;  %v10061_v28 = vld [vmem:[%s14687_s1 + $0x80c] ss:$16 sps:$4 sm:$0xff]  }
  0xc7   :  { %6726 = vmatpush1.bf16.msra.mxu0 %v9966_v29  ;;  %7574 = vmatpush1.bf16.msra.mxu1 %v9969_v30  ;;  %v49_v29 = vld [vmem:[%s14688_s0 + $0x118] sm:$0xff]  ;;  %v8334_v30 = vcombine.low %v11889_v33, %v11894_v35 }
  0xc8   :  { %6727 = vmatprep.subr.bf16.mxu0 %v9974_v31  ;;  %7575 = vmatprep.subr.bf16.mxu1 %v9977_v32  ;;  %v65_v31 = vld [vmem:[%s14688_s0 + $0x198] sm:$0xff]  ;;  %v10056_v32 = vld [vmem:[%s14687_s1 + $0x800] ss:$16 sps:$4 sm:$0xff]  }
  0xc9   :  { %v10067_v33 = vld [vmem:[%s14687_s1 + $0x82c] ss:$16 sps:$4 sm:$0xff]   ;;  %v8367_v35 = vcombine.high %v49_v29, %v65_v31 }
  0xca   :  { %6713 = vmatmul.mubr.bf16.gmra.mrb[4].mxu0 %v8364_v34  ;;  %7561 = vmatmul.mubr.bf16.gmra.mrb[4].mxu1 %v8364_v34  ;;  %v10059_v34 = vld [vmem:[%s14687_s1 + $0x808] ss:$16 sps:$4 sm:$0xff]  }
  0xcb   :  { %6728 = vmatpush1.bf16.msra.mxu0 %v9972_v36  ;;  %7576 = vmatpush1.bf16.msra.mxu1 %v9975_v37  ;;  %v10064_v36 = vld [vmem:[%s14687_s1 + $0x824] ss:$16 sps:$4 sm:$0xff]   ;;  %v10062_v37 = vld [vmem:[%s14687_s1 + $0x820] ss:$16 sps:$4 sm:$0xff]  }
  0xcc   :  { %6729 = vmatprep.subr.bf16.mxu0 %v9980_v38  ;;  %7577 = vmatprep.subr.bf16.mxu1 %v9983_v39  ;;  %v10065_v38 = vld [vmem:[%s14687_s1 + $0x828] ss:$16 sps:$4 sm:$0xff]   ;;  %v10070_v39 = vld [vmem:[%s14687_s1 + $0x844] ss:$16 sps:$4 sm:$0xff]  }
  0xcd   :  { %6755 = vmatprep.mubr.bf16.mxu0 %v8335_v40  ;;  %7603 = vmatprep.mubr.bf16.mxu1 %v8335_v40  ;;  %v10073_v40 = vld [vmem:[%s14687_s1 + $0x84c] ss:$16 sps:$4 sm:$0xff]  }
  0xcf   :  { %6730 = vmatpush1.bf16.msra.mxu0 %v9978_v41  ;;  %7578 = vmatpush1.bf16.msra.mxu1 %v9981_v42  ;;  %v12101_v41 = vld [vmem:[%s14688_s0 + $0x20] sm:$0xff]  ;;  %v8366_v42 = vcombine.low %v49_v29, %v65_v31 }
  0xd0   :  { %6731 = vmatprep.subr.bf16.mxu0 %v9986_v43  ;;  %7579 = vmatprep.subr.bf16.mxu1 %v9989_v44  ;;  %v12106_v43 = vld [vmem:[%s14688_s0 + $0xa0] sm:$0xff] }
  0xd1   :  { %v10068_v44 = vld [vmem:[%s14687_s1 + $0x840] ss:$16 sps:$4 sm:$0xff]   ;;  %v10148_v31 = vld [vmem:[%s14687_s1 + $0x9e4] ss:$16 sps:$4 sm:$0xff]  }
  0xd2   :  { %v10140_v29 = vld [vmem:[%s14687_s1 + $0x9c0] ss:$16 sps:$4 sm:$0xff]  }
  0xd3   :  { %6732 = vmatpush1.bf16.msra.mxu0 %v9984_v45  ;;  %7580 = vmatpush1.bf16.msra.mxu1 %v9987_v46  ;;  %v10071_v45 = vld [vmem:[%s14687_s1 + $0x848] ss:$16 sps:$4 sm:$0xff]   ;;  %v10076_v46 = vld [vmem:[%s14687_s1 + $0x864] ss:$16 sps:$4 sm:$0xff]  }
  0xd4   :  { %6733 = vmatprep.subr.bf16.mxu0 %v9992_v47  ;;  %7581 = vmatprep.subr.bf16.mxu1 %v9995_v48  ;;  %v10079_v47 = vld [vmem:[%s14687_s1 + $0x86c] ss:$16 sps:$4 sm:$0xff]   ;;  %v8337_v48 = vcombine.high %v12101_v41, %v12106_v43 }
  0xd7   :  { %6734 = vmatpush1.bf16.msra.mxu0 %v9990_v49  ;;  %7582 = vmatpush1.bf16.msra.mxu1 %v9993_v50  ;;  %v10074_v49 = vld [vmem:[%s14687_s1 + $0x860] ss:$16 sps:$4 sm:$0xff]   ;;  %v10077_v50 = vld [vmem:[%s14687_s1 + $0x868] ss:$16 sps:$4 sm:$0xff]  }
  0xd8   :  { %6735 = vmatprep.subr.bf16.mxu0 %v9998_v51  ;;  %7583 = vmatprep.subr.bf16.mxu1 %v10001_v52  ;;  %v10082_v51 = vld [vmem:[%s14687_s1 + $0x884] ss:$16 sps:$4 sm:$0xff]   ;;  %v10085_v52 = vld [vmem:[%s14687_s1 + $0x88c] ss:$16 sps:$4 sm:$0xff]  }
  0xdb   :  { %6736 = vmatpush1.bf16.msra.mxu0 %v9996_v53  ;;  %7584 = vmatpush1.bf16.msra.mxu1 %v9999_v54  ;;  %v10080_v53 = vld [vmem:[%s14687_s1 + $0x880] ss:$16 sps:$4 sm:$0xff]   ;;  %v10083_v54 = vld [vmem:[%s14687_s1 + $0x888] ss:$16 sps:$4 sm:$0xff]  }
  0xdc   :  { %6737 = vmatprep.subr.bf16.mxu0 %v10004_v55  ;;  %7585 = vmatprep.subr.bf16.mxu1 %v10007_v56  ;;  %v10088_v55 = vld [vmem:[%s14687_s1 + $0x8a4] ss:$16 sps:$4 sm:$0xff]   ;;  %v10091_v56 = vld [vmem:[%s14687_s1 + $0x8ac] ss:$16 sps:$4 sm:$0xff]  }
  0xdf   :  { %6738 = vmatpush1.bf16.msra.mxu0 %v10002_v57  ;;  %7586 = vmatpush1.bf16.msra.mxu1 %v10005_v58  ;;  %v10086_v57 = vld [vmem:[%s14687_s1 + $0x8a0] ss:$16 sps:$4 sm:$0xff]   ;;  %v10089_v58 = vld [vmem:[%s14687_s1 + $0x8a8] ss:$16 sps:$4 sm:$0xff]  }
  0xe0   :  { %6739 = vmatprep.subr.bf16.mxu0 %v10010_v59  ;;  %7587 = vmatprep.subr.bf16.mxu1 %v10013_v60  ;;  %v10094_v59 = vld [vmem:[%s14687_s1 + $0x8c4] ss:$16 sps:$4 sm:$0xff]   ;;  %v10097_v60 = vld [vmem:[%s14687_s1 + $0x8cc] ss:$16 sps:$4 sm:$0xff]  }
  0xe3   :  { %6740 = vmatpush1.bf16.msra.mxu0 %v10008_v61  ;;  %7588 = vmatpush1.bf16.msra.mxu1 %v10011_v62  ;;  %v10092_v61 = vld [vmem:[%s14687_s1 + $0x8c0] ss:$16 sps:$4 sm:$0xff]   ;;  %v10095_v62 = vld [vmem:[%s14687_s1 + $0x8c8] ss:$16 sps:$4 sm:$0xff]  }
  0xe4   :  { %6741 = vmatprep.subr.bf16.mxu0 %v10016_v63  ;;  %7589 = vmatprep.subr.bf16.mxu1 %v10019_v0  ;;  %v10100_v63 = vld [vmem:[%s14687_s1 + $0x8e4] ss:$16 sps:$4 sm:$0xff]   ;;  %v10103_v0 = vld [vmem:[%s14687_s1 + $0x8ec] ss:$16 sps:$4 sm:$0xff]  }
  0xe7   :  { %6742 = vmatpush1.bf16.msra.mxu0 %v10014_v1  ;;  %7590 = vmatpush1.bf16.msra.mxu1 %v10017_v2  ;;  %v10098_v1 = vld [vmem:[%s14687_s1 + $0x8e0] ss:$16 sps:$4 sm:$0xff]   ;;  %v10101_v2 = vld [vmem:[%s14687_s1 + $0x8e8] ss:$16 sps:$4 sm:$0xff]  }
  0xe8   :  { %6743 = vmatprep.subr.bf16.mxu0 %v10022_v3  ;;  %7591 = vmatprep.subr.bf16.mxu1 %v10025_v4  ;;  %v10106_v3 = vld [vmem:[%s14687_s1 + $0x904] ss:$16 sps:$4 sm:$0xff]   ;;  %v10109_v4 = vld [vmem:[%s14687_s1 + $0x90c] ss:$16 sps:$4 sm:$0xff]  }
  0xeb   :  { %6744 = vmatpush1.bf16.msra.mxu0 %v10020_v5  ;;  %7592 = vmatpush1.bf16.msra.mxu1 %v10023_v6  ;;  %v10104_v5 = vld [vmem:[%s14687_s1 + $0x900] ss:$16 sps:$4 sm:$0xff]   ;;  %v10107_v6 = vld [vmem:[%s14687_s1 + $0x908] ss:$16 sps:$4 sm:$0xff]  }
  0xec   :  { %6745 = vmatprep.subr.bf16.mxu0 %v10028_v7  ;;  %7593 = vmatprep.subr.bf16.mxu1 %v10031_v8  ;;  %v10112_v7 = vld [vmem:[%s14687_s1 + $0x924] ss:$16 sps:$4 sm:$0xff]   ;;  %v10115_v8 = vld [vmem:[%s14687_s1 + $0x92c] ss:$16 sps:$4 sm:$0xff]  }
  0xef   :  { %6746 = vmatpush1.bf16.msra.mxu0 %v10026_v9  ;;  %7594 = vmatpush1.bf16.msra.mxu1 %v10029_v10  ;;  %v10110_v9 = vld [vmem:[%s14687_s1 + $0x920] ss:$16 sps:$4 sm:$0xff]   ;;  %v10113_v10 = vld [vmem:[%s14687_s1 + $0x928] ss:$16 sps:$4 sm:$0xff]  }
  0xf0   :  { %6747 = vmatprep.subr.bf16.mxu0 %v10034_v11  ;;  %7595 = vmatprep.subr.bf16.mxu1 %v10037_v12  ;;  %v10118_v11 = vld [vmem:[%s14687_s1 + $0x944] ss:$16 sps:$4 sm:$0xff]   ;;  %v10121_v12 = vld [vmem:[%s14687_s1 + $0x94c] ss:$16 sps:$4 sm:$0xff]  }
  0xf3   :  { %6748 = vmatpush1.bf16.msra.mxu0 %v10032_v13  ;;  %7596 = vmatpush1.bf16.msra.mxu1 %v10035_v14  ;;  %v10116_v13 = vld [vmem:[%s14687_s1 + $0x940] ss:$16 sps:$4 sm:$0xff]   ;;  %v10119_v14 = vld [vmem:[%s14687_s1 + $0x948] ss:$16 sps:$4 sm:$0xff]  }
  0xf4   :  { %6749 = vmatprep.subr.bf16.mxu0 %v10040_v15  ;;  %7597 = vmatprep.subr.bf16.mxu1 %v10043_v16  ;;  %v10124_v15 = vld [vmem:[%s14687_s1 + $0x964] ss:$16 sps:$4 sm:$0xff]   ;;  %v10127_v16 = vld [vmem:[%s14687_s1 + $0x96c] ss:$16 sps:$4 sm:$0xff]  }
  0xf7   :  { %6750 = vmatpush1.bf16.msra.mxu0 %v10038_v17  ;;  %7598 = vmatpush1.bf16.msra.mxu1 %v10041_v18  ;;  %v10122_v17 = vld [vmem:[%s14687_s1 + $0x960] ss:$16 sps:$4 sm:$0xff]   ;;  %v10125_v18 = vld [vmem:[%s14687_s1 + $0x968] ss:$16 sps:$4 sm:$0xff]  }
  0xf8   :  { %6751 = vmatprep.subr.bf16.mxu0 %v10046_v19  ;;  %7599 = vmatprep.subr.bf16.mxu1 %v10049_v20  ;;  %v10130_v19 = vld [vmem:[%s14687_s1 + $0x984] ss:$16 sps:$4 sm:$0xff]   ;;  %v10133_v20 = vld [vmem:[%s14687_s1 + $0x98c] ss:$16 sps:$4 sm:$0xff]  }
  0xfb   :  { %6752 = vmatpush1.bf16.msra.mxu0 %v10044_v21  ;;  %7600 = vmatpush1.bf16.msra.mxu1 %v10047_v22  ;;  %v10128_v21 = vld [vmem:[%s14687_s1 + $0x980] ss:$16 sps:$4 sm:$0xff]   ;;  %v10131_v22 = vld [vmem:[%s14687_s1 + $0x988] ss:$16 sps:$4 sm:$0xff]  }
  0xfc   :  { %6753 = vmatprep.subr.bf16.mxu0 %v10052_v23  ;;  %7601 = vmatprep.subr.bf16.mxu1 %v10055_v24  ;;  %v10136_v23 = vld [vmem:[%s14687_s1 + $0x9a4] ss:$16 sps:$4 sm:$0xff]   ;;  %v10139_v24 = vld [vmem:[%s14687_s1 + $0x9ac] ss:$16 sps:$4 sm:$0xff]  }
  0xff   :  { %6754 = vmatpush1.bf16.msra.mxu0 %v10050_v26  ;;  %7602 = vmatpush1.bf16.msra.mxu1 %v10053_v25  ;;  %v10134_v26 = vld [vmem:[%s14687_s1 + $0x9a0] ss:$16 sps:$4 sm:$0xff]   ;;  %v10137_v25 = vld [vmem:[%s14687_s1 + $0x9a8] ss:$16 sps:$4 sm:$0xff]  }
 0x100   :  { %6776 = vmatprep.subr.bf16.mxu0 %v10058_v27  ;;  %7624 = vmatprep.subr.bf16.mxu1 %v10061_v28  ;;  %v10142_v27 = vld [vmem:[%s14687_s1 + $0x9c4] ss:$16 sps:$4 sm:$0xff]   ;;  %v10145_v28 = vld [vmem:[%s14687_s1 + $0x9cc] ss:$16 sps:$4 sm:$0xff]  }
 0x102   :  { %6756 = vmatmul.mubr.bf16.vlgmr.msra.gmra.mrb[0].mxu0 %v8334_v30  ;;  %7604 = vmatmul.mubr.bf16.vlgmr.msra.gmra.mrb[0].mxu1 %v8334_v30  ;;  %v10143_v30 = vld [vmem:[%s14687_s1 + $0x9c8] ss:$16 sps:$4 sm:$0xff]  }
 0x103   :  { %6777 = vmatpush1.bf16.msra.mxu0 %v10056_v32  ;;  %7625 = vmatpush1.bf16.msra.mxu1 %v10059_v34  ;;  %v10151_v32 = vld [vmem:[%s14687_s1 + $0x9ec] ss:$16 sps:$4 sm:$0xff]   ;;  %v10146_v34 = vld [vmem:[%s14687_s1 + $0x9e0] ss:$16 sps:$4 sm:$0xff]  }
 0x104   :  { %6778 = vmatprep.subr.bf16.mxu0 %v10064_v36  ;;  %7626 = vmatprep.subr.bf16.mxu1 %v10067_v33  ;;  %v10149_v36 = vld [vmem:[%s14687_s1 + $0x9e8] ss:$16 sps:$4 sm:$0xff]   ;;  %v10154_v33 = vld [vmem:[%s14687_s1 + $0xa04] ss:$16 sps:$4 sm:$0xff]  }
 0x105   :  { %6765 = vmatprep.mubr.bf16.mxu0 %v8367_v35  ;;  %7613 = vmatprep.mubr.bf16.mxu1 %v8367_v35  ;;  %v10157_v35 = vld [vmem:[%s14687_s1 + $0xa0c] ss:$16 sps:$4 sm:$0xff]  }
 0x107   :  { %6779 = vmatpush1.bf16.msra.mxu0 %v10062_v37  ;;  %7627 = vmatpush1.bf16.msra.mxu1 %v10065_v38  ;;  %v50_v37 = vld [vmem:[%s14688_s0 + $0x120] sm:$0xff] }
 0x108   :  { %6780 = vmatprep.subr.bf16.mxu0 %v10070_v39  ;;  %7628 = vmatprep.subr.bf16.mxu1 %v10073_v40  ;;  %v66_v38 = vld [vmem:[%s14688_s0 + $0x1a0] sm:$0xff]  ;;  %v8336_v39 = vcombine.low %v12101_v41, %v12106_v43  ;;  %v10163_v41 = vld [vmem:[%s14687_s1 + $0xa2c] ss:$16 sps:$4 sm:$0xff]  }
 0x109   :  { %v10152_v40 = vld [vmem:[%s14687_s1 + $0xa00] ss:$16 sps:$4 sm:$0xff]  }
 0x10a   :  { %6766 = vmatmul.mubr.bf16.gmra.mrb[4].mxu0 %v8366_v42  ;;  %7614 = vmatmul.mubr.bf16.gmra.mrb[4].mxu1 %v8366_v42  ;;  %v10155_v42 = vld [vmem:[%s14687_s1 + $0xa08] ss:$16 sps:$4 sm:$0xff]   ;;  %v10158_v43 = vld [vmem:[%s14687_s1 + $0xa20] ss:$16 sps:$4 sm:$0xff]  }
 0x10b   :  { %6781 = vmatpush1.bf16.msra.mxu0 %v10068_v44  ;;  %7629 = vmatpush1.bf16.msra.mxu1 %v10071_v45  ;;  %v10160_v44 = vld [vmem:[%s14687_s1 + $0xa24] ss:$16 sps:$4 sm:$0xff]   ;;  %v10161_v45 = vld [vmem:[%s14687_s1 + $0xa28] ss:$16 sps:$4 sm:$0xff]  }
 0x10c   :  { %6782 = vmatprep.subr.bf16.mxu0 %v10076_v46  ;;  %7630 = vmatprep.subr.bf16.mxu1 %v10079_v47  ;;  %v8369_v46 = vcombine.high %v50_v37, %v66_v38  ;;  %v10166_v47 = vld [vmem:[%s14687_s1 + $0xa44] ss:$16 sps:$4 sm:$0xff]  }
 0x10d   :  { %6808 = vmatprep.mubr.bf16.mxu0 %v8337_v48  ;;  %7656 = vmatprep.mubr.bf16.mxu1 %v8337_v48  ;;  %v10169_v48 = vld [vmem:[%s14687_s1 + $0xa4c] ss:$16 sps:$4 sm:$0xff]  }
 0x10f   :  { %6783 = vmatpush1.bf16.msra.mxu0 %v10074_v49  ;;  %7631 = vmatpush1.bf16.msra.mxu1 %v10077_v50  ;;  %v12313_v49 = vld [vmem:[%s14688_s0 + $0x28] sm:$0xff] }
 0x110   :  { %6784 = vmatprep.subr.bf16.mxu0 %v10082_v51  ;;  %7632 = vmatprep.subr.bf16.mxu1 %v10085_v52  ;;  %v12318_v50 = vld [vmem:[%s14688_s0 + $0xa8] sm:$0xff]  ;;  %v8368_v51 = vcombine.low %v50_v37, %v66_v38  ;;  %v10164_v52 = vld [vmem:[%s14687_s1 + $0xa40] ss:$16 sps:$4 sm:$0xff]  }
 0x111   :  { %v10236_v37 = vld [vmem:[%s14687_s1 + $0xbc0] ss:$16 sps:$4 sm:$0xff]   ;;  %v10239_v38 = vld [vmem:[%s14687_s1 + $0xbc8] ss:$16 sps:$4 sm:$0xff]  }
 0x113   :  { %6785 = vmatpush1.bf16.msra.mxu0 %v10080_v53  ;;  %7633 = vmatpush1.bf16.msra.mxu1 %v10083_v54  ;;  %v10167_v53 = vld [vmem:[%s14687_s1 + $0xa48] ss:$16 sps:$4 sm:$0xff]   ;;  %v10172_v54 = vld [vmem:[%s14687_s1 + $0xa64] ss:$16 sps:$4 sm:$0xff]  }
 0x114   :  { %6786 = vmatprep.subr.bf16.mxu0 %v10088_v55  ;;  %7634 = vmatprep.subr.bf16.mxu1 %v10091_v56  ;;  %v10175_v55 = vld [vmem:[%s14687_s1 + $0xa6c] ss:$16 sps:$4 sm:$0xff]   ;;  %v8339_v56 = vcombine.high %v12313_v49, %v12318_v50 }
 0x117   :  { %6787 = vmatpush1.bf16.msra.mxu0 %v10086_v57  ;;  %7635 = vmatpush1.bf16.msra.mxu1 %v10089_v58  ;;  %v10170_v57 = vld [vmem:[%s14687_s1 + $0xa60] ss:$16 sps:$4 sm:$0xff]   ;;  %v10173_v58 = vld [vmem:[%s14687_s1 + $0xa68] ss:$16 sps:$4 sm:$0xff]  }
 0x118   :  { %6788 = vmatprep.subr.bf16.mxu0 %v10094_v59  ;;  %7636 = vmatprep.subr.bf16.mxu1 %v10097_v60  ;;  %v10178_v59 = vld [vmem:[%s14687_s1 + $0xa84] ss:$16 sps:$4 sm:$0xff]   ;;  %v10181_v60 = vld [vmem:[%s14687_s1 + $0xa8c] ss:$16 sps:$4 sm:$0xff]  }
 0x11b   :  { %6789 = vmatpush1.bf16.msra.mxu0 %v10092_v61  ;;  %7637 = vmatpush1.bf16.msra.mxu1 %v10095_v62  ;;  %v10176_v61 = vld [vmem:[%s14687_s1 + $0xa80] ss:$16 sps:$4 sm:$0xff]   ;;  %v10179_v62 = vld [vmem:[%s14687_s1 + $0xa88] ss:$16 sps:$4 sm:$0xff]  }
 0x11c   :  { %6790 = vmatprep.subr.bf16.mxu0 %v10100_v63  ;;  %7638 = vmatprep.subr.bf16.mxu1 %v10103_v0  ;;  %v10184_v63 = vld [vmem:[%s14687_s1 + $0xaa4] ss:$16 sps:$4 sm:$0xff]   ;;  %v10187_v0 = vld [vmem:[%s14687_s1 + $0xaac] ss:$16 sps:$4 sm:$0xff]  }
 0x11f   :  { %6791 = vmatpush1.bf16.msra.mxu0 %v10098_v1  ;;  %7639 = vmatpush1.bf16.msra.mxu1 %v10101_v2  ;;  %v10182_v1 = vld [vmem:[%s14687_s1 + $0xaa0] ss:$16 sps:$4 sm:$0xff]   ;;  %v10185_v2 = vld [vmem:[%s14687_s1 + $0xaa8] ss:$16 sps:$4 sm:$0xff]  }
 0x120   :  { %6792 = vmatprep.subr.bf16.mxu0 %v10106_v3  ;;  %7640 = vmatprep.subr.bf16.mxu1 %v10109_v4  ;;  %v10190_v3 = vld [vmem:[%s14687_s1 + $0xac4] ss:$16 sps:$4 sm:$0xff]   ;;  %v10193_v4 = vld [vmem:[%s14687_s1 + $0xacc] ss:$16 sps:$4 sm:$0xff]  }
 0x123   :  { %6793 = vmatpush1.bf16.msra.mxu0 %v10104_v5  ;;  %7641 = vmatpush1.bf16.msra.mxu1 %v10107_v6  ;;  %v10188_v5 = vld [vmem:[%s14687_s1 + $0xac0] ss:$16 sps:$4 sm:$0xff]   ;;  %v10191_v6 = vld [vmem:[%s14687_s1 + $0xac8] ss:$16 sps:$4 sm:$0xff]  }
 0x124   :  { %6794 = vmatprep.subr.bf16.mxu0 %v10112_v7  ;;  %7642 = vmatprep.subr.bf16.mxu1 %v10115_v8  ;;  %v10196_v7 = vld [vmem:[%s14687_s1 + $0xae4] ss:$16 sps:$4 sm:$0xff]   ;;  %v10199_v8 = vld [vmem:[%s14687_s1 + $0xaec] ss:$16 sps:$4 sm:$0xff]  }
 0x127   :  { %6795 = vmatpush1.bf16.msra.mxu0 %v10110_v9  ;;  %7643 = vmatpush1.bf16.msra.mxu1 %v10113_v10  ;;  %v10194_v9 = vld [vmem:[%s14687_s1 + $0xae0] ss:$16 sps:$4 sm:$0xff]   ;;  %v10197_v10 = vld [vmem:[%s14687_s1 + $0xae8] ss:$16 sps:$4 sm:$0xff]  }
 0x128   :  { %6796 = vmatprep.subr.bf16.mxu0 %v10118_v11  ;;  %7644 = vmatprep.subr.bf16.mxu1 %v10121_v12  ;;  %v10202_v11 = vld [vmem:[%s14687_s1 + $0xb04] ss:$16 sps:$4 sm:$0xff]   ;;  %v10205_v12 = vld [vmem:[%s14687_s1 + $0xb0c] ss:$16 sps:$4 sm:$0xff]  }
 0x12b   :  { %6797 = vmatpush1.bf16.msra.mxu0 %v10116_v13  ;;  %7645 = vmatpush1.bf16.msra.mxu1 %v10119_v14  ;;  %v10200_v13 = vld [vmem:[%s14687_s1 + $0xb00] ss:$16 sps:$4 sm:$0xff]   ;;  %v10203_v14 = vld [vmem:[%s14687_s1 + $0xb08] ss:$16 sps:$4 sm:$0xff]  }
 0x12c   :  { %6798 = vmatprep.subr.bf16.mxu0 %v10124_v15  ;;  %7646 = vmatprep.subr.bf16.mxu1 %v10127_v16  ;;  %v10208_v15 = vld [vmem:[%s14687_s1 + $0xb24] ss:$16 sps:$4 sm:$0xff]   ;;  %v10211_v16 = vld [vmem:[%s14687_s1 + $0xb2c] ss:$16 sps:$4 sm:$0xff]  }
 0x12f   :  { %6799 = vmatpush1.bf16.msra.mxu0 %v10122_v17  ;;  %7647 = vmatpush1.bf16.msra.mxu1 %v10125_v18  ;;  %v10206_v17 = vld [vmem:[%s14687_s1 + $0xb20] ss:$16 sps:$4 sm:$0xff]   ;;  %v10209_v18 = vld [vmem:[%s14687_s1 + $0xb28] ss:$16 sps:$4 sm:$0xff]  }
 0x130   :  { %6800 = vmatprep.subr.bf16.mxu0 %v10130_v19  ;;  %7648 = vmatprep.subr.bf16.mxu1 %v10133_v20  ;;  %v10214_v19 = vld [vmem:[%s14687_s1 + $0xb44] ss:$16 sps:$4 sm:$0xff]   ;;  %v10217_v20 = vld [vmem:[%s14687_s1 + $0xb4c] ss:$16 sps:$4 sm:$0xff]  }
 0x133   :  { %6801 = vmatpush1.bf16.msra.mxu0 %v10128_v21  ;;  %7649 = vmatpush1.bf16.msra.mxu1 %v10131_v22  ;;  %v10212_v21 = vld [vmem:[%s14687_s1 + $0xb40] ss:$16 sps:$4 sm:$0xff]   ;;  %v10215_v22 = vld [vmem:[%s14687_s1 + $0xb48] ss:$16 sps:$4 sm:$0xff]  }
 0x134   :  { %6802 = vmatprep.subr.bf16.mxu0 %v10136_v23  ;;  %7650 = vmatprep.subr.bf16.mxu1 %v10139_v24  ;;  %v10220_v23 = vld [vmem:[%s14687_s1 + $0xb64] ss:$16 sps:$4 sm:$0xff]   ;;  %v10223_v24 = vld [vmem:[%s14687_s1 + $0xb6c] ss:$16 sps:$4 sm:$0xff]  }
 0x137   :  { %6803 = vmatpush1.bf16.msra.mxu0 %v10134_v26  ;;  %7651 = vmatpush1.bf16.msra.mxu1 %v10137_v25  ;;  %v10218_v26 = vld [vmem:[%s14687_s1 + $0xb60] ss:$16 sps:$4 sm:$0xff]   ;;  %v10221_v25 = vld [vmem:[%s14687_s1 + $0xb68] ss:$16 sps:$4 sm:$0xff]  }
 0x138   :  { %6804 = vmatprep.subr.bf16.mxu0 %v10142_v27  ;;  %7652 = vmatprep.subr.bf16.mxu1 %v10145_v28  ;;  %v10226_v27 = vld [vmem:[%s14687_s1 + $0xb84] ss:$16 sps:$4 sm:$0xff]   ;;  %v10229_v28 = vld [vmem:[%s14687_s1 + $0xb8c] ss:$16 sps:$4 sm:$0xff]  }
 0x13b   :  { %6805 = vmatpush1.bf16.msra.mxu0 %v10140_v29  ;;  %7653 = vmatpush1.bf16.msra.mxu1 %v10143_v30  ;;  %v10224_v29 = vld [vmem:[%s14687_s1 + $0xb80] ss:$16 sps:$4 sm:$0xff]   ;;  %v10227_v30 = vld [vmem:[%s14687_s1 + $0xb88] ss:$16 sps:$4 sm:$0xff]  }
 0x13c   :  { %6806 = vmatprep.subr.bf16.mxu0 %v10148_v31  ;;  %7654 = vmatprep.subr.bf16.mxu1 %v10151_v32  ;;  %v10232_v31 = vld [vmem:[%s14687_s1 + $0xba4] ss:$16 sps:$4 sm:$0xff]   ;;  %v10235_v32 = vld [vmem:[%s14687_s1 + $0xbac] ss:$16 sps:$4 sm:$0xff]  }
 0x13f   :  { %6807 = vmatpush1.bf16.msra.mxu0 %v10146_v34  ;;  %7655 = vmatpush1.bf16.msra.mxu1 %v10149_v36  ;;  %v10230_v34 = vld [vmem:[%s14687_s1 + $0xba0] ss:$16 sps:$4 sm:$0xff]   ;;  %v10233_v36 = vld [vmem:[%s14687_s1 + $0xba8] ss:$16 sps:$4 sm:$0xff]  }
 0x140   :  { %6829 = vmatprep.subr.bf16.mxu0 %v10154_v33  ;;  %7677 = vmatprep.subr.bf16.mxu1 %v10157_v35  ;;  %v10238_v33 = vld [vmem:[%s14687_s1 + $0xbc4] ss:$16 sps:$4 sm:$0xff]   ;;  %v10241_v35 = vld [vmem:[%s14687_s1 + $0xbcc] ss:$16 sps:$4 sm:$0xff]  }
 0x142   :  { %6809 = vmatmul.mubr.bf16.vlgmr.msra.gmra.mrb[0].mxu0 %v8336_v39  ;;  %7657 = vmatmul.mubr.bf16.vlgmr.msra.gmra.mrb[0].mxu1 %v8336_v39  ;;  %v10244_v39 = vld [vmem:[%s14687_s1 + $0xbe4] ss:$16 sps:$4 sm:$0xff]  }
 0x143   :  { %6830 = vmatpush1.bf16.msra.mxu0 %v10152_v40  ;;  %7678 = vmatpush1.bf16.msra.mxu1 %v10155_v42  ;;  %v10247_v40 = vld [vmem:[%s14687_s1 + $0xbec] ss:$16 sps:$4 sm:$0xff]   ;;  %v10242_v42 = vld [vmem:[%s14687_s1 + $0xbe0] ss:$16 sps:$4 sm:$0xff]  }
 0x144   :  { %6831 = vmatprep.subr.bf16.mxu0 %v10160_v44  ;;  %7679 = vmatprep.subr.bf16.mxu1 %v10163_v41  ;;  %v10245_v44 = vld [vmem:[%s14687_s1 + $0xbe8] ss:$16 sps:$4 sm:$0xff]   ;;  %v10250_v41 = vld [vmem:[%s14687_s1 + $0xc04] ss:$16 sps:$4 sm:$0xff]  }
 0x145   :  { %6818 = vmatprep.mubr.bf16.mxu0 %v8369_v46  ;;  %7666 = vmatprep.mubr.bf16.mxu1 %v8369_v46  ;;  %v67_v46 = vld [vmem:[%s14688_s0 + $0x1a8] sm:$0xff] }
 0x147   :  { %6832 = vmatpush1.bf16.msra.mxu0 %v10158_v43  ;;  %7680 = vmatpush1.bf16.msra.mxu1 %v10161_v45  ;;  %v10253_v43 = vld [vmem:[%s14687_s1 + $0xc0c] ss:$16 sps:$4 sm:$0xff]  }
 0x148   :  { %6833 = vmatprep.subr.bf16.mxu0 %v10166_v47  ;;  %7681 = vmatprep.subr.bf16.mxu1 %v10169_v48  ;;  %v51_v45 = vld [vmem:[%s14688_s0 + $0x128] sm:$0xff]  ;;  %v8338_v47 = vcombine.low %v12313_v49, %v12318_v50  ;;  %v10248_v48 = vld [vmem:[%s14687_s1 + $0xc00] ss:$16 sps:$4 sm:$0xff]  }
 0x149   :  { %v10259_v49 = vld [vmem:[%s14687_s1 + $0xc2c] ss:$16 sps:$4 sm:$0xff]   ;;  %v10254_v50 = vld [vmem:[%s14687_s1 + $0xc20] ss:$16 sps:$4 sm:$0xff]  }
 0x14a   :  { %6819 = vmatmul.mubr.bf16.gmra.mrb[4].mxu0 %v8368_v51  ;;  %7667 = vmatmul.mubr.bf16.gmra.mrb[4].mxu1 %v8368_v51  ;;  %v10251_v51 = vld [vmem:[%s14687_s1 + $0xc08] ss:$16 sps:$4 sm:$0xff]  }
 0x14b   :  { %6834 = vmatpush1.bf16.msra.mxu0 %v10164_v52  ;;  %7682 = vmatpush1.bf16.msra.mxu1 %v10167_v53  ;;  %v10256_v52 = vld [vmem:[%s14687_s1 + $0xc24] ss:$16 sps:$4 sm:$0xff]   ;;  %v10257_v53 = vld [vmem:[%s14687_s1 + $0xc28] ss:$16 sps:$4 sm:$0xff]  }
 0x14c   :  { %6835 = vmatprep.subr.bf16.mxu0 %v10172_v54  ;;  %7683 = vmatprep.subr.bf16.mxu1 %v10175_v55  ;;  %v8371_v54 = vcombine.high %v51_v45, %v67_v46  ;;  %v10262_v55 = vld [vmem:[%s14687_s1 + $0xc44] ss:$16 sps:$4 sm:$0xff]  }
 0x14d   :  { %6861 = vmatprep.mubr.bf16.mxu0 %v8339_v56  ;;  %7709 = vmatprep.mubr.bf16.mxu1 %v8339_v56  ;;  %v10265_v56 = vld [vmem:[%s14687_s1 + $0xc4c] ss:$16 sps:$4 sm:$0xff]  }
 0x14f   :  { %6836 = vmatpush1.bf16.msra.mxu0 %v10170_v57  ;;  %7684 = vmatpush1.bf16.msra.mxu1 %v10173_v58  ;;  %v12525_v57 = vld [vmem:[%s14688_s0 + $0x30] sm:$0xff] }
 0x150   :  { %6837 = vmatprep.subr.bf16.mxu0 %v10178_v59  ;;  %7685 = vmatprep.subr.bf16.mxu1 %v10181_v60  ;;  %v12530_v58 = vld [vmem:[%s14688_s0 + $0xb0] sm:$0xff]  ;;  %v8370_v59 = vcombine.low %v51_v45, %v67_v46  ;;  %v10335_v46 = vld [vmem:[%s14687_s1 + $0xdc8] ss:$16 sps:$4 sm:$0xff]  }
 0x151   :  { %v10260_v60 = vld [vmem:[%s14687_s1 + $0xc40] ss:$16 sps:$4 sm:$0xff]  }
 0x152   :  { %v10332_v45 = vld [vmem:[%s14687_s1 + $0xdc0] ss:$16 sps:$4 sm:$0xff]  }
 0x153   :  { %6838 = vmatpush1.bf16.msra.mxu0 %v10176_v61  ;;  %7686 = vmatpush1.bf16.msra.mxu1 %v10179_v62  ;;  %v10263_v61 = vld [vmem:[%s14687_s1 + $0xc48] ss:$16 sps:$4 sm:$0xff]   ;;  %v10268_v62 = vld [vmem:[%s14687_s1 + $0xc64] ss:$16 sps:$4 sm:$0xff]  }
 0x154   :  { %6839 = vmatprep.subr.bf16.mxu0 %v10184_v63  ;;  %7687 = vmatprep.subr.bf16.mxu1 %v10187_v0  ;;  %v10271_v63 = vld [vmem:[%s14687_s1 + $0xc6c] ss:$16 sps:$4 sm:$0xff]   ;;  %v8341_v0 = vcombine.high %v12525_v57, %v12530_v58 }
 0x157   :  { %6840 = vmatpush1.bf16.msra.mxu0 %v10182_v1  ;;  %7688 = vmatpush1.bf16.msra.mxu1 %v10185_v2  ;;  %v10266_v1 = vld [vmem:[%s14687_s1 + $0xc60] ss:$16 sps:$4 sm:$0xff]   ;;  %v10269_v2 = vld [vmem:[%s14687_s1 + $0xc68] ss:$16 sps:$4 sm:$0xff]  }
 0x158   :  { %6841 = vmatprep.subr.bf16.mxu0 %v10190_v3  ;;  %7689 = vmatprep.subr.bf16.mxu1 %v10193_v4  ;;  %v10274_v3 = vld [vmem:[%s14687_s1 + $0xc84] ss:$16 sps:$4 sm:$0xff]   ;;  %v10277_v4 = vld [vmem:[%s14687_s1 + $0xc8c] ss:$16 sps:$4 sm:$0xff]  }
 0x15b   :  { %6842 = vmatpush1.bf16.msra.mxu0 %v10188_v5  ;;  %7690 = vmatpush1.bf16.msra.mxu1 %v10191_v6  ;;  %v10272_v5 = vld [vmem:[%s14687_s1 + $0xc80] ss:$16 sps:$4 sm:$0xff]   ;;  %v10275_v6 = vld [vmem:[%s14687_s1 + $0xc88] ss:$16 sps:$4 sm:$0xff]  }
 0x15c   :  { %6843 = vmatprep.subr.bf16.mxu0 %v10196_v7  ;;  %7691 = vmatprep.subr.bf16.mxu1 %v10199_v8  ;;  %v10280_v7 = vld [vmem:[%s14687_s1 + $0xca4] ss:$16 sps:$4 sm:$0xff]   ;;  %v10283_v8 = vld [vmem:[%s14687_s1 + $0xcac] ss:$16 sps:$4 sm:$0xff]  }
 0x15f   :  { %6844 = vmatpush1.bf16.msra.mxu0 %v10194_v9  ;;  %7692 = vmatpush1.bf16.msra.mxu1 %v10197_v10  ;;  %v10278_v9 = vld [vmem:[%s14687_s1 + $0xca0] ss:$16 sps:$4 sm:$0xff]   ;;  %v10281_v10 = vld [vmem:[%s14687_s1 + $0xca8] ss:$16 sps:$4 sm:$0xff]  }
 0x160   :  { %6845 = vmatprep.subr.bf16.mxu0 %v10202_v11  ;;  %7693 = vmatprep.subr.bf16.mxu1 %v10205_v12  ;;  %v10286_v11 = vld [vmem:[%s14687_s1 + $0xcc4] ss:$16 sps:$4 sm:$0xff]   ;;  %v10289_v12 = vld [vmem:[%s14687_s1 + $0xccc] ss:$16 sps:$4 sm:$0xff]  }
 0x163   :  { %6846 = vmatpush1.bf16.msra.mxu0 %v10200_v13  ;;  %7694 = vmatpush1.bf16.msra.mxu1 %v10203_v14  ;;  %v10284_v13 = vld [vmem:[%s14687_s1 + $0xcc0] ss:$16 sps:$4 sm:$0xff]   ;;  %v10287_v14 = vld [vmem:[%s14687_s1 + $0xcc8] ss:$16 sps:$4 sm:$0xff]  }
 0x164   :  { %6847 = vmatprep.subr.bf16.mxu0 %v10208_v15  ;;  %7695 = vmatprep.subr.bf16.mxu1 %v10211_v16  ;;  %v10292_v15 = vld [vmem:[%s14687_s1 + $0xce4] ss:$16 sps:$4 sm:$0xff]   ;;  %v10295_v16 = vld [vmem:[%s14687_s1 + $0xcec] ss:$16 sps:$4 sm:$0xff]  }
 0x167   :  { %6848 = vmatpush1.bf16.msra.mxu0 %v10206_v17  ;;  %7696 = vmatpush1.bf16.msra.mxu1 %v10209_v18  ;;  %v10290_v17 = vld [vmem:[%s14687_s1 + $0xce0] ss:$16 sps:$4 sm:$0xff]   ;;  %v10293_v18 = vld [vmem:[%s14687_s1 + $0xce8] ss:$16 sps:$4 sm:$0xff]  }
 0x168   :  { %6849 = vmatprep.subr.bf16.mxu0 %v10214_v19  ;;  %7697 = vmatprep.subr.bf16.mxu1 %v10217_v20  ;;  %v10298_v19 = vld [vmem:[%s14687_s1 + $0xd04] ss:$16 sps:$4 sm:$0xff]   ;;  %v10301_v20 = vld [vmem:[%s14687_s1 + $0xd0c] ss:$16 sps:$4 sm:$0xff]  }
 0x16b   :  { %6850 = vmatpush1.bf16.msra.mxu0 %v10212_v21  ;;  %7698 = vmatpush1.bf16.msra.mxu1 %v10215_v22  ;;  %v10296_v21 = vld [vmem:[%s14687_s1 + $0xd00] ss:$16 sps:$4 sm:$0xff]   ;;  %v10299_v22 = vld [vmem:[%s14687_s1 + $0xd08] ss:$16 sps:$4 sm:$0xff]  }
 0x16c   :  { %6851 = vmatprep.subr.bf16.mxu0 %v10220_v23  ;;  %7699 = vmatprep.subr.bf16.mxu1 %v10223_v24  ;;  %v10304_v23 = vld [vmem:[%s14687_s1 + $0xd24] ss:$16 sps:$4 sm:$0xff]   ;;  %v10307_v24 = vld [vmem:[%s14687_s1 + $0xd2c] ss:$16 sps:$4 sm:$0xff]  }
 0x16f   :  { %6852 = vmatpush1.bf16.msra.mxu0 %v10218_v26  ;;  %7700 = vmatpush1.bf16.msra.mxu1 %v10221_v25  ;;  %v10302_v26 = vld [vmem:[%s14687_s1 + $0xd20] ss:$16 sps:$4 sm:$0xff]   ;;  %v10305_v25 = vld [vmem:[%s14687_s1 + $0xd28] ss:$16 sps:$4 sm:$0xff]  }
 0x170   :  { %6853 = vmatprep.subr.bf16.mxu0 %v10226_v27  ;;  %7701 = vmatprep.subr.bf16.mxu1 %v10229_v28  ;;  %v10310_v27 = vld [vmem:[%s14687_s1 + $0xd44] ss:$16 sps:$4 sm:$0xff]   ;;  %v10313_v28 = vld [vmem:[%s14687_s1 + $0xd4c] ss:$16 sps:$4 sm:$0xff]  }
 0x173   :  { %6854 = vmatpush1.bf16.msra.mxu0 %v10224_v29  ;;  %7702 = vmatpush1.bf16.msra.mxu1 %v10227_v30  ;;  %v10308_v29 = vld [vmem:[%s14687_s1 + $0xd40] ss:$16 sps:$4 sm:$0xff]   ;;  %v10311_v30 = vld [vmem:[%s14687_s1 + $0xd48] ss:$16 sps:$4 sm:$0xff]  }
 0x174   :  { %6855 = vmatprep.subr.bf16.mxu0 %v10232_v31  ;;  %7703 = vmatprep.subr.bf16.mxu1 %v10235_v32  ;;  %v10316_v31 = vld [vmem:[%s14687_s1 + $0xd64] ss:$16 sps:$4 sm:$0xff]   ;;  %v10319_v32 = vld [vmem:[%s14687_s1 + $0xd6c] ss:$16 sps:$4 sm:$0xff]  }
 0x177   :  { %6856 = vmatpush1.bf16.msra.mxu0 %v10230_v34  ;;  %7704 = vmatpush1.bf16.msra.mxu1 %v10233_v36  ;;  %v10314_v34 = vld [vmem:[%s14687_s1 + $0xd60] ss:$16 sps:$4 sm:$0xff]   ;;  %v10317_v36 = vld [vmem:[%s14687_s1 + $0xd68] ss:$16 sps:$4 sm:$0xff]  }
 0x178   :  { %6857 = vmatprep.subr.bf16.mxu0 %v10238_v33  ;;  %7705 = vmatprep.subr.bf16.mxu1 %v10241_v35  ;;  %v10322_v33 = vld [vmem:[%s14687_s1 + $0xd84] ss:$16 sps:$4 sm:$0xff]   ;;  %v10325_v35 = vld [vmem:[%s14687_s1 + $0xd8c] ss:$16 sps:$4 sm:$0xff]  }
 0x17b   :  { %6858 = vmatpush1.bf16.msra.mxu0 %v10236_v37  ;;  %7706 = vmatpush1.bf16.msra.mxu1 %v10239_v38  ;;  %v10320_v37 = vld [vmem:[%s14687_s1 + $0xd80] ss:$16 sps:$4 sm:$0xff]   ;;  %v10323_v38 = vld [vmem:[%s14687_s1 + $0xd88] ss:$16 sps:$4 sm:$0xff]  }
 0x17c   :  { %6859 = vmatprep.subr.bf16.mxu0 %v10244_v39  ;;  %7707 = vmatprep.subr.bf16.mxu1 %v10247_v40  ;;  %v10328_v39 = vld [vmem:[%s14687_s1 + $0xda4] ss:$16 sps:$4 sm:$0xff]   ;;  %v10331_v40 = vld [vmem:[%s14687_s1 + $0xdac] ss:$16 sps:$4 sm:$0xff]  }
 0x17f   :  { %6860 = vmatpush1.bf16.msra.mxu0 %v10242_v42  ;;  %7708 = vmatpush1.bf16.msra.mxu1 %v10245_v44  ;;  %v10326_v42 = vld [vmem:[%s14687_s1 + $0xda0] ss:$16 sps:$4 sm:$0xff]   ;;  %v10329_v44 = vld [vmem:[%s14687_s1 + $0xda8] ss:$16 sps:$4 sm:$0xff]  }
 0x180   :  { %6882 = vmatprep.subr.bf16.mxu0 %v10250_v41  ;;  %7730 = vmatprep.subr.bf16.mxu1 %v10253_v43  ;;  %v10334_v41 = vld [vmem:[%s14687_s1 + $0xdc4] ss:$16 sps:$4 sm:$0xff]   ;;  %v10337_v43 = vld [vmem:[%s14687_s1 + $0xdcc] ss:$16 sps:$4 sm:$0xff]  }
 0x182   :  { %6862 = vmatmul.mubr.bf16.vlgmr.msra.gmra.mrb[0].mxu0 %v8338_v47  ;;  %7710 = vmatmul.mubr.bf16.vlgmr.msra.gmra.mrb[0].mxu1 %v8338_v47  ;;  %v10340_v47 = vld [vmem:[%s14687_s1 + $0xde4] ss:$16 sps:$4 sm:$0xff]  }
 0x183   :  { %6883 = vmatpush1.bf16.msra.mxu0 %v10248_v48  ;;  %7731 = vmatpush1.bf16.msra.mxu1 %v10251_v51  ;;  %v10343_v48 = vld [vmem:[%s14687_s1 + $0xdec] ss:$16 sps:$4 sm:$0xff]   ;;  %v10338_v51 = vld [vmem:[%s14687_s1 + $0xde0] ss:$16 sps:$4 sm:$0xff]  }
 0x184   :  { %6884 = vmatprep.subr.bf16.mxu0 %v10256_v52  ;;  %7732 = vmatprep.subr.bf16.mxu1 %v10259_v49  ;;  %v10341_v52 = vld [vmem:[%s14687_s1 + $0xde8] ss:$16 sps:$4 sm:$0xff]   ;;  %v10346_v49 = vld [vmem:[%s14687_s1 + $0xe04] ss:$16 sps:$4 sm:$0xff]  }
 0x185   :  { %6871 = vmatprep.mubr.bf16.mxu0 %v8371_v54  ;;  %7719 = vmatprep.mubr.bf16.mxu1 %v8371_v54  ;;  %v68_v54 = vld [vmem:[%s14688_s0 + $0x1b0] sm:$0xff] }
 0x187   :  { %6885 = vmatpush1.bf16.msra.mxu0 %v10254_v50  ;;  %7733 = vmatpush1.bf16.msra.mxu1 %v10257_v53  ;;  %v10349_v50 = vld [vmem:[%s14687_s1 + $0xe0c] ss:$16 sps:$4 sm:$0xff]   ;;  %v52_v53 = vld [vmem:[%s14688_s0 + $0x130] sm:$0xff] }
 0x188   :  { %6886 = vmatprep.subr.bf16.mxu0 %v10262_v55  ;;  %7734 = vmatprep.subr.bf16.mxu1 %v10265_v56  ;;  %v8340_v55 = vcombine.low %v12525_v57, %v12530_v58  ;;  %v10344_v56 = vld [vmem:[%s14687_s1 + $0xe00] ss:$16 sps:$4 sm:$0xff]   ;;  %v10355_v57 = vld [vmem:[%s14687_s1 + $0xe2c] ss:$16 sps:$4 sm:$0xff]  }
 0x189   :  { %v10350_v58 = vld [vmem:[%s14687_s1 + $0xe20] ss:$16 sps:$4 sm:$0xff]  }
 0x18a   :  { %6872 = vmatmul.mubr.bf16.gmra.mrb[4].mxu0 %v8370_v59  ;;  %7720 = vmatmul.mubr.bf16.gmra.mrb[4].mxu1 %v8370_v59  ;;  %v10347_v59 = vld [vmem:[%s14687_s1 + $0xe08] ss:$16 sps:$4 sm:$0xff]  }
 0x18b   :  { %6887 = vmatpush1.bf16.msra.mxu0 %v10260_v60  ;;  %7735 = vmatpush1.bf16.msra.mxu1 %v10263_v61  ;;  %v10352_v60 = vld [vmem:[%s14687_s1 + $0xe24] ss:$16 sps:$4 sm:$0xff]   ;;  %v10353_v61 = vld [vmem:[%s14687_s1 + $0xe28] ss:$16 sps:$4 sm:$0xff]  }
 0x18c   :  { %6888 = vmatprep.subr.bf16.mxu0 %v10268_v62  ;;  %7736 = vmatprep.subr.bf16.mxu1 %v10271_v63  ;;  %v8373_v62 = vcombine.high %v52_v53, %v68_v54  ;;  %v10358_v63 = vld [vmem:[%s14687_s1 + $0xe44] ss:$16 sps:$4 sm:$0xff]  }
 0x18d   :  { %6914 = vmatprep.mubr.bf16.mxu0 %v8341_v0  ;;  %7762 = vmatprep.mubr.bf16.mxu1 %v8341_v0  ;;  %v10361_v0 = vld [vmem:[%s14687_s1 + $0xe4c] ss:$16 sps:$4 sm:$0xff]  }
 0x18f   :  { %6889 = vmatpush1.bf16.msra.mxu0 %v10266_v1  ;;  %7737 = vmatpush1.bf16.msra.mxu1 %v10269_v2  ;;  %v12737_v1 = vld [vmem:[%s14688_s0 + $0x38] sm:$0xff] }
 0x190   :  { %6890 = vmatprep.subr.bf16.mxu0 %v10274_v3  ;;  %7738 = vmatprep.subr.bf16.mxu1 %v10277_v4  ;;  %v12742_v2 = vld [vmem:[%s14688_s0 + $0xb8] sm:$0xff]  ;;  %v8372_v3 = vcombine.low %v52_v53, %v68_v54  ;;  %v10356_v4 = vld [vmem:[%s14687_s1 + $0xe40] ss:$16 sps:$4 sm:$0xff]  }
 0x191   :  { %v10428_v53 = vld [vmem:[%s14687_s1 + $0xfc0] ss:$16 sps:$4 sm:$0xff]   ;;  %v10431_v54 = vld [vmem:[%s14687_s1 + $0xfc8] ss:$16 sps:$4 sm:$0xff]  }
 0x193   :  { %6891 = vmatpush1.bf16.msra.mxu0 %v10272_v5  ;;  %7739 = vmatpush1.bf16.msra.mxu1 %v10275_v6  ;;  %v10359_v5 = vld [vmem:[%s14687_s1 + $0xe48] ss:$16 sps:$4 sm:$0xff]   ;;  %v10364_v6 = vld [vmem:[%s14687_s1 + $0xe64] ss:$16 sps:$4 sm:$0xff]  }
 0x194   :  { %6892 = vmatprep.subr.bf16.mxu0 %v10280_v7  ;;  %7740 = vmatprep.subr.bf16.mxu1 %v10283_v8  ;;  %v10367_v7 = vld [vmem:[%s14687_s1 + $0xe6c] ss:$16 sps:$4 sm:$0xff]   ;;  %v8343_v8 = vcombine.high %v12737_v1, %v12742_v2 }
 0x197   :  { %6893 = vmatpush1.bf16.msra.mxu0 %v10278_v9  ;;  %7741 = vmatpush1.bf16.msra.mxu1 %v10281_v10  ;;  %v10362_v9 = vld [vmem:[%s14687_s1 + $0xe60] ss:$16 sps:$4 sm:$0xff]   ;;  %v10365_v10 = vld [vmem:[%s14687_s1 + $0xe68] ss:$16 sps:$4 sm:$0xff]  }
 0x198   :  { %6894 = vmatprep.subr.bf16.mxu0 %v10286_v11  ;;  %7742 = vmatprep.subr.bf16.mxu1 %v10289_v12  ;;  %v10370_v11 = vld [vmem:[%s14687_s1 + $0xe84] ss:$16 sps:$4 sm:$0xff]   ;;  %v10373_v12 = vld [vmem:[%s14687_s1 + $0xe8c] ss:$16 sps:$4 sm:$0xff]  }
 0x19b   :  { %6895 = vmatpush1.bf16.msra.mxu0 %v10284_v13  ;;  %7743 = vmatpush1.bf16.msra.mxu1 %v10287_v14  ;;  %v10368_v13 = vld [vmem:[%s14687_s1 + $0xe80] ss:$16 sps:$4 sm:$0xff]   ;;  %v10371_v14 = vld [vmem:[%s14687_s1 + $0xe88] ss:$16 sps:$4 sm:$0xff]  }
 0x19c   :  { %6896 = vmatprep.subr.bf16.mxu0 %v10292_v15  ;;  %7744 = vmatprep.subr.bf16.mxu1 %v10295_v16  ;;  %v10376_v15 = vld [vmem:[%s14687_s1 + $0xea4] ss:$16 sps:$4 sm:$0xff]   ;;  %v10379_v16 = vld [vmem:[%s14687_s1 + $0xeac] ss:$16 sps:$4 sm:$0xff]  }
 0x19f   :  { %6897 = vmatpush1.bf16.msra.mxu0 %v10290_v17  ;;  %7745 = vmatpush1.bf16.msra.mxu1 %v10293_v18  ;;  %v10374_v17 = vld [vmem:[%s14687_s1 + $0xea0] ss:$16 sps:$4 sm:$0xff]   ;;  %v10377_v18 = vld [vmem:[%s14687_s1 + $0xea8] ss:$16 sps:$4 sm:$0xff]  }
 0x1a0   :  { %6898 = vmatprep.subr.bf16.mxu0 %v10298_v19  ;;  %7746 = vmatprep.subr.bf16.mxu1 %v10301_v20  ;;  %v10382_v19 = vld [vmem:[%s14687_s1 + $0xec4] ss:$16 sps:$4 sm:$0xff]   ;;  %v10385_v20 = vld [vmem:[%s14687_s1 + $0xecc] ss:$16 sps:$4 sm:$0xff]  }
 0x1a3   :  { %6899 = vmatpush1.bf16.msra.mxu0 %v10296_v21  ;;  %7747 = vmatpush1.bf16.msra.mxu1 %v10299_v22  ;;  %v10380_v21 = vld [vmem:[%s14687_s1 + $0xec0] ss:$16 sps:$4 sm:$0xff]   ;;  %v10383_v22 = vld [vmem:[%s14687_s1 + $0xec8] ss:$16 sps:$4 sm:$0xff]  }
 0x1a4   :  { %6900 = vmatprep.subr.bf16.mxu0 %v10304_v23  ;;  %7748 = vmatprep.subr.bf16.mxu1 %v10307_v24  ;;  %v10388_v23 = vld [vmem:[%s14687_s1 + $0xee4] ss:$16 sps:$4 sm:$0xff]   ;;  %v10391_v24 = vld [vmem:[%s14687_s1 + $0xeec] ss:$16 sps:$4 sm:$0xff]  }
 0x1a7   :  { %6901 = vmatpush1.bf16.msra.mxu0 %v10302_v26  ;;  %7749 = vmatpush1.bf16.msra.mxu1 %v10305_v25  ;;  %v10386_v26 = vld [vmem:[%s14687_s1 + $0xee0] ss:$16 sps:$4 sm:$0xff]   ;;  %v10389_v25 = vld [vmem:[%s14687_s1 + $0xee8] ss:$16 sps:$4 sm:$0xff]  }
 0x1a8   :  { %6902 = vmatprep.subr.bf16.mxu0 %v10310_v27  ;;  %7750 = vmatprep.subr.bf16.mxu1 %v10313_v28  ;;  %v10394_v27 = vld [vmem:[%s14687_s1 + $0xf04] ss:$16 sps:$4 sm:$0xff]   ;;  %v10397_v28 = vld [vmem:[%s14687_s1 + $0xf0c] ss:$16 sps:$4 sm:$0xff]  }
 0x1ab   :  { %6903 = vmatpush1.bf16.msra.mxu0 %v10308_v29  ;;  %7751 = vmatpush1.bf16.msra.mxu1 %v10311_v30  ;;  %v10392_v29 = vld [vmem:[%s14687_s1 + $0xf00] ss:$16 sps:$4 sm:$0xff]   ;;  %v10395_v30 = vld [vmem:[%s14687_s1 + $0xf08] ss:$16 sps:$4 sm:$0xff]  }
 0x1ac   :  { %6904 = vmatprep.subr.bf16.mxu0 %v10316_v31  ;;  %7752 = vmatprep.subr.bf16.mxu1 %v10319_v32  ;;  %v10400_v31 = vld [vmem:[%s14687_s1 + $0xf24] ss:$16 sps:$4 sm:$0xff]   ;;  %v10403_v32 = vld [vmem:[%s14687_s1 + $0xf2c] ss:$16 sps:$4 sm:$0xff]  }
 0x1af   :  { %6905 = vmatpush1.bf16.msra.mxu0 %v10314_v34  ;;  %7753 = vmatpush1.bf16.msra.mxu1 %v10317_v36  ;;  %v10398_v34 = vld [vmem:[%s14687_s1 + $0xf20] ss:$16 sps:$4 sm:$0xff]   ;;  %v10401_v36 = vld [vmem:[%s14687_s1 + $0xf28] ss:$16 sps:$4 sm:$0xff]  }
 0x1b0   :  { %6906 = vmatprep.subr.bf16.mxu0 %v10322_v33  ;;  %7754 = vmatprep.subr.bf16.mxu1 %v10325_v35  ;;  %v10406_v33 = vld [vmem:[%s14687_s1 + $0xf44] ss:$16 sps:$4 sm:$0xff]   ;;  %v10409_v35 = vld [vmem:[%s14687_s1 + $0xf4c] ss:$16 sps:$4 sm:$0xff]  }
 0x1b3   :  { %6907 = vmatpush1.bf16.msra.mxu0 %v10320_v37  ;;  %7755 = vmatpush1.bf16.msra.mxu1 %v10323_v38  ;;  %v10404_v37 = vld [vmem:[%s14687_s1 + $0xf40] ss:$16 sps:$4 sm:$0xff]   ;;  %v10407_v38 = vld [vmem:[%s14687_s1 + $0xf48] ss:$16 sps:$4 sm:$0xff]  }
 0x1b4   :  { %6908 = vmatprep.subr.bf16.mxu0 %v10328_v39  ;;  %7756 = vmatprep.subr.bf16.mxu1 %v10331_v40  ;;  %v10412_v39 = vld [vmem:[%s14687_s1 + $0xf64] ss:$16 sps:$4 sm:$0xff]   ;;  %v10415_v40 = vld [vmem:[%s14687_s1 + $0xf6c] ss:$16 sps:$4 sm:$0xff]  }
 0x1b7   :  { %6909 = vmatpush1.bf16.msra.mxu0 %v10326_v42  ;;  %7757 = vmatpush1.bf16.msra.mxu1 %v10329_v44  ;;  %v10410_v42 = vld [vmem:[%s14687_s1 + $0xf60] ss:$16 sps:$4 sm:$0xff]   ;;  %v10413_v44 = vld [vmem:[%s14687_s1 + $0xf68] ss:$16 sps:$4 sm:$0xff]  }
 0x1b8   :  { %6910 = vmatprep.subr.bf16.mxu0 %v10334_v41  ;;  %7758 = vmatprep.subr.bf16.mxu1 %v10337_v43  ;;  %v10418_v41 = vld [vmem:[%s14687_s1 + $0xf84] ss:$16 sps:$4 sm:$0xff]   ;;  %v10421_v43 = vld [vmem:[%s14687_s1 + $0xf8c] ss:$16 sps:$4 sm:$0xff]  }
 0x1bb   :  { %6911 = vmatpush1.bf16.msra.mxu0 %v10332_v45  ;;  %7759 = vmatpush1.bf16.msra.mxu1 %v10335_v46  ;;  %v10416_v45 = vld [vmem:[%s14687_s1 + $0xf80] ss:$16 sps:$4 sm:$0xff]   ;;  %v10419_v46 = vld [vmem:[%s14687_s1 + $0xf88] ss:$16 sps:$4 sm:$0xff]  }
 0x1bc   :  { %6912 = vmatprep.subr.bf16.mxu0 %v10340_v47  ;;  %7760 = vmatprep.subr.bf16.mxu1 %v10343_v48  ;;  %v10424_v47 = vld [vmem:[%s14687_s1 + $0xfa4] ss:$16 sps:$4 sm:$0xff]   ;;  %v10427_v48 = vld [vmem:[%s14687_s1 + $0xfac] ss:$16 sps:$4 sm:$0xff]  }
 0x1bf   :  { %6913 = vmatpush1.bf16.msra.mxu0 %v10338_v51  ;;  %7761 = vmatpush1.bf16.msra.mxu1 %v10341_v52  ;;  %v10422_v51 = vld [vmem:[%s14687_s1 + $0xfa0] ss:$16 sps:$4 sm:$0xff]   ;;  %v10425_v52 = vld [vmem:[%s14687_s1 + $0xfa8] ss:$16 sps:$4 sm:$0xff]  }
 0x1c0   :  { %6935 = vmatprep.subr.bf16.mxu0 %v10346_v49  ;;  %7783 = vmatprep.subr.bf16.mxu1 %v10349_v50  ;;  %v10430_v49 = vld [vmem:[%s14687_s1 + $0xfc4] ss:$16 sps:$4 sm:$0xff]   ;;  %v10433_v50 = vld [vmem:[%s14687_s1 + $0xfcc] ss:$16 sps:$4 sm:$0xff]  }
 0x1c2   :  { %6915 = vmatmul.mubr.bf16.vlgmr.msra.gmra.mrb[0].mxu0 %v8340_v55  ;;  %7763 = vmatmul.mubr.bf16.vlgmr.msra.gmra.mrb[0].mxu1 %v8340_v55  ;;  %v10436_v55 = vld [vmem:[%s14687_s1 + $0xfe4] ss:$16 sps:$4 sm:$0xff]  }
 0x1c3   :  { %6936 = vmatpush1.bf16.msra.mxu0 %v10344_v56  ;;  %7784 = vmatpush1.bf16.msra.mxu1 %v10347_v59  ;;  %v10439_v56 = vld [vmem:[%s14687_s1 + $0xfec] ss:$16 sps:$4 sm:$0xff]   ;;  %v10434_v59 = vld [vmem:[%s14687_s1 + $0xfe0] ss:$16 sps:$4 sm:$0xff]  }
 0x1c4   :  { %6937 = vmatprep.subr.bf16.mxu0 %v10352_v60  ;;  %7785 = vmatprep.subr.bf16.mxu1 %v10355_v57  ;;  %v10437_v60 = vld [vmem:[%s14687_s1 + $0xfe8] ss:$16 sps:$4 sm:$0xff]   ;;  %v10442_v57 = vld [vmem:[%s14687_s1 + $0x1004] ss:$16 sps:$4 sm:$0xff]  }
 0x1c5   :  { %6924 = vmatprep.mubr.bf16.mxu0 %v8373_v62  ;;  %7772 = vmatprep.mubr.bf16.mxu1 %v8373_v62  ;;  %v69_v62 = vld [vmem:[%s14688_s0 + $0x1b8] sm:$0xff] }
 0x1c7   :  { %6938 = vmatpush1.bf16.msra.mxu0 %v10350_v58  ;;  %7786 = vmatpush1.bf16.msra.mxu1 %v10353_v61  ;;  %v10445_v58 = vld [vmem:[%s14687_s1 + $0x100c] ss:$16 sps:$4 sm:$0xff]  }
 0x1c8   :  { %6939 = vmatprep.subr.bf16.mxu0 %v10358_v63  ;;  %7787 = vmatprep.subr.bf16.mxu1 %v10361_v0  ;;  %v53_v61 = vld [vmem:[%s14688_s0 + $0x138] sm:$0xff]  ;;  %v8342_v63 = vcombine.low %v12737_v1, %v12742_v2  ;;  %v10440_v0 = vld [vmem:[%s14687_s1 + $0x1000] ss:$16 sps:$4 sm:$0xff]  }
 0x1c9   :  { %v10451_v1 = vld [vmem:[%s14687_s1 + $0x102c] ss:$16 sps:$4 sm:$0xff]   ;;  %v10446_v2 = vld [vmem:[%s14687_s1 + $0x1020] ss:$16 sps:$4 sm:$0xff]  }
 0x1ca   :  { %6925 = vmatmul.mubr.bf16.gmra.mrb[4].mxu0 %v8372_v3  ;;  %7773 = vmatmul.mubr.bf16.gmra.mrb[4].mxu1 %v8372_v3  ;;  %v10443_v3 = vld [vmem:[%s14687_s1 + $0x1008] ss:$16 sps:$4 sm:$0xff]  }
 0x1cb   :  { %6940 = vmatpush1.bf16.msra.mxu0 %v10356_v4  ;;  %7788 = vmatpush1.bf16.msra.mxu1 %v10359_v5  ;;  %v10448_v4 = vld [vmem:[%s14687_s1 + $0x1024] ss:$16 sps:$4 sm:$0xff]   ;;  %v10449_v5 = vld [vmem:[%s14687_s1 + $0x1028] ss:$16 sps:$4 sm:$0xff]  }
 0x1cc   :  { %6941 = vmatprep.subr.bf16.mxu0 %v10364_v6  ;;  %7789 = vmatprep.subr.bf16.mxu1 %v10367_v7  ;;  %v8375_v6 = vcombine.high %v53_v61, %v69_v62  ;;  %v10454_v7 = vld [vmem:[%s14687_s1 + $0x1044] ss:$16 sps:$4 sm:$0xff]  }
 0x1cd   :  { %6967 = vmatprep.mubr.bf16.mxu0 %v8343_v8  ;;  %7815 = vmatprep.mubr.bf16.mxu1 %v8343_v8  ;;  %v10457_v8 = vld [vmem:[%s14687_s1 + $0x104c] ss:$16 sps:$4 sm:$0xff]  }
 0x1cf   :  { %6942 = vmatpush1.bf16.msra.mxu0 %v10362_v9  ;;  %7790 = vmatpush1.bf16.msra.mxu1 %v10365_v10  ;;  %v12949_v9 = vld [vmem:[%s14688_s0 + $0x40] sm:$0xff] }
 0x1d0   :  { %6943 = vmatprep.subr.bf16.mxu0 %v10370_v11  ;;  %7791 = vmatprep.subr.bf16.mxu1 %v10373_v12  ;;  %v12954_v10 = vld [vmem:[%s14688_s0 + $0xc0] sm:$0xff]  ;;  %v8374_v11 = vcombine.low %v53_v61, %v69_v62  ;;  %v10527_v62 = vld [vmem:[%s14687_s1 + $0x11c8] ss:$16 sps:$4 sm:$0xff]  }
 0x1d1   :  { %v10452_v12 = vld [vmem:[%s14687_s1 + $0x1040] ss:$16 sps:$4 sm:$0xff]  }
 0x1d2   :  { %v10524_v61 = vld [vmem:[%s14687_s1 + $0x11c0] ss:$16 sps:$4 sm:$0xff]  }
 0x1d3   :  { %6944 = vmatpush1.bf16.msra.mxu0 %v10368_v13  ;;  %7792 = vmatpush1.bf16.msra.mxu1 %v10371_v14  ;;  %v10455_v13 = vld [vmem:[%s14687_s1 + $0x1048] ss:$16 sps:$4 sm:$0xff]   ;;  %v10460_v14 = vld [vmem:[%s14687_s1 + $0x1064] ss:$16 sps:$4 sm:$0xff]  }
 0x1d4   :  { %6945 = vmatprep.subr.bf16.mxu0 %v10376_v15  ;;  %7793 = vmatprep.subr.bf16.mxu1 %v10379_v16  ;;  %v10463_v15 = vld [vmem:[%s14687_s1 + $0x106c] ss:$16 sps:$4 sm:$0xff]   ;;  %v8345_v16 = vcombine.high %v12949_v9, %v12954_v10 }
 0x1d7   :  { %6946 = vmatpush1.bf16.msra.mxu0 %v10374_v17  ;;  %7794 = vmatpush1.bf16.msra.mxu1 %v10377_v18  ;;  %v10458_v17 = vld [vmem:[%s14687_s1 + $0x1060] ss:$16 sps:$4 sm:$0xff]   ;;  %v10461_v18 = vld [vmem:[%s14687_s1 + $0x1068] ss:$16 sps:$4 sm:$0xff]  }
 0x1d8   :  { %6947 = vmatprep.subr.bf16.mxu0 %v10382_v19  ;;  %7795 = vmatprep.subr.bf16.mxu1 %v10385_v20  ;;  %v10466_v19 = vld [vmem:[%s14687_s1 + $0x1084] ss:$16 sps:$4 sm:$0xff]   ;;  %v10469_v20 = vld [vmem:[%s14687_s1 + $0x108c] ss:$16 sps:$4 sm:$0xff]  }
 0x1db   :  { %6948 = vmatpush1.bf16.msra.mxu0 %v10380_v21  ;;  %7796 = vmatpush1.bf16.msra.mxu1 %v10383_v22  ;;  %v10464_v21 = vld [vmem:[%s14687_s1 + $0x1080] ss:$16 sps:$4 sm:$0xff]   ;;  %v10467_v22 = vld [vmem:[%s14687_s1 + $0x1088] ss:$16 sps:$4 sm:$0xff]  }
 0x1dc   :  { %6949 = vmatprep.subr.bf16.mxu0 %v10388_v23  ;;  %7797 = vmatprep.subr.bf16.mxu1 %v10391_v24  ;;  %v10472_v23 = vld [vmem:[%s14687_s1 + $0x10a4] ss:$16 sps:$4 sm:$0xff]   ;;  %v10475_v24 = vld [vmem:[%s14687_s1 + $0x10ac] ss:$16 sps:$4 sm:$0xff]  }
 0x1df   :  { %6950 = vmatpush1.bf16.msra.mxu0 %v10386_v26  ;;  %7798 = vmatpush1.bf16.msra.mxu1 %v10389_v25  ;;  %v10470_v26 = vld [vmem:[%s14687_s1 + $0x10a0] ss:$16 sps:$4 sm:$0xff]   ;;  %v10473_v25 = vld [vmem:[%s14687_s1 + $0x10a8] ss:$16 sps:$4 sm:$0xff]  }
 0x1e0   :  { %6951 = vmatprep.subr.bf16.mxu0 %v10394_v27  ;;  %7799 = vmatprep.subr.bf16.mxu1 %v10397_v28  ;;  %v10478_v27 = vld [vmem:[%s14687_s1 + $0x10c4] ss:$16 sps:$4 sm:$0xff]   ;;  %v10481_v28 = vld [vmem:[%s14687_s1 + $0x10cc] ss:$16 sps:$4 sm:$0xff]  }
 0x1e3   :  { %6952 = vmatpush1.bf16.msra.mxu0 %v10392_v29  ;;  %7800 = vmatpush1.bf16.msra.mxu1 %v10395_v30  ;;  %v10476_v29 = vld [vmem:[%s14687_s1 + $0x10c0] ss:$16 sps:$4 sm:$0xff]   ;;  %v10479_v30 = vld [vmem:[%s14687_s1 + $0x10c8] ss:$16 sps:$4 sm:$0xff]  }
 0x1e4   :  { %6953 = vmatprep.subr.bf16.mxu0 %v10400_v31  ;;  %7801 = vmatprep.subr.bf16.mxu1 %v10403_v32  ;;  %v10484_v31 = vld [vmem:[%s14687_s1 + $0x10e4] ss:$16 sps:$4 sm:$0xff]   ;;  %v10487_v32 = vld [vmem:[%s14687_s1 + $0x10ec] ss:$16 sps:$4 sm:$0xff]  }
 0x1e7   :  { %6954 = vmatpush1.bf16.msra.mxu0 %v10398_v34  ;;  %7802 = vmatpush1.bf16.msra.mxu1 %v10401_v36  ;;  %v10482_v34 = vld [vmem:[%s14687_s1 + $0x10e0] ss:$16 sps:$4 sm:$0xff]   ;;  %v10485_v36 = vld [vmem:[%s14687_s1 + $0x10e8] ss:$16 sps:$4 sm:$0xff]  }
 0x1e8   :  { %6955 = vmatprep.subr.bf16.mxu0 %v10406_v33  ;;  %7803 = vmatprep.subr.bf16.mxu1 %v10409_v35  ;;  %v10490_v33 = vld [vmem:[%s14687_s1 + $0x1104] ss:$16 sps:$4 sm:$0xff]   ;;  %v10493_v35 = vld [vmem:[%s14687_s1 + $0x110c] ss:$16 sps:$4 sm:$0xff]  }
 0x1eb   :  { %6956 = vmatpush1.bf16.msra.mxu0 %v10404_v37  ;;  %7804 = vmatpush1.bf16.msra.mxu1 %v10407_v38  ;;  %v10488_v37 = vld [vmem:[%s14687_s1 + $0x1100] ss:$16 sps:$4 sm:$0xff]   ;;  %v10491_v38 = vld [vmem:[%s14687_s1 + $0x1108] ss:$16 sps:$4 sm:$0xff]  }
 0x1ec   :  { %6957 = vmatprep.subr.bf16.mxu0 %v10412_v39  ;;  %7805 = vmatprep.subr.bf16.mxu1 %v10415_v40  ;;  %v10496_v39 = vld [vmem:[%s14687_s1 + $0x1124] ss:$16 sps:$4 sm:$0xff]   ;;  %v10499_v40 = vld [vmem:[%s14687_s1 + $0x112c] ss:$16 sps:$4 sm:$0xff]  }
 0x1ef   :  { %6958 = vmatpush1.bf16.msra.mxu0 %v10410_v42  ;;  %7806 = vmatpush1.bf16.msra.mxu1 %v10413_v44  ;;  %v10494_v42 = vld [vmem:[%s14687_s1 + $0x1120] ss:$16 sps:$4 sm:$0xff]   ;;  %v10497_v44 = vld [vmem:[%s14687_s1 + $0x1128] ss:$16 sps:$4 sm:$0xff]  }
 0x1f0   :  { %6959 = vmatprep.subr.bf16.mxu0 %v10418_v41  ;;  %7807 = vmatprep.subr.bf16.mxu1 %v10421_v43  ;;  %v10502_v41 = vld [vmem:[%s14687_s1 + $0x1144] ss:$16 sps:$4 sm:$0xff]   ;;  %v10505_v43 = vld [vmem:[%s14687_s1 + $0x114c] ss:$16 sps:$4 sm:$0xff]  }
 0x1f3   :  { %6960 = vmatpush1.bf16.msra.mxu0 %v10416_v45  ;;  %7808 = vmatpush1.bf16.msra.mxu1 %v10419_v46  ;;  %v10500_v45 = vld [vmem:[%s14687_s1 + $0x1140] ss:$16 sps:$4 sm:$0xff]   ;;  %v10503_v46 = vld [vmem:[%s14687_s1 + $0x1148] ss:$16 sps:$4 sm:$0xff]  }
 0x1f4   :  { %6961 = vmatprep.subr.bf16.mxu0 %v10424_v47  ;;  %7809 = vmatprep.subr.bf16.mxu1 %v10427_v48  ;;  %v10508_v47 = vld [vmem:[%s14687_s1 + $0x1164] ss:$16 sps:$4 sm:$0xff]   ;;  %v10511_v48 = vld [vmem:[%s14687_s1 + $0x116c] ss:$16 sps:$4 sm:$0xff]  }
 0x1f7   :  { %6962 = vmatpush1.bf16.msra.mxu0 %v10422_v51  ;;  %7810 = vmatpush1.bf16.msra.mxu1 %v10425_v52  ;;  %v10506_v51 = vld [vmem:[%s14687_s1 + $0x1160] ss:$16 sps:$4 sm:$0xff]   ;;  %v10509_v52 = vld [vmem:[%s14687_s1 + $0x1168] ss:$16 sps:$4 sm:$0xff]  }
 0x1f8   :  { %6963 = vmatprep.subr.bf16.mxu0 %v10430_v49  ;;  %7811 = vmatprep.subr.bf16.mxu1 %v10433_v50  ;;  %v10514_v49 = vld [vmem:[%s14687_s1 + $0x1184] ss:$16 sps:$4 sm:$0xff]   ;;  %v10517_v50 = vld [vmem:[%s14687_s1 + $0x118c] ss:$16 sps:$4 sm:$0xff]  }
 0x1fb   :  { %6964 = vmatpush1.bf16.msra.mxu0 %v10428_v53  ;;  %7812 = vmatpush1.bf16.msra.mxu1 %v10431_v54  ;;  %v10512_v53 = vld [vmem:[%s14687_s1 + $0x1180] ss:$16 sps:$4 sm:$0xff]   ;;  %v10515_v54 = vld [vmem:[%s14687_s1 + $0x1188] ss:$16 sps:$4 sm:$0xff]  }
 0x1fc   :  { %6965 = vmatprep.subr.bf16.mxu0 %v10436_v55  ;;  %7813 = vmatprep.subr.bf16.mxu1 %v10439_v56  ;;  %v10520_v55 = vld [vmem:[%s14687_s1 + $0x11a4] ss:$16 sps:$4 sm:$0xff]   ;;  %v10523_v56 = vld [vmem:[%s14687_s1 + $0x11ac] ss:$16 sps:$4 sm:$0xff]  }
 0x1ff   :  { %6966 = vmatpush1.bf16.msra.mxu0 %v10434_v59  ;;  %7814 = vmatpush1.bf16.msra.mxu1 %v10437_v60  ;;  %v10518_v59 = vld [vmem:[%s14687_s1 + $0x11a0] ss:$16 sps:$4 sm:$0xff]   ;;  %v10521_v60 = vld [vmem:[%s14687_s1 + $0x11a8] ss:$16 sps:$4 sm:$0xff]  }
 0x200   :  { %6988 = vmatprep.subr.bf16.mxu0 %v10442_v57  ;;  %7836 = vmatprep.subr.bf16.mxu1 %v10445_v58  ;;  %v10526_v57 = vld [vmem:[%s14687_s1 + $0x11c4] ss:$16 sps:$4 sm:$0xff]   ;;  %v10529_v58 = vld [vmem:[%s14687_s1 + $0x11cc] ss:$16 sps:$4 sm:$0xff]  }
 0x202   :  { %6968 = vmatmul.mubr.bf16.vlgmr.msra.gmra.mrb[0].mxu0 %v8342_v63  ;;  %7816 = vmatmul.mubr.bf16.vlgmr.msra.gmra.mrb[0].mxu1 %v8342_v63  ;;  %v10532_v63 = vld [vmem:[%s14687_s1 + $0x11e4] ss:$16 sps:$4 sm:$0xff]  }
 0x203   :  { %6989 = vmatpush1.bf16.msra.mxu0 %v10440_v0  ;;  %7837 = vmatpush1.bf16.msra.mxu1 %v10443_v3  ;;  %v10535_v0 = vld [vmem:[%s14687_s1 + $0x11ec] ss:$16 sps:$4 sm:$0xff]   ;;  %v10530_v3 = vld [vmem:[%s14687_s1 + $0x11e0] ss:$16 sps:$4 sm:$0xff]  }
 0x204   :  { %6990 = vmatprep.subr.bf16.mxu0 %v10448_v4  ;;  %7838 = vmatprep.subr.bf16.mxu1 %v10451_v1  ;;  %v10533_v4 = vld [vmem:[%s14687_s1 + $0x11e8] ss:$16 sps:$4 sm:$0xff]   ;;  %v10538_v1 = vld [vmem:[%s14687_s1 + $0x1204] ss:$16 sps:$4 sm:$0xff]  }
 0x205   :  { %6977 = vmatprep.mubr.bf16.mxu0 %v8375_v6  ;;  %7825 = vmatprep.mubr.bf16.mxu1 %v8375_v6  ;;  %v70_v6 = vld [vmem:[%s14688_s0 + $0x1c0] sm:$0xff] }
 0x207   :  { %6991 = vmatpush1.bf16.msra.mxu0 %v10446_v2  ;;  %7839 = vmatpush1.bf16.msra.mxu1 %v10449_v5  ;;  %v10541_v2 = vld [vmem:[%s14687_s1 + $0x120c] ss:$16 sps:$4 sm:$0xff]   ;;  %v54_v5 = vld [vmem:[%s14688_s0 + $0x140] sm:$0xff] }
 0x208   :  { %6992 = vmatprep.subr.bf16.mxu0 %v10454_v7  ;;  %7840 = vmatprep.subr.bf16.mxu1 %v10457_v8  ;;  %v8344_v7 = vcombine.low %v12949_v9, %v12954_v10  ;;  %v10536_v8 = vld [vmem:[%s14687_s1 + $0x1200] ss:$16 sps:$4 sm:$0xff]   ;;  %v10547_v9 = vld [vmem:[%s14687_s1 + $0x122c] ss:$16 sps:$4 sm:$0xff]  }
 0x209   :  { %v10542_v10 = vld [vmem:[%s14687_s1 + $0x1220] ss:$16 sps:$4 sm:$0xff]  }
 0x20a   :  { %6978 = vmatmul.mubr.bf16.gmra.mrb[4].mxu0 %v8374_v11  ;;  %7826 = vmatmul.mubr.bf16.gmra.mrb[4].mxu1 %v8374_v11  ;;  %v10539_v11 = vld [vmem:[%s14687_s1 + $0x1208] ss:$16 sps:$4 sm:$0xff]  }
 0x20b   :  { %6993 = vmatpush1.bf16.msra.mxu0 %v10452_v12  ;;  %7841 = vmatpush1.bf16.msra.mxu1 %v10455_v13  ;;  %v10544_v12 = vld [vmem:[%s14687_s1 + $0x1224] ss:$16 sps:$4 sm:$0xff]   ;;  %v10545_v13 = vld [vmem:[%s14687_s1 + $0x1228] ss:$16 sps:$4 sm:$0xff]  }
 0x20c   :  { %6994 = vmatprep.subr.bf16.mxu0 %v10460_v14  ;;  %7842 = vmatprep.subr.bf16.mxu1 %v10463_v15  ;;  %v8377_v14 = vcombine.high %v54_v5, %v70_v6  ;;  %v10550_v15 = vld [vmem:[%s14687_s1 + $0x1244] ss:$16 sps:$4 sm:$0xff]  }
 0x20d   :  { %7020 = vmatprep.mubr.bf16.mxu0 %v8345_v16  ;;  %7868 = vmatprep.mubr.bf16.mxu1 %v8345_v16  ;;  %v10553_v16 = vld [vmem:[%s14687_s1 + $0x124c] ss:$16 sps:$4 sm:$0xff]  }
 0x20f   :  { %6995 = vmatpush1.bf16.msra.mxu0 %v10458_v17  ;;  %7843 = vmatpush1.bf16.msra.mxu1 %v10461_v18  ;;  %v13161_v17 = vld [vmem:[%s14688_s0 + $0x48] sm:$0xff] }
 0x210   :  { %6996 = vmatprep.subr.bf16.mxu0 %v10466_v19  ;;  %7844 = vmatprep.subr.bf16.mxu1 %v10469_v20  ;;  %v13166_v18 = vld [vmem:[%s14688_s0 + $0xc8] sm:$0xff]  ;;  %v8376_v19 = vcombine.low %v54_v5, %v70_v6  ;;  %v10548_v20 = vld [vmem:[%s14687_s1 + $0x1240] ss:$16 sps:$4 sm:$0xff]  }
 0x211   :  { %v10620_v5 = vld [vmem:[%s14687_s1 + $0x13c0] ss:$16 sps:$4 sm:$0xff]   ;;  %v10623_v6 = vld [vmem:[%s14687_s1 + $0x13c8] ss:$16 sps:$4 sm:$0xff]  }
 0x213   :  { %6997 = vmatpush1.bf16.msra.mxu0 %v10464_v21  ;;  %7845 = vmatpush1.bf16.msra.mxu1 %v10467_v22  ;;  %v10551_v21 = vld [vmem:[%s14687_s1 + $0x1248] ss:$16 sps:$4 sm:$0xff]   ;;  %v10556_v22 = vld [vmem:[%s14687_s1 + $0x1264] ss:$16 sps:$4 sm:$0xff]  }
 0x214   :  { %6998 = vmatprep.subr.bf16.mxu0 %v10472_v23  ;;  %7846 = vmatprep.subr.bf16.mxu1 %v10475_v24  ;;  %v10559_v23 = vld [vmem:[%s14687_s1 + $0x126c] ss:$16 sps:$4 sm:$0xff]   ;;  %v8347_v24 = vcombine.high %v13161_v17, %v13166_v18 }
 0x217   :  { %6999 = vmatpush1.bf16.msra.mxu0 %v10470_v26  ;;  %7847 = vmatpush1.bf16.msra.mxu1 %v10473_v25  ;;  %v10554_v26 = vld [vmem:[%s14687_s1 + $0x1260] ss:$16 sps:$4 sm:$0xff]   ;;  %v10557_v25 = vld [vmem:[%s14687_s1 + $0x1268] ss:$16 sps:$4 sm:$0xff]  }
 0x218   :  { %7000 = vmatprep.subr.bf16.mxu0 %v10478_v27  ;;  %7848 = vmatprep.subr.bf16.mxu1 %v10481_v28  ;;  %v10562_v27 = vld [vmem:[%s14687_s1 + $0x1284] ss:$16 sps:$4 sm:$0xff]   ;;  %v10565_v28 = vld [vmem:[%s14687_s1 + $0x128c] ss:$16 sps:$4 sm:$0xff]  }
 0x21b   :  { %7001 = vmatpush1.bf16.msra.mxu0 %v10476_v29  ;;  %7849 = vmatpush1.bf16.msra.mxu1 %v10479_v30  ;;  %v10560_v29 = vld [vmem:[%s14687_s1 + $0x1280] ss:$16 sps:$4 sm:$0xff]   ;;  %v10563_v30 = vld [vmem:[%s14687_s1 + $0x1288] ss:$16 sps:$4 sm:$0xff]  }
 0x21c   :  { %7002 = vmatprep.subr.bf16.mxu0 %v10484_v31  ;;  %7850 = vmatprep.subr.bf16.mxu1 %v10487_v32  ;;  %v10568_v31 = vld [vmem:[%s14687_s1 + $0x12a4] ss:$16 sps:$4 sm:$0xff]   ;;  %v10571_v32 = vld [vmem:[%s14687_s1 + $0x12ac] ss:$16 sps:$4 sm:$0xff]  }
 0x21f   :  { %7003 = vmatpush1.bf16.msra.mxu0 %v10482_v34  ;;  %7851 = vmatpush1.bf16.msra.mxu1 %v10485_v36  ;;  %v10566_v34 = vld [vmem:[%s14687_s1 + $0x12a0] ss:$16 sps:$4 sm:$0xff]   ;;  %v10569_v36 = vld [vmem:[%s14687_s1 + $0x12a8] ss:$16 sps:$4 sm:$0xff]  }
 0x220   :  { %7004 = vmatprep.subr.bf16.mxu0 %v10490_v33  ;;  %7852 = vmatprep.subr.bf16.mxu1 %v10493_v35  ;;  %v10574_v33 = vld [vmem:[%s14687_s1 + $0x12c4] ss:$16 sps:$4 sm:$0xff]   ;;  %v10577_v35 = vld [vmem:[%s14687_s1 + $0x12cc] ss:$16 sps:$4 sm:$0xff]  }
 0x223   :  { %7005 = vmatpush1.bf16.msra.mxu0 %v10488_v37  ;;  %7853 = vmatpush1.bf16.msra.mxu1 %v10491_v38  ;;  %v10572_v37 = vld [vmem:[%s14687_s1 + $0x12c0] ss:$16 sps:$4 sm:$0xff]   ;;  %v10575_v38 = vld [vmem:[%s14687_s1 + $0x12c8] ss:$16 sps:$4 sm:$0xff]  }
 0x224   :  { %7006 = vmatprep.subr.bf16.mxu0 %v10496_v39  ;;  %7854 = vmatprep.subr.bf16.mxu1 %v10499_v40  ;;  %v10580_v39 = vld [vmem:[%s14687_s1 + $0x12e4] ss:$16 sps:$4 sm:$0xff]   ;;  %v10583_v40 = vld [vmem:[%s14687_s1 + $0x12ec] ss:$16 sps:$4 sm:$0xff]  }
 0x227   :  { %7007 = vmatpush1.bf16.msra.mxu0 %v10494_v42  ;;  %7855 = vmatpush1.bf16.msra.mxu1 %v10497_v44  ;;  %v10578_v42 = vld [vmem:[%s14687_s1 + $0x12e0] ss:$16 sps:$4 sm:$0xff]   ;;  %v10581_v44 = vld [vmem:[%s14687_s1 + $0x12e8] ss:$16 sps:$4 sm:$0xff]  }
 0x228   :  { %7008 = vmatprep.subr.bf16.mxu0 %v10502_v41  ;;  %7856 = vmatprep.subr.bf16.mxu1 %v10505_v43  ;;  %v10586_v41 = vld [vmem:[%s14687_s1 + $0x1304] ss:$16 sps:$4 sm:$0xff]   ;;  %v10589_v43 = vld [vmem:[%s14687_s1 + $0x130c] ss:$16 sps:$4 sm:$0xff]  }
 0x22b   :  { %7009 = vmatpush1.bf16.msra.mxu0 %v10500_v45  ;;  %7857 = vmatpush1.bf16.msra.mxu1 %v10503_v46  ;;  %v10584_v45 = vld [vmem:[%s14687_s1 + $0x1300] ss:$16 sps:$4 sm:$0xff]   ;;  %v10587_v46 = vld [vmem:[%s14687_s1 + $0x1308] ss:$16 sps:$4 sm:$0xff]  }
 0x22c   :  { %7010 = vmatprep.subr.bf16.mxu0 %v10508_v47  ;;  %7858 = vmatprep.subr.bf16.mxu1 %v10511_v48  ;;  %v10592_v47 = vld [vmem:[%s14687_s1 + $0x1324] ss:$16 sps:$4 sm:$0xff]   ;;  %v10595_v48 = vld [vmem:[%s14687_s1 + $0x132c] ss:$16 sps:$4 sm:$0xff]  }
 0x22f   :  { %7011 = vmatpush1.bf16.msra.mxu0 %v10506_v51  ;;  %7859 = vmatpush1.bf16.msra.mxu1 %v10509_v52  ;;  %v10590_v51 = vld [vmem:[%s14687_s1 + $0x1320] ss:$16 sps:$4 sm:$0xff]   ;;  %v10593_v52 = vld [vmem:[%s14687_s1 + $0x1328] ss:$16 sps:$4 sm:$0xff]  }
 0x230   :  { %7012 = vmatprep.subr.bf16.mxu0 %v10514_v49  ;;  %7860 = vmatprep.subr.bf16.mxu1 %v10517_v50  ;;  %v10598_v49 = vld [vmem:[%s14687_s1 + $0x1344] ss:$16 sps:$4 sm:$0xff]   ;;  %v10601_v50 = vld [vmem:[%s14687_s1 + $0x134c] ss:$16 sps:$4 sm:$0xff]  }
 0x233   :  { %7013 = vmatpush1.bf16.msra.mxu0 %v10512_v53  ;;  %7861 = vmatpush1.bf16.msra.mxu1 %v10515_v54  ;;  %v10596_v53 = vld [vmem:[%s14687_s1 + $0x1340] ss:$16 sps:$4 sm:$0xff]   ;;  %v10599_v54 = vld [vmem:[%s14687_s1 + $0x1348] ss:$16 sps:$4 sm:$0xff]  }
 0x234   :  { %7014 = vmatprep.subr.bf16.mxu0 %v10520_v55  ;;  %7862 = vmatprep.subr.bf16.mxu1 %v10523_v56  ;;  %v10604_v55 = vld [vmem:[%s14687_s1 + $0x1364] ss:$16 sps:$4 sm:$0xff]   ;;  %v10607_v56 = vld [vmem:[%s14687_s1 + $0x136c] ss:$16 sps:$4 sm:$0xff]  }
 0x237   :  { %7015 = vmatpush1.bf16.msra.mxu0 %v10518_v59  ;;  %7863 = vmatpush1.bf16.msra.mxu1 %v10521_v60  ;;  %v10602_v59 = vld [vmem:[%s14687_s1 + $0x1360] ss:$16 sps:$4 sm:$0xff]   ;;  %v10605_v60 = vld [vmem:[%s14687_s1 + $0x1368] ss:$16 sps:$4 sm:$0xff]  }
 0x238   :  { %7016 = vmatprep.subr.bf16.mxu0 %v10526_v57  ;;  %7864 = vmatprep.subr.bf16.mxu1 %v10529_v58  ;;  %v10610_v57 = vld [vmem:[%s14687_s1 + $0x1384] ss:$16 sps:$4 sm:$0xff]   ;;  %v10613_v58 = vld [vmem:[%s14687_s1 + $0x138c] ss:$16 sps:$4 sm:$0xff]  }
 0x23b   :  { %7017 = vmatpush1.bf16.msra.mxu0 %v10524_v61  ;;  %7865 = vmatpush1.bf16.msra.mxu1 %v10527_v62  ;;  %v10608_v61 = vld [vmem:[%s14687_s1 + $0x1380] ss:$16 sps:$4 sm:$0xff]   ;;  %v10611_v62 = vld [vmem:[%s14687_s1 + $0x1388] ss:$16 sps:$4 sm:$0xff]  }
 0x23c   :  { %7018 = vmatprep.subr.bf16.mxu0 %v10532_v63  ;;  %7866 = vmatprep.subr.bf16.mxu1 %v10535_v0  ;;  %v10616_v63 = vld [vmem:[%s14687_s1 + $0x13a4] ss:$16 sps:$4 sm:$0xff]   ;;  %v10619_v0 = vld [vmem:[%s14687_s1 + $0x13ac] ss:$16 sps:$4 sm:$0xff]  }
 0x23f   :  { %7019 = vmatpush1.bf16.msra.mxu0 %v10530_v3  ;;  %7867 = vmatpush1.bf16.msra.mxu1 %v10533_v4  ;;  %v10614_v3 = vld [vmem:[%s14687_s1 + $0x13a0] ss:$16 sps:$4 sm:$0xff]   ;;  %v10617_v4 = vld [vmem:[%s14687_s1 + $0x13a8] ss:$16 sps:$4 sm:$0xff]  }
 0x240   :  { %7041 = vmatprep.subr.bf16.mxu0 %v10538_v1  ;;  %7889 = vmatprep.subr.bf16.mxu1 %v10541_v2  ;;  %v10622_v1 = vld [vmem:[%s14687_s1 + $0x13c4] ss:$16 sps:$4 sm:$0xff]   ;;  %v10625_v2 = vld [vmem:[%s14687_s1 + $0x13cc] ss:$16 sps:$4 sm:$0xff]  }
 0x242   :  { %7021 = vmatmul.mubr.bf16.vlgmr.msra.gmra.mrb[0].mxu0 %v8344_v7  ;;  %7869 = vmatmul.mubr.bf16.vlgmr.msra.gmra.mrb[0].mxu1 %v8344_v7  ;;  %v10628_v7 = vld [vmem:[%s14687_s1 + $0x13e4] ss:$16 sps:$4 sm:$0xff]  }
 0x243   :  { %7042 = vmatpush1.bf16.msra.mxu0 %v10536_v8  ;;  %7890 = vmatpush1.bf16.msra.mxu1 %v10539_v11  ;;  %v10631_v8 = vld [vmem:[%s14687_s1 + $0x13ec] ss:$16 sps:$4 sm:$0xff]   ;;  %v10626_v11 = vld [vmem:[%s14687_s1 + $0x13e0] ss:$16 sps:$4 sm:$0xff]  }
 0x244   :  { %7043 = vmatprep.subr.bf16.mxu0 %v10544_v12  ;;  %7891 = vmatprep.subr.bf16.mxu1 %v10547_v9  ;;  %v10629_v12 = vld [vmem:[%s14687_s1 + $0x13e8] ss:$16 sps:$4 sm:$0xff]   ;;  %v10634_v9 = vld [vmem:[%s14687_s1 + $0x1404] ss:$16 sps:$4 sm:$0xff]  }
 0x245   :  { %7030 = vmatprep.mubr.bf16.mxu0 %v8377_v14  ;;  %7878 = vmatprep.mubr.bf16.mxu1 %v8377_v14  ;;  %v55_v14 = vld [vmem:[%s14688_s0 + $0x148] sm:$0xff] }
 0x247   :  { %7044 = vmatpush1.bf16.msra.mxu0 %v10542_v10  ;;  %7892 = vmatpush1.bf16.msra.mxu1 %v10545_v13  ;;  %v10637_v10 = vld [vmem:[%s14687_s1 + $0x140c] ss:$16 sps:$4 sm:$0xff]   ;;  %v8346_v13 = vcombine.low %v13161_v17, %v13166_v18  ;;  %v10640_v17 = vld [vmem:[%s14687_s1 + $0x1424] ss:$16 sps:$4 sm:$0xff]  }
 0x248   :  { %7045 = vmatprep.subr.bf16.mxu0 %v10550_v15  ;;  %7893 = vmatprep.subr.bf16.mxu1 %v10553_v16  ;;  %v71_v15 = vld [vmem:[%s14688_s0 + $0x1c8] sm:$0xff]  ;;  %v10632_v16 = vld [vmem:[%s14687_s1 + $0x1400] ss:$16 sps:$4 sm:$0xff]  }
 0x249   :  { %v10643_v18 = vld [vmem:[%s14687_s1 + $0x142c] ss:$16 sps:$4 sm:$0xff]  }
 0x24a   :  { %7031 = vmatmul.mubr.bf16.gmra.mrb[4].mxu0 %v8376_v19  ;;  %7879 = vmatmul.mubr.bf16.gmra.mrb[4].mxu1 %v8376_v19  ;;  %v10635_v19 = vld [vmem:[%s14687_s1 + $0x1408] ss:$16 sps:$4 sm:$0xff]  }
 0x24b   :  { %7046 = vmatpush1.bf16.msra.mxu0 %v10548_v20  ;;  %7894 = vmatpush1.bf16.msra.mxu1 %v10551_v21  ;;  %v8379_v20 = vcombine.high %v55_v14, %v71_v15  ;;  %v10638_v21 = vld [vmem:[%s14687_s1 + $0x1420] ss:$16 sps:$4 sm:$0xff]  }
 0x24c   :  { %7047 = vmatprep.subr.bf16.mxu0 %v10556_v22  ;;  %7895 = vmatprep.subr.bf16.mxu1 %v10559_v23  ;;  %v10641_v22 = vld [vmem:[%s14687_s1 + $0x1428] ss:$16 sps:$4 sm:$0xff]   ;;  %v10646_v23 = vld [vmem:[%s14687_s1 + $0x1444] ss:$16 sps:$4 sm:$0xff]  }
 0x24d   :  { %7073 = vmatprep.mubr.bf16.mxu0 %v8347_v24  ;;  %7921 = vmatprep.mubr.bf16.mxu1 %v8347_v24  ;;  %v10649_v24 = vld [vmem:[%s14687_s1 + $0x144c] ss:$16 sps:$4 sm:$0xff]  }
 0x24f   :  { %7048 = vmatpush1.bf16.msra.mxu0 %v10554_v26  ;;  %7896 = vmatpush1.bf16.msra.mxu1 %v10557_v25  ;;  %v8378_v26 = vcombine.low %v55_v14, %v71_v15  ;;  %v13373_v25 = vld [vmem:[%s14688_s0 + $0x50] sm:$0xff]  ;;  %v10719_v14 = vld [vmem:[%s14687_s1 + $0x15c8] ss:$16 sps:$4 sm:$0xff]  }
 0x250   :  { %7049 = vmatprep.subr.bf16.mxu0 %v10562_v27  ;;  %7897 = vmatprep.subr.bf16.mxu1 %v10565_v28  ;;  %v13378_v27 = vld [vmem:[%s14688_s0 + $0xd0] sm:$0xff] }
 0x251   :  { %v10644_v28 = vld [vmem:[%s14687_s1 + $0x1440] ss:$16 sps:$4 sm:$0xff]   ;;  %v10724_v15 = vld [vmem:[%s14687_s1 + $0x15e4] ss:$16 sps:$4 sm:$0xff]  }
 0x253   :  { %7050 = vmatpush1.bf16.msra.mxu0 %v10560_v29  ;;  %7898 = vmatpush1.bf16.msra.mxu1 %v10563_v30  ;;  %v10647_v29 = vld [vmem:[%s14687_s1 + $0x1448] ss:$16 sps:$4 sm:$0xff]   ;;  %v10652_v30 = vld [vmem:[%s14687_s1 + $0x1464] ss:$16 sps:$4 sm:$0xff]  }
 0x254   :  { %7051 = vmatprep.subr.bf16.mxu0 %v10568_v31  ;;  %7899 = vmatprep.subr.bf16.mxu1 %v10571_v32  ;;  %v10655_v31 = vld [vmem:[%s14687_s1 + $0x146c] ss:$16 sps:$4 sm:$0xff]   ;;  %v8349_v32 = vcombine.high %v13373_v25, %v13378_v27 }
 0x257   :  { %7052 = vmatpush1.bf16.msra.mxu0 %v10566_v34  ;;  %7900 = vmatpush1.bf16.msra.mxu1 %v10569_v36  ;;  %v10650_v34 = vld [vmem:[%s14687_s1 + $0x1460] ss:$16 sps:$4 sm:$0xff]   ;;  %v10653_v36 = vld [vmem:[%s14687_s1 + $0x1468] ss:$16 sps:$4 sm:$0xff]  }
 0x258   :  { %7053 = vmatprep.subr.bf16.mxu0 %v10574_v33  ;;  %7901 = vmatprep.subr.bf16.mxu1 %v10577_v35  ;;  %v10658_v33 = vld [vmem:[%s14687_s1 + $0x1484] ss:$16 sps:$4 sm:$0xff]   ;;  %v10661_v35 = vld [vmem:[%s14687_s1 + $0x148c] ss:$16 sps:$4 sm:$0xff]  }
 0x25b   :  { %7054 = vmatpush1.bf16.msra.mxu0 %v10572_v37  ;;  %7902 = vmatpush1.bf16.msra.mxu1 %v10575_v38  ;;  %v10656_v37 = vld [vmem:[%s14687_s1 + $0x1480] ss:$16 sps:$4 sm:$0xff]   ;;  %v10659_v38 = vld [vmem:[%s14687_s1 + $0x1488] ss:$16 sps:$4 sm:$0xff]  }
 0x25c   :  { %7055 = vmatprep.subr.bf16.mxu0 %v10580_v39  ;;  %7903 = vmatprep.subr.bf16.mxu1 %v10583_v40  ;;  %v10664_v39 = vld [vmem:[%s14687_s1 + $0x14a4] ss:$16 sps:$4 sm:$0xff]   ;;  %v10667_v40 = vld [vmem:[%s14687_s1 + $0x14ac] ss:$16 sps:$4 sm:$0xff]  }
 0x25f   :  { %7056 = vmatpush1.bf16.msra.mxu0 %v10578_v42  ;;  %7904 = vmatpush1.bf16.msra.mxu1 %v10581_v44  ;;  %v10662_v42 = vld [vmem:[%s14687_s1 + $0x14a0] ss:$16 sps:$4 sm:$0xff]   ;;  %v10665_v44 = vld [vmem:[%s14687_s1 + $0x14a8] ss:$16 sps:$4 sm:$0xff]  }
 0x260   :  { %7057 = vmatprep.subr.bf16.mxu0 %v10586_v41  ;;  %7905 = vmatprep.subr.bf16.mxu1 %v10589_v43  ;;  %v10670_v41 = vld [vmem:[%s14687_s1 + $0x14c4] ss:$16 sps:$4 sm:$0xff]   ;;  %v10673_v43 = vld [vmem:[%s14687_s1 + $0x14cc] ss:$16 sps:$4 sm:$0xff]  }
 0x263   :  { %7058 = vmatpush1.bf16.msra.mxu0 %v10584_v45  ;;  %7906 = vmatpush1.bf16.msra.mxu1 %v10587_v46  ;;  %v10668_v45 = vld [vmem:[%s14687_s1 + $0x14c0] ss:$16 sps:$4 sm:$0xff]   ;;  %v10671_v46 = vld [vmem:[%s14687_s1 + $0x14c8] ss:$16 sps:$4 sm:$0xff]  }
 0x264   :  { %7059 = vmatprep.subr.bf16.mxu0 %v10592_v47  ;;  %7907 = vmatprep.subr.bf16.mxu1 %v10595_v48  ;;  %v10676_v47 = vld [vmem:[%s14687_s1 + $0x14e4] ss:$16 sps:$4 sm:$0xff]   ;;  %v10679_v48 = vld [vmem:[%s14687_s1 + $0x14ec] ss:$16 sps:$4 sm:$0xff]  }
 0x267   :  { %7060 = vmatpush1.bf16.msra.mxu0 %v10590_v51  ;;  %7908 = vmatpush1.bf16.msra.mxu1 %v10593_v52  ;;  %v10674_v51 = vld [vmem:[%s14687_s1 + $0x14e0] ss:$16 sps:$4 sm:$0xff]   ;;  %v10677_v52 = vld [vmem:[%s14687_s1 + $0x14e8] ss:$16 sps:$4 sm:$0xff]  }
 0x268   :  { %7061 = vmatprep.subr.bf16.mxu0 %v10598_v49  ;;  %7909 = vmatprep.subr.bf16.mxu1 %v10601_v50  ;;  %v10682_v49 = vld [vmem:[%s14687_s1 + $0x1504] ss:$16 sps:$4 sm:$0xff]   ;;  %v10685_v50 = vld [vmem:[%s14687_s1 + $0x150c] ss:$16 sps:$4 sm:$0xff]  }
 0x26b   :  { %7062 = vmatpush1.bf16.msra.mxu0 %v10596_v53  ;;  %7910 = vmatpush1.bf16.msra.mxu1 %v10599_v54  ;;  %v10680_v53 = vld [vmem:[%s14687_s1 + $0x1500] ss:$16 sps:$4 sm:$0xff]   ;;  %v10683_v54 = vld [vmem:[%s14687_s1 + $0x1508] ss:$16 sps:$4 sm:$0xff]  }
 0x26c   :  { %7063 = vmatprep.subr.bf16.mxu0 %v10604_v55  ;;  %7911 = vmatprep.subr.bf16.mxu1 %v10607_v56  ;;  %v10688_v55 = vld [vmem:[%s14687_s1 + $0x1524] ss:$16 sps:$4 sm:$0xff]   ;;  %v10691_v56 = vld [vmem:[%s14687_s1 + $0x152c] ss:$16 sps:$4 sm:$0xff]  }
 0x26f   :  { %7064 = vmatpush1.bf16.msra.mxu0 %v10602_v59  ;;  %7912 = vmatpush1.bf16.msra.mxu1 %v10605_v60  ;;  %v10686_v59 = vld [vmem:[%s14687_s1 + $0x1520] ss:$16 sps:$4 sm:$0xff]   ;;  %v10689_v60 = vld [vmem:[%s14687_s1 + $0x1528] ss:$16 sps:$4 sm:$0xff]  }
 0x270   :  { %7065 = vmatprep.subr.bf16.mxu0 %v10610_v57  ;;  %7913 = vmatprep.subr.bf16.mxu1 %v10613_v58  ;;  %v10694_v57 = vld [vmem:[%s14687_s1 + $0x1544] ss:$16 sps:$4 sm:$0xff]   ;;  %v10697_v58 = vld [vmem:[%s14687_s1 + $0x154c] ss:$16 sps:$4 sm:$0xff]  }
 0x273   :  { %7066 = vmatpush1.bf16.msra.mxu0 %v10608_v61  ;;  %7914 = vmatpush1.bf16.msra.mxu1 %v10611_v62  ;;  %v10692_v61 = vld [vmem:[%s14687_s1 + $0x1540] ss:$16 sps:$4 sm:$0xff]   ;;  %v10695_v62 = vld [vmem:[%s14687_s1 + $0x1548] ss:$16 sps:$4 sm:$0xff]  }
 0x274   :  { %7067 = vmatprep.subr.bf16.mxu0 %v10616_v63  ;;  %7915 = vmatprep.subr.bf16.mxu1 %v10619_v0  ;;  %v10700_v63 = vld [vmem:[%s14687_s1 + $0x1564] ss:$16 sps:$4 sm:$0xff]   ;;  %v10703_v0 = vld [vmem:[%s14687_s1 + $0x156c] ss:$16 sps:$4 sm:$0xff]  }
 0x277   :  { %7068 = vmatpush1.bf16.msra.mxu0 %v10614_v3  ;;  %7916 = vmatpush1.bf16.msra.mxu1 %v10617_v4  ;;  %v10698_v3 = vld [vmem:[%s14687_s1 + $0x1560] ss:$16 sps:$4 sm:$0xff]   ;;  %v10701_v4 = vld [vmem:[%s14687_s1 + $0x1568] ss:$16 sps:$4 sm:$0xff]  }
 0x278   :  { %7069 = vmatprep.subr.bf16.mxu0 %v10622_v1  ;;  %7917 = vmatprep.subr.bf16.mxu1 %v10625_v2  ;;  %v10706_v1 = vld [vmem:[%s14687_s1 + $0x1584] ss:$16 sps:$4 sm:$0xff]   ;;  %v10709_v2 = vld [vmem:[%s14687_s1 + $0x158c] ss:$16 sps:$4 sm:$0xff]  }
 0x27b   :  { %7070 = vmatpush1.bf16.msra.mxu0 %v10620_v5  ;;  %7918 = vmatpush1.bf16.msra.mxu1 %v10623_v6  ;;  %v10704_v5 = vld [vmem:[%s14687_s1 + $0x1580] ss:$16 sps:$4 sm:$0xff]   ;;  %v10707_v6 = vld [vmem:[%s14687_s1 + $0x1588] ss:$16 sps:$4 sm:$0xff]  }
 0x27c   :  { %7071 = vmatprep.subr.bf16.mxu0 %v10628_v7  ;;  %7919 = vmatprep.subr.bf16.mxu1 %v10631_v8  ;;  %v10712_v7 = vld [vmem:[%s14687_s1 + $0x15a4] ss:$16 sps:$4 sm:$0xff]   ;;  %v10715_v8 = vld [vmem:[%s14687_s1 + $0x15ac] ss:$16 sps:$4 sm:$0xff]  }
 0x27f   :  { %7072 = vmatpush1.bf16.msra.mxu0 %v10626_v11  ;;  %7920 = vmatpush1.bf16.msra.mxu1 %v10629_v12  ;;  %v10710_v11 = vld [vmem:[%s14687_s1 + $0x15a0] ss:$16 sps:$4 sm:$0xff]   ;;  %v10713_v12 = vld [vmem:[%s14687_s1 + $0x15a8] ss:$16 sps:$4 sm:$0xff]  }
 0x280   :  { %7094 = vmatprep.subr.bf16.mxu0 %v10634_v9  ;;  %7942 = vmatprep.subr.bf16.mxu1 %v10637_v10  ;;  %v10718_v9 = vld [vmem:[%s14687_s1 + $0x15c4] ss:$16 sps:$4 sm:$0xff]   ;;  %v10721_v10 = vld [vmem:[%s14687_s1 + $0x15cc] ss:$16 sps:$4 sm:$0xff]  }
 0x282   :  { %7074 = vmatmul.mubr.bf16.vlgmr.msra.gmra.mrb[0].mxu0 %v8346_v13  ;;  %7922 = vmatmul.mubr.bf16.vlgmr.msra.gmra.mrb[0].mxu1 %v8346_v13  ;;  %v10716_v13 = vld [vmem:[%s14687_s1 + $0x15c0] ss:$16 sps:$4 sm:$0xff]  }
 0x283   :  { %7095 = vmatpush1.bf16.msra.mxu0 %v10632_v16  ;;  %7943 = vmatpush1.bf16.msra.mxu1 %v10635_v19  ;;  %v10727_v16 = vld [vmem:[%s14687_s1 + $0x15ec] ss:$16 sps:$4 sm:$0xff]   ;;  %v10722_v19 = vld [vmem:[%s14687_s1 + $0x15e0] ss:$16 sps:$4 sm:$0xff]  }
 0x284   :  { %7096 = vmatprep.subr.bf16.mxu0 %v10640_v17  ;;  %7944 = vmatprep.subr.bf16.mxu1 %v10643_v18  ;;  %v10725_v17 = vld [vmem:[%s14687_s1 + $0x15e8] ss:$16 sps:$4 sm:$0xff]   ;;  %v10730_v18 = vld [vmem:[%s14687_s1 + $0x1604] ss:$16 sps:$4 sm:$0xff]  }
 0x285   :  { %7083 = vmatprep.mubr.bf16.mxu0 %v8379_v20  ;;  %7931 = vmatprep.mubr.bf16.mxu1 %v8379_v20  ;;  %v10733_v20 = vld [vmem:[%s14687_s1 + $0x160c] ss:$16 sps:$4 sm:$0xff]  }
 0x287   :  { %7097 = vmatpush1.bf16.msra.mxu0 %v10638_v21  ;;  %7945 = vmatpush1.bf16.msra.mxu1 %v10641_v22  ;;  %v8348_v21 = vcombine.low %v13373_v25, %v13378_v27  ;;  %v56_v22 = vld [vmem:[%s14688_s0 + $0x150] sm:$0xff]  ;;  %v10739_v27 = vld [vmem:[%s14687_s1 + $0x162c] ss:$16 sps:$4 sm:$0xff]  }
 0x288   :  { %7098 = vmatprep.subr.bf16.mxu0 %v10646_v23  ;;  %7946 = vmatprep.subr.bf16.mxu1 %v10649_v24  ;;  %v72_v23 = vld [vmem:[%s14688_s0 + $0x1d0] sm:$0xff] }
 0x289   :  { %v10728_v24 = vld [vmem:[%s14687_s1 + $0x1600] ss:$16 sps:$4 sm:$0xff]   ;;  %v10736_v25 = vld [vmem:[%s14687_s1 + $0x1624] ss:$16 sps:$4 sm:$0xff]  }
 0x28a   :  { %7084 = vmatmul.mubr.bf16.gmra.mrb[4].mxu0 %v8378_v26  ;;  %7932 = vmatmul.mubr.bf16.gmra.mrb[4].mxu1 %v8378_v26  ;;  %v10731_v26 = vld [vmem:[%s14687_s1 + $0x1608] ss:$16 sps:$4 sm:$0xff]  }
 0x28b   :  { %7099 = vmatpush1.bf16.msra.mxu0 %v10644_v28  ;;  %7947 = vmatpush1.bf16.msra.mxu1 %v10647_v29  ;;  %v8381_v28 = vcombine.high %v56_v22, %v72_v23  ;;  %v10734_v29 = vld [vmem:[%s14687_s1 + $0x1620] ss:$16 sps:$4 sm:$0xff]  }
 0x28c   :  { %7100 = vmatprep.subr.bf16.mxu0 %v10652_v30  ;;  %7948 = vmatprep.subr.bf16.mxu1 %v10655_v31  ;;  %v10737_v30 = vld [vmem:[%s14687_s1 + $0x1628] ss:$16 sps:$4 sm:$0xff]   ;;  %v10742_v31 = vld [vmem:[%s14687_s1 + $0x1644] ss:$16 sps:$4 sm:$0xff]  }
 0x28d   :  { %7126 = vmatprep.mubr.bf16.mxu0 %v8349_v32  ;;  %7974 = vmatprep.mubr.bf16.mxu1 %v8349_v32  ;;  %v10745_v32 = vld [vmem:[%s14687_s1 + $0x164c] ss:$16 sps:$4 sm:$0xff]  }
 0x28f   :  { %7101 = vmatpush1.bf16.msra.mxu0 %v10650_v34  ;;  %7949 = vmatpush1.bf16.msra.mxu1 %v10653_v36  ;;  %v8380_v34 = vcombine.low %v56_v22, %v72_v23  ;;  %v13585_v36 = vld [vmem:[%s14688_s0 + $0x58] sm:$0xff]  ;;  %v10820_v23 = vld [vmem:[%s14687_s1 + $0x17e4] ss:$16 sps:$4 sm:$0xff]  }
 0x290   :  { %7102 = vmatprep.subr.bf16.mxu0 %v10658_v33  ;;  %7950 = vmatprep.subr.bf16.mxu1 %v10661_v35  ;;  %v13590_v33 = vld [vmem:[%s14688_s0 + $0xd8] sm:$0xff]  ;;  %v10740_v35 = vld [vmem:[%s14687_s1 + $0x1640] ss:$16 sps:$4 sm:$0xff]  }
 0x291   :  { %v10815_v22 = vld [vmem:[%s14687_s1 + $0x17c8] ss:$16 sps:$4 sm:$0xff]  }
 0x293   :  { %7103 = vmatpush1.bf16.msra.mxu0 %v10656_v37  ;;  %7951 = vmatpush1.bf16.msra.mxu1 %v10659_v38  ;;  %v10743_v37 = vld [vmem:[%s14687_s1 + $0x1648] ss:$16 sps:$4 sm:$0xff]   ;;  %v10748_v38 = vld [vmem:[%s14687_s1 + $0x1664] ss:$16 sps:$4 sm:$0xff]  }
 0x294   :  { %7104 = vmatprep.subr.bf16.mxu0 %v10664_v39  ;;  %7952 = vmatprep.subr.bf16.mxu1 %v10667_v40  ;;  %v10751_v39 = vld [vmem:[%s14687_s1 + $0x166c] ss:$16 sps:$4 sm:$0xff]   ;;  %v8351_v40 = vcombine.high %v13585_v36, %v13590_v33 }
 0x297   :  { %7105 = vmatpush1.bf16.msra.mxu0 %v10662_v42  ;;  %7953 = vmatpush1.bf16.msra.mxu1 %v10665_v44  ;;  %v10746_v42 = vld [vmem:[%s14687_s1 + $0x1660] ss:$16 sps:$4 sm:$0xff]   ;;  %v10749_v44 = vld [vmem:[%s14687_s1 + $0x1668] ss:$16 sps:$4 sm:$0xff]  }
 0x298   :  { %7106 = vmatprep.subr.bf16.mxu0 %v10670_v41  ;;  %7954 = vmatprep.subr.bf16.mxu1 %v10673_v43  ;;  %v10754_v41 = vld [vmem:[%s14687_s1 + $0x1684] ss:$16 sps:$4 sm:$0xff]   ;;  %v10757_v43 = vld [vmem:[%s14687_s1 + $0x168c] ss:$16 sps:$4 sm:$0xff]  }
 0x29b   :  { %7107 = vmatpush1.bf16.msra.mxu0 %v10668_v45  ;;  %7955 = vmatpush1.bf16.msra.mxu1 %v10671_v46  ;;  %v10752_v45 = vld [vmem:[%s14687_s1 + $0x1680] ss:$16 sps:$4 sm:$0xff]   ;;  %v10755_v46 = vld [vmem:[%s14687_s1 + $0x1688] ss:$16 sps:$4 sm:$0xff]  }
 0x29c   :  { %7108 = vmatprep.subr.bf16.mxu0 %v10676_v47  ;;  %7956 = vmatprep.subr.bf16.mxu1 %v10679_v48  ;;  %v10760_v47 = vld [vmem:[%s14687_s1 + $0x16a4] ss:$16 sps:$4 sm:$0xff]   ;;  %v10763_v48 = vld [vmem:[%s14687_s1 + $0x16ac] ss:$16 sps:$4 sm:$0xff]  }
 0x29f   :  { %7109 = vmatpush1.bf16.msra.mxu0 %v10674_v51  ;;  %7957 = vmatpush1.bf16.msra.mxu1 %v10677_v52  ;;  %v10758_v51 = vld [vmem:[%s14687_s1 + $0x16a0] ss:$16 sps:$4 sm:$0xff]   ;;  %v10761_v52 = vld [vmem:[%s14687_s1 + $0x16a8] ss:$16 sps:$4 sm:$0xff]  }
 0x2a0   :  { %7110 = vmatprep.subr.bf16.mxu0 %v10682_v49  ;;  %7958 = vmatprep.subr.bf16.mxu1 %v10685_v50  ;;  %v10766_v49 = vld [vmem:[%s14687_s1 + $0x16c4] ss:$16 sps:$4 sm:$0xff]   ;;  %v10769_v50 = vld [vmem:[%s14687_s1 + $0x16cc] ss:$16 sps:$4 sm:$0xff]  }
 0x2a3   :  { %7111 = vmatpush1.bf16.msra.mxu0 %v10680_v53  ;;  %7959 = vmatpush1.bf16.msra.mxu1 %v10683_v54  ;;  %v10764_v53 = vld [vmem:[%s14687_s1 + $0x16c0] ss:$16 sps:$4 sm:$0xff]   ;;  %v10767_v54 = vld [vmem:[%s14687_s1 + $0x16c8] ss:$16 sps:$4 sm:$0xff]  }
 0x2a4   :  { %7112 = vmatprep.subr.bf16.mxu0 %v10688_v55  ;;  %7960 = vmatprep.subr.bf16.mxu1 %v10691_v56  ;;  %v10772_v55 = vld [vmem:[%s14687_s1 + $0x16e4] ss:$16 sps:$4 sm:$0xff]   ;;  %v10775_v56 = vld [vmem:[%s14687_s1 + $0x16ec] ss:$16 sps:$4 sm:$0xff]  }
 0x2a7   :  { %7113 = vmatpush1.bf16.msra.mxu0 %v10686_v59  ;;  %7961 = vmatpush1.bf16.msra.mxu1 %v10689_v60  ;;  %v10770_v59 = vld [vmem:[%s14687_s1 + $0x16e0] ss:$16 sps:$4 sm:$0xff]   ;;  %v10773_v60 = vld [vmem:[%s14687_s1 + $0x16e8] ss:$16 sps:$4 sm:$0xff]  }
 0x2a8   :  { %7114 = vmatprep.subr.bf16.mxu0 %v10694_v57  ;;  %7962 = vmatprep.subr.bf16.mxu1 %v10697_v58  ;;  %v10778_v57 = vld [vmem:[%s14687_s1 + $0x1704] ss:$16 sps:$4 sm:$0xff]   ;;  %v10781_v58 = vld [vmem:[%s14687_s1 + $0x170c] ss:$16 sps:$4 sm:$0xff]  }
 0x2ab   :  { %7115 = vmatpush1.bf16.msra.mxu0 %v10692_v61  ;;  %7963 = vmatpush1.bf16.msra.mxu1 %v10695_v62  ;;  %v10776_v61 = vld [vmem:[%s14687_s1 + $0x1700] ss:$16 sps:$4 sm:$0xff]   ;;  %v10779_v62 = vld [vmem:[%s14687_s1 + $0x1708] ss:$16 sps:$4 sm:$0xff]  }
 0x2ac   :  { %7116 = vmatprep.subr.bf16.mxu0 %v10700_v63  ;;  %7964 = vmatprep.subr.bf16.mxu1 %v10703_v0  ;;  %v10784_v63 = vld [vmem:[%s14687_s1 + $0x1724] ss:$16 sps:$4 sm:$0xff]   ;;  %v10787_v0 = vld [vmem:[%s14687_s1 + $0x172c] ss:$16 sps:$4 sm:$0xff]  }
 0x2af   :  { %7117 = vmatpush1.bf16.msra.mxu0 %v10698_v3  ;;  %7965 = vmatpush1.bf16.msra.mxu1 %v10701_v4  ;;  %v10782_v3 = vld [vmem:[%s14687_s1 + $0x1720] ss:$16 sps:$4 sm:$0xff]   ;;  %v10785_v4 = vld [vmem:[%s14687_s1 + $0x1728] ss:$16 sps:$4 sm:$0xff]  }
 0x2b0   :  { %7118 = vmatprep.subr.bf16.mxu0 %v10706_v1  ;;  %7966 = vmatprep.subr.bf16.mxu1 %v10709_v2  ;;  %v10790_v1 = vld [vmem:[%s14687_s1 + $0x1744] ss:$16 sps:$4 sm:$0xff]   ;;  %v10793_v2 = vld [vmem:[%s14687_s1 + $0x174c] ss:$16 sps:$4 sm:$0xff]  }
 0x2b3   :  { %7119 = vmatpush1.bf16.msra.mxu0 %v10704_v5  ;;  %7967 = vmatpush1.bf16.msra.mxu1 %v10707_v6  ;;  %v10788_v5 = vld [vmem:[%s14687_s1 + $0x1740] ss:$16 sps:$4 sm:$0xff]   ;;  %v10791_v6 = vld [vmem:[%s14687_s1 + $0x1748] ss:$16 sps:$4 sm:$0xff]  }
 0x2b4   :  { %7120 = vmatprep.subr.bf16.mxu0 %v10712_v7  ;;  %7968 = vmatprep.subr.bf16.mxu1 %v10715_v8  ;;  %v10796_v7 = vld [vmem:[%s14687_s1 + $0x1764] ss:$16 sps:$4 sm:$0xff]   ;;  %v10799_v8 = vld [vmem:[%s14687_s1 + $0x176c] ss:$16 sps:$4 sm:$0xff]  }
 0x2b7   :  { %7121 = vmatpush1.bf16.msra.mxu0 %v10710_v11  ;;  %7969 = vmatpush1.bf16.msra.mxu1 %v10713_v12  ;;  %v10794_v11 = vld [vmem:[%s14687_s1 + $0x1760] ss:$16 sps:$4 sm:$0xff]   ;;  %v10797_v12 = vld [vmem:[%s14687_s1 + $0x1768] ss:$16 sps:$4 sm:$0xff]  }
 0x2b8   :  { %7122 = vmatprep.subr.bf16.mxu0 %v10718_v9  ;;  %7970 = vmatprep.subr.bf16.mxu1 %v10721_v10  ;;  %v10802_v9 = vld [vmem:[%s14687_s1 + $0x1784] ss:$16 sps:$4 sm:$0xff]   ;;  %v10805_v10 = vld [vmem:[%s14687_s1 + $0x178c] ss:$16 sps:$4 sm:$0xff]  }
 0x2bb   :  { %7123 = vmatpush1.bf16.msra.mxu0 %v10716_v13  ;;  %7971 = vmatpush1.bf16.msra.mxu1 %v10719_v14  ;;  %v10800_v13 = vld [vmem:[%s14687_s1 + $0x1780] ss:$16 sps:$4 sm:$0xff]   ;;  %v10803_v14 = vld [vmem:[%s14687_s1 + $0x1788] ss:$16 sps:$4 sm:$0xff]  }
 0x2bc   :  { %7124 = vmatprep.subr.bf16.mxu0 %v10724_v15  ;;  %7972 = vmatprep.subr.bf16.mxu1 %v10727_v16  ;;  %v10808_v15 = vld [vmem:[%s14687_s1 + $0x17a4] ss:$16 sps:$4 sm:$0xff]   ;;  %v10811_v16 = vld [vmem:[%s14687_s1 + $0x17ac] ss:$16 sps:$4 sm:$0xff]  }
 0x2bf   :  { %7125 = vmatpush1.bf16.msra.mxu0 %v10722_v19  ;;  %7973 = vmatpush1.bf16.msra.mxu1 %v10725_v17  ;;  %v10806_v19 = vld [vmem:[%s14687_s1 + $0x17a0] ss:$16 sps:$4 sm:$0xff]   ;;  %v10809_v17 = vld [vmem:[%s14687_s1 + $0x17a8] ss:$16 sps:$4 sm:$0xff]  }
 0x2c0   :  { %7147 = vmatprep.subr.bf16.mxu0 %v10730_v18  ;;  %7995 = vmatprep.subr.bf16.mxu1 %v10733_v20  ;;  %v10814_v18 = vld [vmem:[%s14687_s1 + $0x17c4] ss:$16 sps:$4 sm:$0xff]   ;;  %v10817_v20 = vld [vmem:[%s14687_s1 + $0x17cc] ss:$16 sps:$4 sm:$0xff]  }
 0x2c2   :  { %7127 = vmatmul.mubr.bf16.vlgmr.msra.gmra.mrb[0].mxu0 %v8348_v21  ;;  %7975 = vmatmul.mubr.bf16.vlgmr.msra.gmra.mrb[0].mxu1 %v8348_v21  ;;  %v10812_v21 = vld [vmem:[%s14687_s1 + $0x17c0] ss:$16 sps:$4 sm:$0xff]  }
 0x2c3   :  { %7148 = vmatpush1.bf16.msra.mxu0 %v10728_v24  ;;  %7996 = vmatpush1.bf16.msra.mxu1 %v10731_v26  ;;  %v10823_v24 = vld [vmem:[%s14687_s1 + $0x17ec] ss:$16 sps:$4 sm:$0xff]   ;;  %v10818_v26 = vld [vmem:[%s14687_s1 + $0x17e0] ss:$16 sps:$4 sm:$0xff]  }
 0x2c4   :  { %7149 = vmatprep.subr.bf16.mxu0 %v10736_v25  ;;  %7997 = vmatprep.subr.bf16.mxu1 %v10739_v27  ;;  %v10821_v25 = vld [vmem:[%s14687_s1 + $0x17e8] ss:$16 sps:$4 sm:$0xff]   ;;  %v10826_v27 = vld [vmem:[%s14687_s1 + $0x1804] ss:$16 sps:$4 sm:$0xff]  }
 0x2c5   :  { %7136 = vmatprep.mubr.bf16.mxu0 %v8381_v28  ;;  %7984 = vmatprep.mubr.bf16.mxu1 %v8381_v28  ;;  %v10829_v28 = vld [vmem:[%s14687_s1 + $0x180c] ss:$16 sps:$4 sm:$0xff]  }
 0x2c7   :  { %7150 = vmatpush1.bf16.msra.mxu0 %v10734_v29  ;;  %7998 = vmatpush1.bf16.msra.mxu1 %v10737_v30  ;;  %v8350_v29 = vcombine.low %v13585_v36, %v13590_v33  ;;  %v57_v30 = vld [vmem:[%s14688_s0 + $0x158] sm:$0xff]  ;;  %v10832_v36 = vld [vmem:[%s14687_s1 + $0x1824] ss:$16 sps:$4 sm:$0xff]  }
 0x2c8   :  { %7151 = vmatprep.subr.bf16.mxu0 %v10742_v31  ;;  %7999 = vmatprep.subr.bf16.mxu1 %v10745_v32  ;;  %v73_v31 = vld [vmem:[%s14688_s0 + $0x1d8] sm:$0xff]  ;;  %v10824_v32 = vld [vmem:[%s14687_s1 + $0x1800] ss:$16 sps:$4 sm:$0xff]  }
 0x2c9   :  { %v10835_v33 = vld [vmem:[%s14687_s1 + $0x182c] ss:$16 sps:$4 sm:$0xff]  }
 0x2ca   :  { %7137 = vmatmul.mubr.bf16.gmra.mrb[4].mxu0 %v8380_v34  ;;  %7985 = vmatmul.mubr.bf16.gmra.mrb[4].mxu1 %v8380_v34  ;;  %v10827_v34 = vld [vmem:[%s14687_s1 + $0x1808] ss:$16 sps:$4 sm:$0xff]  }
 0x2cb   :  { %7152 = vmatpush1.bf16.msra.mxu0 %v10740_v35  ;;  %8000 = vmatpush1.bf16.msra.mxu1 %v10743_v37  ;;  %v8383_v35 = vcombine.high %v57_v30, %v73_v31  ;;  %v10830_v37 = vld [vmem:[%s14687_s1 + $0x1820] ss:$16 sps:$4 sm:$0xff]  }
 0x2cc   :  { %7153 = vmatprep.subr.bf16.mxu0 %v10748_v38  ;;  %8001 = vmatprep.subr.bf16.mxu1 %v10751_v39  ;;  %v10833_v38 = vld [vmem:[%s14687_s1 + $0x1828] ss:$16 sps:$4 sm:$0xff]   ;;  %v10838_v39 = vld [vmem:[%s14687_s1 + $0x1844] ss:$16 sps:$4 sm:$0xff]  }
 0x2cd   :  { %7179 = vmatprep.mubr.bf16.mxu0 %v8351_v40  ;;  %8027 = vmatprep.mubr.bf16.mxu1 %v8351_v40  ;;  %v10841_v40 = vld [vmem:[%s14687_s1 + $0x184c] ss:$16 sps:$4 sm:$0xff]  }
 0x2cf   :  { %7154 = vmatpush1.bf16.msra.mxu0 %v10746_v42  ;;  %8002 = vmatpush1.bf16.msra.mxu1 %v10749_v44  ;;  %v8382_v42 = vcombine.low %v57_v30, %v73_v31  ;;  %v13797_v44 = vld [vmem:[%s14688_s0 + $0x60] sm:$0xff]  ;;  %v10911_v30 = vld [vmem:[%s14687_s1 + $0x19c8] ss:$16 sps:$4 sm:$0xff]  }
 0x2d0   :  { %7155 = vmatprep.subr.bf16.mxu0 %v10754_v41  ;;  %8003 = vmatprep.subr.bf16.mxu1 %v10757_v43  ;;  %v13802_v41 = vld [vmem:[%s14688_s0 + $0xe0] sm:$0xff] }
 0x2d1   :  { %v10836_v43 = vld [vmem:[%s14687_s1 + $0x1840] ss:$16 sps:$4 sm:$0xff]   ;;  %v10916_v31 = vld [vmem:[%s14687_s1 + $0x19e4] ss:$16 sps:$4 sm:$0xff]  }
 0x2d3   :  { %7156 = vmatpush1.bf16.msra.mxu0 %v10752_v45  ;;  %8004 = vmatpush1.bf16.msra.mxu1 %v10755_v46  ;;  %v10839_v45 = vld [vmem:[%s14687_s1 + $0x1848] ss:$16 sps:$4 sm:$0xff]   ;;  %v10844_v46 = vld [vmem:[%s14687_s1 + $0x1864] ss:$16 sps:$4 sm:$0xff]  }
 0x2d4   :  { %7157 = vmatprep.subr.bf16.mxu0 %v10760_v47  ;;  %8005 = vmatprep.subr.bf16.mxu1 %v10763_v48  ;;  %v10847_v47 = vld [vmem:[%s14687_s1 + $0x186c] ss:$16 sps:$4 sm:$0xff]   ;;  %v8353_v48 = vcombine.high %v13797_v44, %v13802_v41 }
 0x2d7   :  { %7158 = vmatpush1.bf16.msra.mxu0 %v10758_v51  ;;  %8006 = vmatpush1.bf16.msra.mxu1 %v10761_v52  ;;  %v10842_v51 = vld [vmem:[%s14687_s1 + $0x1860] ss:$16 sps:$4 sm:$0xff]   ;;  %v10845_v52 = vld [vmem:[%s14687_s1 + $0x1868] ss:$16 sps:$4 sm:$0xff]  }
 0x2d8   :  { %7159 = vmatprep.subr.bf16.mxu0 %v10766_v49  ;;  %8007 = vmatprep.subr.bf16.mxu1 %v10769_v50  ;;  %v10850_v49 = vld [vmem:[%s14687_s1 + $0x1884] ss:$16 sps:$4 sm:$0xff]   ;;  %v10853_v50 = vld [vmem:[%s14687_s1 + $0x188c] ss:$16 sps:$4 sm:$0xff]  }
 0x2db   :  { %7160 = vmatpush1.bf16.msra.mxu0 %v10764_v53  ;;  %8008 = vmatpush1.bf16.msra.mxu1 %v10767_v54  ;;  %v10848_v53 = vld [vmem:[%s14687_s1 + $0x1880] ss:$16 sps:$4 sm:$0xff]   ;;  %v10851_v54 = vld [vmem:[%s14687_s1 + $0x1888] ss:$16 sps:$4 sm:$0xff]  }
 0x2dc   :  { %7161 = vmatprep.subr.bf16.mxu0 %v10772_v55  ;;  %8009 = vmatprep.subr.bf16.mxu1 %v10775_v56  ;;  %v10856_v55 = vld [vmem:[%s14687_s1 + $0x18a4] ss:$16 sps:$4 sm:$0xff]   ;;  %v10859_v56 = vld [vmem:[%s14687_s1 + $0x18ac] ss:$16 sps:$4 sm:$0xff]  }
 0x2df   :  { %7162 = vmatpush1.bf16.msra.mxu0 %v10770_v59  ;;  %8010 = vmatpush1.bf16.msra.mxu1 %v10773_v60  ;;  %v10854_v59 = vld [vmem:[%s14687_s1 + $0x18a0] ss:$16 sps:$4 sm:$0xff]   ;;  %v10857_v60 = vld [vmem:[%s14687_s1 + $0x18a8] ss:$16 sps:$4 sm:$0xff]  }
 0x2e0   :  { %7163 = vmatprep.subr.bf16.mxu0 %v10778_v57  ;;  %8011 = vmatprep.subr.bf16.mxu1 %v10781_v58  ;;  %v10862_v57 = vld [vmem:[%s14687_s1 + $0x18c4] ss:$16 sps:$4 sm:$0xff]   ;;  %v10865_v58 = vld [vmem:[%s14687_s1 + $0x18cc] ss:$16 sps:$4 sm:$0xff]  }
 0x2e3   :  { %7164 = vmatpush1.bf16.msra.mxu0 %v10776_v61  ;;  %8012 = vmatpush1.bf16.msra.mxu1 %v10779_v62  ;;  %v10860_v61 = vld [vmem:[%s14687_s1 + $0x18c0] ss:$16 sps:$4 sm:$0xff]   ;;  %v10863_v62 = vld [vmem:[%s14687_s1 + $0x18c8] ss:$16 sps:$4 sm:$0xff]  }
 0x2e4   :  { %7165 = vmatprep.subr.bf16.mxu0 %v10784_v63  ;;  %8013 = vmatprep.subr.bf16.mxu1 %v10787_v0  ;;  %v10868_v63 = vld [vmem:[%s14687_s1 + $0x18e4] ss:$16 sps:$4 sm:$0xff]   ;;  %v10871_v0 = vld [vmem:[%s14687_s1 + $0x18ec] ss:$16 sps:$4 sm:$0xff]  }
 0x2e7   :  { %7166 = vmatpush1.bf16.msra.mxu0 %v10782_v3  ;;  %8014 = vmatpush1.bf16.msra.mxu1 %v10785_v4  ;;  %v10866_v3 = vld [vmem:[%s14687_s1 + $0x18e0] ss:$16 sps:$4 sm:$0xff]   ;;  %v10869_v4 = vld [vmem:[%s14687_s1 + $0x18e8] ss:$16 sps:$4 sm:$0xff]  }
 0x2e8   :  { %7167 = vmatprep.subr.bf16.mxu0 %v10790_v1  ;;  %8015 = vmatprep.subr.bf16.mxu1 %v10793_v2  ;;  %v10874_v1 = vld [vmem:[%s14687_s1 + $0x1904] ss:$16 sps:$4 sm:$0xff]   ;;  %v10877_v2 = vld [vmem:[%s14687_s1 + $0x190c] ss:$16 sps:$4 sm:$0xff]  }
 0x2eb   :  { %7168 = vmatpush1.bf16.msra.mxu0 %v10788_v5  ;;  %8016 = vmatpush1.bf16.msra.mxu1 %v10791_v6  ;;  %v10872_v5 = vld [vmem:[%s14687_s1 + $0x1900] ss:$16 sps:$4 sm:$0xff]   ;;  %v10875_v6 = vld [vmem:[%s14687_s1 + $0x1908] ss:$16 sps:$4 sm:$0xff]  }
 0x2ec   :  { %7169 = vmatprep.subr.bf16.mxu0 %v10796_v7  ;;  %8017 = vmatprep.subr.bf16.mxu1 %v10799_v8  ;;  %v10880_v7 = vld [vmem:[%s14687_s1 + $0x1924] ss:$16 sps:$4 sm:$0xff]   ;;  %v10883_v8 = vld [vmem:[%s14687_s1 + $0x192c] ss:$16 sps:$4 sm:$0xff]  }
 0x2ef   :  { %7170 = vmatpush1.bf16.msra.mxu0 %v10794_v11  ;;  %8018 = vmatpush1.bf16.msra.mxu1 %v10797_v12  ;;  %v10878_v11 = vld [vmem:[%s14687_s1 + $0x1920] ss:$16 sps:$4 sm:$0xff]   ;;  %v10881_v12 = vld [vmem:[%s14687_s1 + $0x1928] ss:$16 sps:$4 sm:$0xff]  }
 0x2f0   :  { %7171 = vmatprep.subr.bf16.mxu0 %v10802_v9  ;;  %8019 = vmatprep.subr.bf16.mxu1 %v10805_v10  ;;  %v10886_v9 = vld [vmem:[%s14687_s1 + $0x1944] ss:$16 sps:$4 sm:$0xff]   ;;  %v10889_v10 = vld [vmem:[%s14687_s1 + $0x194c] ss:$16 sps:$4 sm:$0xff]  }
 0x2f3   :  { %7172 = vmatpush1.bf16.msra.mxu0 %v10800_v13  ;;  %8020 = vmatpush1.bf16.msra.mxu1 %v10803_v14  ;;  %v10884_v13 = vld [vmem:[%s14687_s1 + $0x1940] ss:$16 sps:$4 sm:$0xff]   ;;  %v10887_v14 = vld [vmem:[%s14687_s1 + $0x1948] ss:$16 sps:$4 sm:$0xff]  }
 0x2f4   :  { %7173 = vmatprep.subr.bf16.mxu0 %v10808_v15  ;;  %8021 = vmatprep.subr.bf16.mxu1 %v10811_v16  ;;  %v10892_v15 = vld [vmem:[%s14687_s1 + $0x1964] ss:$16 sps:$4 sm:$0xff]   ;;  %v10895_v16 = vld [vmem:[%s14687_s1 + $0x196c] ss:$16 sps:$4 sm:$0xff]  }
 0x2f7   :  { %7174 = vmatpush1.bf16.msra.mxu0 %v10806_v19  ;;  %8022 = vmatpush1.bf16.msra.mxu1 %v10809_v17  ;;  %v10890_v19 = vld [vmem:[%s14687_s1 + $0x1960] ss:$16 sps:$4 sm:$0xff]   ;;  %v10893_v17 = vld [vmem:[%s14687_s1 + $0x1968] ss:$16 sps:$4 sm:$0xff]  }
 0x2f8   :  { %7175 = vmatprep.subr.bf16.mxu0 %v10814_v18  ;;  %8023 = vmatprep.subr.bf16.mxu1 %v10817_v20  ;;  %v10898_v18 = vld [vmem:[%s14687_s1 + $0x1984] ss:$16 sps:$4 sm:$0xff]   ;;  %v10901_v20 = vld [vmem:[%s14687_s1 + $0x198c] ss:$16 sps:$4 sm:$0xff]  }
 0x2fb   :  { %7176 = vmatpush1.bf16.msra.mxu0 %v10812_v21  ;;  %8024 = vmatpush1.bf16.msra.mxu1 %v10815_v22  ;;  %v10896_v21 = vld [vmem:[%s14687_s1 + $0x1980] ss:$16 sps:$4 sm:$0xff]   ;;  %v10899_v22 = vld [vmem:[%s14687_s1 + $0x1988] ss:$16 sps:$4 sm:$0xff]  }
 0x2fc   :  { %7177 = vmatprep.subr.bf16.mxu0 %v10820_v23  ;;  %8025 = vmatprep.subr.bf16.mxu1 %v10823_v24  ;;  %v10904_v23 = vld [vmem:[%s14687_s1 + $0x19a4] ss:$16 sps:$4 sm:$0xff]   ;;  %v10907_v24 = vld [vmem:[%s14687_s1 + $0x19ac] ss:$16 sps:$4 sm:$0xff]  }
 0x2ff   :  { %7178 = vmatpush1.bf16.msra.mxu0 %v10818_v26  ;;  %8026 = vmatpush1.bf16.msra.mxu1 %v10821_v25  ;;  %v10902_v26 = vld [vmem:[%s14687_s1 + $0x19a0] ss:$16 sps:$4 sm:$0xff]   ;;  %v10905_v25 = vld [vmem:[%s14687_s1 + $0x19a8] ss:$16 sps:$4 sm:$0xff]  }
 0x300   :  { %7200 = vmatprep.subr.bf16.mxu0 %v10826_v27  ;;  %8048 = vmatprep.subr.bf16.mxu1 %v10829_v28  ;;  %v10910_v27 = vld [vmem:[%s14687_s1 + $0x19c4] ss:$16 sps:$4 sm:$0xff]   ;;  %v10913_v28 = vld [vmem:[%s14687_s1 + $0x19cc] ss:$16 sps:$4 sm:$0xff]  }
 0x302   :  { %7180 = vmatmul.mubr.bf16.vlgmr.msra.gmra.mrb[0].mxu0 %v8350_v29  ;;  %8028 = vmatmul.mubr.bf16.vlgmr.msra.gmra.mrb[0].mxu1 %v8350_v29  ;;  %v10908_v29 = vld [vmem:[%s14687_s1 + $0x19c0] ss:$16 sps:$4 sm:$0xff]  }
 0x303   :  { %7201 = vmatpush1.bf16.msra.mxu0 %v10824_v32  ;;  %8049 = vmatpush1.bf16.msra.mxu1 %v10827_v34  ;;  %v10919_v32 = vld [vmem:[%s14687_s1 + $0x19ec] ss:$16 sps:$4 sm:$0xff]   ;;  %v10914_v34 = vld [vmem:[%s14687_s1 + $0x19e0] ss:$16 sps:$4 sm:$0xff]  }
 0x304   :  { %7202 = vmatprep.subr.bf16.mxu0 %v10832_v36  ;;  %8050 = vmatprep.subr.bf16.mxu1 %v10835_v33  ;;  %v10917_v36 = vld [vmem:[%s14687_s1 + $0x19e8] ss:$16 sps:$4 sm:$0xff]   ;;  %v10922_v33 = vld [vmem:[%s14687_s1 + $0x1a04] ss:$16 sps:$4 sm:$0xff]  }
 0x305   :  { %7189 = vmatprep.mubr.bf16.mxu0 %v8383_v35  ;;  %8037 = vmatprep.mubr.bf16.mxu1 %v8383_v35  ;;  %v10925_v35 = vld [vmem:[%s14687_s1 + $0x1a0c] ss:$16 sps:$4 sm:$0xff]  }
 0x307   :  { %7203 = vmatpush1.bf16.msra.mxu0 %v10830_v37  ;;  %8051 = vmatpush1.bf16.msra.mxu1 %v10833_v38  ;;  %v8352_v37 = vcombine.low %v13797_v44, %v13802_v41  ;;  %v58_v38 = vld [vmem:[%s14688_s0 + $0x160] sm:$0xff]  ;;  %v10931_v41 = vld [vmem:[%s14687_s1 + $0x1a2c] ss:$16 sps:$4 sm:$0xff]  }
 0x308   :  { %7204 = vmatprep.subr.bf16.mxu0 %v10838_v39  ;;  %8052 = vmatprep.subr.bf16.mxu1 %v10841_v40  ;;  %v74_v39 = vld [vmem:[%s14688_s0 + $0x1e0] sm:$0xff] }
 0x309   :  { %v10920_v40 = vld [vmem:[%s14687_s1 + $0x1a00] ss:$16 sps:$4 sm:$0xff]   ;;  %v10928_v44 = vld [vmem:[%s14687_s1 + $0x1a24] ss:$16 sps:$4 sm:$0xff]  }
 0x30a   :  { %7190 = vmatmul.mubr.bf16.gmra.mrb[4].mxu0 %v8382_v42  ;;  %8038 = vmatmul.mubr.bf16.gmra.mrb[4].mxu1 %v8382_v42  ;;  %v10923_v42 = vld [vmem:[%s14687_s1 + $0x1a08] ss:$16 sps:$4 sm:$0xff]  }
 0x30b   :  { %7205 = vmatpush1.bf16.msra.mxu0 %v10836_v43  ;;  %8053 = vmatpush1.bf16.msra.mxu1 %v10839_v45  ;;  %v8385_v43 = vcombine.high %v58_v38, %v74_v39  ;;  %v10926_v45 = vld [vmem:[%s14687_s1 + $0x1a20] ss:$16 sps:$4 sm:$0xff]  }
 0x30c   :  { %7206 = vmatprep.subr.bf16.mxu0 %v10844_v46  ;;  %8054 = vmatprep.subr.bf16.mxu1 %v10847_v47  ;;  %v10929_v46 = vld [vmem:[%s14687_s1 + $0x1a28] ss:$16 sps:$4 sm:$0xff]   ;;  %v10934_v47 = vld [vmem:[%s14687_s1 + $0x1a44] ss:$16 sps:$4 sm:$0xff]  }
 0x30d   :  { %7232 = vmatprep.mubr.bf16.mxu0 %v8353_v48  ;;  %8080 = vmatprep.mubr.bf16.mxu1 %v8353_v48  ;;  %v10937_v48 = vld [vmem:[%s14687_s1 + $0x1a4c] ss:$16 sps:$4 sm:$0xff]  }
 0x30f   :  { %7207 = vmatpush1.bf16.msra.mxu0 %v10842_v51  ;;  %8055 = vmatpush1.bf16.msra.mxu1 %v10845_v52  ;;  %v8384_v51 = vcombine.low %v58_v38, %v74_v39  ;;  %v14009_v52 = vld [vmem:[%s14688_s0 + $0x68] sm:$0xff]  ;;  %v11012_v39 = vld [vmem:[%s14687_s1 + $0x1be4] ss:$16 sps:$4 sm:$0xff]  }
 0x310   :  { %7208 = vmatprep.subr.bf16.mxu0 %v10850_v49  ;;  %8056 = vmatprep.subr.bf16.mxu1 %v10853_v50  ;;  %v14014_v49 = vld [vmem:[%s14688_s0 + $0xe8] sm:$0xff]  ;;  %v10932_v50 = vld [vmem:[%s14687_s1 + $0x1a40] ss:$16 sps:$4 sm:$0xff]  }
 0x311   :  { %v11007_v38 = vld [vmem:[%s14687_s1 + $0x1bc8] ss:$16 sps:$4 sm:$0xff]  }
 0x313   :  { %7209 = vmatpush1.bf16.msra.mxu0 %v10848_v53  ;;  %8057 = vmatpush1.bf16.msra.mxu1 %v10851_v54  ;;  %v10935_v53 = vld [vmem:[%s14687_s1 + $0x1a48] ss:$16 sps:$4 sm:$0xff]   ;;  %v10940_v54 = vld [vmem:[%s14687_s1 + $0x1a64] ss:$16 sps:$4 sm:$0xff]  }
 0x314   :  { %7210 = vmatprep.subr.bf16.mxu0 %v10856_v55  ;;  %8058 = vmatprep.subr.bf16.mxu1 %v10859_v56  ;;  %v10943_v55 = vld [vmem:[%s14687_s1 + $0x1a6c] ss:$16 sps:$4 sm:$0xff]   ;;  %v8355_v56 = vcombine.high %v14009_v52, %v14014_v49 }
 0x317   :  { %7211 = vmatpush1.bf16.msra.mxu0 %v10854_v59  ;;  %8059 = vmatpush1.bf16.msra.mxu1 %v10857_v60  ;;  %v10938_v59 = vld [vmem:[%s14687_s1 + $0x1a60] ss:$16 sps:$4 sm:$0xff]   ;;  %v10941_v60 = vld [vmem:[%s14687_s1 + $0x1a68] ss:$16 sps:$4 sm:$0xff]  }
 0x318   :  { %7212 = vmatprep.subr.bf16.mxu0 %v10862_v57  ;;  %8060 = vmatprep.subr.bf16.mxu1 %v10865_v58  ;;  %v10946_v57 = vld [vmem:[%s14687_s1 + $0x1a84] ss:$16 sps:$4 sm:$0xff]   ;;  %v10949_v58 = vld [vmem:[%s14687_s1 + $0x1a8c] ss:$16 sps:$4 sm:$0xff]  }
 0x31b   :  { %7213 = vmatpush1.bf16.msra.mxu0 %v10860_v61  ;;  %8061 = vmatpush1.bf16.msra.mxu1 %v10863_v62  ;;  %v10944_v61 = vld [vmem:[%s14687_s1 + $0x1a80] ss:$16 sps:$4 sm:$0xff]   ;;  %v10947_v62 = vld [vmem:[%s14687_s1 + $0x1a88] ss:$16 sps:$4 sm:$0xff]  }
 0x31c   :  { %7214 = vmatprep.subr.bf16.mxu0 %v10868_v63  ;;  %8062 = vmatprep.subr.bf16.mxu1 %v10871_v0  ;;  %v10952_v63 = vld [vmem:[%s14687_s1 + $0x1aa4] ss:$16 sps:$4 sm:$0xff]   ;;  %v10955_v0 = vld [vmem:[%s14687_s1 + $0x1aac] ss:$16 sps:$4 sm:$0xff]  }
 0x31f   :  { %7215 = vmatpush1.bf16.msra.mxu0 %v10866_v3  ;;  %8063 = vmatpush1.bf16.msra.mxu1 %v10869_v4  ;;  %v10950_v3 = vld [vmem:[%s14687_s1 + $0x1aa0] ss:$16 sps:$4 sm:$0xff]   ;;  %v10953_v4 = vld [vmem:[%s14687_s1 + $0x1aa8] ss:$16 sps:$4 sm:$0xff]  }
 0x320   :  { %7216 = vmatprep.subr.bf16.mxu0 %v10874_v1  ;;  %8064 = vmatprep.subr.bf16.mxu1 %v10877_v2  ;;  %v10958_v1 = vld [vmem:[%s14687_s1 + $0x1ac4] ss:$16 sps:$4 sm:$0xff]   ;;  %v10961_v2 = vld [vmem:[%s14687_s1 + $0x1acc] ss:$16 sps:$4 sm:$0xff]  }
 0x323   :  { %7217 = vmatpush1.bf16.msra.mxu0 %v10872_v5  ;;  %8065 = vmatpush1.bf16.msra.mxu1 %v10875_v6  ;;  %v10956_v5 = vld [vmem:[%s14687_s1 + $0x1ac0] ss:$16 sps:$4 sm:$0xff]   ;;  %v10959_v6 = vld [vmem:[%s14687_s1 + $0x1ac8] ss:$16 sps:$4 sm:$0xff]  }
 0x324   :  { %7218 = vmatprep.subr.bf16.mxu0 %v10880_v7  ;;  %8066 = vmatprep.subr.bf16.mxu1 %v10883_v8  ;;  %v10964_v7 = vld [vmem:[%s14687_s1 + $0x1ae4] ss:$16 sps:$4 sm:$0xff]   ;;  %v10967_v8 = vld [vmem:[%s14687_s1 + $0x1aec] ss:$16 sps:$4 sm:$0xff]  }
 0x327   :  { %7219 = vmatpush1.bf16.msra.mxu0 %v10878_v11  ;;  %8067 = vmatpush1.bf16.msra.mxu1 %v10881_v12  ;;  %v10962_v11 = vld [vmem:[%s14687_s1 + $0x1ae0] ss:$16 sps:$4 sm:$0xff]   ;;  %v10965_v12 = vld [vmem:[%s14687_s1 + $0x1ae8] ss:$16 sps:$4 sm:$0xff]  }
 0x328   :  { %7220 = vmatprep.subr.bf16.mxu0 %v10886_v9  ;;  %8068 = vmatprep.subr.bf16.mxu1 %v10889_v10  ;;  %v10970_v9 = vld [vmem:[%s14687_s1 + $0x1b04] ss:$16 sps:$4 sm:$0xff]   ;;  %v10973_v10 = vld [vmem:[%s14687_s1 + $0x1b0c] ss:$16 sps:$4 sm:$0xff]  }
 0x32b   :  { %7221 = vmatpush1.bf16.msra.mxu0 %v10884_v13  ;;  %8069 = vmatpush1.bf16.msra.mxu1 %v10887_v14  ;;  %v10968_v13 = vld [vmem:[%s14687_s1 + $0x1b00] ss:$16 sps:$4 sm:$0xff]   ;;  %v10971_v14 = vld [vmem:[%s14687_s1 + $0x1b08] ss:$16 sps:$4 sm:$0xff]  }
 0x32c   :  { %7222 = vmatprep.subr.bf16.mxu0 %v10892_v15  ;;  %8070 = vmatprep.subr.bf16.mxu1 %v10895_v16  ;;  %v10976_v15 = vld [vmem:[%s14687_s1 + $0x1b24] ss:$16 sps:$4 sm:$0xff]   ;;  %v10979_v16 = vld [vmem:[%s14687_s1 + $0x1b2c] ss:$16 sps:$4 sm:$0xff]  }
 0x32f   :  { %7223 = vmatpush1.bf16.msra.mxu0 %v10890_v19  ;;  %8071 = vmatpush1.bf16.msra.mxu1 %v10893_v17  ;;  %v10974_v19 = vld [vmem:[%s14687_s1 + $0x1b20] ss:$16 sps:$4 sm:$0xff]   ;;  %v10977_v17 = vld [vmem:[%s14687_s1 + $0x1b28] ss:$16 sps:$4 sm:$0xff]  }
 0x330   :  { %7224 = vmatprep.subr.bf16.mxu0 %v10898_v18  ;;  %8072 = vmatprep.subr.bf16.mxu1 %v10901_v20  ;;  %v10982_v18 = vld [vmem:[%s14687_s1 + $0x1b44] ss:$16 sps:$4 sm:$0xff]   ;;  %v10985_v20 = vld [vmem:[%s14687_s1 + $0x1b4c] ss:$16 sps:$4 sm:$0xff]  }
 0x333   :  { %7225 = vmatpush1.bf16.msra.mxu0 %v10896_v21  ;;  %8073 = vmatpush1.bf16.msra.mxu1 %v10899_v22  ;;  %v10980_v21 = vld [vmem:[%s14687_s1 + $0x1b40] ss:$16 sps:$4 sm:$0xff]   ;;  %v10983_v22 = vld [vmem:[%s14687_s1 + $0x1b48] ss:$16 sps:$4 sm:$0xff]  }
 0x334   :  { %7226 = vmatprep.subr.bf16.mxu0 %v10904_v23  ;;  %8074 = vmatprep.subr.bf16.mxu1 %v10907_v24  ;;  %v10988_v23 = vld [vmem:[%s14687_s1 + $0x1b64] ss:$16 sps:$4 sm:$0xff]   ;;  %v10991_v24 = vld [vmem:[%s14687_s1 + $0x1b6c] ss:$16 sps:$4 sm:$0xff]  }
 0x337   :  { %7227 = vmatpush1.bf16.msra.mxu0 %v10902_v26  ;;  %8075 = vmatpush1.bf16.msra.mxu1 %v10905_v25  ;;  %v10986_v26 = vld [vmem:[%s14687_s1 + $0x1b60] ss:$16 sps:$4 sm:$0xff]   ;;  %v10989_v25 = vld [vmem:[%s14687_s1 + $0x1b68] ss:$16 sps:$4 sm:$0xff]  }
 0x338   :  { %7228 = vmatprep.subr.bf16.mxu0 %v10910_v27  ;;  %8076 = vmatprep.subr.bf16.mxu1 %v10913_v28  ;;  %v10994_v27 = vld [vmem:[%s14687_s1 + $0x1b84] ss:$16 sps:$4 sm:$0xff]   ;;  %v10997_v28 = vld [vmem:[%s14687_s1 + $0x1b8c] ss:$16 sps:$4 sm:$0xff]  }
 0x33b   :  { %7229 = vmatpush1.bf16.msra.mxu0 %v10908_v29  ;;  %8077 = vmatpush1.bf16.msra.mxu1 %v10911_v30  ;;  %v10992_v29 = vld [vmem:[%s14687_s1 + $0x1b80] ss:$16 sps:$4 sm:$0xff]   ;;  %v10995_v30 = vld [vmem:[%s14687_s1 + $0x1b88] ss:$16 sps:$4 sm:$0xff]  }
 0x33c   :  { %7230 = vmatprep.subr.bf16.mxu0 %v10916_v31  ;;  %8078 = vmatprep.subr.bf16.mxu1 %v10919_v32  ;;  %v11000_v31 = vld [vmem:[%s14687_s1 + $0x1ba4] ss:$16 sps:$4 sm:$0xff]   ;;  %v11003_v32 = vld [vmem:[%s14687_s1 + $0x1bac] ss:$16 sps:$4 sm:$0xff]  }
 0x33f   :  { %7231 = vmatpush1.bf16.msra.mxu0 %v10914_v34  ;;  %8079 = vmatpush1.bf16.msra.mxu1 %v10917_v36  ;;  %v10998_v34 = vld [vmem:[%s14687_s1 + $0x1ba0] ss:$16 sps:$4 sm:$0xff]   ;;  %v11001_v36 = vld [vmem:[%s14687_s1 + $0x1ba8] ss:$16 sps:$4 sm:$0xff]  }
 0x340   :  { %7253 = vmatprep.subr.bf16.mxu0 %v10922_v33  ;;  %8101 = vmatprep.subr.bf16.mxu1 %v10925_v35  ;;  %v11006_v33 = vld [vmem:[%s14687_s1 + $0x1bc4] ss:$16 sps:$4 sm:$0xff]   ;;  %v11009_v35 = vld [vmem:[%s14687_s1 + $0x1bcc] ss:$16 sps:$4 sm:$0xff]  }
 0x342   :  { %7233 = vmatmul.mubr.bf16.vlgmr.msra.gmra.mrb[0].mxu0 %v8352_v37  ;;  %8081 = vmatmul.mubr.bf16.vlgmr.msra.gmra.mrb[0].mxu1 %v8352_v37  ;;  %v11004_v37 = vld [vmem:[%s14687_s1 + $0x1bc0] ss:$16 sps:$4 sm:$0xff]  }
 0x343   :  { %7254 = vmatpush1.bf16.msra.mxu0 %v10920_v40  ;;  %8102 = vmatpush1.bf16.msra.mxu1 %v10923_v42  ;;  %v11015_v40 = vld [vmem:[%s14687_s1 + $0x1bec] ss:$16 sps:$4 sm:$0xff]   ;;  %v11010_v42 = vld [vmem:[%s14687_s1 + $0x1be0] ss:$16 sps:$4 sm:$0xff]  }
 0x344   :  { %7255 = vmatprep.subr.bf16.mxu0 %v10928_v44  ;;  %8103 = vmatprep.subr.bf16.mxu1 %v10931_v41  ;;  %v11013_v44 = vld [vmem:[%s14687_s1 + $0x1be8] ss:$16 sps:$4 sm:$0xff]   ;;  %v11018_v41 = vld [vmem:[%s14687_s1 + $0x1c04] ss:$16 sps:$4 sm:$0xff]  }
 0x345   :  { %7242 = vmatprep.mubr.bf16.mxu0 %v8385_v43  ;;  %8090 = vmatprep.mubr.bf16.mxu1 %v8385_v43  ;;  %v11021_v43 = vld [vmem:[%s14687_s1 + $0x1c0c] ss:$16 sps:$4 sm:$0xff]  }
 0x347   :  { %7256 = vmatpush1.bf16.msra.mxu0 %v10926_v45  ;;  %8104 = vmatpush1.bf16.msra.mxu1 %v10929_v46  ;;  %v8354_v45 = vcombine.low %v14009_v52, %v14014_v49  ;;  %v59_v46 = vld [vmem:[%s14688_s0 + $0x168] sm:$0xff]  ;;  %v11024_v52 = vld [vmem:[%s14687_s1 + $0x1c24] ss:$16 sps:$4 sm:$0xff]  }
 0x348   :  { %7257 = vmatprep.subr.bf16.mxu0 %v10934_v47  ;;  %8105 = vmatprep.subr.bf16.mxu1 %v10937_v48  ;;  %v75_v47 = vld [vmem:[%s14688_s0 + $0x1e8] sm:$0xff]  ;;  %v11016_v48 = vld [vmem:[%s14687_s1 + $0x1c00] ss:$16 sps:$4 sm:$0xff]  }
 0x349   :  { %v11027_v49 = vld [vmem:[%s14687_s1 + $0x1c2c] ss:$16 sps:$4 sm:$0xff]  }
 0x34a   :  { %7243 = vmatmul.mubr.bf16.gmra.mrb[4].mxu0 %v8384_v51  ;;  %8091 = vmatmul.mubr.bf16.gmra.mrb[4].mxu1 %v8384_v51  ;;  %v11019_v51 = vld [vmem:[%s14687_s1 + $0x1c08] ss:$16 sps:$4 sm:$0xff]  }
 0x34b   :  { %7258 = vmatpush1.bf16.msra.mxu0 %v10932_v50  ;;  %8106 = vmatpush1.bf16.msra.mxu1 %v10935_v53  ;;  %v8387_v50 = vcombine.high %v59_v46, %v75_v47  ;;  %v11022_v53 = vld [vmem:[%s14687_s1 + $0x1c20] ss:$16 sps:$4 sm:$0xff]  }
 0x34c   :  { %7259 = vmatprep.subr.bf16.mxu0 %v10940_v54  ;;  %8107 = vmatprep.subr.bf16.mxu1 %v10943_v55  ;;  %v11025_v54 = vld [vmem:[%s14687_s1 + $0x1c28] ss:$16 sps:$4 sm:$0xff]   ;;  %v11030_v55 = vld [vmem:[%s14687_s1 + $0x1c44] ss:$16 sps:$4 sm:$0xff]  }
 0x34d   :  { %7285 = vmatprep.mubr.bf16.mxu0 %v8355_v56  ;;  %8133 = vmatprep.mubr.bf16.mxu1 %v8355_v56  ;;  %v11033_v56 = vld [vmem:[%s14687_s1 + $0x1c4c] ss:$16 sps:$4 sm:$0xff]  }
 0x34f   :  { %7260 = vmatpush1.bf16.msra.mxu0 %v10938_v59  ;;  %8108 = vmatpush1.bf16.msra.mxu1 %v10941_v60  ;;  %v8386_v59 = vcombine.low %v59_v46, %v75_v47  ;;  %v14221_v60 = vld [vmem:[%s14688_s0 + $0x70] sm:$0xff]  ;;  %v11103_v46 = vld [vmem:[%s14687_s1 + $0x1dc8] ss:$16 sps:$4 sm:$0xff]  }
 0x350   :  { %7261 = vmatprep.subr.bf16.mxu0 %v10946_v57  ;;  %8109 = vmatprep.subr.bf16.mxu1 %v10949_v58  ;;  %v14226_v57 = vld [vmem:[%s14688_s0 + $0xf0] sm:$0xff] }
 0x351   :  { %v11028_v58 = vld [vmem:[%s14687_s1 + $0x1c40] ss:$16 sps:$4 sm:$0xff]   ;;  %v11108_v47 = vld [vmem:[%s14687_s1 + $0x1de4] ss:$16 sps:$4 sm:$0xff]  }
 0x353   :  { %7262 = vmatpush1.bf16.msra.mxu0 %v10944_v61  ;;  %8110 = vmatpush1.bf16.msra.mxu1 %v10947_v62  ;;  %v11031_v61 = vld [vmem:[%s14687_s1 + $0x1c48] ss:$16 sps:$4 sm:$0xff]   ;;  %v11036_v62 = vld [vmem:[%s14687_s1 + $0x1c64] ss:$16 sps:$4 sm:$0xff]  }
 0x354   :  { %7263 = vmatprep.subr.bf16.mxu0 %v10952_v63  ;;  %8111 = vmatprep.subr.bf16.mxu1 %v10955_v0  ;;  %v11039_v63 = vld [vmem:[%s14687_s1 + $0x1c6c] ss:$16 sps:$4 sm:$0xff]   ;;  %v8357_v0 = vcombine.high %v14221_v60, %v14226_v57 }
 0x357   :  { %7264 = vmatpush1.bf16.msra.mxu0 %v10950_v3  ;;  %8112 = vmatpush1.bf16.msra.mxu1 %v10953_v4  ;;  %v11034_v3 = vld [vmem:[%s14687_s1 + $0x1c60] ss:$16 sps:$4 sm:$0xff]   ;;  %v11037_v4 = vld [vmem:[%s14687_s1 + $0x1c68] ss:$16 sps:$4 sm:$0xff]  }
 0x358   :  { %7265 = vmatprep.subr.bf16.mxu0 %v10958_v1  ;;  %8113 = vmatprep.subr.bf16.mxu1 %v10961_v2  ;;  %v11042_v1 = vld [vmem:[%s14687_s1 + $0x1c84] ss:$16 sps:$4 sm:$0xff]   ;;  %v11045_v2 = vld [vmem:[%s14687_s1 + $0x1c8c] ss:$16 sps:$4 sm:$0xff]  }
 0x35b   :  { %7266 = vmatpush1.bf16.msra.mxu0 %v10956_v5  ;;  %8114 = vmatpush1.bf16.msra.mxu1 %v10959_v6  ;;  %v11040_v5 = vld [vmem:[%s14687_s1 + $0x1c80] ss:$16 sps:$4 sm:$0xff]   ;;  %v11043_v6 = vld [vmem:[%s14687_s1 + $0x1c88] ss:$16 sps:$4 sm:$0xff]  }
 0x35c   :  { %7267 = vmatprep.subr.bf16.mxu0 %v10964_v7  ;;  %8115 = vmatprep.subr.bf16.mxu1 %v10967_v8  ;;  %v11048_v7 = vld [vmem:[%s14687_s1 + $0x1ca4] ss:$16 sps:$4 sm:$0xff]   ;;  %v11051_v8 = vld [vmem:[%s14687_s1 + $0x1cac] ss:$16 sps:$4 sm:$0xff]  }
 0x35f   :  { %7268 = vmatpush1.bf16.msra.mxu0 %v10962_v11  ;;  %8116 = vmatpush1.bf16.msra.mxu1 %v10965_v12  ;;  %v11046_v11 = vld [vmem:[%s14687_s1 + $0x1ca0] ss:$16 sps:$4 sm:$0xff]   ;;  %v11049_v12 = vld [vmem:[%s14687_s1 + $0x1ca8] ss:$16 sps:$4 sm:$0xff]  }
 0x360   :  { %7269 = vmatprep.subr.bf16.mxu0 %v10970_v9  ;;  %8117 = vmatprep.subr.bf16.mxu1 %v10973_v10  ;;  %v11054_v9 = vld [vmem:[%s14687_s1 + $0x1cc4] ss:$16 sps:$4 sm:$0xff]   ;;  %v11057_v10 = vld [vmem:[%s14687_s1 + $0x1ccc] ss:$16 sps:$4 sm:$0xff]  }
 0x363   :  { %7270 = vmatpush1.bf16.msra.mxu0 %v10968_v13  ;;  %8118 = vmatpush1.bf16.msra.mxu1 %v10971_v14  ;;  %v11052_v13 = vld [vmem:[%s14687_s1 + $0x1cc0] ss:$16 sps:$4 sm:$0xff]   ;;  %v11055_v14 = vld [vmem:[%s14687_s1 + $0x1cc8] ss:$16 sps:$4 sm:$0xff]  }
 0x364   :  { %7271 = vmatprep.subr.bf16.mxu0 %v10976_v15  ;;  %8119 = vmatprep.subr.bf16.mxu1 %v10979_v16  ;;  %v11060_v15 = vld [vmem:[%s14687_s1 + $0x1ce4] ss:$16 sps:$4 sm:$0xff]   ;;  %v11063_v16 = vld [vmem:[%s14687_s1 + $0x1cec] ss:$16 sps:$4 sm:$0xff]  }
 0x367   :  { %7272 = vmatpush1.bf16.msra.mxu0 %v10974_v19  ;;  %8120 = vmatpush1.bf16.msra.mxu1 %v10977_v17  ;;  %v11058_v19 = vld [vmem:[%s14687_s1 + $0x1ce0] ss:$16 sps:$4 sm:$0xff]   ;;  %v11061_v17 = vld [vmem:[%s14687_s1 + $0x1ce8] ss:$16 sps:$4 sm:$0xff]  }
 0x368   :  { %7273 = vmatprep.subr.bf16.mxu0 %v10982_v18  ;;  %8121 = vmatprep.subr.bf16.mxu1 %v10985_v20  ;;  %v11066_v18 = vld [vmem:[%s14687_s1 + $0x1d04] ss:$16 sps:$4 sm:$0xff]   ;;  %v11069_v20 = vld [vmem:[%s14687_s1 + $0x1d0c] ss:$16 sps:$4 sm:$0xff]  }
 0x36b   :  { %7274 = vmatpush1.bf16.msra.mxu0 %v10980_v21  ;;  %8122 = vmatpush1.bf16.msra.mxu1 %v10983_v22  ;;  %v11064_v21 = vld [vmem:[%s14687_s1 + $0x1d00] ss:$16 sps:$4 sm:$0xff]   ;;  %v11067_v22 = vld [vmem:[%s14687_s1 + $0x1d08] ss:$16 sps:$4 sm:$0xff]  }
 0x36c   :  { %7275 = vmatprep.subr.bf16.mxu0 %v10988_v23  ;;  %8123 = vmatprep.subr.bf16.mxu1 %v10991_v24  ;;  %v11072_v23 = vld [vmem:[%s14687_s1 + $0x1d24] ss:$16 sps:$4 sm:$0xff]   ;;  %v11075_v24 = vld [vmem:[%s14687_s1 + $0x1d2c] ss:$16 sps:$4 sm:$0xff]  }
 0x36f   :  { %7276 = vmatpush1.bf16.msra.mxu0 %v10986_v26  ;;  %8124 = vmatpush1.bf16.msra.mxu1 %v10989_v25  ;;  %v11070_v26 = vld [vmem:[%s14687_s1 + $0x1d20] ss:$16 sps:$4 sm:$0xff]   ;;  %v11073_v25 = vld [vmem:[%s14687_s1 + $0x1d28] ss:$16 sps:$4 sm:$0xff]  }
 0x370   :  { %7277 = vmatprep.subr.bf16.mxu0 %v10994_v27  ;;  %8125 = vmatprep.subr.bf16.mxu1 %v10997_v28  ;;  %v11078_v27 = vld [vmem:[%s14687_s1 + $0x1d44] ss:$16 sps:$4 sm:$0xff]   ;;  %v11081_v28 = vld [vmem:[%s14687_s1 + $0x1d4c] ss:$16 sps:$4 sm:$0xff]  }
 0x373   :  { %7278 = vmatpush1.bf16.msra.mxu0 %v10992_v29  ;;  %8126 = vmatpush1.bf16.msra.mxu1 %v10995_v30  ;;  %v11076_v29 = vld [vmem:[%s14687_s1 + $0x1d40] ss:$16 sps:$4 sm:$0xff]   ;;  %v11079_v30 = vld [vmem:[%s14687_s1 + $0x1d48] ss:$16 sps:$4 sm:$0xff]  }
 0x374   :  { %7279 = vmatprep.subr.bf16.mxu0 %v11000_v31  ;;  %8127 = vmatprep.subr.bf16.mxu1 %v11003_v32  ;;  %v11084_v31 = vld [vmem:[%s14687_s1 + $0x1d64] ss:$16 sps:$4 sm:$0xff]   ;;  %v11087_v32 = vld [vmem:[%s14687_s1 + $0x1d6c] ss:$16 sps:$4 sm:$0xff]  }
 0x377   :  { %7280 = vmatpush1.bf16.msra.mxu0 %v10998_v34  ;;  %8128 = vmatpush1.bf16.msra.mxu1 %v11001_v36  ;;  %v11082_v34 = vld [vmem:[%s14687_s1 + $0x1d60] ss:$16 sps:$4 sm:$0xff]   ;;  %v11085_v36 = vld [vmem:[%s14687_s1 + $0x1d68] ss:$16 sps:$4 sm:$0xff]  }
 0x378   :  { %7281 = vmatprep.subr.bf16.mxu0 %v11006_v33  ;;  %8129 = vmatprep.subr.bf16.mxu1 %v11009_v35  ;;  %v11090_v33 = vld [vmem:[%s14687_s1 + $0x1d84] ss:$16 sps:$4 sm:$0xff]   ;;  %v11093_v35 = vld [vmem:[%s14687_s1 + $0x1d8c] ss:$16 sps:$4 sm:$0xff]  }
 0x37b   :  { %7282 = vmatpush1.bf16.msra.mxu0 %v11004_v37  ;;  %8130 = vmatpush1.bf16.msra.mxu1 %v11007_v38  ;;  %v11088_v37 = vld [vmem:[%s14687_s1 + $0x1d80] ss:$16 sps:$4 sm:$0xff]   ;;  %v11091_v38 = vld [vmem:[%s14687_s1 + $0x1d88] ss:$16 sps:$4 sm:$0xff]  }
 0x37c   :  { %7283 = vmatprep.subr.bf16.mxu0 %v11012_v39  ;;  %8131 = vmatprep.subr.bf16.mxu1 %v11015_v40  ;;  %v11096_v39 = vld [vmem:[%s14687_s1 + $0x1da4] ss:$16 sps:$4 sm:$0xff]   ;;  %v11099_v40 = vld [vmem:[%s14687_s1 + $0x1dac] ss:$16 sps:$4 sm:$0xff]  }
 0x37f   :  { %7284 = vmatpush1.bf16.msra.mxu0 %v11010_v42  ;;  %8132 = vmatpush1.bf16.msra.mxu1 %v11013_v44  ;;  %v11094_v42 = vld [vmem:[%s14687_s1 + $0x1da0] ss:$16 sps:$4 sm:$0xff]   ;;  %v11097_v44 = vld [vmem:[%s14687_s1 + $0x1da8] ss:$16 sps:$4 sm:$0xff]  }
 0x380   :  { %7306 = vmatprep.subr.bf16.mxu0 %v11018_v41  ;;  %8154 = vmatprep.subr.bf16.mxu1 %v11021_v43  ;;  %v11102_v41 = vld [vmem:[%s14687_s1 + $0x1dc4] ss:$16 sps:$4 sm:$0xff]   ;;  %v11105_v43 = vld [vmem:[%s14687_s1 + $0x1dcc] ss:$16 sps:$4 sm:$0xff]  }
 0x382   :  { %7286 = vmatmul.mubr.bf16.vlgmr.msra.gmra.mrb[0].mxu0 %v8354_v45  ;;  %8134 = vmatmul.mubr.bf16.vlgmr.msra.gmra.mrb[0].mxu1 %v8354_v45  ;;  %v11100_v45 = vld [vmem:[%s14687_s1 + $0x1dc0] ss:$16 sps:$4 sm:$0xff]  }
 0x383   :  { %7307 = vmatpush1.bf16.msra.mxu0 %v11016_v48  ;;  %8155 = vmatpush1.bf16.msra.mxu1 %v11019_v51  ;;  %v11111_v48 = vld [vmem:[%s14687_s1 + $0x1dec] ss:$16 sps:$4 sm:$0xff]   ;;  %v11106_v51 = vld [vmem:[%s14687_s1 + $0x1de0] ss:$16 sps:$4 sm:$0xff]  }
 0x384   :  { %7308 = vmatprep.subr.bf16.mxu0 %v11024_v52  ;;  %8156 = vmatprep.subr.bf16.mxu1 %v11027_v49  ;;  %v11109_v52 = vld [vmem:[%s14687_s1 + $0x1de8] ss:$16 sps:$4 sm:$0xff]   ;;  %v11114_v49 = vld [vmem:[%s14687_s1 + $0x1e04] ss:$16 sps:$4 sm:$0xff]  }
 0x385   :  { %7295 = vmatprep.mubr.bf16.mxu0 %v8387_v50  ;;  %8143 = vmatprep.mubr.bf16.mxu1 %v8387_v50  ;;  %v11117_v50 = vld [vmem:[%s14687_s1 + $0x1e0c] ss:$16 sps:$4 sm:$0xff]  }
 0x387   :  { %7309 = vmatpush1.bf16.msra.mxu0 %v11022_v53  ;;  %8157 = vmatpush1.bf16.msra.mxu1 %v11025_v54  ;;  %v8356_v53 = vcombine.low %v14221_v60, %v14226_v57  ;;  %v60_v54 = vld [vmem:[%s14688_s0 + $0x170] sm:$0xff]  ;;  %v11123_v57 = vld [vmem:[%s14687_s1 + $0x1e2c] ss:$16 sps:$4 sm:$0xff]  }
 0x388   :  { %7310 = vmatprep.subr.bf16.mxu0 %v11030_v55  ;;  %8158 = vmatprep.subr.bf16.mxu1 %v11033_v56  ;;  %v76_v55 = vld [vmem:[%s14688_s0 + $0x1f0] sm:$0xff] }
 0x389   :  { %v11112_v56 = vld [vmem:[%s14687_s1 + $0x1e00] ss:$16 sps:$4 sm:$0xff]   ;;  %v11120_v60 = vld [vmem:[%s14687_s1 + $0x1e24] ss:$16 sps:$4 sm:$0xff]  }
 0x38a   :  { %7296 = vmatmul.mubr.bf16.gmra.mrb[4].mxu0 %v8386_v59  ;;  %8144 = vmatmul.mubr.bf16.gmra.mrb[4].mxu1 %v8386_v59  ;;  %v11115_v59 = vld [vmem:[%s14687_s1 + $0x1e08] ss:$16 sps:$4 sm:$0xff]  }
 0x38b   :  { %7311 = vmatpush1.bf16.msra.mxu0 %v11028_v58  ;;  %8159 = vmatpush1.bf16.msra.mxu1 %v11031_v61  ;;  %v8389_v58 = vcombine.high %v60_v54, %v76_v55  ;;  %v11118_v61 = vld [vmem:[%s14687_s1 + $0x1e20] ss:$16 sps:$4 sm:$0xff]  }
 0x38c   :  { %7312 = vmatprep.subr.bf16.mxu0 %v11036_v62  ;;  %8160 = vmatprep.subr.bf16.mxu1 %v11039_v63  ;;  %v11121_v62 = vld [vmem:[%s14687_s1 + $0x1e28] ss:$16 sps:$4 sm:$0xff]   ;;  %v11126_v63 = vld [vmem:[%s14687_s1 + $0x1e44] ss:$16 sps:$4 sm:$0xff]  }
 0x38d   :  { %7338 = vmatprep.mubr.bf16.mxu0 %v8357_v0  ;;  %8186 = vmatprep.mubr.bf16.mxu1 %v8357_v0  ;;  %v11129_v0 = vld [vmem:[%s14687_s1 + $0x1e4c] ss:$16 sps:$4 sm:$0xff]  }
 0x38f   :  { %7313 = vmatpush1.bf16.msra.mxu0 %v11034_v3  ;;  %8161 = vmatpush1.bf16.msra.mxu1 %v11037_v4  ;;  %v8388_v3 = vcombine.low %v60_v54, %v76_v55  ;;  %v14433_v4 = vld [vmem:[%s14688_s0 + $0x78] sm:$0xff]  ;;  %v11204_v55 = vld [vmem:[%s14687_s1 + $0x1fe4] ss:$16 sps:$4 sm:$0xff]  }
 0x390   :  { %7314 = vmatprep.subr.bf16.mxu0 %v11042_v1  ;;  %8162 = vmatprep.subr.bf16.mxu1 %v11045_v2  ;;  %v14438_v1 = vld [vmem:[%s14688_s0 + $0xf8] sm:$0xff]  ;;  %v11124_v2 = vld [vmem:[%s14687_s1 + $0x1e40] ss:$16 sps:$4 sm:$0xff]  }
 0x391   :  { %v11199_v54 = vld [vmem:[%s14687_s1 + $0x1fc8] ss:$16 sps:$4 sm:$0xff]  }
 0x393   :  { %7315 = vmatpush1.bf16.msra.mxu0 %v11040_v5  ;;  %8163 = vmatpush1.bf16.msra.mxu1 %v11043_v6  ;;  %v11127_v5 = vld [vmem:[%s14687_s1 + $0x1e48] ss:$16 sps:$4 sm:$0xff]   ;;  %v11132_v6 = vld [vmem:[%s14687_s1 + $0x1e64] ss:$16 sps:$4 sm:$0xff]  }
 0x394   :  { %7316 = vmatprep.subr.bf16.mxu0 %v11048_v7  ;;  %8164 = vmatprep.subr.bf16.mxu1 %v11051_v8  ;;  %v11135_v7 = vld [vmem:[%s14687_s1 + $0x1e6c] ss:$16 sps:$4 sm:$0xff]   ;;  %v8359_v8 = vcombine.high %v14433_v4, %v14438_v1 }
 0x397   :  { %7317 = vmatpush1.bf16.msra.mxu0 %v11046_v11  ;;  %8165 = vmatpush1.bf16.msra.mxu1 %v11049_v12  ;;  %v11130_v11 = vld [vmem:[%s14687_s1 + $0x1e60] ss:$16 sps:$4 sm:$0xff]   ;;  %v11133_v12 = vld [vmem:[%s14687_s1 + $0x1e68] ss:$16 sps:$4 sm:$0xff]  }
 0x398   :  { %7318 = vmatprep.subr.bf16.mxu0 %v11054_v9  ;;  %8166 = vmatprep.subr.bf16.mxu1 %v11057_v10  ;;  %v11138_v9 = vld [vmem:[%s14687_s1 + $0x1e84] ss:$16 sps:$4 sm:$0xff]   ;;  %v11141_v10 = vld [vmem:[%s14687_s1 + $0x1e8c] ss:$16 sps:$4 sm:$0xff]  }
 0x39b   :  { %7319 = vmatpush1.bf16.msra.mxu0 %v11052_v13  ;;  %8167 = vmatpush1.bf16.msra.mxu1 %v11055_v14  ;;  %v11136_v13 = vld [vmem:[%s14687_s1 + $0x1e80] ss:$16 sps:$4 sm:$0xff]   ;;  %v11139_v14 = vld [vmem:[%s14687_s1 + $0x1e88] ss:$16 sps:$4 sm:$0xff]  }
 0x39c   :  { %7320 = vmatprep.subr.bf16.mxu0 %v11060_v15  ;;  %8168 = vmatprep.subr.bf16.mxu1 %v11063_v16  ;;  %v11144_v15 = vld [vmem:[%s14687_s1 + $0x1ea4] ss:$16 sps:$4 sm:$0xff]   ;;  %v11147_v16 = vld [vmem:[%s14687_s1 + $0x1eac] ss:$16 sps:$4 sm:$0xff]  }
 0x39f   :  { %7321 = vmatpush1.bf16.msra.mxu0 %v11058_v19  ;;  %8169 = vmatpush1.bf16.msra.mxu1 %v11061_v17  ;;  %v11142_v19 = vld [vmem:[%s14687_s1 + $0x1ea0] ss:$16 sps:$4 sm:$0xff]   ;;  %v11145_v17 = vld [vmem:[%s14687_s1 + $0x1ea8] ss:$16 sps:$4 sm:$0xff]  }
 0x3a0   :  { %7322 = vmatprep.subr.bf16.mxu0 %v11066_v18  ;;  %8170 = vmatprep.subr.bf16.mxu1 %v11069_v20  ;;  %v11150_v18 = vld [vmem:[%s14687_s1 + $0x1ec4] ss:$16 sps:$4 sm:$0xff]   ;;  %v11153_v20 = vld [vmem:[%s14687_s1 + $0x1ecc] ss:$16 sps:$4 sm:$0xff]  }
 0x3a3   :  { %7323 = vmatpush1.bf16.msra.mxu0 %v11064_v21  ;;  %8171 = vmatpush1.bf16.msra.mxu1 %v11067_v22  ;;  %v11148_v21 = vld [vmem:[%s14687_s1 + $0x1ec0] ss:$16 sps:$4 sm:$0xff]   ;;  %v11151_v22 = vld [vmem:[%s14687_s1 + $0x1ec8] ss:$16 sps:$4 sm:$0xff]  }
 0x3a4   :  { %7324 = vmatprep.subr.bf16.mxu0 %v11072_v23  ;;  %8172 = vmatprep.subr.bf16.mxu1 %v11075_v24  ;;  %v11156_v23 = vld [vmem:[%s14687_s1 + $0x1ee4] ss:$16 sps:$4 sm:$0xff]   ;;  %v11159_v24 = vld [vmem:[%s14687_s1 + $0x1eec] ss:$16 sps:$4 sm:$0xff]  }
 0x3a7   :  { %7325 = vmatpush1.bf16.msra.mxu0 %v11070_v26  ;;  %8173 = vmatpush1.bf16.msra.mxu1 %v11073_v25  ;;  %v11154_v26 = vld [vmem:[%s14687_s1 + $0x1ee0] ss:$16 sps:$4 sm:$0xff]   ;;  %v11157_v25 = vld [vmem:[%s14687_s1 + $0x1ee8] ss:$16 sps:$4 sm:$0xff]  }
 0x3a8   :  { %7326 = vmatprep.subr.bf16.mxu0 %v11078_v27  ;;  %8174 = vmatprep.subr.bf16.mxu1 %v11081_v28  ;;  %v11162_v27 = vld [vmem:[%s14687_s1 + $0x1f04] ss:$16 sps:$4 sm:$0xff]   ;;  %v11165_v28 = vld [vmem:[%s14687_s1 + $0x1f0c] ss:$16 sps:$4 sm:$0xff]  }
 0x3ab   :  { %7327 = vmatpush1.bf16.msra.mxu0 %v11076_v29  ;;  %8175 = vmatpush1.bf16.msra.mxu1 %v11079_v30  ;;  %v11160_v29 = vld [vmem:[%s14687_s1 + $0x1f00] ss:$16 sps:$4 sm:$0xff]   ;;  %v11163_v30 = vld [vmem:[%s14687_s1 + $0x1f08] ss:$16 sps:$4 sm:$0xff]  }
 0x3ac   :  { %7328 = vmatprep.subr.bf16.mxu0 %v11084_v31  ;;  %8176 = vmatprep.subr.bf16.mxu1 %v11087_v32  ;;  %v11168_v31 = vld [vmem:[%s14687_s1 + $0x1f24] ss:$16 sps:$4 sm:$0xff]   ;;  %v11171_v32 = vld [vmem:[%s14687_s1 + $0x1f2c] ss:$16 sps:$4 sm:$0xff]  }
 0x3af   :  { %7329 = vmatpush1.bf16.msra.mxu0 %v11082_v34  ;;  %8177 = vmatpush1.bf16.msra.mxu1 %v11085_v36  ;;  %v11166_v34 = vld [vmem:[%s14687_s1 + $0x1f20] ss:$16 sps:$4 sm:$0xff]   ;;  %v11169_v36 = vld [vmem:[%s14687_s1 + $0x1f28] ss:$16 sps:$4 sm:$0xff]  }
 0x3b0   :  { %7330 = vmatprep.subr.bf16.mxu0 %v11090_v33  ;;  %8178 = vmatprep.subr.bf16.mxu1 %v11093_v35  ;;  %v11174_v33 = vld [vmem:[%s14687_s1 + $0x1f44] ss:$16 sps:$4 sm:$0xff]   ;;  %v11177_v35 = vld [vmem:[%s14687_s1 + $0x1f4c] ss:$16 sps:$4 sm:$0xff]  }
 0x3b3   :  { %7331 = vmatpush1.bf16.msra.mxu0 %v11088_v37  ;;  %8179 = vmatpush1.bf16.msra.mxu1 %v11091_v38  ;;  %v11172_v37 = vld [vmem:[%s14687_s1 + $0x1f40] ss:$16 sps:$4 sm:$0xff]   ;;  %v11175_v38 = vld [vmem:[%s14687_s1 + $0x1f48] ss:$16 sps:$4 sm:$0xff]  }
 0x3b4   :  { %7332 = vmatprep.subr.bf16.mxu0 %v11096_v39  ;;  %8180 = vmatprep.subr.bf16.mxu1 %v11099_v40  ;;  %v11180_v39 = vld [vmem:[%s14687_s1 + $0x1f64] ss:$16 sps:$4 sm:$0xff]   ;;  %v11183_v40 = vld [vmem:[%s14687_s1 + $0x1f6c] ss:$16 sps:$4 sm:$0xff]  }
 0x3b7   :  { %7333 = vmatpush1.bf16.msra.mxu0 %v11094_v42  ;;  %8181 = vmatpush1.bf16.msra.mxu1 %v11097_v44  ;;  %v11178_v42 = vld [vmem:[%s14687_s1 + $0x1f60] ss:$16 sps:$4 sm:$0xff]   ;;  %v11181_v44 = vld [vmem:[%s14687_s1 + $0x1f68] ss:$16 sps:$4 sm:$0xff]  }
 0x3b8   :  { %7334 = vmatprep.subr.bf16.mxu0 %v11102_v41  ;;  %8182 = vmatprep.subr.bf16.mxu1 %v11105_v43  ;;  %v11186_v41 = vld [vmem:[%s14687_s1 + $0x1f84] ss:$16 sps:$4 sm:$0xff]   ;;  %v11189_v43 = vld [vmem:[%s14687_s1 + $0x1f8c] ss:$16 sps:$4 sm:$0xff]  }
 0x3bb   :  { %7335 = vmatpush1.bf16.msra.mxu0 %v11100_v45  ;;  %8183 = vmatpush1.bf16.msra.mxu1 %v11103_v46  ;;  %v11184_v45 = vld [vmem:[%s14687_s1 + $0x1f80] ss:$16 sps:$4 sm:$0xff]   ;;  %v11187_v46 = vld [vmem:[%s14687_s1 + $0x1f88] ss:$16 sps:$4 sm:$0xff]  }
 0x3bc   :  { %7336 = vmatprep.subr.bf16.mxu0 %v11108_v47  ;;  %8184 = vmatprep.subr.bf16.mxu1 %v11111_v48  ;;  %v11192_v47 = vld [vmem:[%s14687_s1 + $0x1fa4] ss:$16 sps:$4 sm:$0xff]   ;;  %v11195_v48 = vld [vmem:[%s14687_s1 + $0x1fac] ss:$16 sps:$4 sm:$0xff]  }
 0x3bf   :  { %7337 = vmatpush1.bf16.msra.mxu0 %v11106_v51  ;;  %8185 = vmatpush1.bf16.msra.mxu1 %v11109_v52  ;;  %v11190_v51 = vld [vmem:[%s14687_s1 + $0x1fa0] ss:$16 sps:$4 sm:$0xff]   ;;  %v11193_v52 = vld [vmem:[%s14687_s1 + $0x1fa8] ss:$16 sps:$4 sm:$0xff]  }
 0x3c0   :  { %7359 = vmatprep.subr.bf16.mxu0 %v11114_v49  ;;  %8207 = vmatprep.subr.bf16.mxu1 %v11117_v50  ;;  %v11198_v49 = vld [vmem:[%s14687_s1 + $0x1fc4] ss:$16 sps:$4 sm:$0xff]   ;;  %v11201_v50 = vld [vmem:[%s14687_s1 + $0x1fcc] ss:$16 sps:$4 sm:$0xff]  }
 0x3c2   :  { %7339 = vmatmul.mubr.bf16.vlgmr.msra.gmra.mrb[0].mxu0 %v8356_v53  ;;  %8187 = vmatmul.mubr.bf16.vlgmr.msra.gmra.mrb[0].mxu1 %v8356_v53  ;;  %v11196_v53 = vld [vmem:[%s14687_s1 + $0x1fc0] ss:$16 sps:$4 sm:$0xff]  }
 0x3c3   :  { %7360 = vmatpush1.bf16.msra.mxu0 %v11112_v56  ;;  %8208 = vmatpush1.bf16.msra.mxu1 %v11115_v59  ;;  %v11207_v56 = vld [vmem:[%s14687_s1 + $0x1fec] ss:$16 sps:$4 sm:$0xff]   ;;  %v11202_v59 = vld [vmem:[%s14687_s1 + $0x1fe0] ss:$16 sps:$4 sm:$0xff]  }
 0x3c4   :  { %7361 = vmatprep.subr.bf16.mxu0 %v11120_v60  ;;  %8209 = vmatprep.subr.bf16.mxu1 %v11123_v57  ;;  %v11205_v60 = vld [vmem:[%s14687_s1 + $0x1fe8] ss:$16 sps:$4 sm:$0xff]  }
 0x3c5   :  { %7348 = vmatprep.mubr.bf16.mxu0 %v8389_v58  ;;  %8196 = vmatprep.mubr.bf16.mxu1 %v8389_v58  ;;  %v61_v57 = vld [vmem:[%s14688_s0 + $0x178] sm:$0xff] }
 0x3c6   :  { %v77_v58 = vld [vmem:[%s14688_s0 + $0x1f8] sm:$0xff] }
 0x3c7   :  { %7362 = vmatpush1.bf16.msra.mxu0 %v11118_v61  ;;  %8210 = vmatpush1.bf16.msra.mxu1 %v11121_v62  ;;  %v8358_v61 = vcombine.low %v14433_v4, %v14438_v1  ;;  %v8391_v62 = vcombine.high %v61_v57, %v77_v58 }
 0x3c8   :  { %7363 = vmatprep.subr.bf16.mxu0 %v11126_v63  ;;  %8211 = vmatprep.subr.bf16.mxu1 %v11129_v0  ;;  %v8390_v63 = vcombine.low %v61_v57, %v77_v58  ;;  %v1104_v0 = vlaneseq }
 0x3ca   :  { %7349 = vmatmul.mubr.bf16.gmra.mrb[4].mxu0 %v8388_v3  ;;  %8197 = vmatmul.mubr.bf16.gmra.mrb[4].mxu1 %v8388_v3  ;;  %v1105_v3 = vshrl.u32 %v1104_v0, 7 }
 0x3cb   :  { %7364 = vmatpush1.bf16.msra.mxu0 %v11124_v2  ;;  %8212 = vmatpush1.bf16.msra.mxu1 %v11127_v5 }
 0x3cc   :  { %7365 = vmatprep.subr.bf16.mxu0 %v11132_v6  ;;  %8213 = vmatprep.subr.bf16.mxu1 %v11135_v7  ;;  %v1106_v2 = vsub.s32 0, %v1105_v3  ;;  %v1114_v5 = vsub.s32 2, %v1105_v3  ;;  %v1102_v6 = vld [vmem:[%s14689_s2] sm:$0xf]  ;;  %v1110_v7 = vsub.s32 1, %v1105_v3  ;;  %v1118_v4 = vsub.s32 3, %v1105_v3 }
 0x3cd   :  { %7391 = vmatprep.mubr.bf16.mxu0 %v8359_v8  ;;  %8239 = vmatprep.mubr.bf16.mxu1 %v8359_v8 }
 0x3ce   :  { %v14615_v1 = vrot.slane %v1102_v6, %v1106_v2  ;;  %v14617_v8 = vrot.slane %v1102_v6, %v1114_v5 }
 0x3cf   :  { %7366 = vmatpush1.bf16.msra.mxu0 %v11130_v11  ;;  %8214 = vmatpush1.bf16.msra.mxu1 %v11133_v12  ;;  %v14619_v11 = vrot.slane %v1102_v6, %v1110_v7  ;;  %v14621_v12 = vrot.slane %v1102_v6, %v1118_v4 }
 0x3d0   :  { %7367 = vmatprep.subr.bf16.mxu0 %v11138_v9  ;;  %8215 = vmatprep.subr.bf16.mxu1 %v11141_v10 }
 0x3d3   :  { %7368 = vmatpush1.bf16.msra.mxu0 %v11136_v13  ;;  %8216 = vmatpush1.bf16.msra.mxu1 %v11139_v14 }
 0x3d4   :  { %7369 = vmatprep.subr.bf16.mxu0 %v11144_v15  ;;  %8217 = vmatprep.subr.bf16.mxu1 %v11147_v16 }
 0x3d7   :  { %7370 = vmatpush1.bf16.msra.mxu0 %v11142_v19  ;;  %8218 = vmatpush1.bf16.msra.mxu1 %v11145_v17 }
 0x3d8   :  { %7371 = vmatprep.subr.bf16.mxu0 %v11150_v18  ;;  %8219 = vmatprep.subr.bf16.mxu1 %v11153_v20 }
 0x3db   :  { %7372 = vmatpush1.bf16.msra.mxu0 %v11148_v21  ;;  %8220 = vmatpush1.bf16.msra.mxu1 %v11151_v22 }
 0x3dc   :  { %7373 = vmatprep.subr.bf16.mxu0 %v11156_v23  ;;  %8221 = vmatprep.subr.bf16.mxu1 %v11159_v24 }
 0x3df   :  { %7374 = vmatpush1.bf16.msra.mxu0 %v11154_v26  ;;  %8222 = vmatpush1.bf16.msra.mxu1 %v11157_v25 }
 0x3e0   :  { %7375 = vmatprep.subr.bf16.mxu0 %v11162_v27  ;;  %8223 = vmatprep.subr.bf16.mxu1 %v11165_v28 }
 0x3e3   :  { %7376 = vmatpush1.bf16.msra.mxu0 %v11160_v29  ;;  %8224 = vmatpush1.bf16.msra.mxu1 %v11163_v30 }
 0x3e4   :  { %7377 = vmatprep.subr.bf16.mxu0 %v11168_v31  ;;  %8225 = vmatprep.subr.bf16.mxu1 %v11171_v32 }
 0x3e7   :  { %7378 = vmatpush1.bf16.msra.mxu0 %v11166_v34  ;;  %8226 = vmatpush1.bf16.msra.mxu1 %v11169_v36 }
 0x3e8   :  { %7379 = vmatprep.subr.bf16.mxu0 %v11174_v33  ;;  %8227 = vmatprep.subr.bf16.mxu1 %v11177_v35 }
 0x3eb   :  { %7380 = vmatpush1.bf16.msra.mxu0 %v11172_v37  ;;  %8228 = vmatpush1.bf16.msra.mxu1 %v11175_v38 }
 0x3ec   :  { %7381 = vmatprep.subr.bf16.mxu0 %v11180_v39  ;;  %8229 = vmatprep.subr.bf16.mxu1 %v11183_v40 }
 0x3ef   :  { %7382 = vmatpush1.bf16.msra.mxu0 %v11178_v42  ;;  %8230 = vmatpush1.bf16.msra.mxu1 %v11181_v44 }
 0x3f0   :  { %7383 = vmatprep.subr.bf16.mxu0 %v11186_v41  ;;  %8231 = vmatprep.subr.bf16.mxu1 %v11189_v43 }
 0x3f3   :  { %7384 = vmatpush1.bf16.msra.mxu0 %v11184_v45  ;;  %8232 = vmatpush1.bf16.msra.mxu1 %v11187_v46 }
 0x3f4   :  { %7385 = vmatprep.subr.bf16.mxu0 %v11192_v47  ;;  %8233 = vmatprep.subr.bf16.mxu1 %v11195_v48 }
 0x3f7   :  { %7386 = vmatpush1.bf16.msra.mxu0 %v11190_v51  ;;  %8234 = vmatpush1.bf16.msra.mxu1 %v11193_v52 }
 0x3f8   :  { %7387 = vmatprep.subr.bf16.mxu0 %v11198_v49  ;;  %8235 = vmatprep.subr.bf16.mxu1 %v11201_v50 }
 0x3fb   :  { %7388 = vmatpush1.bf16.msra.mxu0 %v11196_v53  ;;  %8236 = vmatpush1.bf16.msra.mxu1 %v11199_v54 }
 0x3fc   :  { %7389 = vmatprep.subr.bf16.mxu0 %v11204_v55  ;;  %8237 = vmatprep.subr.bf16.mxu1 %v11207_v56 }
 0x3ff   :  { %7390 = vmatpush1.bf16.msra.mxu0 %v11202_v59  ;;  %8238 = vmatpush1.bf16.msra.mxu1 %v11205_v60 }
 0x402   :  { %7392 = vmatmul.mubr.bf16.vlgmr.msra.gmra.mrb[0].mxu0 %v8358_v61  ;;  %8240 = vmatmul.mubr.bf16.vlgmr.msra.gmra.mrb[0].mxu1 %v8358_v61 }
 0x403   :  { %7401 = vmatprep.mubr.bf16.mxu0 %v8391_v62  ;;  %8249 = vmatprep.mubr.bf16.mxu1 %v8391_v62 }
 0x40a   :  { %7402 = vmatmul.mubr.bf16.gmra.mrb[4].mxu0 %v8390_v63  ;;  %8250 = vmatmul.mubr.bf16.gmra.mrb[4].mxu1 %v8390_v63 }
 0x4d5   :  { %v7393_v9 = vpop.f32.mrb[0].mxu0  ;;  %v8241_v10 = vpop.f32.mrb[0].mxu1 }
 0x4d6   :  { %v9416_v13 = vadd.f32 %v7393_v9, %v14615_v1  ;;  %v9424_v14 = vadd.f32 %v8241_v10, %v14617_v8  ;;  %v7395_v15 = vpop.f32.mrb[1].mxu0  ;;  %v8243_v16 = vpop.f32.mrb[1].mxu1 }
 0x4d7   :  { %v9417_v19 = vadd.f32 %v7395_v15, %v14619_v11  ;;  %v9425_v17 = vadd.f32 %v8243_v16, %v14621_v12  ;;  %v7397_v18 = vpop.f32.mrb[2].mxu0  ;;  %v8245_v20 = vpop.f32.mrb[2].mxu1 }
 0x4d8   :  { %vm8260_vm0 = vcmp.gt.f32.partialorder %v9416_v13, 0.0  ;;  %v8276_v21 = vmul.f32 0.2, %v9416_v13  ;;  %vm8262_vm1 = vcmp.gt.f32.partialorder %v9424_v14, 0.0  ;;  %v8278_v22 = vmul.f32 0.2, %v9424_v14 }
 0x4d9   :  { %vm8261_vm2 = vcmp.gt.f32.partialorder %v9417_v19, 0.0  ;;  %v8277_v23 = vmul.f32 0.2, %v9417_v19  ;;  %vm8263_vm3 = vcmp.gt.f32.partialorder %v9425_v17, 0.0  ;;  %v8279_v24 = vmul.f32 0.2, %v9425_v17 }
 0x4da   :  { %v8292_v26 = vsel %vm8260_vm0, %v9416_v13, %v8276_v21  ;;  %v8294_v25 = vsel %vm8262_vm1, %v9424_v14, %v8278_v22  ;;  %v9418_v27 = vadd.f32 %v7397_v18, %v14615_v1  ;;  %v9426_v28 = vadd.f32 %v8245_v20, %v14617_v8  ;;  %v7399_v29 = vpop.f32.mrb[3].mxu0  ;;  %v8247_v30 = vpop.f32.mrb[3].mxu1 }
 0x4db   :  { %8308 = vst [vmem:[%s14690_s3] sm:$0xff] %v8292_v26  ;;  %8310 = vst [vmem:[%s14690_s3 + $0x10] sm:$0xff] %v8294_v25  ;;  %v8293_v31 = vsel %vm8261_vm2, %v9417_v19, %v8277_v23  ;;  %v8295_v32 = vsel %vm8263_vm3, %v9425_v17, %v8279_v24  ;;  %v9419_v34 = vadd.f32 %v7399_v29, %v14619_v11 }
 0x4dc   :  { %v9427_v36 = vadd.f32 %v8247_v30, %v14621_v12  ;;  %8309 = vst [vmem:[%s14690_s3 + $0x8] sm:$0xff] %v8293_v31  ;;  %8311 = vst [vmem:[%s14690_s3 + $0x18] sm:$0xff] %v8295_v32  ;;  %vm8264_vm4 = vcmp.gt.f32.partialorder %v9418_v27, 0.0  ;;  %v8280_v33 = vmul.f32 0.2, %v9418_v27  ;;  %vm8266_vm5 = vcmp.gt.f32.partialorder %v9426_v28, 0.0 }
 0x4dd   :  { %v8282_v35 = vmul.f32 0.2, %v9426_v28  ;;  %vm8265_vm6 = vcmp.gt.f32.partialorder %v9419_v34, 0.0  ;;  %v8281_v37 = vmul.f32 0.2, %v9419_v34  ;;  %v7403_v42 = vpop.f32.mrb[4].mxu0 }
 0x4de   :  { %vm8267_vm7 = vcmp.gt.f32.partialorder %v9427_v36, 0.0  ;;  %v8283_v38 = vmul.f32 0.2, %v9427_v36  ;;  %v8296_v39 = vsel %vm8264_vm4, %v9418_v27, %v8280_v33  ;;  %v8251_v44 = vpop.f32.mrb[4].mxu1  ;;  %v9420_v45 = vadd.f32 %v7403_v42, %v14615_v1  ;;  %v7405_v47 = vpop.f32.mrb[5].mxu0 }
 0x4df   :  { %v8298_v40 = vsel %vm8266_vm5, %v9426_v28, %v8282_v35  ;;  %8312 = vst [vmem:[%s14690_s3 + $0x20] sm:$0xff] %v8296_v39  ;;  %v8297_v41 = vsel %vm8265_vm6, %v9419_v34, %v8281_v37  ;;  %v9428_v46 = vadd.f32 %v8251_v44, %v14617_v8  ;;  %v8253_v48 = vpop.f32.mrb[5].mxu1  ;;  %v9421_v51 = vadd.f32 %v7405_v47, %v14619_v11  ;;  %v7407_v49 = vpop.f32.mrb[6].mxu0 }
 0x4e0   :  { %8314 = vst [vmem:[%s14690_s3 + $0x30] sm:$0xff] %v8298_v40  ;;  %v8299_v43 = vsel %vm8267_vm7, %v9427_v36, %v8283_v38  ;;  %8313 = vst [vmem:[%s14690_s3 + $0x28] sm:$0xff] %v8297_v41  ;;  %v9429_v52 = vadd.f32 %v8253_v48, %v14621_v12  ;;  %v8255_v50 = vpop.f32.mrb[6].mxu1  ;;  %vm8268_vm8 = vcmp.gt.f32.partialorder %v9420_v45, 0.0  ;;  %v8284_v53 = vmul.f32 0.2, %v9420_v45 }
 0x4e1   :  { %8315 = vst [vmem:[%s14690_s3 + $0x38] sm:$0xff] %v8299_v43  ;;  %vm8270_vm9 = vcmp.gt.f32.partialorder %v9428_v46, 0.0  ;;  %v8286_v54 = vmul.f32 0.2, %v9428_v46  ;;  %vm8269_vm10 = vcmp.gt.f32.partialorder %v9421_v51, 0.0  ;;  %v9422_v57 = vadd.f32 %v7407_v49, %v14615_v1  ;;  %v7409_v61 = vpop.f32.mrb[7].mxu0 }
 0x4e2   :  { %v8285_v55 = vmul.f32 0.2, %v9421_v51  ;;  %vm8271_vm11 = vcmp.gt.f32.partialorder %v9429_v52, 0.0  ;;  %v8287_v56 = vmul.f32 0.2, %v9429_v52  ;;  %v8300_v59 = vsel %vm8268_vm8, %v9420_v45, %v8284_v53  ;;  %v8257_v62 = vpop.f32.mrb[7].mxu1 }
 0x4e3   :  { %v8302_v60 = vsel %vm8270_vm9, %v9428_v46, %v8286_v54  ;;  %v9430_v58 = vadd.f32 %v8255_v50, %v14617_v8  ;;  %8316 = vst [vmem:[%s14690_s3 + $0x40] sm:$0xff] %v8300_v59  ;;  %v9423_v3 = vadd.f32 %v7409_v61, %v14619_v11  ;;  %v9431_v2 = vadd.f32 %v8257_v62, %v14621_v12 }
 0x4e4   :  { %8318 = vst [vmem:[%s14690_s3 + $0x50] sm:$0xff] %v8302_v60  ;;  %v8301_v63 = vsel %vm8269_vm10, %v9421_v51, %v8285_v55  ;;  %v8303_v0 = vsel %vm8271_vm11, %v9429_v52, %v8287_v56  ;;  %vm8272_vm12 = vcmp.gt.f32.partialorder %v9422_v57, 0.0  ;;  %v8288_v5 = vmul.f32 0.2, %v9422_v57 }
 0x4e5   :  { %8317 = vst [vmem:[%s14690_s3 + $0x48] sm:$0xff] %v8301_v63  ;;  %8319 = vst [vmem:[%s14690_s3 + $0x58] sm:$0xff] %v8303_v0  ;;  %vm8274_vm13 = vcmp.gt.f32.partialorder %v9430_v58, 0.0  ;;  %v8290_v6 = vmul.f32 0.2, %v9430_v58  ;;  %vm8273_vm14 = vcmp.gt.f32.partialorder %v9423_v3, 0.0 }
 0x4e6   :  { %v8289_v7 = vmul.f32 0.2, %v9423_v3  ;;  %vm8275_vm15 = vcmp.gt.f32.partialorder %v9431_v2, 0.0  ;;  %v8291_v4 = vmul.f32 0.2, %v9431_v2  ;;  %v8304_v1 = vsel %vm8272_vm12, %v9422_v57, %v8288_v5 }
 0x4e7   :  { %v8306_v8 = vsel %vm8274_vm13, %v9430_v58, %v8290_v6  ;;  %8320 = vst [vmem:[%s14690_s3 + $0x60] sm:$0xff] %v8304_v1 }
 0x4e8   :  { %8322 = vst [vmem:[%s14690_s3 + $0x70] sm:$0xff] %v8306_v8  ;;  %v8305_v11 = vsel %vm8273_vm14, %v9423_v3, %v8289_v7  ;;  %v8307_v12 = vsel %vm8275_vm15, %v9431_v2, %v8291_v4 }
 0x4e9   :  { %8321 = vst [vmem:[%s14690_s3 + $0x68] sm:$0xff] %v8305_v11  ;;  %8323 = vst [vmem:[%s14690_s3 + $0x78] sm:$0xff] %v8307_v12 }

// kernel: discriminator64_forward.9
= control target key start
LH: loop header
LB: loop body
LE: loop exit
PB: predicated region body
PF: predicated region fallthrough
CT: control target
= control target key end

     0   :  { %v7623_v22 = vmov 1966171168   ;;  %v1066_v24 = vlaneseq  ;;  %s9324_s1 = inlined_call_operand.vmem [shape: bf16[8192,128], index: 1, kind: input, shape index: {}]   ;;  %s9325_s0 = inlined_call_operand.vmem [shape: bf16[2,8192], index: 0, kind: input, shape index: {}]   ;;  %s9326_s2 = inlined_call_operand.vmem [shape: f32[1,128], index: 2, kind: input, shape index: {}]   ;;  %s9327_s3 = inlined_call_operand.vmem [shape: f32[2,128], index: 3, kind: output, shape index: {}]  }
   0x1   :  { %v7099_v0 = vld [vmem:[%s9324_s1 + $0x40] sm:$0xff]   ;;  %v7103_v4 = vld [vmem:[%s9324_s1 + $0x48] sm:$0xff]   ;;  %v7107_v8 = vld [vmem:[%s9324_s1 + $0x50] sm:$0xff]   ;;  %v1064_v23 = vunpack.c.l.s4 %v7623_v22 }
   0x2   :  { %v7100_v1 = vld [vmem:[%s9324_s1 + $0xc0] sm:$0xff]   ;;  %6394 = vmatprep.subr.bf16.mxu0 %v7099_v0  ;;  %v7104_v5 = vld [vmem:[%s9324_s1 + $0xc8] sm:$0xff]   ;;  %v7108_v9 = vld [vmem:[%s9324_s1 + $0xd0] sm:$0xff]   ;;  %v1067_v30 = vshrl.u32 %v1066_v24, 7 }
   0x3   :  { %v7101_v2 = vld [vmem:[%s9324_s1] sm:$0xff]   ;;  %6416 = vmatprep.subr.bf16.mxu1 %v7100_v1  ;;  %v7105_v6 = vld [vmem:[%s9324_s1 + $0x8] sm:$0xff]   ;;  %v7109_v10 = vld [vmem:[%s9324_s1 + $0x10] sm:$0xff]   ;;  %v1065_v29 = vunpack.c.0.s8 %v1064_v23 }
   0x4   :  { %v7102_v3 = vld [vmem:[%s9324_s1 + $0x80] sm:$0xff]   ;;  %6395 = vmatpush3.bf16.msra.mxu0 %v7101_v2  ;;  %v7106_v7 = vld [vmem:[%s9324_s1 + $0x88] sm:$0xff]   ;;  %v7110_v11 = vld [vmem:[%s9324_s1 + $0x90] sm:$0xff]  }
   0x5   :  { %6417 = vmatpush3.bf16.msra.mxu1 %v7102_v3  ;;  %6396 = vmatprep.subr.bf16.mxu0 %v7103_v4  ;;  %v7111_v12 = vld [vmem:[%s9324_s1 + $0x58] sm:$0xff]   ;;  %v7115_v16 = vld [vmem:[%s9324_s1 + $0x60] sm:$0xff]   ;;  %v7119_v20 = vld [vmem:[%s9324_s1 + $0x68] sm:$0xff]   ;;  %v7734_v35 = vsub.s32 %v1065_v29, %v1067_v30 }
   0x6   :  { %6418 = vmatprep.subr.bf16.mxu1 %v7104_v5  ;;  %v7112_v13 = vld [vmem:[%s9324_s1 + $0xd8] sm:$0xff]   ;;  %v7116_v17 = vld [vmem:[%s9324_s1 + $0xe0] sm:$0xff]   ;;  %v7120_v21 = vld [vmem:[%s9324_s1 + $0xe8] sm:$0xff]  }
   0x7   :  { %v7113_v14 = vld [vmem:[%s9324_s1 + $0x18] sm:$0xff]   ;;  %v7117_v18 = vld [vmem:[%s9324_s1 + $0x20] sm:$0xff]   ;;  %v7121_v25 = vld [vmem:[%s9324_s1 + $0x28] sm:$0xff]  }
   0x8   :  { %6397 = vmatpush3.bf16.msra.mxu0 %v7105_v6  ;;  %v7114_v15 = vld [vmem:[%s9324_s1 + $0x98] sm:$0xff]   ;;  %v7118_v19 = vld [vmem:[%s9324_s1 + $0xa0] sm:$0xff]   ;;  %v7122_v26 = vld [vmem:[%s9324_s1 + $0xa8] sm:$0xff]  }
   0x9   :  { %6419 = vmatpush3.bf16.msra.mxu1 %v7106_v7  ;;  %6398 = vmatprep.subr.bf16.mxu0 %v7107_v8  ;;  %v7123_v27 = vld [vmem:[%s9324_s1 + $0x70] sm:$0xff]   ;;  %v7127_v33 = vld [vmem:[%s9324_s1 + $0x78] sm:$0xff]   ;;  %v15_v38 = vld [vmem:[%s9325_s0] sm:$0xff] }
   0xa   :  { %6420 = vmatprep.subr.bf16.mxu1 %v7108_v9  ;;  %v7124_v28 = vld [vmem:[%s9324_s1 + $0xf0] sm:$0xff]   ;;  %v7128_v34 = vld [vmem:[%s9324_s1 + $0xf8] sm:$0xff]   ;;  %v1062_v39 = vcombine.high %v15_v38, %v15_v38  ;;  %v1069_v40 = vrot.slane %v15_v38, %v7734_v35  ;;  %v7132_v41 = vld [vmem:[%s9324_s1 + $0x140] sm:$0xff]  }
   0xb   :  { %v7125_v31 = vld [vmem:[%s9324_s1 + $0x30] sm:$0xff]   ;;  %v7129_v36 = vld [vmem:[%s9324_s1 + $0x38] sm:$0xff]   ;;  %v7133_v42 = vld [vmem:[%s9324_s1 + $0x1c0] sm:$0xff]  }
   0xc   :  { %6399 = vmatpush3.bf16.msra.mxu0 %v7109_v10  ;;  %v7126_v32 = vld [vmem:[%s9324_s1 + $0xb0] sm:$0xff]   ;;  %v7130_v37 = vld [vmem:[%s9324_s1 + $0xb8] sm:$0xff]   ;;  %v1077_v43 = vcombine.high %v1069_v40, %v1069_v40  ;;  %v1085_v44 = vrot.slane %v1069_v40, %v7734_v35  ;;  %v7754_v45 = vrot.slane %v1062_v39, %v7734_v35  ;;  %v7134_v46 = vld [vmem:[%s9324_s1 + $0x100] sm:$0xff]  }
   0xd   :  { %6421 = vmatpush3.bf16.msra.mxu1 %v7110_v11  ;;  %6400 = vmatprep.subr.bf16.mxu0 %v7111_v12  ;;  %v7135_v48 = vld [vmem:[%s9324_s1 + $0x180] sm:$0xff]   ;;  %v7136_v51 = vld [vmem:[%s9324_s1 + $0x148] sm:$0xff]   ;;  %v7140_v58 = vld [vmem:[%s9324_s1 + $0x150] sm:$0xff]  }
   0xe   :  { %6422 = vmatprep.subr.bf16.mxu1 %v7112_v13  ;;  %v1099_v47 = vrot.slane %v1077_v43, %v7734_v35  ;;  %v1078_v49 = vcombine.high %v7754_v45, %v7754_v45  ;;  %v1107_v50 = vcombine.high %v1085_v44, %v1085_v44  ;;  %v7137_v53 = vld [vmem:[%s9324_s1 + $0x1c8] sm:$0xff]   ;;  %v7141_v59 = vld [vmem:[%s9324_s1 + $0x1d0] sm:$0xff]   ;;  %v7144_v62 = vld [vmem:[%s9324_s1 + $0x158] sm:$0xff]  }
   0xf   :  { %v7138_v55 = vld [vmem:[%s9324_s1 + $0x108] sm:$0xff]   ;;  %v7142_v60 = vld [vmem:[%s9324_s1 + $0x110] sm:$0xff]   ;;  %v7145_v63 = vld [vmem:[%s9324_s1 + $0x1d8] sm:$0xff]  }
  0x10   :  { %6401 = vmatpush3.bf16.msra.mxu0 %v7113_v14  ;;  %4622 = vmatprep.mubr.bf16.mxu0 %v1099_v47  ;;  %v1109_v52 = vcombine.high %v1099_v47, %v1099_v47  ;;  %v1106_v54 = vrot.slane %v1078_v49, %v7734_v35  ;;  %v7139_v56 = vld [vmem:[%s9324_s1 + $0x188] sm:$0xff]   ;;  %v7143_v61 = vld [vmem:[%s9324_s1 + $0x190] sm:$0xff]   ;;  %v7146_v0 = vld [vmem:[%s9324_s1 + $0x118] sm:$0xff]  }
  0x11   :  { %6423 = vmatpush3.bf16.msra.mxu1 %v7114_v15  ;;  %6402 = vmatprep.subr.bf16.mxu0 %v7115_v16  ;;  %v7147_v1 = vld [vmem:[%s9324_s1 + $0x198] sm:$0xff]   ;;  %v7148_v2 = vld [vmem:[%s9324_s1 + $0x160] sm:$0xff]   ;;  %v7152_v6 = vld [vmem:[%s9324_s1 + $0x168] sm:$0xff]  }
  0x12   :  { %6424 = vmatprep.subr.bf16.mxu1 %v7116_v17  ;;  %4662 = vmatprep.mubr.bf16.mxu1 %v1109_v52  ;;  %v1110_v57 = vcombine.high %v1106_v54, %v1106_v54  ;;  %v7149_v3 = vld [vmem:[%s9324_s1 + $0x1e0] sm:$0xff]   ;;  %v7153_v7 = vld [vmem:[%s9324_s1 + $0x1e8] sm:$0xff]   ;;  %v7156_v10 = vld [vmem:[%s9324_s1 + $0x170] sm:$0xff]  }
  0x13   :  { %v7150_v4 = vld [vmem:[%s9324_s1 + $0x120] sm:$0xff]   ;;  %v7154_v8 = vld [vmem:[%s9324_s1 + $0x128] sm:$0xff]   ;;  %v7157_v11 = vld [vmem:[%s9324_s1 + $0x1f0] sm:$0xff]  }
  0x14   :  { %6403 = vmatpush3.bf16.msra.mxu0 %v7117_v18  ;;  %v7151_v5 = vld [vmem:[%s9324_s1 + $0x1a0] sm:$0xff]   ;;  %v7155_v9 = vld [vmem:[%s9324_s1 + $0x1a8] sm:$0xff]   ;;  %v7158_v12 = vld [vmem:[%s9324_s1 + $0x130] sm:$0xff]   ;;  %v1092_v18 = vrot.slane %v7754_v45, %v7734_v35 }
  0x15   :  { %6425 = vmatpush3.bf16.msra.mxu1 %v7118_v19  ;;  %6404 = vmatprep.subr.bf16.mxu0 %v7119_v20  ;;  %v7159_v13 = vld [vmem:[%s9324_s1 + $0x1b0] sm:$0xff]   ;;  %v7160_v14 = vld [vmem:[%s9324_s1 + $0x178] sm:$0xff]   ;;  %v7164_v19 = vld [vmem:[%s9324_s1 + $0x240] sm:$0xff]  }
  0x16   :  { %6426 = vmatprep.subr.bf16.mxu1 %v7120_v21  ;;  %v7161_v15 = vld [vmem:[%s9324_s1 + $0x1f8] sm:$0xff]   ;;  %v7165_v20 = vld [vmem:[%s9324_s1 + $0x2c0] sm:$0xff]   ;;  %v1108_v23 = vcombine.high %v1092_v18, %v1092_v18  ;;  %v7168_v24 = vld [vmem:[%s9324_s1 + $0x248] sm:$0xff]  }
  0x17   :  { %v7162_v16 = vld [vmem:[%s9324_s1 + $0x138] sm:$0xff]   ;;  %v7166_v21 = vld [vmem:[%s9324_s1 + $0x200] sm:$0xff]   ;;  %v7173_v29 = vld [vmem:[%s9324_s1 + $0x2d0] sm:$0xff]  }
  0x18   :  { %6405 = vmatpush3.bf16.msra.mxu0 %v7121_v25  ;;  %v7163_v17 = vld [vmem:[%s9324_s1 + $0x1b8] sm:$0xff]   ;;  %v7167_v22 = vld [vmem:[%s9324_s1 + $0x280] sm:$0xff]   ;;  %v7169_v25 = vld [vmem:[%s9324_s1 + $0x2c8] sm:$0xff]  }
  0x19   :  { %6427 = vmatpush3.bf16.msra.mxu1 %v7122_v26  ;;  %6406 = vmatprep.subr.bf16.mxu0 %v7123_v27  ;;  %v7170_v26 = vld [vmem:[%s9324_s1 + $0x208] sm:$0xff]   ;;  %v7174_v30 = vld [vmem:[%s9324_s1 + $0x210] sm:$0xff]   ;;  %v7181_v38 = vld [vmem:[%s9324_s1 + $0x2e0] sm:$0xff]  }
  0x1a   :  { %6428 = vmatprep.subr.bf16.mxu1 %v7124_v28  ;;  %v7171_v27 = vld [vmem:[%s9324_s1 + $0x288] sm:$0xff]   ;;  %v7172_v28 = vld [vmem:[%s9324_s1 + $0x250] sm:$0xff]   ;;  %v7182_v39 = vld [vmem:[%s9324_s1 + $0x220] sm:$0xff]  }
  0x1b   :  { %v7183_v40 = vld [vmem:[%s9324_s1 + $0x2a0] sm:$0xff]   ;;  %v7186_v43 = vld [vmem:[%s9324_s1 + $0x228] sm:$0xff]   ;;  %v7188_v45 = vld [vmem:[%s9324_s1 + $0x270] sm:$0xff]  }
  0x1c   :  { %6407 = vmatpush3.bf16.msra.mxu0 %v7125_v31  ;;  %v7175_v31 = vld [vmem:[%s9324_s1 + $0x290] sm:$0xff]   ;;  %v7192_v49 = vld [vmem:[%s9324_s1 + $0x278] sm:$0xff]   ;;  %v16_v52 = vld [vmem:[%s9325_s0 + $0x8] sm:$0xff] }
  0x1d   :  { %6429 = vmatpush3.bf16.msra.mxu1 %v7126_v32  ;;  %6408 = vmatprep.subr.bf16.mxu0 %v7127_v33  ;;  %v7176_v32 = vld [vmem:[%s9324_s1 + $0x258] sm:$0xff]   ;;  %v7190_v47 = vld [vmem:[%s9324_s1 + $0x230] sm:$0xff]  }
  0x1e   :  { %6430 = vmatprep.subr.bf16.mxu1 %v7128_v34  ;;  %v7177_v33 = vld [vmem:[%s9324_s1 + $0x2d8] sm:$0xff]  }
  0x1f   :  { %v7178_v34 = vld [vmem:[%s9324_s1 + $0x218] sm:$0xff]  }
  0x20   :  { %6409 = vmatpush3.bf16.msra.mxu0 %v7129_v36  ;;  %v7179_v36 = vld [vmem:[%s9324_s1 + $0x298] sm:$0xff]  }
  0x21   :  { %6431 = vmatpush3.bf16.msra.mxu1 %v7130_v37  ;;  %6438 = vmatprep.subr.bf16.mxu0 %v7132_v41  ;;  %v7180_v37 = vld [vmem:[%s9324_s1 + $0x260] sm:$0xff]   ;;  %v7184_v41 = vld [vmem:[%s9324_s1 + $0x268] sm:$0xff]  }
  0x22   :  { %6460 = vmatprep.subr.bf16.mxu1 %v7133_v42  ;;  %v7185_v42 = vld [vmem:[%s9324_s1 + $0x2e8] sm:$0xff]  }
  0x23   :  { %4623 = vmatmul.mubr.bf16.vlgmr.msra.gmra.mrb[0].mxu0 %v1085_v44  ;;  %v7187_v44 = vld [vmem:[%s9324_s1 + $0x2a8] sm:$0xff]  }
  0x24   :  { %6439 = vmatpush3.bf16.msra.mxu0 %v7134_v46  ;;  %4663 = vmatmul.mubr.bf16.vlgmr.msra.gmra.mrb[0].mxu1 %v1107_v50  ;;  %v7189_v46 = vld [vmem:[%s9324_s1 + $0x2f0] sm:$0xff]   ;;  %v7193_v50 = vld [vmem:[%s9324_s1 + $0x2f8] sm:$0xff]  }
  0x25   :  { %6440 = vmatprep.subr.bf16.mxu0 %v7136_v51  ;;  %6461 = vmatpush3.bf16.msra.mxu1 %v7135_v48  ;;  %v7191_v48 = vld [vmem:[%s9324_s1 + $0x2b0] sm:$0xff]   ;;  %v7194_v51 = vld [vmem:[%s9324_s1 + $0x238] sm:$0xff]  }
  0x26   :  { %4702 = vmatprep.mubr.bf16.mxu0 %v1106_v54  ;;  %6462 = vmatprep.subr.bf16.mxu1 %v7137_v53  ;;  %v7195_v53 = vld [vmem:[%s9324_s1 + $0x2b8] sm:$0xff]   ;;  %v1118_v54 = vrot.slane %v16_v52, %v7734_v35 }
  0x27   :  { %4742 = vmatprep.mubr.bf16.mxu1 %v1110_v57 }
  0x28   :  { %6441 = vmatpush3.bf16.msra.mxu0 %v7138_v55  ;;  %v1111_v55 = vcombine.high %v16_v52, %v16_v52  ;;  %v1126_v57 = vcombine.high %v1118_v54, %v1118_v54  ;;  %v7245_v52 = vld [vmem:[%s9324_s1 + $0x460] sm:$0xff]  }
  0x29   :  { %6442 = vmatprep.subr.bf16.mxu0 %v7140_v58  ;;  %6463 = vmatpush3.bf16.msra.mxu1 %v7139_v56  ;;  %v7196_v56 = vld [vmem:[%s9324_s1 + $0x340] sm:$0xff]   ;;  %v1134_v58 = vrot.slane %v1118_v54, %v7734_v35 }
  0x2a   :  { %6464 = vmatprep.subr.bf16.mxu1 %v7141_v59  ;;  %v7197_v59 = vld [vmem:[%s9324_s1 + $0x3c0] sm:$0xff]  }
  0x2b   :  { %v7247_v54 = vld [vmem:[%s9324_s1 + $0x420] sm:$0xff]  }
  0x2c   :  { %6443 = vmatpush3.bf16.msra.mxu0 %v7142_v60  ;;  %v7960_v60 = vrot.slane %v1111_v55, %v7734_v35  ;;  %v7248_v55 = vld [vmem:[%s9324_s1 + $0x4a0] sm:$0xff]  }
  0x2d   :  { %6444 = vmatprep.subr.bf16.mxu0 %v7144_v62  ;;  %6465 = vmatpush3.bf16.msra.mxu1 %v7143_v61  ;;  %v7198_v61 = vld [vmem:[%s9324_s1 + $0x300] sm:$0xff]   ;;  %v1148_v62 = vrot.slane %v1126_v57, %v7734_v35  ;;  %v7250_v57 = vld [vmem:[%s9324_s1 + $0x4e8] sm:$0xff]  }
  0x2e   :  { %6466 = vmatprep.subr.bf16.mxu1 %v7145_v63  ;;  %v7199_v63 = vld [vmem:[%s9324_s1 + $0x380] sm:$0xff]  }
  0x30   :  { %6445 = vmatpush3.bf16.msra.mxu0 %v7146_v0  ;;  %v1127_v0 = vcombine.high %v7960_v60, %v7960_v60 }
  0x31   :  { %6446 = vmatprep.subr.bf16.mxu0 %v7148_v2  ;;  %6467 = vmatpush3.bf16.msra.mxu1 %v7147_v1  ;;  %v1156_v1 = vcombine.high %v1134_v58, %v1134_v58  ;;  %v7200_v2 = vld [vmem:[%s9324_s1 + $0x348] sm:$0xff]  }
  0x32   :  { %6468 = vmatprep.subr.bf16.mxu1 %v7149_v3  ;;  %v1158_v3 = vcombine.high %v1148_v62, %v1148_v62 }
  0x34   :  { %6447 = vmatpush3.bf16.msra.mxu0 %v7150_v4  ;;  %v7201_v4 = vld [vmem:[%s9324_s1 + $0x3c8] sm:$0xff]  }
  0x35   :  { %6448 = vmatprep.subr.bf16.mxu0 %v7152_v6  ;;  %6469 = vmatpush3.bf16.msra.mxu1 %v7151_v5  ;;  %v1155_v5 = vrot.slane %v1127_v0, %v7734_v35  ;;  %v7202_v6 = vld [vmem:[%s9324_s1 + $0x308] sm:$0xff]   ;;  %v7257_v0 = vld [vmem:[%s9324_s1 + $0x478] sm:$0xff]  }
  0x36   :  { %6470 = vmatprep.subr.bf16.mxu1 %v7153_v7  ;;  %v7203_v7 = vld [vmem:[%s9324_s1 + $0x388] sm:$0xff]  }
  0x38   :  { %6449 = vmatpush3.bf16.msra.mxu0 %v7154_v8  ;;  %v1159_v8 = vcombine.high %v1155_v5, %v1155_v5 }
  0x39   :  { %6450 = vmatprep.subr.bf16.mxu0 %v7156_v10  ;;  %6471 = vmatpush3.bf16.msra.mxu1 %v7155_v9  ;;  %v7204_v9 = vld [vmem:[%s9324_s1 + $0x350] sm:$0xff]  }
  0x3a   :  { %6472 = vmatprep.subr.bf16.mxu1 %v7157_v11  ;;  %v7205_v10 = vld [vmem:[%s9324_s1 + $0x3d0] sm:$0xff]  }
  0x3b   :  { %v7206_v11 = vld [vmem:[%s9324_s1 + $0x310] sm:$0xff]  }
  0x3c   :  { %6451 = vmatpush3.bf16.msra.mxu0 %v7158_v12  ;;  %v7207_v12 = vld [vmem:[%s9324_s1 + $0x390] sm:$0xff]  }
  0x3d   :  { %6452 = vmatprep.subr.bf16.mxu0 %v7160_v14  ;;  %6473 = vmatpush3.bf16.msra.mxu1 %v7159_v13  ;;  %v7208_v13 = vld [vmem:[%s9324_s1 + $0x358] sm:$0xff]  }
  0x3e   :  { %6474 = vmatprep.subr.bf16.mxu1 %v7161_v15  ;;  %v7209_v14 = vld [vmem:[%s9324_s1 + $0x3d8] sm:$0xff]  }
  0x3f   :  { %v7210_v15 = vld [vmem:[%s9324_s1 + $0x318] sm:$0xff]  }
  0x40   :  { %6453 = vmatpush3.bf16.msra.mxu0 %v7162_v16  ;;  %v7211_v16 = vld [vmem:[%s9324_s1 + $0x398] sm:$0xff]  }
  0x41   :  { %6482 = vmatprep.subr.bf16.mxu0 %v7164_v19  ;;  %6475 = vmatpush3.bf16.msra.mxu1 %v7163_v17  ;;  %v7212_v17 = vld [vmem:[%s9324_s1 + $0x360] sm:$0xff]  }
  0x42   :  { %6504 = vmatprep.subr.bf16.mxu1 %v7165_v20  ;;  %v7214_v19 = vld [vmem:[%s9324_s1 + $0x320] sm:$0xff]  }
  0x43   :  { %4703 = vmatmul.mubr.bf16.vlgmr.msra.gmra.mrb[4].mxu0 %v1092_v18  ;;  %v7213_v18 = vld [vmem:[%s9324_s1 + $0x3e0] sm:$0xff]  }
  0x44   :  { %6483 = vmatpush3.bf16.msra.mxu0 %v7166_v21  ;;  %4743 = vmatmul.mubr.bf16.vlgmr.msra.gmra.mrb[4].mxu1 %v1108_v23  ;;  %v7215_v20 = vld [vmem:[%s9324_s1 + $0x3a0] sm:$0xff]   ;;  %v7216_v21 = vld [vmem:[%s9324_s1 + $0x368] sm:$0xff]  }
  0x45   :  { %6484 = vmatprep.subr.bf16.mxu0 %v7168_v24  ;;  %6505 = vmatpush3.bf16.msra.mxu1 %v7167_v22  ;;  %v7217_v22 = vld [vmem:[%s9324_s1 + $0x3e8] sm:$0xff]  }
  0x46   :  { %6506 = vmatprep.subr.bf16.mxu1 %v7169_v25  ;;  %4782 = vmatprep.mubr.bf16.mxu0 %v1148_v62  ;;  %v7218_v23 = vld [vmem:[%s9324_s1 + $0x328] sm:$0xff]   ;;  %v7220_v25 = vld [vmem:[%s9324_s1 + $0x370] sm:$0xff]  }
  0x47   :  { %4822 = vmatprep.mubr.bf16.mxu1 %v1158_v3  ;;  %v7219_v24 = vld [vmem:[%s9324_s1 + $0x3a8] sm:$0xff]   ;;  %v7255_v62 = vld [vmem:[%s9324_s1 + $0x430] sm:$0xff]  }
  0x48   :  { %6485 = vmatpush3.bf16.msra.mxu0 %v7170_v26  ;;  %v7221_v26 = vld [vmem:[%s9324_s1 + $0x3f0] sm:$0xff]  }
  0x49   :  { %6486 = vmatprep.subr.bf16.mxu0 %v7172_v28  ;;  %6507 = vmatpush3.bf16.msra.mxu1 %v7171_v27  ;;  %v7222_v27 = vld [vmem:[%s9324_s1 + $0x330] sm:$0xff]  }
  0x4a   :  { %6508 = vmatprep.subr.bf16.mxu1 %v7173_v29  ;;  %v7223_v28 = vld [vmem:[%s9324_s1 + $0x3b0] sm:$0xff]   ;;  %v7224_v29 = vld [vmem:[%s9324_s1 + $0x378] sm:$0xff]  }
  0x4b   :  { %v17_v3 = vld [vmem:[%s9325_s0 + $0x10] sm:$0xff] }
  0x4c   :  { %6487 = vmatpush3.bf16.msra.mxu0 %v7174_v30  ;;  %v7225_v30 = vld [vmem:[%s9324_s1 + $0x3f8] sm:$0xff]  }
  0x4d   :  { %6488 = vmatprep.subr.bf16.mxu0 %v7176_v32  ;;  %6509 = vmatpush3.bf16.msra.mxu1 %v7175_v31  ;;  %v7226_v31 = vld [vmem:[%s9324_s1 + $0x338] sm:$0xff]  }
  0x4e   :  { %6510 = vmatprep.subr.bf16.mxu1 %v7177_v33  ;;  %v7227_v32 = vld [vmem:[%s9324_s1 + $0x3b8] sm:$0xff]   ;;  %v1141_v33 = vrot.slane %v7960_v60, %v7734_v35  ;;  %v7253_v60 = vld [vmem:[%s9324_s1 + $0x470] sm:$0xff]  }
  0x50   :  { %6489 = vmatpush3.bf16.msra.mxu0 %v7178_v34  ;;  %v7229_v34 = vld [vmem:[%s9324_s1 + $0x440] sm:$0xff]  }
  0x51   :  { %6490 = vmatprep.subr.bf16.mxu0 %v7180_v37  ;;  %6511 = vmatpush3.bf16.msra.mxu1 %v7179_v36  ;;  %v7230_v36 = vld [vmem:[%s9324_s1 + $0x4c0] sm:$0xff]  }
  0x52   :  { %6512 = vmatprep.subr.bf16.mxu1 %v7181_v38  ;;  %v7231_v37 = vld [vmem:[%s9324_s1 + $0x400] sm:$0xff]  }
  0x53   :  { %v7232_v38 = vld [vmem:[%s9324_s1 + $0x480] sm:$0xff]  }
  0x54   :  { %6491 = vmatpush3.bf16.msra.mxu0 %v7182_v39  ;;  %v1157_v39 = vcombine.high %v1141_v33, %v1141_v33 }
  0x55   :  { %6492 = vmatprep.subr.bf16.mxu0 %v7184_v41  ;;  %6513 = vmatpush3.bf16.msra.mxu1 %v7183_v40  ;;  %v7233_v40 = vld [vmem:[%s9324_s1 + $0x448] sm:$0xff]  }
  0x56   :  { %6514 = vmatprep.subr.bf16.mxu1 %v7185_v42  ;;  %v7234_v41 = vld [vmem:[%s9324_s1 + $0x4c8] sm:$0xff]  }
  0x57   :  { %v7235_v42 = vld [vmem:[%s9324_s1 + $0x408] sm:$0xff]  }
  0x58   :  { %6493 = vmatpush3.bf16.msra.mxu0 %v7186_v43  ;;  %v7236_v43 = vld [vmem:[%s9324_s1 + $0x488] sm:$0xff]  }
  0x59   :  { %6494 = vmatprep.subr.bf16.mxu0 %v7188_v45  ;;  %6515 = vmatpush3.bf16.msra.mxu1 %v7187_v44  ;;  %v7237_v44 = vld [vmem:[%s9324_s1 + $0x450] sm:$0xff]  }
  0x5a   :  { %6516 = vmatprep.subr.bf16.mxu1 %v7189_v46  ;;  %v7238_v45 = vld [vmem:[%s9324_s1 + $0x4d0] sm:$0xff]  }
  0x5b   :  { %v7239_v46 = vld [vmem:[%s9324_s1 + $0x410] sm:$0xff]  }
  0x5c   :  { %6495 = vmatpush3.bf16.msra.mxu0 %v7190_v47  ;;  %v7240_v47 = vld [vmem:[%s9324_s1 + $0x490] sm:$0xff]  }
  0x5d   :  { %6496 = vmatprep.subr.bf16.mxu0 %v7192_v49  ;;  %6517 = vmatpush3.bf16.msra.mxu1 %v7191_v48  ;;  %v7241_v48 = vld [vmem:[%s9324_s1 + $0x458] sm:$0xff]  }
  0x5e   :  { %6518 = vmatprep.subr.bf16.mxu1 %v7193_v50  ;;  %v7242_v49 = vld [vmem:[%s9324_s1 + $0x4d8] sm:$0xff]  }
  0x5f   :  { %v7243_v50 = vld [vmem:[%s9324_s1 + $0x418] sm:$0xff]  }
  0x60   :  { %6497 = vmatpush3.bf16.msra.mxu0 %v7194_v51  ;;  %v7244_v51 = vld [vmem:[%s9324_s1 + $0x498] sm:$0xff]  }
  0x61   :  { %6526 = vmatprep.subr.bf16.mxu0 %v7196_v56  ;;  %6519 = vmatpush3.bf16.msra.mxu1 %v7195_v53  ;;  %v7246_v53 = vld [vmem:[%s9324_s1 + $0x4e0] sm:$0xff]   ;;  %v7249_v56 = vld [vmem:[%s9324_s1 + $0x468] sm:$0xff]  }
  0x62   :  { %6548 = vmatprep.subr.bf16.mxu1 %v7197_v59  ;;  %v7252_v59 = vld [vmem:[%s9324_s1 + $0x4a8] sm:$0xff]  }
  0x63   :  { %4783 = vmatmul.mubr.bf16.vlgmr.msra.gmra.mrb[8].mxu0 %v1134_v58  ;;  %v7251_v58 = vld [vmem:[%s9324_s1 + $0x428] sm:$0xff]  }
  0x64   :  { %6527 = vmatpush3.bf16.msra.mxu0 %v7198_v61  ;;  %4823 = vmatmul.mubr.bf16.vlgmr.msra.gmra.mrb[8].mxu1 %v1156_v1  ;;  %v7254_v61 = vld [vmem:[%s9324_s1 + $0x4f0] sm:$0xff]   ;;  %v7258_v1 = vld [vmem:[%s9324_s1 + $0x4f8] sm:$0xff]  }
  0x65   :  { %6528 = vmatprep.subr.bf16.mxu0 %v7200_v2  ;;  %6549 = vmatpush3.bf16.msra.mxu1 %v7199_v63  ;;  %v7256_v63 = vld [vmem:[%s9324_s1 + $0x4b0] sm:$0xff]   ;;  %v7259_v2 = vld [vmem:[%s9324_s1 + $0x438] sm:$0xff]  }
  0x66   :  { %4862 = vmatprep.mubr.bf16.mxu0 %v1155_v5  ;;  %6550 = vmatprep.subr.bf16.mxu1 %v7201_v4  ;;  %v7260_v4 = vld [vmem:[%s9324_s1 + $0x4b8] sm:$0xff]   ;;  %v1167_v5 = vrot.slane %v17_v3, %v7734_v35 }
  0x67   :  { %4902 = vmatprep.mubr.bf16.mxu1 %v1159_v8 }
  0x68   :  { %6529 = vmatpush3.bf16.msra.mxu0 %v7202_v6  ;;  %v1160_v6 = vcombine.high %v17_v3, %v17_v3  ;;  %v1175_v8 = vcombine.high %v1167_v5, %v1167_v5  ;;  %v7310_v3 = vld [vmem:[%s9324_s1 + $0x660] sm:$0xff]  }
  0x69   :  { %6530 = vmatprep.subr.bf16.mxu0 %v7204_v9  ;;  %6551 = vmatpush3.bf16.msra.mxu1 %v7203_v7  ;;  %v7261_v7 = vld [vmem:[%s9324_s1 + $0x540] sm:$0xff]   ;;  %v1183_v9 = vrot.slane %v1167_v5, %v7734_v35 }
  0x6a   :  { %6552 = vmatprep.subr.bf16.mxu1 %v7205_v10  ;;  %v7262_v10 = vld [vmem:[%s9324_s1 + $0x5c0] sm:$0xff]  }
  0x6b   :  { %v7312_v5 = vld [vmem:[%s9324_s1 + $0x620] sm:$0xff]  }
  0x6c   :  { %6531 = vmatpush3.bf16.msra.mxu0 %v7206_v11  ;;  %v8166_v11 = vrot.slane %v1160_v6, %v7734_v35  ;;  %v7313_v6 = vld [vmem:[%s9324_s1 + $0x6a0] sm:$0xff]  }
  0x6d   :  { %6532 = vmatprep.subr.bf16.mxu0 %v7208_v13  ;;  %6553 = vmatpush3.bf16.msra.mxu1 %v7207_v12  ;;  %v7263_v12 = vld [vmem:[%s9324_s1 + $0x500] sm:$0xff]   ;;  %v1197_v13 = vrot.slane %v1175_v8, %v7734_v35  ;;  %v7315_v8 = vld [vmem:[%s9324_s1 + $0x6e8] sm:$0xff]  }
  0x6e   :  { %6554 = vmatprep.subr.bf16.mxu1 %v7209_v14  ;;  %v7264_v14 = vld [vmem:[%s9324_s1 + $0x580] sm:$0xff]  }
  0x70   :  { %6533 = vmatpush3.bf16.msra.mxu0 %v7210_v15  ;;  %v1176_v15 = vcombine.high %v8166_v11, %v8166_v11 }
  0x71   :  { %6534 = vmatprep.subr.bf16.mxu0 %v7212_v17  ;;  %6555 = vmatpush3.bf16.msra.mxu1 %v7211_v16  ;;  %v1205_v16 = vcombine.high %v1183_v9, %v1183_v9  ;;  %v7265_v17 = vld [vmem:[%s9324_s1 + $0x548] sm:$0xff]  }
  0x72   :  { %6556 = vmatprep.subr.bf16.mxu1 %v7213_v18  ;;  %v1207_v18 = vcombine.high %v1197_v13, %v1197_v13 }
  0x74   :  { %6535 = vmatpush3.bf16.msra.mxu0 %v7214_v19  ;;  %v7266_v19 = vld [vmem:[%s9324_s1 + $0x5c8] sm:$0xff]  }
  0x75   :  { %6536 = vmatprep.subr.bf16.mxu0 %v7216_v21  ;;  %6557 = vmatpush3.bf16.msra.mxu1 %v7215_v20  ;;  %v1204_v20 = vrot.slane %v1176_v15, %v7734_v35  ;;  %v7267_v21 = vld [vmem:[%s9324_s1 + $0x508] sm:$0xff]   ;;  %v7322_v15 = vld [vmem:[%s9324_s1 + $0x678] sm:$0xff]  }
  0x76   :  { %6558 = vmatprep.subr.bf16.mxu1 %v7217_v22  ;;  %v7268_v22 = vld [vmem:[%s9324_s1 + $0x588] sm:$0xff]  }
  0x78   :  { %6537 = vmatpush3.bf16.msra.mxu0 %v7218_v23  ;;  %v1208_v23 = vcombine.high %v1204_v20, %v1204_v20 }
  0x79   :  { %6538 = vmatprep.subr.bf16.mxu0 %v7220_v25  ;;  %6559 = vmatpush3.bf16.msra.mxu1 %v7219_v24  ;;  %v7269_v24 = vld [vmem:[%s9324_s1 + $0x550] sm:$0xff]  }
  0x7a   :  { %6560 = vmatprep.subr.bf16.mxu1 %v7221_v26  ;;  %v7270_v25 = vld [vmem:[%s9324_s1 + $0x5d0] sm:$0xff]  }
  0x7b   :  { %v7271_v26 = vld [vmem:[%s9324_s1 + $0x510] sm:$0xff]  }
  0x7c   :  { %6539 = vmatpush3.bf16.msra.mxu0 %v7222_v27  ;;  %v7272_v27 = vld [vmem:[%s9324_s1 + $0x590] sm:$0xff]  }
  0x7d   :  { %6540 = vmatprep.subr.bf16.mxu0 %v7224_v29  ;;  %6561 = vmatpush3.bf16.msra.mxu1 %v7223_v28  ;;  %v7273_v28 = vld [vmem:[%s9324_s1 + $0x558] sm:$0xff]  }
  0x7e   :  { %6562 = vmatprep.subr.bf16.mxu1 %v7225_v30  ;;  %v7274_v29 = vld [vmem:[%s9324_s1 + $0x5d8] sm:$0xff]  }
  0x7f   :  { %v7275_v30 = vld [vmem:[%s9324_s1 + $0x518] sm:$0xff]  }
  0x80   :  { %6541 = vmatpush3.bf16.msra.mxu0 %v7226_v31  ;;  %v7276_v31 = vld [vmem:[%s9324_s1 + $0x598] sm:$0xff]  }
  0x81   :  { %6570 = vmatprep.subr.bf16.mxu0 %v7229_v34  ;;  %6563 = vmatpush3.bf16.msra.mxu1 %v7227_v32  ;;  %v7277_v32 = vld [vmem:[%s9324_s1 + $0x560] sm:$0xff]  }
  0x82   :  { %6592 = vmatprep.subr.bf16.mxu1 %v7230_v36  ;;  %v7279_v34 = vld [vmem:[%s9324_s1 + $0x520] sm:$0xff]  }
  0x83   :  { %4863 = vmatmul.mubr.bf16.vlgmr.msra.gmra.mrb[12].mxu0 %v1141_v33  ;;  %v7278_v33 = vld [vmem:[%s9324_s1 + $0x5e0] sm:$0xff]  }
  0x84   :  { %6571 = vmatpush3.bf16.msra.mxu0 %v7231_v37  ;;  %4903 = vmatmul.mubr.bf16.vlgmr.msra.gmra.mrb[12].mxu1 %v1157_v39  ;;  %v7280_v36 = vld [vmem:[%s9324_s1 + $0x5a0] sm:$0xff]   ;;  %v7281_v37 = vld [vmem:[%s9324_s1 + $0x568] sm:$0xff]  }
  0x85   :  { %6572 = vmatprep.subr.bf16.mxu0 %v7233_v40  ;;  %6593 = vmatpush3.bf16.msra.mxu1 %v7232_v38  ;;  %v7282_v38 = vld [vmem:[%s9324_s1 + $0x5e8] sm:$0xff]  }
  0x86   :  { %6594 = vmatprep.subr.bf16.mxu1 %v7234_v41  ;;  %4942 = vmatprep.mubr.bf16.mxu0 %v1197_v13  ;;  %v7283_v39 = vld [vmem:[%s9324_s1 + $0x528] sm:$0xff]   ;;  %v7285_v41 = vld [vmem:[%s9324_s1 + $0x570] sm:$0xff]  }
  0x87   :  { %4982 = vmatprep.mubr.bf16.mxu1 %v1207_v18  ;;  %v7284_v40 = vld [vmem:[%s9324_s1 + $0x5a8] sm:$0xff]   ;;  %v7320_v13 = vld [vmem:[%s9324_s1 + $0x630] sm:$0xff]   ;;  %v18_v18 = vld [vmem:[%s9325_s0 + $0x18] sm:$0xff] }
  0x88   :  { %6573 = vmatpush3.bf16.msra.mxu0 %v7235_v42  ;;  %v7286_v42 = vld [vmem:[%s9324_s1 + $0x5f0] sm:$0xff]  }
  0x89   :  { %6574 = vmatprep.subr.bf16.mxu0 %v7237_v44  ;;  %6595 = vmatpush3.bf16.msra.mxu1 %v7236_v43  ;;  %v7287_v43 = vld [vmem:[%s9324_s1 + $0x530] sm:$0xff]  }
  0x8a   :  { %6596 = vmatprep.subr.bf16.mxu1 %v7238_v45  ;;  %v7288_v44 = vld [vmem:[%s9324_s1 + $0x5b0] sm:$0xff]   ;;  %v7289_v45 = vld [vmem:[%s9324_s1 + $0x578] sm:$0xff]  }
  0x8c   :  { %6575 = vmatpush3.bf16.msra.mxu0 %v7239_v46  ;;  %v7290_v46 = vld [vmem:[%s9324_s1 + $0x5f8] sm:$0xff]  }
  0x8d   :  { %6576 = vmatprep.subr.bf16.mxu0 %v7241_v48  ;;  %6597 = vmatpush3.bf16.msra.mxu1 %v7240_v47  ;;  %v7291_v47 = vld [vmem:[%s9324_s1 + $0x538] sm:$0xff]  }
  0x8e   :  { %6598 = vmatprep.subr.bf16.mxu1 %v7242_v49  ;;  %v7292_v48 = vld [vmem:[%s9324_s1 + $0x5b8] sm:$0xff]   ;;  %v1190_v49 = vrot.slane %v8166_v11, %v7734_v35  ;;  %v7318_v11 = vld [vmem:[%s9324_s1 + $0x670] sm:$0xff]  }
  0x90   :  { %6577 = vmatpush3.bf16.msra.mxu0 %v7243_v50  ;;  %v7294_v50 = vld [vmem:[%s9324_s1 + $0x640] sm:$0xff]  }
  0x91   :  { %6578 = vmatprep.subr.bf16.mxu0 %v7245_v52  ;;  %6599 = vmatpush3.bf16.msra.mxu1 %v7244_v51  ;;  %v7295_v51 = vld [vmem:[%s9324_s1 + $0x6c0] sm:$0xff]  }
  0x92   :  { %6600 = vmatprep.subr.bf16.mxu1 %v7246_v53  ;;  %v7296_v52 = vld [vmem:[%s9324_s1 + $0x600] sm:$0xff]  }
  0x93   :  { %v7297_v53 = vld [vmem:[%s9324_s1 + $0x680] sm:$0xff]  }
  0x94   :  { %6579 = vmatpush3.bf16.msra.mxu0 %v7247_v54  ;;  %v1206_v54 = vcombine.high %v1190_v49, %v1190_v49 }
  0x95   :  { %6580 = vmatprep.subr.bf16.mxu0 %v7249_v56  ;;  %6601 = vmatpush3.bf16.msra.mxu1 %v7248_v55  ;;  %v7298_v55 = vld [vmem:[%s9324_s1 + $0x648] sm:$0xff]  }
  0x96   :  { %6602 = vmatprep.subr.bf16.mxu1 %v7250_v57  ;;  %v7299_v56 = vld [vmem:[%s9324_s1 + $0x6c8] sm:$0xff]  }
  0x97   :  { %v7300_v57 = vld [vmem:[%s9324_s1 + $0x608] sm:$0xff]  }
  0x98   :  { %6581 = vmatpush3.bf16.msra.mxu0 %v7251_v58  ;;  %v7301_v58 = vld [vmem:[%s9324_s1 + $0x688] sm:$0xff]  }
  0x99   :  { %6582 = vmatprep.subr.bf16.mxu0 %v7253_v60  ;;  %6603 = vmatpush3.bf16.msra.mxu1 %v7252_v59  ;;  %v7302_v59 = vld [vmem:[%s9324_s1 + $0x650] sm:$0xff]  }
  0x9a   :  { %6604 = vmatprep.subr.bf16.mxu1 %v7254_v61  ;;  %v7303_v60 = vld [vmem:[%s9324_s1 + $0x6d0] sm:$0xff]  }
  0x9b   :  { %v7304_v61 = vld [vmem:[%s9324_s1 + $0x610] sm:$0xff]  }
  0x9c   :  { %6583 = vmatpush3.bf16.msra.mxu0 %v7255_v62  ;;  %v7305_v62 = vld [vmem:[%s9324_s1 + $0x690] sm:$0xff]  }
  0x9d   :  { %6584 = vmatprep.subr.bf16.mxu0 %v7257_v0  ;;  %6605 = vmatpush3.bf16.msra.mxu1 %v7256_v63  ;;  %v7306_v63 = vld [vmem:[%s9324_s1 + $0x658] sm:$0xff]  }
  0x9e   :  { %6606 = vmatprep.subr.bf16.mxu1 %v7258_v1  ;;  %v7307_v0 = vld [vmem:[%s9324_s1 + $0x6d8] sm:$0xff]  }
  0x9f   :  { %v7308_v1 = vld [vmem:[%s9324_s1 + $0x618] sm:$0xff]  }
  0xa0   :  { %6585 = vmatpush3.bf16.msra.mxu0 %v7259_v2  ;;  %v7309_v2 = vld [vmem:[%s9324_s1 + $0x698] sm:$0xff]  }
  0xa1   :  { %6614 = vmatprep.subr.bf16.mxu0 %v7261_v7  ;;  %6607 = vmatpush3.bf16.msra.mxu1 %v7260_v4  ;;  %v7311_v4 = vld [vmem:[%s9324_s1 + $0x6e0] sm:$0xff]   ;;  %v7314_v7 = vld [vmem:[%s9324_s1 + $0x668] sm:$0xff]  }
  0xa2   :  { %6636 = vmatprep.subr.bf16.mxu1 %v7262_v10  ;;  %v7317_v10 = vld [vmem:[%s9324_s1 + $0x6a8] sm:$0xff]  }
  0xa3   :  { %4943 = vmatmul.mubr.bf16.vlgmr.msra.gmra.mrb[16].mxu0 %v1183_v9  ;;  %v7316_v9 = vld [vmem:[%s9324_s1 + $0x628] sm:$0xff]  }
  0xa4   :  { %6615 = vmatpush3.bf16.msra.mxu0 %v7263_v12  ;;  %4983 = vmatmul.mubr.bf16.vlgmr.msra.gmra.mrb[16].mxu1 %v1205_v16  ;;  %v7319_v12 = vld [vmem:[%s9324_s1 + $0x6f0] sm:$0xff]   ;;  %v7323_v16 = vld [vmem:[%s9324_s1 + $0x6f8] sm:$0xff]  }
  0xa5   :  { %6616 = vmatprep.subr.bf16.mxu0 %v7265_v17  ;;  %6637 = vmatpush3.bf16.msra.mxu1 %v7264_v14  ;;  %v7321_v14 = vld [vmem:[%s9324_s1 + $0x6b0] sm:$0xff]   ;;  %v7324_v17 = vld [vmem:[%s9324_s1 + $0x638] sm:$0xff]  }
  0xa6   :  { %5022 = vmatprep.mubr.bf16.mxu0 %v1204_v20  ;;  %6638 = vmatprep.subr.bf16.mxu1 %v7266_v19  ;;  %v1216_v19 = vrot.slane %v18_v18, %v7734_v35  ;;  %v7326_v20 = vld [vmem:[%s9324_s1 + $0x740] sm:$0xff]  }
  0xa7   :  { %5062 = vmatprep.mubr.bf16.mxu1 %v1208_v23 }
  0xa8   :  { %6617 = vmatpush3.bf16.msra.mxu0 %v7267_v21  ;;  %v1209_v21 = vcombine.high %v18_v18, %v18_v18  ;;  %v1224_v23 = vcombine.high %v1216_v19, %v1216_v19 }
  0xa9   :  { %6618 = vmatprep.subr.bf16.mxu0 %v7269_v24  ;;  %6639 = vmatpush3.bf16.msra.mxu1 %v7268_v22  ;;  %v7325_v22 = vld [vmem:[%s9324_s1 + $0x6b8] sm:$0xff]   ;;  %v1232_v24 = vrot.slane %v1216_v19, %v7734_v35  ;;  %v7363_v19 = vld [vmem:[%s9324_s1 + $0x848] sm:$0xff]  }
  0xaa   :  { %6640 = vmatprep.subr.bf16.mxu1 %v7270_v25  ;;  %v7327_v25 = vld [vmem:[%s9324_s1 + $0x7c0] sm:$0xff]  }
  0xac   :  { %6619 = vmatpush3.bf16.msra.mxu0 %v7271_v26  ;;  %v8372_v26 = vrot.slane %v1209_v21, %v7734_v35  ;;  %v7365_v21 = vld [vmem:[%s9324_s1 + $0x808] sm:$0xff]  }
  0xad   :  { %6620 = vmatprep.subr.bf16.mxu0 %v7273_v28  ;;  %6641 = vmatpush3.bf16.msra.mxu1 %v7272_v27  ;;  %v1246_v27 = vrot.slane %v1224_v23, %v7734_v35  ;;  %v7328_v28 = vld [vmem:[%s9324_s1 + $0x700] sm:$0xff]   ;;  %v7367_v23 = vld [vmem:[%s9324_s1 + $0x850] sm:$0xff]  }
  0xae   :  { %6642 = vmatprep.subr.bf16.mxu1 %v7274_v29  ;;  %v1225_v29 = vcombine.high %v8372_v26, %v8372_v26 }
  0xb0   :  { %6621 = vmatpush3.bf16.msra.mxu0 %v7275_v30  ;;  %v1254_v30 = vcombine.high %v1232_v24, %v1232_v24 }
  0xb1   :  { %6622 = vmatprep.subr.bf16.mxu0 %v7277_v32  ;;  %6643 = vmatpush3.bf16.msra.mxu1 %v7276_v31  ;;  %v7330_v31 = vld [vmem:[%s9324_s1 + $0x748] sm:$0xff]   ;;  %v1256_v32 = vcombine.high %v1246_v27, %v1246_v27 }
  0xb2   :  { %6644 = vmatprep.subr.bf16.mxu1 %v7278_v33  ;;  %v7329_v33 = vld [vmem:[%s9324_s1 + $0x780] sm:$0xff]  }
  0xb4   :  { %6623 = vmatpush3.bf16.msra.mxu0 %v7279_v34  ;;  %v1253_v34 = vrot.slane %v1225_v29, %v7734_v35  ;;  %v7373_v29 = vld [vmem:[%s9324_s1 + $0x818] sm:$0xff]  }
  0xb5   :  { %6624 = vmatprep.subr.bf16.mxu0 %v7281_v37  ;;  %6645 = vmatpush3.bf16.msra.mxu1 %v7280_v36  ;;  %v7331_v36 = vld [vmem:[%s9324_s1 + $0x7c8] sm:$0xff]  }
  0xb6   :  { %6646 = vmatprep.subr.bf16.mxu1 %v7282_v38  ;;  %v7332_v37 = vld [vmem:[%s9324_s1 + $0x708] sm:$0xff]   ;;  %v1257_v38 = vcombine.high %v1253_v34, %v1253_v34 }
  0xb8   :  { %6625 = vmatpush3.bf16.msra.mxu0 %v7283_v39  ;;  %v7334_v39 = vld [vmem:[%s9324_s1 + $0x750] sm:$0xff]  }
  0xb9   :  { %6626 = vmatprep.subr.bf16.mxu0 %v7285_v41  ;;  %6647 = vmatpush3.bf16.msra.mxu1 %v7284_v40  ;;  %v7333_v40 = vld [vmem:[%s9324_s1 + $0x788] sm:$0xff]   ;;  %v7335_v41 = vld [vmem:[%s9324_s1 + $0x7d0] sm:$0xff]  }
  0xba   :  { %6648 = vmatprep.subr.bf16.mxu1 %v7286_v42  ;;  %v7336_v42 = vld [vmem:[%s9324_s1 + $0x710] sm:$0xff]  }
  0xbc   :  { %6627 = vmatpush3.bf16.msra.mxu0 %v7287_v43  ;;  %v7338_v43 = vld [vmem:[%s9324_s1 + $0x758] sm:$0xff]  }
  0xbd   :  { %6628 = vmatprep.subr.bf16.mxu0 %v7289_v45  ;;  %6649 = vmatpush3.bf16.msra.mxu1 %v7288_v44  ;;  %v7337_v44 = vld [vmem:[%s9324_s1 + $0x790] sm:$0xff]   ;;  %v7339_v45 = vld [vmem:[%s9324_s1 + $0x7d8] sm:$0xff]  }
  0xbe   :  { %6650 = vmatprep.subr.bf16.mxu1 %v7290_v46  ;;  %v7340_v46 = vld [vmem:[%s9324_s1 + $0x718] sm:$0xff]  }
  0xc0   :  { %6629 = vmatpush3.bf16.msra.mxu0 %v7291_v47  ;;  %v7342_v47 = vld [vmem:[%s9324_s1 + $0x760] sm:$0xff]  }
  0xc1   :  { %6658 = vmatprep.subr.bf16.mxu0 %v7294_v50  ;;  %6651 = vmatpush3.bf16.msra.mxu1 %v7292_v48  ;;  %v7341_v48 = vld [vmem:[%s9324_s1 + $0x798] sm:$0xff]   ;;  %v7344_v50 = vld [vmem:[%s9324_s1 + $0x720] sm:$0xff]  }
  0xc2   :  { %6680 = vmatprep.subr.bf16.mxu1 %v7295_v51  ;;  %v7346_v51 = vld [vmem:[%s9324_s1 + $0x768] sm:$0xff]  }
  0xc3   :  { %5023 = vmatmul.mubr.bf16.vlgmr.msra.gmra.mrb[20].mxu0 %v1190_v49  ;;  %v7343_v49 = vld [vmem:[%s9324_s1 + $0x7e0] sm:$0xff]  }
  0xc4   :  { %6659 = vmatpush3.bf16.msra.mxu0 %v7296_v52  ;;  %5063 = vmatmul.mubr.bf16.vlgmr.msra.gmra.mrb[20].mxu1 %v1206_v54  ;;  %v7345_v52 = vld [vmem:[%s9324_s1 + $0x7a0] sm:$0xff]  }
  0xc5   :  { %6660 = vmatprep.subr.bf16.mxu0 %v7298_v55  ;;  %6681 = vmatpush3.bf16.msra.mxu1 %v7297_v53  ;;  %v7347_v53 = vld [vmem:[%s9324_s1 + $0x7e8] sm:$0xff]   ;;  %v5881_v54 = vld [vmem:[%s9326_s2] ss:$0 sm:$0xff] }
  0xc6   :  { %6682 = vmatprep.subr.bf16.mxu1 %v7299_v56  ;;  %5102 = vmatprep.mubr.bf16.mxu0 %v1246_v27  ;;  %v7348_v55 = vld [vmem:[%s9324_s1 + $0x728] sm:$0xff]   ;;  %v7371_v27 = vld [vmem:[%s9324_s1 + $0x858] sm:$0xff]  }
  0xc7   :  { %5142 = vmatprep.mubr.bf16.mxu1 %v1256_v32  ;;  %v7376_v32 = vld [vmem:[%s9324_s1 + $0x8e0] sm:$0xff]  }
  0xc8   :  { %6661 = vmatpush3.bf16.msra.mxu0 %v7300_v57  ;;  %v7350_v57 = vld [vmem:[%s9324_s1 + $0x770] sm:$0xff]  }
  0xc9   :  { %6662 = vmatprep.subr.bf16.mxu0 %v7302_v59  ;;  %6683 = vmatpush3.bf16.msra.mxu1 %v7301_v58  ;;  %v7349_v59 = vld [vmem:[%s9324_s1 + $0x7a8] sm:$0xff]  }
  0xca   :  { %6684 = vmatprep.subr.bf16.mxu1 %v7303_v60 }
  0xcc   :  { %6663 = vmatpush3.bf16.msra.mxu0 %v7304_v61 }
  0xcd   :  { %6664 = vmatprep.subr.bf16.mxu0 %v7306_v63  ;;  %6685 = vmatpush3.bf16.msra.mxu1 %v7305_v62  ;;  %v7351_v63 = vld [vmem:[%s9324_s1 + $0x7f0] sm:$0xff]  }
  0xce   :  { %6686 = vmatprep.subr.bf16.mxu1 %v7307_v0  ;;  %v7352_v0 = vld [vmem:[%s9324_s1 + $0x730] sm:$0xff]  }
  0xd0   :  { %6665 = vmatpush3.bf16.msra.mxu0 %v7308_v1 }
  0xd1   :  { %6666 = vmatprep.subr.bf16.mxu0 %v7310_v3  ;;  %6687 = vmatpush3.bf16.msra.mxu1 %v7309_v2  ;;  %v7353_v3 = vld [vmem:[%s9324_s1 + $0x7b0] sm:$0xff]  }
  0xd2   :  { %6688 = vmatprep.subr.bf16.mxu1 %v7311_v4 }
  0xd4   :  { %6667 = vmatpush3.bf16.msra.mxu0 %v7312_v5 }
  0xd5   :  { %6668 = vmatprep.subr.bf16.mxu0 %v7314_v7  ;;  %6689 = vmatpush3.bf16.msra.mxu1 %v7313_v6  ;;  %v7354_v7 = vld [vmem:[%s9324_s1 + $0x778] sm:$0xff]  }
  0xd6   :  { %6690 = vmatprep.subr.bf16.mxu1 %v7315_v8 }
  0xd8   :  { %6669 = vmatpush3.bf16.msra.mxu0 %v7316_v9  ;;  %v7355_v9 = vld [vmem:[%s9324_s1 + $0x7f8] sm:$0xff]  }
  0xd9   :  { %6670 = vmatprep.subr.bf16.mxu0 %v7318_v11  ;;  %6691 = vmatpush3.bf16.msra.mxu1 %v7317_v10  ;;  %v7356_v11 = vld [vmem:[%s9324_s1 + $0x738] sm:$0xff]  }
  0xda   :  { %6692 = vmatprep.subr.bf16.mxu1 %v7319_v12  ;;  %v7357_v12 = vld [vmem:[%s9324_s1 + $0x7b8] sm:$0xff]  }
  0xdc   :  { %6671 = vmatpush3.bf16.msra.mxu0 %v7320_v13  ;;  %v1239_v13 = vrot.slane %v8372_v26, %v7734_v35  ;;  %v7370_v26 = vld [vmem:[%s9324_s1 + $0x890] sm:$0xff]  }
  0xdd   :  { %6672 = vmatprep.subr.bf16.mxu0 %v7322_v15  ;;  %6693 = vmatpush3.bf16.msra.mxu1 %v7321_v14  ;;  %v7359_v14 = vld [vmem:[%s9324_s1 + $0x840] sm:$0xff]  }
  0xde   :  { %6694 = vmatprep.subr.bf16.mxu1 %v7323_v16  ;;  %v7360_v15 = vld [vmem:[%s9324_s1 + $0x8c0] sm:$0xff]   ;;  %v1255_v18 = vcombine.high %v1239_v13, %v1239_v13 }
  0xdf   :  { %v7361_v16 = vld [vmem:[%s9324_s1 + $0x800] sm:$0xff]  }
  0xe0   :  { %6673 = vmatpush3.bf16.msra.mxu0 %v7324_v17  ;;  %v7362_v17 = vld [vmem:[%s9324_s1 + $0x880] sm:$0xff]  }
  0xe1   :  { %6702 = vmatprep.subr.bf16.mxu0 %v7326_v20  ;;  %6695 = vmatpush3.bf16.msra.mxu1 %v7325_v22  ;;  %v7364_v20 = vld [vmem:[%s9324_s1 + $0x8c8] sm:$0xff]  }
  0xe2   :  { %6724 = vmatprep.subr.bf16.mxu1 %v7327_v25  ;;  %v7366_v22 = vld [vmem:[%s9324_s1 + $0x888] sm:$0xff]   ;;  %v7369_v25 = vld [vmem:[%s9324_s1 + $0x810] sm:$0xff]  }
  0xe3   :  { %5103 = vmatmul.mubr.bf16.vlgmr.msra.gmra.mrb[24].mxu0 %v1232_v24  ;;  %v7368_v24 = vld [vmem:[%s9324_s1 + $0x8d0] sm:$0xff]  }
  0xe4   :  { %6703 = vmatpush3.bf16.msra.mxu0 %v7328_v28  ;;  %5143 = vmatmul.mubr.bf16.vlgmr.msra.gmra.mrb[24].mxu1 %v1254_v30  ;;  %v7372_v28 = vld [vmem:[%s9324_s1 + $0x8d8] sm:$0xff]  }
  0xe5   :  { %6704 = vmatprep.subr.bf16.mxu0 %v7330_v31  ;;  %6725 = vmatpush3.bf16.msra.mxu1 %v7329_v33  ;;  %v7374_v30 = vld [vmem:[%s9324_s1 + $0x898] sm:$0xff]   ;;  %v7375_v31 = vld [vmem:[%s9324_s1 + $0x860] sm:$0xff]  }
  0xe6   :  { %5182 = vmatprep.mubr.bf16.mxu0 %v1253_v34  ;;  %6726 = vmatprep.subr.bf16.mxu1 %v7331_v36  ;;  %v7377_v33 = vld [vmem:[%s9324_s1 + $0x820] sm:$0xff]   ;;  %v7379_v36 = vld [vmem:[%s9324_s1 + $0x868] sm:$0xff]  }
  0xe7   :  { %5222 = vmatprep.mubr.bf16.mxu1 %v1257_v38  ;;  %v7378_v34 = vld [vmem:[%s9324_s1 + $0x8a0] sm:$0xff]   ;;  %v7381_v38 = vld [vmem:[%s9324_s1 + $0x828] sm:$0xff]  }
  0xe8   :  { %6705 = vmatpush3.bf16.msra.mxu0 %v7332_v37  ;;  %v7380_v37 = vld [vmem:[%s9324_s1 + $0x8e8] sm:$0xff]  }
  0xe9   :  { %6706 = vmatprep.subr.bf16.mxu0 %v7334_v39  ;;  %6727 = vmatpush3.bf16.msra.mxu1 %v7333_v40  ;;  %v7382_v39 = vld [vmem:[%s9324_s1 + $0x8a8] sm:$0xff]  }
  0xea   :  { %6728 = vmatprep.subr.bf16.mxu1 %v7335_v41  ;;  %v7383_v41 = vld [vmem:[%s9324_s1 + $0x870] sm:$0xff]  }
  0xec   :  { %6707 = vmatpush3.bf16.msra.mxu0 %v7336_v42 }
  0xed   :  { %6708 = vmatprep.subr.bf16.mxu0 %v7338_v43  ;;  %6729 = vmatpush3.bf16.msra.mxu1 %v7337_v44  ;;  %v7384_v43 = vld [vmem:[%s9324_s1 + $0x8f0] sm:$0xff]  }
  0xee   :  { %6730 = vmatprep.subr.bf16.mxu1 %v7339_v45 }
  0xf0   :  { %6709 = vmatpush3.bf16.msra.mxu0 %v7340_v46 }
  0xf1   :  { %6710 = vmatprep.subr.bf16.mxu0 %v7342_v47  ;;  %6731 = vmatpush3.bf16.msra.mxu1 %v7341_v48 }
  0xf2   :  { %6732 = vmatprep.subr.bf16.mxu1 %v7343_v49  ;;  %v7385_v49 = vld [vmem:[%s9324_s1 + $0x830] sm:$0xff]  }
  0xf4   :  { %6711 = vmatpush3.bf16.msra.mxu0 %v7344_v50  ;;  %v7386_v50 = vld [vmem:[%s9324_s1 + $0x8b0] sm:$0xff]  }
  0xf5   :  { %6712 = vmatprep.subr.bf16.mxu0 %v7346_v51  ;;  %6733 = vmatpush3.bf16.msra.mxu1 %v7345_v52 }
  0xf6   :  { %v6410_v56 = vpop.f32.mrb[0].mxu0  ;;  %6734 = vmatprep.subr.bf16.mxu1 %v7347_v53 }
  0xf7   :  { %v6411_v58 = vpop.f32.mrb[1].mxu0  ;;  %v6432_v60 = vpop.f32.mrb[0].mxu1 }
  0xf8   :  { %v6412_v61 = vadd.f32 %v6411_v58, %v6410_v56  ;;  %v6413_v62 = vpop.f32.mrb[2].mxu0  ;;  %v6433_v1 = vpop.f32.mrb[1].mxu1  ;;  %6713 = vmatpush3.bf16.msra.mxu0 %v7348_v55  ;;  %v7388_v56 = vld [vmem:[%s9324_s1 + $0x8f8] sm:$0xff]  }
  0xf9   :  { %v6414_v2 = vpop.f32.mrb[3].mxu0  ;;  %v6434_v5 = vadd.f32 %v6433_v1, %v6432_v60  ;;  %v6435_v6 = vpop.f32.mrb[2].mxu1  ;;  %6714 = vmatprep.subr.bf16.mxu0 %v7350_v57  ;;  %6735 = vmatpush3.bf16.msra.mxu1 %v7349_v59  ;;  %v7389_v58 = vld [vmem:[%s9324_s1 + $0x838] sm:$0xff]   ;;  %v19_v59 = vld [vmem:[%s9325_s0 + $0x20] sm:$0xff] }
  0xfa   :  { %v4625_v4 = vadd.f32 %v6412_v61, %v5881_v54  ;;  %v6436_v8 = vpop.f32.mrb[3].mxu1  ;;  %6736 = vmatprep.subr.bf16.mxu1 %v7351_v63  ;;  %v7387_v54 = vld [vmem:[%s9324_s1 + $0x878] sm:$0xff]   ;;  %v1265_v60 = vrot.slane %v19_v59, %v7734_v35  ;;  %v7391_v61 = vld [vmem:[%s9324_s1 + $0x940] sm:$0xff]   ;;  %v1258_v62 = vcombine.high %v19_v59, %v19_v59  ;;  %v7428_v59 = vld [vmem:[%s9324_s1 + $0xa48] sm:$0xff]  }
  0xfb   :  { %v7390_v63 = vld [vmem:[%s9324_s1 + $0x8b8] sm:$0xff]   ;;  %v7392_v2 = vld [vmem:[%s9324_s1 + $0x9c0] sm:$0xff]  }
  0xfc   :  { %v8465_v10 = vadd.f32 %v6434_v5, %v4625_v4  ;;  %6715 = vmatpush3.bf16.msra.mxu0 %v7352_v0  ;;  %v1273_v0 = vcombine.high %v1265_v60, %v1265_v60  ;;  %v1281_v1 = vrot.slane %v1265_v60, %v7734_v35  ;;  %v7393_v4 = vld [vmem:[%s9324_s1 + $0x900] sm:$0xff]   ;;  %v7429_v60 = vld [vmem:[%s9324_s1 + $0xac8] sm:$0xff]  }
  0xfd   :  { %6716 = vmatprep.subr.bf16.mxu0 %v7354_v7  ;;  %6737 = vmatpush3.bf16.msra.mxu1 %v7353_v3  ;;  %v8586_v3 = vrot.slane %v1258_v62, %v7734_v35  ;;  %v7394_v6 = vld [vmem:[%s9324_s1 + $0x980] sm:$0xff]   ;;  %v7431_v62 = vld [vmem:[%s9324_s1 + $0xa88] sm:$0xff]  }
  0xfe   :  { %6738 = vmatprep.subr.bf16.mxu1 %v7355_v9  ;;  %v1295_v5 = vrot.slane %v1273_v0, %v7734_v35  ;;  %v1303_v8 = vcombine.high %v1281_v1, %v1281_v1  ;;  %v7395_v9 = vld [vmem:[%s9324_s1 + $0x948] sm:$0xff]   ;;  %v7433_v0 = vld [vmem:[%s9324_s1 + $0xad0] sm:$0xff]  }
  0xff   :  { %v1274_v7 = vcombine.high %v8586_v3, %v8586_v3 }
 0x100   :  { %6717 = vmatpush3.bf16.msra.mxu0 %v7356_v11  ;;  %v7396_v11 = vld [vmem:[%s9324_s1 + $0x9c8] sm:$0xff]  }
 0x101   :  { %6746 = vmatprep.subr.bf16.mxu0 %v7359_v14  ;;  %6739 = vmatpush3.bf16.msra.mxu1 %v7357_v12  ;;  %v1302_v12 = vrot.slane %v1274_v7, %v7734_v35  ;;  %v7398_v14 = vld [vmem:[%s9324_s1 + $0x988] sm:$0xff]   ;;  %v7440_v7 = vld [vmem:[%s9324_s1 + $0xa60] sm:$0xff]  }
 0x102   :  { %6768 = vmatprep.subr.bf16.mxu1 %v7360_v15 }
 0x103   :  { %5183 = vmatmul.mubr.bf16.vlgmr.msra.gmra.mrb[28].mxu0 %v1239_v13  ;;  %v7397_v13 = vld [vmem:[%s9324_s1 + $0x908] sm:$0xff]   ;;  %v1306_v15 = vcombine.high %v1302_v12, %v1302_v12 }
 0x104   :  { %6747 = vmatpush3.bf16.msra.mxu0 %v7361_v16  ;;  %5223 = vmatmul.mubr.bf16.vlgmr.msra.gmra.mrb[28].mxu1 %v1255_v18  ;;  %v7399_v16 = vld [vmem:[%s9324_s1 + $0x950] sm:$0xff]  }
 0x105   :  { %6748 = vmatprep.subr.bf16.mxu0 %v7363_v19  ;;  %6769 = vmatpush3.bf16.msra.mxu1 %v7362_v17  ;;  %v7400_v17 = vld [vmem:[%s9324_s1 + $0x9d0] sm:$0xff]  }
 0x106   :  { %6770 = vmatprep.subr.bf16.mxu1 %v7364_v20  ;;  %5262 = vmatprep.mubr.bf16.mxu0 %v1295_v5  ;;  %v7401_v18 = vld [vmem:[%s9324_s1 + $0x910] sm:$0xff]   ;;  %v7403_v20 = vld [vmem:[%s9324_s1 + $0x958] sm:$0xff]  }
 0x107   :  { %v7402_v19 = vld [vmem:[%s9324_s1 + $0x990] sm:$0xff]  }
 0x108   :  { %6749 = vmatpush3.bf16.msra.mxu0 %v7365_v21  ;;  %v7404_v21 = vld [vmem:[%s9324_s1 + $0x9d8] sm:$0xff]  }
 0x109   :  { %6750 = vmatprep.subr.bf16.mxu0 %v7367_v23  ;;  %6771 = vmatpush3.bf16.msra.mxu1 %v7366_v22  ;;  %v7405_v22 = vld [vmem:[%s9324_s1 + $0x918] sm:$0xff]  }
 0x10a   :  { %6772 = vmatprep.subr.bf16.mxu1 %v7368_v24  ;;  %v7406_v23 = vld [vmem:[%s9324_s1 + $0x998] sm:$0xff]   ;;  %v7407_v24 = vld [vmem:[%s9324_s1 + $0x960] sm:$0xff]  }
 0x10c   :  { %6751 = vmatpush3.bf16.msra.mxu0 %v7369_v25  ;;  %v7408_v25 = vld [vmem:[%s9324_s1 + $0x9e0] sm:$0xff]  }
 0x10d   :  { %6752 = vmatprep.subr.bf16.mxu0 %v7371_v27  ;;  %6773 = vmatpush3.bf16.msra.mxu1 %v7370_v26  ;;  %v7409_v26 = vld [vmem:[%s9324_s1 + $0x920] sm:$0xff]  }
 0x10e   :  { %6774 = vmatprep.subr.bf16.mxu1 %v7372_v28  ;;  %v7410_v27 = vld [vmem:[%s9324_s1 + $0x9a0] sm:$0xff]   ;;  %v7411_v28 = vld [vmem:[%s9324_s1 + $0x968] sm:$0xff]  }
 0x110   :  { %6753 = vmatpush3.bf16.msra.mxu0 %v7373_v29  ;;  %v7412_v29 = vld [vmem:[%s9324_s1 + $0x9e8] sm:$0xff]  }
 0x111   :  { %6754 = vmatprep.subr.bf16.mxu0 %v7375_v31  ;;  %6775 = vmatpush3.bf16.msra.mxu1 %v7374_v30  ;;  %v7413_v30 = vld [vmem:[%s9324_s1 + $0x928] sm:$0xff]  }
 0x112   :  { %6776 = vmatprep.subr.bf16.mxu1 %v7376_v32  ;;  %v7414_v32 = vld [vmem:[%s9324_s1 + $0x9a8] sm:$0xff]  }
 0x114   :  { %6755 = vmatpush3.bf16.msra.mxu0 %v7377_v33 }
 0x115   :  { %6756 = vmatprep.subr.bf16.mxu0 %v7379_v36  ;;  %6777 = vmatpush3.bf16.msra.mxu1 %v7378_v34  ;;  %v7415_v34 = vld [vmem:[%s9324_s1 + $0x970] sm:$0xff]  }
 0x116   :  { %v6454_v40 = vpop.f32.mrb[4].mxu0  ;;  %6778 = vmatprep.subr.bf16.mxu1 %v7380_v37 }
 0x117   :  { %v6455_v42 = vpop.f32.mrb[5].mxu0  ;;  %v6476_v44 = vpop.f32.mrb[4].mxu1 }
 0x118   :  { %v6456_v45 = vadd.f32 %v6455_v42, %v6454_v40  ;;  %v6457_v46 = vpop.f32.mrb[6].mxu0  ;;  %v6477_v47 = vpop.f32.mrb[5].mxu1  ;;  %6757 = vmatpush3.bf16.msra.mxu0 %v7381_v38  ;;  %v7417_v40 = vld [vmem:[%s9324_s1 + $0x930] sm:$0xff]  }
 0x119   :  { %v6458_v48 = vpop.f32.mrb[7].mxu0  ;;  %v6478_v52 = vadd.f32 %v6477_v47, %v6476_v44  ;;  %v6479_v53 = vpop.f32.mrb[6].mxu1  ;;  %6758 = vmatprep.subr.bf16.mxu0 %v7383_v41  ;;  %6779 = vmatpush3.bf16.msra.mxu1 %v7382_v39  ;;  %v7416_v39 = vld [vmem:[%s9324_s1 + $0x9f0] sm:$0xff]  }
 0x11a   :  { %v4705_v51 = vadd.f32 %v6456_v45, %v8465_v10  ;;  %v6480_v55 = vpop.f32.mrb[7].mxu1  ;;  %6780 = vmatprep.subr.bf16.mxu1 %v7384_v43  ;;  %v1305_v10 = vcombine.high %v1295_v5, %v1295_v5  ;;  %v7418_v46 = vld [vmem:[%s9324_s1 + $0x9b0] sm:$0xff]   ;;  %v7419_v48 = vld [vmem:[%s9324_s1 + $0x978] sm:$0xff]   ;;  %v1288_v53 = vrot.slane %v8586_v3, %v7734_v35 }
 0x11b   :  { %v7425_v55 = vld [vmem:[%s9324_s1 + $0xac0] sm:$0xff]   ;;  %v7436_v3 = vld [vmem:[%s9324_s1 + $0xa58] sm:$0xff]  }
 0x11c   :  { %v8566_v57 = vadd.f32 %v6478_v52, %v4705_v51  ;;  %6759 = vmatpush3.bf16.msra.mxu0 %v7385_v49  ;;  %5302 = vmatprep.mubr.bf16.mxu1 %v1305_v10  ;;  %v7421_v51 = vld [vmem:[%s9324_s1 + $0x938] sm:$0xff]   ;;  %v7443_v10 = vld [vmem:[%s9324_s1 + $0xaa0] sm:$0xff]  }
 0x11d   :  { %6760 = vmatprep.subr.bf16.mxu0 %v7387_v54  ;;  %6781 = vmatpush3.bf16.msra.mxu1 %v7386_v50  ;;  %v7420_v50 = vld [vmem:[%s9324_s1 + $0x9f8] sm:$0xff]   ;;  %v7424_v54 = vld [vmem:[%s9324_s1 + $0xa40] sm:$0xff]  }
 0x11e   :  { %6782 = vmatprep.subr.bf16.mxu1 %v7388_v56  ;;  %v7422_v52 = vld [vmem:[%s9324_s1 + $0x9b8] sm:$0xff]   ;;  %v7426_v56 = vld [vmem:[%s9324_s1 + $0xa00] sm:$0xff]  }
 0x11f   :  { %v7438_v5 = vld [vmem:[%s9324_s1 + $0xa18] sm:$0xff]  }
 0x120   :  { %6761 = vmatpush3.bf16.msra.mxu0 %v7389_v58  ;;  %v1304_v58 = vcombine.high %v1288_v53, %v1288_v53 }
 0x121   :  { %6790 = vmatprep.subr.bf16.mxu0 %v7391_v61  ;;  %6783 = vmatpush3.bf16.msra.mxu1 %v7390_v63  ;;  %v7430_v61 = vld [vmem:[%s9324_s1 + $0xa08] sm:$0xff]   ;;  %v7432_v63 = vld [vmem:[%s9324_s1 + $0xa50] sm:$0xff]  }
 0x122   :  { %6812 = vmatprep.subr.bf16.mxu1 %v7392_v2  ;;  %v7435_v2 = vld [vmem:[%s9324_s1 + $0xa90] sm:$0xff]  }
 0x123   :  { %5263 = vmatmul.mubr.bf16.vlgmr.msra.gmra.mrb[32].mxu0 %v1281_v1  ;;  %v7434_v1 = vld [vmem:[%s9324_s1 + $0xa10] sm:$0xff]  }
 0x124   :  { %6791 = vmatpush3.bf16.msra.mxu0 %v7393_v4  ;;  %5303 = vmatmul.mubr.bf16.vlgmr.msra.gmra.mrb[32].mxu1 %v1303_v8  ;;  %v7437_v4 = vld [vmem:[%s9324_s1 + $0xad8] sm:$0xff]   ;;  %v7441_v8 = vld [vmem:[%s9324_s1 + $0xae0] sm:$0xff]  }
 0x125   :  { %6792 = vmatprep.subr.bf16.mxu0 %v7395_v9  ;;  %6813 = vmatpush3.bf16.msra.mxu1 %v7394_v6  ;;  %v7439_v6 = vld [vmem:[%s9324_s1 + $0xa98] sm:$0xff]   ;;  %v7442_v9 = vld [vmem:[%s9324_s1 + $0xa20] sm:$0xff]  }
 0x126   :  { %5342 = vmatprep.mubr.bf16.mxu0 %v1302_v12  ;;  %6814 = vmatprep.subr.bf16.mxu1 %v7396_v11  ;;  %v7444_v11 = vld [vmem:[%s9324_s1 + $0xa68] sm:$0xff]  }
 0x127   :  { %5382 = vmatprep.mubr.bf16.mxu1 %v1306_v15  ;;  %v7445_v12 = vld [vmem:[%s9324_s1 + $0xae8] sm:$0xff]  }
 0x128   :  { %6793 = vmatpush3.bf16.msra.mxu0 %v7397_v13  ;;  %v7446_v13 = vld [vmem:[%s9324_s1 + $0xa28] sm:$0xff]  }
 0x129   :  { %6794 = vmatprep.subr.bf16.mxu0 %v7399_v16  ;;  %6815 = vmatpush3.bf16.msra.mxu1 %v7398_v14  ;;  %v7447_v15 = vld [vmem:[%s9324_s1 + $0xaa8] sm:$0xff]  }
 0x12a   :  { %6816 = vmatprep.subr.bf16.mxu1 %v7400_v17  ;;  %v7448_v17 = vld [vmem:[%s9324_s1 + $0xa70] sm:$0xff]  }
 0x12c   :  { %6795 = vmatpush3.bf16.msra.mxu0 %v7401_v18 }
 0x12d   :  { %6796 = vmatprep.subr.bf16.mxu0 %v7403_v20  ;;  %6817 = vmatpush3.bf16.msra.mxu1 %v7402_v19 }
 0x12e   :  { %6818 = vmatprep.subr.bf16.mxu1 %v7404_v21 }
 0x130   :  { %6797 = vmatpush3.bf16.msra.mxu0 %v7405_v22 }
 0x131   :  { %6798 = vmatprep.subr.bf16.mxu0 %v7407_v24  ;;  %6819 = vmatpush3.bf16.msra.mxu1 %v7406_v23  ;;  %v7449_v23 = vld [vmem:[%s9324_s1 + $0xaf0] sm:$0xff]  }
 0x132   :  { %6820 = vmatprep.subr.bf16.mxu1 %v7408_v25  ;;  %v7450_v24 = vld [vmem:[%s9324_s1 + $0xa30] sm:$0xff]  }
 0x134   :  { %6799 = vmatpush3.bf16.msra.mxu0 %v7409_v26 }
 0x135   :  { %6800 = vmatprep.subr.bf16.mxu0 %v7411_v28  ;;  %6821 = vmatpush3.bf16.msra.mxu1 %v7410_v27  ;;  %v7451_v28 = vld [vmem:[%s9324_s1 + $0xab0] sm:$0xff]  }
 0x136   :  { %v6498_v31 = vpop.f32.mrb[8].mxu0  ;;  %6822 = vmatprep.subr.bf16.mxu1 %v7412_v29 }
 0x137   :  { %v6499_v33 = vpop.f32.mrb[9].mxu0  ;;  %v6520_v36 = vpop.f32.mrb[8].mxu1 }
 0x138   :  { %v6500_v37 = vadd.f32 %v6499_v33, %v6498_v31  ;;  %v6501_v38 = vpop.f32.mrb[10].mxu0  ;;  %v6521_v41 = vpop.f32.mrb[9].mxu1  ;;  %6801 = vmatpush3.bf16.msra.mxu0 %v7413_v30  ;;  %v7452_v30 = vld [vmem:[%s9324_s1 + $0xa78] sm:$0xff]  }
 0x139   :  { %v6502_v42 = vpop.f32.mrb[11].mxu0  ;;  %v6522_v44 = vadd.f32 %v6521_v41, %v6520_v36  ;;  %v6523_v45 = vpop.f32.mrb[10].mxu1  ;;  %6802 = vmatprep.subr.bf16.mxu0 %v7415_v34  ;;  %6823 = vmatpush3.bf16.msra.mxu1 %v7414_v32  ;;  %v7453_v32 = vld [vmem:[%s9324_s1 + $0xaf8] sm:$0xff]   ;;  %v20_v34 = vld [vmem:[%s9325_s0 + $0x28] sm:$0xff] }
 0x13a   :  { %v4785_v43 = vadd.f32 %v6500_v37, %v8566_v57  ;;  %v6524_v47 = vpop.f32.mrb[11].mxu1  ;;  %6824 = vmatprep.subr.bf16.mxu1 %v7416_v39  ;;  %v7427_v57 = vld [vmem:[%s9324_s1 + $0xa80] sm:$0xff]   ;;  %v7454_v33 = vld [vmem:[%s9324_s1 + $0xa38] sm:$0xff]   ;;  %v1314_v36 = vrot.slane %v20_v34, %v7734_v35  ;;  %v1307_v38 = vcombine.high %v20_v34, %v20_v34  ;;  %v7493_v34 = vld [vmem:[%s9324_s1 + $0xc48] sm:$0xff]  }
 0x13b   :  { %v7456_v37 = vld [vmem:[%s9324_s1 + $0xb40] sm:$0xff]   ;;  %v7455_v39 = vld [vmem:[%s9324_s1 + $0xab8] sm:$0xff]  }
 0x13c   :  { %v8674_v49 = vadd.f32 %v6522_v44, %v4785_v43  ;;  %6803 = vmatpush3.bf16.msra.mxu0 %v7417_v40  ;;  %v1322_v40 = vcombine.high %v1314_v36, %v1314_v36  ;;  %v1330_v41 = vrot.slane %v1314_v36, %v7734_v35  ;;  %v7457_v42 = vld [vmem:[%s9324_s1 + $0xbc0] sm:$0xff]   ;;  %v8798_v43 = vrot.slane %v1307_v38, %v7734_v35  ;;  %v7494_v36 = vld [vmem:[%s9324_s1 + $0xcc8] sm:$0xff]  }
 0x13d   :  { %6804 = vmatprep.subr.bf16.mxu0 %v7419_v48  ;;  %6825 = vmatpush3.bf16.msra.mxu1 %v7418_v46  ;;  %v7458_v44 = vld [vmem:[%s9324_s1 + $0xb00] sm:$0xff]   ;;  %v7496_v38 = vld [vmem:[%s9324_s1 + $0xc88] sm:$0xff]  }
 0x13e   :  { %6826 = vmatprep.subr.bf16.mxu1 %v7420_v50  ;;  %v1344_v45 = vrot.slane %v1322_v40, %v7734_v35  ;;  %v7459_v46 = vld [vmem:[%s9324_s1 + $0xb80] sm:$0xff]   ;;  %v1323_v47 = vcombine.high %v8798_v43, %v8798_v43  ;;  %v1352_v48 = vcombine.high %v1330_v41, %v1330_v41  ;;  %v7498_v40 = vld [vmem:[%s9324_s1 + $0xcd0] sm:$0xff]  }
 0x140   :  { %6805 = vmatpush3.bf16.msra.mxu0 %v7421_v51  ;;  %v1354_v50 = vcombine.high %v1344_v45, %v1344_v45  ;;  %v7461_v51 = vld [vmem:[%s9324_s1 + $0xbc8] sm:$0xff]  }
 0x141   :  { %6834 = vmatprep.subr.bf16.mxu0 %v7424_v54  ;;  %6827 = vmatpush3.bf16.msra.mxu1 %v7422_v52  ;;  %v1351_v52 = vrot.slane %v1323_v47, %v7734_v35  ;;  %v7463_v54 = vld [vmem:[%s9324_s1 + $0xb88] sm:$0xff]   ;;  %v7505_v47 = vld [vmem:[%s9324_s1 + $0xc60] sm:$0xff]  }
 0x142   :  { %6856 = vmatprep.subr.bf16.mxu1 %v7425_v55 }
 0x143   :  { %5343 = vmatmul.mubr.bf16.vlgmr.msra.gmra.mrb[36].mxu0 %v1288_v53  ;;  %v7462_v53 = vld [vmem:[%s9324_s1 + $0xb08] sm:$0xff]   ;;  %v1355_v55 = vcombine.high %v1351_v52, %v1351_v52 }
 0x144   :  { %6835 = vmatpush3.bf16.msra.mxu0 %v7426_v56  ;;  %5383 = vmatmul.mubr.bf16.vlgmr.msra.gmra.mrb[36].mxu1 %v1304_v58  ;;  %v7464_v56 = vld [vmem:[%s9324_s1 + $0xb50] sm:$0xff]  }
 0x145   :  { %6836 = vmatprep.subr.bf16.mxu0 %v7428_v59  ;;  %6857 = vmatpush3.bf16.msra.mxu1 %v7427_v57  ;;  %v7465_v57 = vld [vmem:[%s9324_s1 + $0xbd0] sm:$0xff]  }
 0x146   :  { %6858 = vmatprep.subr.bf16.mxu1 %v7429_v60  ;;  %5422 = vmatprep.mubr.bf16.mxu0 %v1344_v45  ;;  %v7466_v58 = vld [vmem:[%s9324_s1 + $0xb10] sm:$0xff]   ;;  %v7468_v60 = vld [vmem:[%s9324_s1 + $0xb58] sm:$0xff]  }
 0x147   :  { %5462 = vmatprep.mubr.bf16.mxu1 %v1354_v50  ;;  %v7467_v59 = vld [vmem:[%s9324_s1 + $0xb90] sm:$0xff]   ;;  %v7503_v45 = vld [vmem:[%s9324_s1 + $0xc18] sm:$0xff]   ;;  %v7508_v50 = vld [vmem:[%s9324_s1 + $0xca0] sm:$0xff]  }
 0x148   :  { %6837 = vmatpush3.bf16.msra.mxu0 %v7430_v61  ;;  %v7469_v61 = vld [vmem:[%s9324_s1 + $0xbd8] sm:$0xff]  }
 0x149   :  { %6838 = vmatprep.subr.bf16.mxu0 %v7432_v63  ;;  %6859 = vmatpush3.bf16.msra.mxu1 %v7431_v62  ;;  %v7470_v62 = vld [vmem:[%s9324_s1 + $0xb18] sm:$0xff]  }
 0x14a   :  { %6860 = vmatprep.subr.bf16.mxu1 %v7433_v0  ;;  %v7471_v63 = vld [vmem:[%s9324_s1 + $0xb98] sm:$0xff]   ;;  %v7472_v0 = vld [vmem:[%s9324_s1 + $0xb60] sm:$0xff]  }
 0x14c   :  { %6839 = vmatpush3.bf16.msra.mxu0 %v7434_v1  ;;  %v7473_v1 = vld [vmem:[%s9324_s1 + $0xbe0] sm:$0xff]  }
 0x14d   :  { %6840 = vmatprep.subr.bf16.mxu0 %v7436_v3  ;;  %6861 = vmatpush3.bf16.msra.mxu1 %v7435_v2  ;;  %v7474_v2 = vld [vmem:[%s9324_s1 + $0xb20] sm:$0xff]  }
 0x14e   :  { %6862 = vmatprep.subr.bf16.mxu1 %v7437_v4  ;;  %v7475_v3 = vld [vmem:[%s9324_s1 + $0xba0] sm:$0xff]   ;;  %v7476_v4 = vld [vmem:[%s9324_s1 + $0xb68] sm:$0xff]  }
 0x150   :  { %6841 = vmatpush3.bf16.msra.mxu0 %v7438_v5  ;;  %v7477_v5 = vld [vmem:[%s9324_s1 + $0xbe8] sm:$0xff]  }
 0x151   :  { %6842 = vmatprep.subr.bf16.mxu0 %v7440_v7  ;;  %6863 = vmatpush3.bf16.msra.mxu1 %v7439_v6  ;;  %v7478_v7 = vld [vmem:[%s9324_s1 + $0xb28] sm:$0xff]  }
 0x152   :  { %6864 = vmatprep.subr.bf16.mxu1 %v7441_v8 }
 0x154   :  { %6843 = vmatpush3.bf16.msra.mxu0 %v7442_v9  ;;  %v7479_v9 = vld [vmem:[%s9324_s1 + $0xba8] sm:$0xff]  }
 0x155   :  { %6844 = vmatprep.subr.bf16.mxu0 %v7444_v11  ;;  %6865 = vmatpush3.bf16.msra.mxu1 %v7443_v10 }
 0x156   :  { %v6542_v14 = vpop.f32.mrb[12].mxu0  ;;  %6866 = vmatprep.subr.bf16.mxu1 %v7445_v12 }
 0x157   :  { %v6543_v16 = vpop.f32.mrb[13].mxu0  ;;  %v6564_v18 = vpop.f32.mrb[12].mxu1 }
 0x158   :  { %v6544_v19 = vadd.f32 %v6543_v16, %v6542_v14  ;;  %v6545_v20 = vpop.f32.mrb[14].mxu0  ;;  %v6565_v21 = vpop.f32.mrb[13].mxu1  ;;  %6845 = vmatpush3.bf16.msra.mxu0 %v7446_v13  ;;  %v7480_v13 = vld [vmem:[%s9324_s1 + $0xb70] sm:$0xff]  }
 0x159   :  { %v6546_v22 = vpop.f32.mrb[15].mxu0  ;;  %v6566_v26 = vadd.f32 %v6565_v21, %v6564_v18  ;;  %v6567_v27 = vpop.f32.mrb[14].mxu1  ;;  %6846 = vmatprep.subr.bf16.mxu0 %v7448_v17  ;;  %6867 = vmatpush3.bf16.msra.mxu1 %v7447_v15  ;;  %v7481_v14 = vld [vmem:[%s9324_s1 + $0xbf0] sm:$0xff]  }
 0x15a   :  { %v4865_v25 = vadd.f32 %v6544_v19, %v8674_v49  ;;  %v6568_v29 = vpop.f32.mrb[15].mxu1  ;;  %6868 = vmatprep.subr.bf16.mxu1 %v7449_v23  ;;  %v7460_v49 = vld [vmem:[%s9324_s1 + $0xb48] sm:$0xff]   ;;  %v7482_v20 = vld [vmem:[%s9324_s1 + $0xb30] sm:$0xff]   ;;  %v7487_v27 = vld [vmem:[%s9324_s1 + $0xbb8] sm:$0xff]  }
 0x15b   :  { %v7483_v22 = vld [vmem:[%s9324_s1 + $0xbb0] sm:$0xff]   ;;  %v7489_v29 = vld [vmem:[%s9324_s1 + $0xc40] sm:$0xff]  }
 0x15c   :  { %v8775_v31 = vadd.f32 %v6566_v26, %v4865_v25  ;;  %6847 = vmatpush3.bf16.msra.mxu0 %v7450_v24  ;;  %v7484_v24 = vld [vmem:[%s9324_s1 + $0xb78] sm:$0xff]  }
 0x15d   :  { %6848 = vmatprep.subr.bf16.mxu0 %v7452_v30  ;;  %6869 = vmatpush3.bf16.msra.mxu1 %v7451_v28  ;;  %v7485_v25 = vld [vmem:[%s9324_s1 + $0xbf8] sm:$0xff]   ;;  %v1337_v28 = vrot.slane %v8798_v43, %v7734_v35  ;;  %v7490_v30 = vld [vmem:[%s9324_s1 + $0xcc0] sm:$0xff]  }
 0x15e   :  { %6870 = vmatprep.subr.bf16.mxu1 %v7453_v32  ;;  %v7486_v26 = vld [vmem:[%s9324_s1 + $0xb38] sm:$0xff]   ;;  %v7492_v32 = vld [vmem:[%s9324_s1 + $0xc80] sm:$0xff]  }
 0x15f   :  { %v7501_v43 = vld [vmem:[%s9324_s1 + $0xc58] sm:$0xff]  }
 0x160   :  { %6849 = vmatpush3.bf16.msra.mxu0 %v7454_v33  ;;  %v1353_v33 = vcombine.high %v1337_v28, %v1337_v28 }
 0x161   :  { %6878 = vmatprep.subr.bf16.mxu0 %v7456_v37  ;;  %6871 = vmatpush3.bf16.msra.mxu1 %v7455_v39  ;;  %v7495_v37 = vld [vmem:[%s9324_s1 + $0xc08] sm:$0xff]   ;;  %v7497_v39 = vld [vmem:[%s9324_s1 + $0xc50] sm:$0xff]  }
 0x162   :  { %6900 = vmatprep.subr.bf16.mxu1 %v7457_v42  ;;  %v7500_v42 = vld [vmem:[%s9324_s1 + $0xc90] sm:$0xff]  }
 0x163   :  { %5423 = vmatmul.mubr.bf16.vlgmr.msra.gmra.mrb[40].mxu0 %v1330_v41  ;;  %v7499_v41 = vld [vmem:[%s9324_s1 + $0xc10] sm:$0xff]  }
 0x164   :  { %6879 = vmatpush3.bf16.msra.mxu0 %v7458_v44  ;;  %5463 = vmatmul.mubr.bf16.vlgmr.msra.gmra.mrb[40].mxu1 %v1352_v48  ;;  %v7502_v44 = vld [vmem:[%s9324_s1 + $0xcd8] sm:$0xff]   ;;  %v7506_v48 = vld [vmem:[%s9324_s1 + $0xce0] sm:$0xff]  }
 0x165   :  { %6880 = vmatprep.subr.bf16.mxu0 %v7460_v49  ;;  %6901 = vmatpush3.bf16.msra.mxu1 %v7459_v46  ;;  %v7504_v46 = vld [vmem:[%s9324_s1 + $0xc98] sm:$0xff]   ;;  %v7507_v49 = vld [vmem:[%s9324_s1 + $0xc20] sm:$0xff]  }
 0x166   :  { %5502 = vmatprep.mubr.bf16.mxu0 %v1351_v52  ;;  %6902 = vmatprep.subr.bf16.mxu1 %v7461_v51  ;;  %v7509_v51 = vld [vmem:[%s9324_s1 + $0xc68] sm:$0xff]  }
 0x167   :  { %5542 = vmatprep.mubr.bf16.mxu1 %v1355_v55  ;;  %v7510_v52 = vld [vmem:[%s9324_s1 + $0xce8] sm:$0xff]  }
 0x168   :  { %6881 = vmatpush3.bf16.msra.mxu0 %v7462_v53 }
 0x169   :  { %6882 = vmatprep.subr.bf16.mxu0 %v7464_v56  ;;  %6903 = vmatpush3.bf16.msra.mxu1 %v7463_v54  ;;  %v7511_v54 = vld [vmem:[%s9324_s1 + $0xc28] sm:$0xff]   ;;  %v7513_v56 = vld [vmem:[%s9324_s1 + $0xc70] sm:$0xff]  }
 0x16a   :  { %6904 = vmatprep.subr.bf16.mxu1 %v7465_v57 }
 0x16c   :  { %6883 = vmatpush3.bf16.msra.mxu0 %v7466_v58 }
 0x16d   :  { %6884 = vmatprep.subr.bf16.mxu0 %v7468_v60  ;;  %6905 = vmatpush3.bf16.msra.mxu1 %v7467_v59 }
 0x16e   :  { %6906 = vmatprep.subr.bf16.mxu1 %v7469_v61  ;;  %v7512_v61 = vld [vmem:[%s9324_s1 + $0xca8] sm:$0xff]  }
 0x170   :  { %6885 = vmatpush3.bf16.msra.mxu0 %v7470_v62 }
 0x171   :  { %6886 = vmatprep.subr.bf16.mxu0 %v7472_v0  ;;  %6907 = vmatpush3.bf16.msra.mxu1 %v7471_v63  ;;  %v7514_v63 = vld [vmem:[%s9324_s1 + $0xcf0] sm:$0xff]  }
 0x172   :  { %6908 = vmatprep.subr.bf16.mxu1 %v7473_v1 }
 0x174   :  { %6887 = vmatpush3.bf16.msra.mxu0 %v7474_v2 }
 0x175   :  { %6888 = vmatprep.subr.bf16.mxu0 %v7476_v4  ;;  %6909 = vmatpush3.bf16.msra.mxu1 %v7475_v3  ;;  %v7515_v3 = vld [vmem:[%s9324_s1 + $0xc30] sm:$0xff]  }
 0x176   :  { %v6586_v6 = vpop.f32.mrb[16].mxu0  ;;  %6910 = vmatprep.subr.bf16.mxu1 %v7477_v5  ;;  %v7517_v5 = vld [vmem:[%s9324_s1 + $0xc78] sm:$0xff]  }
 0x177   :  { %v6587_v8 = vpop.f32.mrb[17].mxu0  ;;  %v6608_v10 = vpop.f32.mrb[16].mxu1 }
 0x178   :  { %v6588_v11 = vadd.f32 %v6587_v8, %v6586_v6  ;;  %v6589_v12 = vpop.f32.mrb[18].mxu0  ;;  %v6609_v15 = vpop.f32.mrb[17].mxu1  ;;  %6889 = vmatpush3.bf16.msra.mxu0 %v7478_v7  ;;  %v7516_v7 = vld [vmem:[%s9324_s1 + $0xcb0] sm:$0xff]   ;;  %v7518_v8 = vld [vmem:[%s9324_s1 + $0xcf8] sm:$0xff]  }
 0x179   :  { %v6590_v16 = vpop.f32.mrb[19].mxu0  ;;  %v6610_v18 = vadd.f32 %v6609_v15, %v6608_v10  ;;  %v6611_v19 = vpop.f32.mrb[18].mxu1  ;;  %6890 = vmatprep.subr.bf16.mxu0 %v7480_v13  ;;  %6911 = vmatpush3.bf16.msra.mxu1 %v7479_v9  ;;  %v7519_v9 = vld [vmem:[%s9324_s1 + $0xc38] sm:$0xff]   ;;  %v21_v10 = vld [vmem:[%s9325_s0 + $0x30] sm:$0xff]  ;;  %v7521_v12 = vld [vmem:[%s9324_s1 + $0xd40] sm:$0xff]  }
 0x17a   :  { %v4945_v17 = vadd.f32 %v6588_v11, %v8775_v31  ;;  %v6612_v21 = vpop.f32.mrb[19].mxu1  ;;  %6912 = vmatprep.subr.bf16.mxu1 %v7481_v14  ;;  %v7491_v31 = vld [vmem:[%s9324_s1 + $0xc00] sm:$0xff]   ;;  %v1363_v11 = vrot.slane %v21_v10, %v7734_v35  ;;  %v1356_v13 = vcombine.high %v21_v10, %v21_v10  ;;  %v7520_v14 = vld [vmem:[%s9324_s1 + $0xcb8] sm:$0xff]   ;;  %v7558_v10 = vld [vmem:[%s9324_s1 + $0xe48] sm:$0xff]  }
 0x17b   :  { %v7523_v19 = vld [vmem:[%s9324_s1 + $0xd00] sm:$0xff]  }
 0x17c   :  { %v8883_v23 = vadd.f32 %v6610_v18, %v4945_v17  ;;  %6891 = vmatpush3.bf16.msra.mxu0 %v7482_v20  ;;  %v1371_v15 = vcombine.high %v1363_v11, %v1363_v11  ;;  %v1379_v16 = vrot.slane %v1363_v11, %v7734_v35  ;;  %v7522_v17 = vld [vmem:[%s9324_s1 + $0xdc0] sm:$0xff]   ;;  %v9010_v18 = vrot.slane %v1356_v13, %v7734_v35  ;;  %v7559_v11 = vld [vmem:[%s9324_s1 + $0xec8] sm:$0xff]  }
 0x17d   :  { %6892 = vmatprep.subr.bf16.mxu0 %v7484_v24  ;;  %6913 = vmatpush3.bf16.msra.mxu1 %v7483_v22  ;;  %v7524_v21 = vld [vmem:[%s9324_s1 + $0xd80] sm:$0xff]   ;;  %v7525_v24 = vld [vmem:[%s9324_s1 + $0xd48] sm:$0xff]  }
 0x17e   :  { %6914 = vmatprep.subr.bf16.mxu1 %v7485_v25  ;;  %v1393_v20 = vrot.slane %v1371_v15, %v7734_v35  ;;  %v1372_v22 = vcombine.high %v9010_v18, %v9010_v18  ;;  %v7561_v13 = vld [vmem:[%s9324_s1 + $0xe88] sm:$0xff]   ;;  %v7563_v15 = vld [vmem:[%s9324_s1 + $0xed0] sm:$0xff]  }
 0x180   :  { %6893 = vmatpush3.bf16.msra.mxu0 %v7486_v26  ;;  %v1403_v25 = vcombine.high %v1393_v20, %v1393_v20  ;;  %v7526_v26 = vld [vmem:[%s9324_s1 + $0xdc8] sm:$0xff]  }
 0x181   :  { %6922 = vmatprep.subr.bf16.mxu0 %v7489_v29  ;;  %6915 = vmatpush3.bf16.msra.mxu1 %v7487_v27  ;;  %v1400_v27 = vrot.slane %v1372_v22, %v7734_v35  ;;  %v7528_v29 = vld [vmem:[%s9324_s1 + $0xd88] sm:$0xff]   ;;  %v7570_v22 = vld [vmem:[%s9324_s1 + $0xe60] sm:$0xff]  }
 0x182   :  { %6944 = vmatprep.subr.bf16.mxu1 %v7490_v30 }
 0x183   :  { %5503 = vmatmul.mubr.bf16.vlgmr.msra.gmra.mrb[44].mxu0 %v1337_v28  ;;  %v7527_v28 = vld [vmem:[%s9324_s1 + $0xd08] sm:$0xff]   ;;  %v1404_v30 = vcombine.high %v1400_v27, %v1400_v27 }
 0x184   :  { %6923 = vmatpush3.bf16.msra.mxu0 %v7491_v31  ;;  %5543 = vmatmul.mubr.bf16.vlgmr.msra.gmra.mrb[44].mxu1 %v1353_v33  ;;  %v7529_v31 = vld [vmem:[%s9324_s1 + $0xd50] sm:$0xff]  }
 0x185   :  { %6924 = vmatprep.subr.bf16.mxu0 %v7493_v34  ;;  %6945 = vmatpush3.bf16.msra.mxu1 %v7492_v32  ;;  %v7530_v32 = vld [vmem:[%s9324_s1 + $0xdd0] sm:$0xff]  }
 0x186   :  { %6946 = vmatprep.subr.bf16.mxu1 %v7494_v36  ;;  %5582 = vmatprep.mubr.bf16.mxu0 %v1393_v20  ;;  %v7531_v33 = vld [vmem:[%s9324_s1 + $0xd10] sm:$0xff]   ;;  %v7533_v36 = vld [vmem:[%s9324_s1 + $0xd58] sm:$0xff]  }
 0x187   :  { %5622 = vmatprep.mubr.bf16.mxu1 %v1403_v25  ;;  %v7532_v34 = vld [vmem:[%s9324_s1 + $0xd90] sm:$0xff]   ;;  %v7568_v20 = vld [vmem:[%s9324_s1 + $0xe18] sm:$0xff]   ;;  %v7573_v25 = vld [vmem:[%s9324_s1 + $0xea0] sm:$0xff]  }
 0x188   :  { %6925 = vmatpush3.bf16.msra.mxu0 %v7495_v37  ;;  %v7534_v37 = vld [vmem:[%s9324_s1 + $0xdd8] sm:$0xff]  }
 0x189   :  { %6926 = vmatprep.subr.bf16.mxu0 %v7497_v39  ;;  %6947 = vmatpush3.bf16.msra.mxu1 %v7496_v38  ;;  %v7535_v38 = vld [vmem:[%s9324_s1 + $0xd18] sm:$0xff]  }
 0x18a   :  { %6948 = vmatprep.subr.bf16.mxu1 %v7498_v40  ;;  %v7536_v39 = vld [vmem:[%s9324_s1 + $0xd98] sm:$0xff]   ;;  %v7537_v40 = vld [vmem:[%s9324_s1 + $0xd60] sm:$0xff]  }
 0x18c   :  { %6927 = vmatpush3.bf16.msra.mxu0 %v7499_v41  ;;  %v7538_v41 = vld [vmem:[%s9324_s1 + $0xde0] sm:$0xff]  }
 0x18d   :  { %6928 = vmatprep.subr.bf16.mxu0 %v7501_v43  ;;  %6949 = vmatpush3.bf16.msra.mxu1 %v7500_v42  ;;  %v7539_v42 = vld [vmem:[%s9324_s1 + $0xd20] sm:$0xff]  }
 0x18e   :  { %6950 = vmatprep.subr.bf16.mxu1 %v7502_v44  ;;  %v7540_v43 = vld [vmem:[%s9324_s1 + $0xda0] sm:$0xff]   ;;  %v7541_v44 = vld [vmem:[%s9324_s1 + $0xd68] sm:$0xff]  }
 0x190   :  { %6929 = vmatpush3.bf16.msra.mxu0 %v7503_v45  ;;  %v7542_v45 = vld [vmem:[%s9324_s1 + $0xde8] sm:$0xff]  }
 0x191   :  { %6930 = vmatprep.subr.bf16.mxu0 %v7505_v47  ;;  %6951 = vmatpush3.bf16.msra.mxu1 %v7504_v46  ;;  %v7543_v47 = vld [vmem:[%s9324_s1 + $0xd28] sm:$0xff]  }
 0x192   :  { %6952 = vmatprep.subr.bf16.mxu1 %v7506_v48 }
 0x194   :  { %6931 = vmatpush3.bf16.msra.mxu0 %v7507_v49  ;;  %v7544_v49 = vld [vmem:[%s9324_s1 + $0xda8] sm:$0xff]  }
 0x195   :  { %6932 = vmatprep.subr.bf16.mxu0 %v7509_v51  ;;  %6953 = vmatpush3.bf16.msra.mxu1 %v7508_v50 }
 0x196   :  { %v6630_v53 = vpop.f32.mrb[20].mxu0  ;;  %6954 = vmatprep.subr.bf16.mxu1 %v7510_v52 }
 0x197   :  { %v6631_v55 = vpop.f32.mrb[21].mxu0  ;;  %v6652_v57 = vpop.f32.mrb[20].mxu1 }
 0x198   :  { %v6632_v58 = vadd.f32 %v6631_v55, %v6630_v53  ;;  %v6633_v59 = vpop.f32.mrb[22].mxu0  ;;  %v6653_v60 = vpop.f32.mrb[21].mxu1  ;;  %6933 = vmatpush3.bf16.msra.mxu0 %v7511_v54  ;;  %v7545_v53 = vld [vmem:[%s9324_s1 + $0xd70] sm:$0xff]  }
 0x199   :  { %v6634_v62 = vpop.f32.mrb[23].mxu0  ;;  %v6654_v1 = vadd.f32 %v6653_v60, %v6652_v57  ;;  %v6655_v2 = vpop.f32.mrb[22].mxu1  ;;  %6934 = vmatprep.subr.bf16.mxu0 %v7513_v56  ;;  %6955 = vmatpush3.bf16.msra.mxu1 %v7512_v61  ;;  %v7546_v54 = vld [vmem:[%s9324_s1 + $0xdf0] sm:$0xff]  }
 0x19a   :  { %v5025_v0 = vadd.f32 %v6632_v58, %v8883_v23  ;;  %v6656_v4 = vpop.f32.mrb[23].mxu1  ;;  %6956 = vmatprep.subr.bf16.mxu1 %v7514_v63  ;;  %v1401_v23 = vcombine.high %v1379_v16, %v1379_v16  ;;  %v7547_v60 = vld [vmem:[%s9324_s1 + $0xd30] sm:$0xff]   ;;  %v7551_v2 = vld [vmem:[%s9324_s1 + $0xd38] sm:$0xff]  }
 0x19b   :  { %v7548_v62 = vld [vmem:[%s9324_s1 + $0xdb0] sm:$0xff]   ;;  %v1386_v4 = vrot.slane %v9010_v18, %v7734_v35  ;;  %v7566_v18 = vld [vmem:[%s9324_s1 + $0xe58] sm:$0xff]  }
 0x19c   :  { %v8984_v6 = vadd.f32 %v6654_v1, %v5025_v0  ;;  %6935 = vmatpush3.bf16.msra.mxu0 %v7515_v3  ;;  %v7549_v0 = vld [vmem:[%s9324_s1 + $0xd78] sm:$0xff]  }
 0x19d   :  { %6936 = vmatprep.subr.bf16.mxu0 %v7517_v5  ;;  %6957 = vmatpush3.bf16.msra.mxu1 %v7516_v7  ;;  %v7550_v1 = vld [vmem:[%s9324_s1 + $0xdf8] sm:$0xff]   ;;  %v7554_v5 = vld [vmem:[%s9324_s1 + $0xe40] sm:$0xff]  }
 0x19e   :  { %6958 = vmatprep.subr.bf16.mxu1 %v7518_v8  ;;  %v7552_v3 = vld [vmem:[%s9324_s1 + $0xdb8] sm:$0xff]   ;;  %v7556_v7 = vld [vmem:[%s9324_s1 + $0xe00] sm:$0xff]  }
 0x19f   :  { %v7557_v8 = vld [vmem:[%s9324_s1 + $0xe80] sm:$0xff]  }
 0x1a0   :  { %6937 = vmatpush3.bf16.msra.mxu0 %v7519_v9  ;;  %v1402_v9 = vcombine.high %v1386_v4, %v1386_v4 }
 0x1a1   :  { %6966 = vmatprep.subr.bf16.mxu0 %v7521_v12  ;;  %6959 = vmatpush3.bf16.msra.mxu1 %v7520_v14  ;;  %v7560_v12 = vld [vmem:[%s9324_s1 + $0xe08] sm:$0xff]   ;;  %v7562_v14 = vld [vmem:[%s9324_s1 + $0xe50] sm:$0xff]  }
 0x1a2   :  { %6988 = vmatprep.subr.bf16.mxu1 %v7522_v17  ;;  %v7565_v17 = vld [vmem:[%s9324_s1 + $0xe90] sm:$0xff]  }
 0x1a3   :  { %5583 = vmatmul.mubr.bf16.vlgmr.msra.gmra.mrb[48].mxu0 %v1379_v16  ;;  %v7564_v16 = vld [vmem:[%s9324_s1 + $0xe10] sm:$0xff]  }
 0x1a4   :  { %6967 = vmatpush3.bf16.msra.mxu0 %v7523_v19  ;;  %5623 = vmatmul.mubr.bf16.vlgmr.msra.gmra.mrb[48].mxu1 %v1401_v23  ;;  %v7567_v19 = vld [vmem:[%s9324_s1 + $0xed8] sm:$0xff]   ;;  %v7571_v23 = vld [vmem:[%s9324_s1 + $0xee0] sm:$0xff]  }
 0x1a5   :  { %6968 = vmatprep.subr.bf16.mxu0 %v7525_v24  ;;  %6989 = vmatpush3.bf16.msra.mxu1 %v7524_v21  ;;  %v7569_v21 = vld [vmem:[%s9324_s1 + $0xe98] sm:$0xff]   ;;  %v7572_v24 = vld [vmem:[%s9324_s1 + $0xe20] sm:$0xff]  }
 0x1a6   :  { %5662 = vmatprep.mubr.bf16.mxu0 %v1400_v27  ;;  %6990 = vmatprep.subr.bf16.mxu1 %v7526_v26  ;;  %v7574_v26 = vld [vmem:[%s9324_s1 + $0xe68] sm:$0xff]  }
 0x1a7   :  { %5702 = vmatprep.mubr.bf16.mxu1 %v1404_v30  ;;  %v7575_v27 = vld [vmem:[%s9324_s1 + $0xee8] sm:$0xff]  }
 0x1a8   :  { %6969 = vmatpush3.bf16.msra.mxu0 %v7527_v28 }
 0x1a9   :  { %6970 = vmatprep.subr.bf16.mxu0 %v7529_v31  ;;  %6991 = vmatpush3.bf16.msra.mxu1 %v7528_v29  ;;  %v7576_v29 = vld [vmem:[%s9324_s1 + $0xe28] sm:$0xff]   ;;  %v7578_v31 = vld [vmem:[%s9324_s1 + $0xe70] sm:$0xff]  }
 0x1aa   :  { %6992 = vmatprep.subr.bf16.mxu1 %v7530_v32 }
 0x1ac   :  { %6971 = vmatpush3.bf16.msra.mxu0 %v7531_v33 }
 0x1ad   :  { %6972 = vmatprep.subr.bf16.mxu0 %v7533_v36  ;;  %6993 = vmatpush3.bf16.msra.mxu1 %v7532_v34 }
 0x1ae   :  { %6994 = vmatprep.subr.bf16.mxu1 %v7534_v37  ;;  %v7577_v37 = vld [vmem:[%s9324_s1 + $0xea8] sm:$0xff]  }
 0x1b0   :  { %6973 = vmatpush3.bf16.msra.mxu0 %v7535_v38 }
 0x1b1   :  { %6974 = vmatprep.subr.bf16.mxu0 %v7537_v40  ;;  %6995 = vmatpush3.bf16.msra.mxu1 %v7536_v39  ;;  %v7579_v39 = vld [vmem:[%s9324_s1 + $0xef0] sm:$0xff]  }
 0x1b2   :  { %6996 = vmatprep.subr.bf16.mxu1 %v7538_v41 }
 0x1b4   :  { %6975 = vmatpush3.bf16.msra.mxu0 %v7539_v42 }
 0x1b5   :  { %6976 = vmatprep.subr.bf16.mxu0 %v7541_v44  ;;  %6997 = vmatpush3.bf16.msra.mxu1 %v7540_v43  ;;  %v7580_v43 = vld [vmem:[%s9324_s1 + $0xe30] sm:$0xff]  }
 0x1b6   :  { %v6674_v46 = vpop.f32.mrb[24].mxu0  ;;  %6998 = vmatprep.subr.bf16.mxu1 %v7542_v45  ;;  %v7582_v45 = vld [vmem:[%s9324_s1 + $0xe78] sm:$0xff]  }
 0x1b7   :  { %v6675_v48 = vpop.f32.mrb[25].mxu0  ;;  %v6696_v50 = vpop.f32.mrb[24].mxu1 }
 0x1b8   :  { %v6676_v51 = vadd.f32 %v6675_v48, %v6674_v46  ;;  %v6677_v52 = vpop.f32.mrb[26].mxu0  ;;  %v6697_v55 = vpop.f32.mrb[25].mxu1  ;;  %6977 = vmatpush3.bf16.msra.mxu0 %v7543_v47  ;;  %v7581_v47 = vld [vmem:[%s9324_s1 + $0xeb0] sm:$0xff]   ;;  %v7583_v48 = vld [vmem:[%s9324_s1 + $0xef8] sm:$0xff]  }
 0x1b9   :  { %v6678_v56 = vpop.f32.mrb[27].mxu0  ;;  %v6698_v58 = vadd.f32 %v6697_v55, %v6696_v50  ;;  %v6699_v59 = vpop.f32.mrb[26].mxu1  ;;  %6978 = vmatprep.subr.bf16.mxu0 %v7545_v53  ;;  %6999 = vmatpush3.bf16.msra.mxu1 %v7544_v49  ;;  %v7584_v49 = vld [vmem:[%s9324_s1 + $0xe38] sm:$0xff]   ;;  %v7586_v52 = vld [vmem:[%s9324_s1 + $0xf40] sm:$0xff]  }
 0x1ba   :  { %v5105_v57 = vadd.f32 %v6676_v51, %v8984_v6  ;;  %v6700_v61 = vpop.f32.mrb[27].mxu1  ;;  %7000 = vmatprep.subr.bf16.mxu1 %v7546_v54  ;;  %v7555_v6 = vld [vmem:[%s9324_s1 + $0xec0] sm:$0xff]   ;;  %v22_v50 = vld [vmem:[%s9325_s0 + $0x38] sm:$0xff] }
 0x1bb   :  { %v1412_v51 = vrot.slane %v22_v50, %v7734_v35  ;;  %v1405_v53 = vcombine.high %v22_v50, %v22_v50  ;;  %v7585_v54 = vld [vmem:[%s9324_s1 + $0xeb8] sm:$0xff]  }
 0x1bc   :  { %v9095_v63 = vadd.f32 %v6698_v58, %v5105_v57  ;;  %6979 = vmatpush3.bf16.msra.mxu0 %v7547_v60  ;;  %v7587_v57 = vld [vmem:[%s9324_s1 + $0xfc0] sm:$0xff]  }
 0x1bd   :  { %6980 = vmatprep.subr.bf16.mxu0 %v7549_v0  ;;  %7001 = vmatpush3.bf16.msra.mxu1 %v7548_v62  ;;  %v1420_v55 = vcombine.high %v1412_v51, %v1412_v51  ;;  %v1428_v56 = vrot.slane %v1412_v51, %v7734_v35  ;;  %v9222_v58 = vrot.slane %v1405_v53, %v7734_v35  ;;  %v7588_v60 = vld [vmem:[%s9324_s1 + $0xf00] sm:$0xff]  }
 0x1be   :  { %7002 = vmatprep.subr.bf16.mxu1 %v7550_v1  ;;  %v7589_v1 = vld [vmem:[%s9324_s1 + $0xf80] sm:$0xff]  }
 0x1bf   :  { %v1442_v59 = vrot.slane %v1420_v55, %v7734_v35  ;;  %v1421_v61 = vcombine.high %v9222_v58, %v9222_v58  ;;  %v1450_v62 = vcombine.high %v1428_v56, %v1428_v56 }
 0x1c0   :  { %6981 = vmatpush3.bf16.msra.mxu0 %v7551_v2 }
 0x1c1   :  { %7010 = vmatprep.subr.bf16.mxu0 %v7554_v5  ;;  %7003 = vmatpush3.bf16.msra.mxu1 %v7552_v3  ;;  %v1452_v0 = vcombine.high %v1442_v59, %v1442_v59  ;;  %v1449_v2 = vrot.slane %v1421_v61, %v7734_v35  ;;  %v7591_v3 = vld [vmem:[%s9324_s1 + $0xfc8] sm:$0xff]  }
 0x1c2   :  { %7032 = vmatprep.subr.bf16.mxu1 %v7555_v6  ;;  %v7594_v6 = vld [vmem:[%s9324_s1 + $0xf50] sm:$0xff]  }
 0x1c3   :  { %5663 = vmatmul.mubr.bf16.vlgmr.msra.gmra.mrb[52].mxu0 %v1386_v4  ;;  %v7592_v4 = vld [vmem:[%s9324_s1 + $0xf08] sm:$0xff]   ;;  %v1453_v5 = vcombine.high %v1449_v2, %v1449_v2 }
 0x1c4   :  { %7011 = vmatpush3.bf16.msra.mxu0 %v7556_v7  ;;  %5703 = vmatmul.mubr.bf16.vlgmr.msra.gmra.mrb[52].mxu1 %v1402_v9  ;;  %v7593_v7 = vld [vmem:[%s9324_s1 + $0xf88] sm:$0xff]   ;;  %v7596_v9 = vld [vmem:[%s9324_s1 + $0xf10] sm:$0xff]  }
 0x1c5   :  { %7012 = vmatprep.subr.bf16.mxu0 %v7558_v10  ;;  %7033 = vmatpush3.bf16.msra.mxu1 %v7557_v8  ;;  %v7595_v8 = vld [vmem:[%s9324_s1 + $0xfd0] sm:$0xff]   ;;  %v7598_v10 = vld [vmem:[%s9324_s1 + $0xf58] sm:$0xff]  }
 0x1c6   :  { %7034 = vmatprep.subr.bf16.mxu1 %v7559_v11  ;;  %5742 = vmatprep.mubr.bf16.mxu0 %v1442_v59  ;;  %v7597_v11 = vld [vmem:[%s9324_s1 + $0xf90] sm:$0xff]  }
 0x1c7   :  { %5782 = vmatprep.mubr.bf16.mxu1 %v1452_v0 }
 0x1c8   :  { %7013 = vmatpush3.bf16.msra.mxu0 %v7560_v12  ;;  %v7599_v12 = vld [vmem:[%s9324_s1 + $0xfd8] sm:$0xff]  }
 0x1c9   :  { %7014 = vmatprep.subr.bf16.mxu0 %v7562_v14  ;;  %7035 = vmatpush3.bf16.msra.mxu1 %v7561_v13  ;;  %v7600_v13 = vld [vmem:[%s9324_s1 + $0xf18] sm:$0xff]   ;;  %v7602_v14 = vld [vmem:[%s9324_s1 + $0xf60] sm:$0xff]  }
 0x1ca   :  { %7036 = vmatprep.subr.bf16.mxu1 %v7563_v15  ;;  %v7601_v15 = vld [vmem:[%s9324_s1 + $0xf98] sm:$0xff]  }
 0x1cc   :  { %7015 = vmatpush3.bf16.msra.mxu0 %v7564_v16  ;;  %v7603_v16 = vld [vmem:[%s9324_s1 + $0xfe0] sm:$0xff]  }
 0x1cd   :  { %7016 = vmatprep.subr.bf16.mxu0 %v7566_v18  ;;  %7037 = vmatpush3.bf16.msra.mxu1 %v7565_v17  ;;  %v7604_v17 = vld [vmem:[%s9324_s1 + $0xf20] sm:$0xff]   ;;  %v7606_v18 = vld [vmem:[%s9324_s1 + $0xf68] sm:$0xff]  }
 0x1ce   :  { %7038 = vmatprep.subr.bf16.mxu1 %v7567_v19  ;;  %v7605_v19 = vld [vmem:[%s9324_s1 + $0xfa0] sm:$0xff]  }
 0x1d0   :  { %7017 = vmatpush3.bf16.msra.mxu0 %v7568_v20 }
 0x1d1   :  { %7018 = vmatprep.subr.bf16.mxu0 %v7570_v22  ;;  %7039 = vmatpush3.bf16.msra.mxu1 %v7569_v21  ;;  %v7607_v21 = vld [vmem:[%s9324_s1 + $0xfe8] sm:$0xff]  }
 0x1d2   :  { %7040 = vmatprep.subr.bf16.mxu1 %v7571_v23  ;;  %v7608_v23 = vld [vmem:[%s9324_s1 + $0xf28] sm:$0xff]  }
 0x1d4   :  { %7019 = vmatpush3.bf16.msra.mxu0 %v7572_v24 }
 0x1d5   :  { %7020 = vmatprep.subr.bf16.mxu0 %v7574_v26  ;;  %7041 = vmatpush3.bf16.msra.mxu1 %v7573_v25 }
 0x1d6   :  { %v6718_v28 = vpop.f32.mrb[28].mxu0  ;;  %7042 = vmatprep.subr.bf16.mxu1 %v7575_v27  ;;  %v7609_v27 = vld [vmem:[%s9324_s1 + $0xfa8] sm:$0xff]  }
 0x1d7   :  { %v6719_v30 = vpop.f32.mrb[29].mxu0  ;;  %v6740_v32 = vpop.f32.mrb[28].mxu1 }
 0x1d8   :  { %v6720_v33 = vadd.f32 %v6719_v30, %v6718_v28  ;;  %v6721_v34 = vpop.f32.mrb[30].mxu0  ;;  %v6741_v36 = vpop.f32.mrb[29].mxu1  ;;  %7021 = vmatpush3.bf16.msra.mxu0 %v7576_v29  ;;  %v7610_v28 = vld [vmem:[%s9324_s1 + $0xf70] sm:$0xff]  }
 0x1d9   :  { %v6722_v38 = vpop.f32.mrb[31].mxu0  ;;  %v6742_v41 = vadd.f32 %v6741_v36, %v6740_v32  ;;  %v6743_v42 = vpop.f32.mrb[30].mxu1  ;;  %7022 = vmatprep.subr.bf16.mxu0 %v7578_v31  ;;  %7043 = vmatpush3.bf16.msra.mxu1 %v7577_v37  ;;  %v7611_v34 = vld [vmem:[%s9324_s1 + $0xff0] sm:$0xff]  }
 0x1da   :  { %v5185_v40 = vadd.f32 %v6720_v33, %v9095_v63  ;;  %v6744_v44 = vpop.f32.mrb[31].mxu1  ;;  %7044 = vmatprep.subr.bf16.mxu1 %v7579_v39  ;;  %v7590_v63 = vld [vmem:[%s9324_s1 + $0xf48] sm:$0xff]   ;;  %v7612_v37 = vld [vmem:[%s9324_s1 + $0xf30] sm:$0xff]   ;;  %v7614_v39 = vld [vmem:[%s9324_s1 + $0xf78] sm:$0xff]  }
 0x1db   :  { %v7616_v42 = vld [vmem:[%s9324_s1 + $0xf38] sm:$0xff]  }
 0x1dc   :  { %v9196_v46 = vadd.f32 %v6742_v41, %v5185_v40  ;;  %7023 = vmatpush3.bf16.msra.mxu0 %v7580_v43  ;;  %v7613_v40 = vld [vmem:[%s9324_s1 + $0xfb0] sm:$0xff]   ;;  %v7615_v41 = vld [vmem:[%s9324_s1 + $0xff8] sm:$0xff]   ;;  %v1435_v43 = vrot.slane %v9222_v58, %v7734_v35 }
 0x1dd   :  { %7024 = vmatprep.subr.bf16.mxu0 %v7582_v45  ;;  %7045 = vmatpush3.bf16.msra.mxu1 %v7581_v47  ;;  %v7617_v44 = vld [vmem:[%s9324_s1 + $0xfb8] sm:$0xff]  }
 0x1de   :  { %7046 = vmatprep.subr.bf16.mxu1 %v7583_v48  ;;  %v1451_v45 = vcombine.high %v1435_v43, %v1435_v43 }
 0x1e0   :  { %7025 = vmatpush3.bf16.msra.mxu0 %v7584_v49 }
 0x1e1   :  { %7054 = vmatprep.subr.bf16.mxu0 %v7586_v52  ;;  %7047 = vmatpush3.bf16.msra.mxu1 %v7585_v54 }
 0x1e2   :  { %7076 = vmatprep.subr.bf16.mxu1 %v7587_v57 }
 0x1e3   :  { %5743 = vmatmul.mubr.bf16.vlgmr.msra.gmra.mrb[56].mxu0 %v1428_v56 }
 0x1e4   :  { %7055 = vmatpush3.bf16.msra.mxu0 %v7588_v60  ;;  %5783 = vmatmul.mubr.bf16.vlgmr.msra.gmra.mrb[56].mxu1 %v1450_v62 }
 0x1e5   :  { %7056 = vmatprep.subr.bf16.mxu0 %v7590_v63  ;;  %7077 = vmatpush3.bf16.msra.mxu1 %v7589_v1 }
 0x1e6   :  { %5822 = vmatprep.mubr.bf16.mxu0 %v1449_v2  ;;  %7078 = vmatprep.subr.bf16.mxu1 %v7591_v3 }
 0x1e7   :  { %5862 = vmatprep.mubr.bf16.mxu1 %v1453_v5 }
 0x1e8   :  { %7057 = vmatpush3.bf16.msra.mxu0 %v7592_v4 }
 0x1e9   :  { %7058 = vmatprep.subr.bf16.mxu0 %v7594_v6  ;;  %7079 = vmatpush3.bf16.msra.mxu1 %v7593_v7 }
 0x1ea   :  { %7080 = vmatprep.subr.bf16.mxu1 %v7595_v8 }
 0x1ec   :  { %7059 = vmatpush3.bf16.msra.mxu0 %v7596_v9 }
 0x1ed   :  { %7060 = vmatprep.subr.bf16.mxu0 %v7598_v10  ;;  %7081 = vmatpush3.bf16.msra.mxu1 %v7597_v11 }
 0x1ee   :  { %7082 = vmatprep.subr.bf16.mxu1 %v7599_v12 }
 0x1f0   :  { %7061 = vmatpush3.bf16.msra.mxu0 %v7600_v13 }
 0x1f1   :  { %7062 = vmatprep.subr.bf16.mxu0 %v7602_v14  ;;  %7083 = vmatpush3.bf16.msra.mxu1 %v7601_v15 }
 0x1f2   :  { %7084 = vmatprep.subr.bf16.mxu1 %v7603_v16 }
 0x1f4   :  { %7063 = vmatpush3.bf16.msra.mxu0 %v7604_v17 }
 0x1f5   :  { %7064 = vmatprep.subr.bf16.mxu0 %v7606_v18  ;;  %7085 = vmatpush3.bf16.msra.mxu1 %v7605_v19 }
 0x1f6   :  { %v6762_v20 = vpop.f32.mrb[32].mxu0  ;;  %7086 = vmatprep.subr.bf16.mxu1 %v7607_v21 }
 0x1f7   :  { %v6763_v22 = vpop.f32.mrb[33].mxu0  ;;  %v6784_v24 = vpop.f32.mrb[32].mxu1 }
 0x1f8   :  { %v6764_v25 = vadd.f32 %v6763_v22, %v6762_v20  ;;  %v6765_v26 = vpop.f32.mrb[34].mxu0  ;;  %v6785_v29 = vpop.f32.mrb[33].mxu1  ;;  %7065 = vmatpush3.bf16.msra.mxu0 %v7608_v23 }
 0x1f9   :  { %v6766_v30 = vpop.f32.mrb[35].mxu0  ;;  %v6786_v32 = vadd.f32 %v6785_v29, %v6784_v24  ;;  %v6787_v33 = vpop.f32.mrb[34].mxu1  ;;  %7066 = vmatprep.subr.bf16.mxu0 %v7610_v28  ;;  %7087 = vmatpush3.bf16.msra.mxu1 %v7609_v27 }
 0x1fa   :  { %v5265_v31 = vadd.f32 %v6764_v25, %v9196_v46  ;;  %v6788_v36 = vpop.f32.mrb[35].mxu1  ;;  %7088 = vmatprep.subr.bf16.mxu1 %v7611_v34 }
 0x1fc   :  { %v5305_v38 = vadd.f32 %v6786_v32, %v5265_v31  ;;  %7067 = vmatpush3.bf16.msra.mxu0 %v7612_v37 }
 0x1fd   :  { %7068 = vmatprep.subr.bf16.mxu0 %v7614_v39  ;;  %7089 = vmatpush3.bf16.msra.mxu1 %v7613_v40 }
 0x1fe   :  { %7090 = vmatprep.subr.bf16.mxu1 %v7615_v41 }
 0x200   :  { %7069 = vmatpush3.bf16.msra.mxu0 %v7616_v42 }
 0x201   :  { %7091 = vmatpush3.bf16.msra.mxu1 %v7617_v44 }
 0x203   :  { %5823 = vmatmul.mubr.bf16.vlgmr.msra.gmra.mrb[60].mxu0 %v1435_v43 }
 0x204   :  { %5863 = vmatmul.mubr.bf16.vlgmr.msra.gmra.mrb[60].mxu1 %v1451_v45 }
 0x216   :  { %v6806_v46 = vpop.f32.mrb[36].mxu0 }
 0x217   :  { %v6807_v47 = vpop.f32.mrb[37].mxu0  ;;  %v6828_v48 = vpop.f32.mrb[36].mxu1 }
 0x218   :  { %v6808_v49 = vadd.f32 %v6807_v47, %v6806_v46  ;;  %v6809_v50 = vpop.f32.mrb[38].mxu0  ;;  %v6829_v51 = vpop.f32.mrb[37].mxu1 }
 0x219   :  { %v6810_v52 = vpop.f32.mrb[39].mxu0  ;;  %v6830_v35 = vadd.f32 %v6829_v51, %v6828_v48  ;;  %v6831_v54 = vpop.f32.mrb[38].mxu1 }
 0x21a   :  { %v5345_v53 = vadd.f32 %v6808_v49, %v5305_v38  ;;  %v6832_v55 = vpop.f32.mrb[39].mxu1 }
 0x21c   :  { %v5385_v56 = vadd.f32 %v6830_v35, %v5345_v53 }
 0x236   :  { %v6850_v57 = vpop.f32.mrb[40].mxu0 }
 0x237   :  { %v6851_v58 = vpop.f32.mrb[41].mxu0  ;;  %v6872_v59 = vpop.f32.mrb[40].mxu1 }
 0x238   :  { %v6852_v60 = vadd.f32 %v6851_v58, %v6850_v57  ;;  %v6853_v61 = vpop.f32.mrb[42].mxu0  ;;  %v6873_v62 = vpop.f32.mrb[41].mxu1 }
 0x239   :  { %v6854_v63 = vpop.f32.mrb[43].mxu0  ;;  %v6874_v1 = vadd.f32 %v6873_v62, %v6872_v59  ;;  %v6875_v2 = vpop.f32.mrb[42].mxu1 }
 0x23a   :  { %v5425_v0 = vadd.f32 %v6852_v60, %v5385_v56  ;;  %v6876_v3 = vpop.f32.mrb[43].mxu1 }
 0x23c   :  { %v5465_v4 = vadd.f32 %v6874_v1, %v5425_v0 }
 0x256   :  { %v6894_v5 = vpop.f32.mrb[44].mxu0 }
 0x257   :  { %v6895_v6 = vpop.f32.mrb[45].mxu0  ;;  %v6916_v7 = vpop.f32.mrb[44].mxu1 }
 0x258   :  { %v6896_v8 = vadd.f32 %v6895_v6, %v6894_v5  ;;  %v6897_v9 = vpop.f32.mrb[46].mxu0  ;;  %v6917_v10 = vpop.f32.mrb[45].mxu1 }
 0x259   :  { %v6898_v11 = vpop.f32.mrb[47].mxu0  ;;  %v6918_v13 = vadd.f32 %v6917_v10, %v6916_v7  ;;  %v6919_v14 = vpop.f32.mrb[46].mxu1 }
 0x25a   :  { %v5505_v12 = vadd.f32 %v6896_v8, %v5465_v4  ;;  %v6920_v15 = vpop.f32.mrb[47].mxu1 }
 0x25c   :  { %v5545_v16 = vadd.f32 %v6918_v13, %v5505_v12 }
 0x276   :  { %v6938_v17 = vpop.f32.mrb[48].mxu0 }
 0x277   :  { %v6939_v18 = vpop.f32.mrb[49].mxu0  ;;  %v6960_v19 = vpop.f32.mrb[48].mxu1 }
 0x278   :  { %v6940_v20 = vadd.f32 %v6939_v18, %v6938_v17  ;;  %v6941_v21 = vpop.f32.mrb[50].mxu0  ;;  %v6961_v22 = vpop.f32.mrb[49].mxu1 }
 0x279   :  { %v6942_v23 = vpop.f32.mrb[51].mxu0  ;;  %v6962_v25 = vadd.f32 %v6961_v22, %v6960_v19  ;;  %v6963_v26 = vpop.f32.mrb[50].mxu1 }
 0x27a   :  { %v5585_v24 = vadd.f32 %v6940_v20, %v5545_v16  ;;  %v6964_v27 = vpop.f32.mrb[51].mxu1 }
 0x27c   :  { %v5625_v28 = vadd.f32 %v6962_v25, %v5585_v24 }
 0x296   :  { %v6982_v29 = vpop.f32.mrb[52].mxu0 }
 0x297   :  { %v6983_v30 = vpop.f32.mrb[53].mxu0  ;;  %v7004_v31 = vpop.f32.mrb[52].mxu1 }
 0x298   :  { %v6984_v32 = vadd.f32 %v6983_v30, %v6982_v29  ;;  %v6985_v33 = vpop.f32.mrb[54].mxu0  ;;  %v7005_v34 = vpop.f32.mrb[53].mxu1 }
 0x299   :  { %v6986_v36 = vpop.f32.mrb[55].mxu0  ;;  %v7006_v38 = vadd.f32 %v7005_v34, %v7004_v31  ;;  %v7007_v39 = vpop.f32.mrb[54].mxu1 }
 0x29a   :  { %v5665_v37 = vadd.f32 %v6984_v32, %v5625_v28  ;;  %v7008_v40 = vpop.f32.mrb[55].mxu1 }
 0x29c   :  { %v5705_v41 = vadd.f32 %v7006_v38, %v5665_v37 }
 0x2b6   :  { %v7026_v42 = vpop.f32.mrb[56].mxu0 }
 0x2b7   :  { %v7027_v43 = vpop.f32.mrb[57].mxu0  ;;  %v7048_v44 = vpop.f32.mrb[56].mxu1 }
 0x2b8   :  { %v7028_v45 = vadd.f32 %v7027_v43, %v7026_v42  ;;  %v7029_v46 = vpop.f32.mrb[58].mxu0  ;;  %v7049_v47 = vpop.f32.mrb[57].mxu1 }
 0x2b9   :  { %v7030_v48 = vpop.f32.mrb[59].mxu0  ;;  %v7050_v50 = vadd.f32 %v7049_v47, %v7048_v44  ;;  %v7051_v51 = vpop.f32.mrb[58].mxu1 }
 0x2ba   :  { %v5745_v49 = vadd.f32 %v7028_v45, %v5705_v41  ;;  %v7052_v52 = vpop.f32.mrb[59].mxu1 }
 0x2bc   :  { %v5785_v53 = vadd.f32 %v7050_v50, %v5745_v49 }
 0x2d6   :  { %v7070_v35 = vpop.f32.mrb[60].mxu0 }
 0x2d7   :  { %v7071_v54 = vpop.f32.mrb[61].mxu0  ;;  %v7092_v55 = vpop.f32.mrb[60].mxu1 }
 0x2d8   :  { %v7072_v56 = vadd.f32 %v7071_v54, %v7070_v35  ;;  %v7073_v57 = vpop.f32.mrb[62].mxu0  ;;  %v7093_v58 = vpop.f32.mrb[61].mxu1 }
 0x2d9   :  { %v7074_v59 = vpop.f32.mrb[63].mxu0  ;;  %v7094_v61 = vadd.f32 %v7093_v58, %v7092_v55  ;;  %v7095_v62 = vpop.f32.mrb[62].mxu1 }
 0x2da   :  { %v5825_v60 = vadd.f32 %v7072_v56, %v5785_v53  ;;  %v7096_v63 = vpop.f32.mrb[63].mxu1 }
 0x2dc   :  { %v5865_v0 = vadd.f32 %v7094_v61, %v5825_v60 }
 0x2de   :  { %v5870_v1 = vsub.f32 0.0, %v5865_v0 }
 0x2e0   :  { %v5871_v2 = vmul.f32 1.442695, %v5870_v1 }
 0x2e2   :  { %7619 = vpow2.f32 %v5871_v2 }
 0x2ec   :  { %v7620_v3 = vpop.eup %7619 }
 0x2ed   :  { %v5873_v4 = vadd.f32 1.0, %v7620_v3 }
 0x2ef   :  { %7621 = vrcp.f32 %v5873_v4 }
 0x2f9   :  { %v7622_v5 = vpop.eup %7621 }
 0x2fa   :  { %5876 = vst [vmem:[%s9327_s3] sm:$0x3] %v7622_v5 }

</bundles_post_ra>
